<compile_context>
chip_gen: v7x
topology: tpu7x:2x2x1
jax: 0.10.0
libtpu: 0.0.40
codegen_flags: <defaults>
</compile_context>

<pallas_src>
import jax
import jax.numpy as jnp
from jax.experimental import pallas as pl
from jax.experimental.pallas import tpu as pltpu

BN_EPS = 1e-5
LANE = 128
VMEM_LIMIT = 32 * 1024 * 1024  # safe scoped-VMEM budget on v5e / v6e / v7x


def _round_up(x, m):
    return (x + m - 1) // m * m


# ----------------------------------------------------------------------------
# Pallas kernels
# ----------------------------------------------------------------------------
def _conv3x3_stats_kernel(xp_ref, w_ref, y_ref, stats_ref):
    """3x3 conv (halo already in xp) + per-image per-channel sum / sumsq.

    xp_ref:    (1, H+2, W+2, CP) bf16  spatially zero-padded NHWC input tile
    w_ref:     (9*CP, CP)        bf16  weights, tap-major / channel-minor
    y_ref:     (1, H*W, CP)      f32   conv output (flattened spatial)
    stats_ref: (1, 2, CP)        f32   row0 = sum, row1 = sum of squares
    """
    h = xp_ref.shape[1] - 2
    w = xp_ref.shape[2] - 2
    cp = xp_ref.shape[3]
    cout = y_ref.shape[2]

    acc = jnp.zeros((h * w, cout), jnp.float32)
    for dy in range(3):
        for dx in range(3):
            win = xp_ref[0, dy:dy + h, dx:dx + w, :].reshape(h * w, cp)
            tap = dy * 3 + dx
            wk = w_ref[tap * cp:(tap + 1) * cp, :]
            acc = acc + jnp.dot(win, wk, preferred_element_type=jnp.float32)

    y_ref[0] = acc
    stats_ref[0, 0:1, :] = jnp.sum(acc, axis=0, keepdims=True)
    stats_ref[0, 1:2, :] = jnp.sum(acc * acc, axis=0, keepdims=True)


def _bn_relu_conv3x3_stats_kernel(y1_ref, scale_ref, shift_ref, w_ref,
                                  y2_ref, stats_ref, pad_ref):
    """BN1 (folded scale/shift) + ReLU + 3x3 conv + per-image sum / sumsq.

    y1_ref:    (1, H*W, CP)   f32   conv1 output
    scale_ref: (1, CP)        f32   gamma1 * rsqrt(var1 + eps)
    shift_ref: (1, CP)        f32   beta1 - mean1 * scale1
    w_ref:     (9*CP, CP)     bf16
    y2_ref:    (1, H*W, CP)   f32
    stats_ref: (1, 2, CP)     f32
    pad_ref:   (H+2, W+2, CP) bf16  VMEM scratch (zero halo for conv2)
    """
    hp2, wp2, cp = pad_ref.shape
    h, w = hp2 - 2, wp2 - 2
    cout = y2_ref.shape[2]

    # BN1 + ReLU in f32, then cast to bf16 activation with a zero halo.
    act = jnp.maximum(y1_ref[0] * scale_ref[...] + shift_ref[...], 0.0)
    pad_ref[...] = jnp.zeros_like(pad_ref)
    pad_ref[1:h + 1, 1:w + 1, :] = act.reshape(h, w, cp).astype(pad_ref.dtype)

    acc = jnp.zeros((h * w, cout), jnp.float32)
    for dy in range(3):
        for dx in range(3):
            win = pad_ref[dy:dy + h, dx:dx + w, :].reshape(h * w, cp)
            tap = dy * 3 + dx
            wk = w_ref[tap * cp:(tap + 1) * cp, :]
            acc = acc + jnp.dot(win, wk, preferred_element_type=jnp.float32)

    y2_ref[0] = acc
    stats_ref[0, 0:1, :] = jnp.sum(acc, axis=0, keepdims=True)
    stats_ref[0, 1:2, :] = jnp.sum(acc * acc, axis=0, keepdims=True)


def _bn_add_relu_kernel(y2_ref, scale_ref, shift_ref, id_ref, o_ref):
    """BN2 (folded scale/shift) + residual add + ReLU."""
    out = y2_ref[0] * scale_ref[...] + shift_ref[...] + id_ref[0]
    o_ref[0] = jnp.maximum(out, 0.0)


# ----------------------------------------------------------------------------
# pallas_call wrappers
# ----------------------------------------------------------------------------
def _call_conv_stats(xp, w, n, h, wd, cp):
    hw = h * wd
    flops = 2 * n * hw * (9 * cp) * cp
    bytes_accessed = xp.size * 2 + w.size * 2 + (n * hw * cp + n * 2 * cp) * 4
    return pl.pallas_call(
        _conv3x3_stats_kernel,
        out_shape=(jax.ShapeDtypeStruct((n, hw, cp), jnp.float32),
                   jax.ShapeDtypeStruct((n, 2, cp), jnp.float32)),
        grid_spec=pltpu.PrefetchScalarGridSpec(
            num_scalar_prefetch=0,
            grid=(n,),
            in_specs=[
                pl.BlockSpec((1, h + 2, wd + 2, cp), lambda i: (i, 0, 0, 0)),
                pl.BlockSpec((9 * cp, cp), lambda i: (0, 0)),
            ],
            out_specs=[
                pl.BlockSpec((1, hw, cp), lambda i: (i, 0, 0)),
                pl.BlockSpec((1, 2, cp), lambda i: (i, 0, 0)),
            ],
        ),
        compiler_params=pltpu.CompilerParams(
            dimension_semantics=("parallel",),
            vmem_limit_bytes=VMEM_LIMIT),
        cost_estimate=pl.CostEstimate(flops=flops, transcendentals=0,
                                      bytes_accessed=bytes_accessed),
    )(xp, w)


def _call_bn_relu_conv_stats(y1, scale, shift, w, n, h, wd, cp):
    hw = h * wd
    flops = 2 * n * hw * (9 * cp) * cp
    bytes_accessed = y1.size * 4 + w.size * 2 + (n * hw * cp + n * 2 * cp + 2 * cp) * 4
    return pl.pallas_call(
        _bn_relu_conv3x3_stats_kernel,
        out_shape=(jax.ShapeDtypeStruct((n, hw, cp), jnp.float32),
                   jax.ShapeDtypeStruct((n, 2, cp), jnp.float32)),
        grid_spec=pltpu.PrefetchScalarGridSpec(
            num_scalar_prefetch=0,
            grid=(n,),
            in_specs=[
                pl.BlockSpec((1, hw, cp), lambda i: (i, 0, 0)),
                pl.BlockSpec((1, cp), lambda i: (0, 0)),
                pl.BlockSpec((1, cp), lambda i: (0, 0)),
                pl.BlockSpec((9 * cp, cp), lambda i: (0, 0)),
            ],
            out_specs=[
                pl.BlockSpec((1, hw, cp), lambda i: (i, 0, 0)),
                pl.BlockSpec((1, 2, cp), lambda i: (i, 0, 0)),
            ],
            scratch_shapes=[pltpu.VMEM((h + 2, wd + 2, cp), jnp.bfloat16)],
        ),
        compiler_params=pltpu.CompilerParams(
            dimension_semantics=("parallel",),
            vmem_limit_bytes=VMEM_LIMIT),
        cost_estimate=pl.CostEstimate(flops=flops, transcendentals=0,
                                      bytes_accessed=bytes_accessed),
    )(y1, scale, shift, w)


def _call_bn_add_relu(y2, scale, shift, identity, n, h, wd, cp):
    hw = h * wd
    bytes_accessed = (y2.size + identity.size + n * hw * cp + 2 * cp) * 4
    return pl.pallas_call(
        _bn_add_relu_kernel,
        out_shape=jax.ShapeDtypeStruct((n, hw, cp), jnp.float32),
        grid_spec=pltpu.PrefetchScalarGridSpec(
            num_scalar_prefetch=0,
            grid=(n,),
            in_specs=[
                pl.BlockSpec((1, hw, cp), lambda i: (i, 0, 0)),
                pl.BlockSpec((1, cp), lambda i: (0, 0)),
                pl.BlockSpec((1, cp), lambda i: (0, 0)),
                pl.BlockSpec((1, hw, cp), lambda i: (i, 0, 0)),
            ],
            out_specs=pl.BlockSpec((1, hw, cp), lambda i: (i, 0, 0)),
        ),
        compiler_params=pltpu.CompilerParams(
            dimension_semantics=("parallel",),
            vmem_limit_bytes=VMEM_LIMIT),
        cost_estimate=pl.CostEstimate(flops=3 * n * hw * cp, transcendentals=0,
                                      bytes_accessed=bytes_accessed),
    )(y2, scale, shift, identity)


# ----------------------------------------------------------------------------
# Host-side glue
# ----------------------------------------------------------------------------
def _pack_conv_weight(w_oihw, cp):
    """(Cout, Cin, 3, 3) -> (9*CP, CP) bf16, tap-major / channel-minor, zero-padded."""
    cout, cin, kh, kw = w_oihw.shape
    w = jnp.transpose(w_oihw, (2, 3, 1, 0))                         # (3,3,Cin,Cout)
    w = jnp.pad(w, ((0, 0), (0, 0), (0, cp - cin), (0, cp - cout)))
    return w.reshape(kh * kw * cp, cp).astype(jnp.bfloat16)


def _bn_scale_shift(pstats, gamma, beta, count, cp):
    """Per-image sum/sumsq -> fused per-channel (scale, shift): y*scale + shift."""
    stats = jnp.sum(pstats, axis=0)                                 # (2, CP)
    mean = stats[0] / count
    var = jnp.maximum(stats[1] / count - mean * mean, 0.0)          # biased (train mode)
    gamma_p = jnp.pad(gamma.reshape(-1), (0, cp - gamma.size))
    beta_p = jnp.pad(beta.reshape(-1), (0, cp - beta.size))
    scale = gamma_p * jax.lax.rsqrt(var + BN_EPS)
    shift = beta_p - mean * scale
    return scale.reshape(1, cp), shift.reshape(1, cp)


@jax.jit
def basic_block_forward(x_nchw, params):
    n, c, h, w = x_nchw.shape
    cp = _round_up(c, LANE)

    # NCHW -> NHWC, channel-pad to a lane-dense multiple of 128.
    x_nhwc = jnp.transpose(x_nchw, (0, 2, 3, 1))
    x_cpad = jnp.pad(x_nhwc, ((0, 0), (0, 0), (0, 0), (0, cp - c)))        # f32
    xp = jnp.pad(x_cpad, ((0, 0), (1, 1), (1, 1), (0, 0))).astype(jnp.bfloat16)

    w1 = _pack_conv_weight(params["conv1_w"], cp)
    w2 = _pack_conv_weight(params["conv2_w"], cp)

    # Stage A: conv1 + per-image channel statistics.
    y1, ps1 = _call_conv_stats(xp, w1, n, h, w, cp)
    scale1, shift1 = _bn_scale_shift(ps1, params["bn1_gamma"],
                                     params["bn1_beta"], n * h * w, cp)

    # Stage B: bn1 + relu + conv2 + per-image channel statistics.
    y2, ps2 = _call_bn_relu_conv_stats(y1, scale1, shift1, w2, n, h, w, cp)
    scale2, shift2 = _bn_scale_shift(ps2, params["bn2_gamma"],
                                     params["bn2_beta"], n * h * w, cp)

    # Stage C: bn2 + identity add + relu.  (stride=1, downsample=None ->
    # identity is the raw input; requires inplanes == planes.)
    identity = x_cpad.reshape(n, h * w, cp)
    out = _call_bn_add_relu(y2, scale2, shift2, identity, n, h, w, cp)

    out = out.reshape(n, h, w, cp)[:, :, :, :c]
    return jnp.transpose(out, (0, 3, 1, 2))                                # NCHW


def init_params(key, inplanes, planes):
    k1, k2 = jax.random.split(key)
    std1 = (2.0 / (inplanes * 9)) ** 0.5
    std2 = (2.0 / (planes * 9)) ** 0.5
    return {
        "conv1_w": std1 * jax.random.normal(k1, (planes, inplanes, 3, 3), jnp.float32),
        "conv2_w": std2 * jax.random.normal(k2, (planes, planes, 3, 3), jnp.float32),
        "bn1_gamma": jnp.ones((planes,), jnp.float32),
        "bn1_beta": jnp.zeros((planes,), jnp.float32),
        "bn2_gamma": jnp.ones((planes,), jnp.float32),
        "bn2_beta": jnp.zeros((planes,), jnp.float32),
    }


def _reference_forward(x, params):
    """Pure-JAX reference (f32) of the PyTorch BasicBlock .train() forward."""
    def conv3x3(x_nchw, w):
        return jax.lax.conv_general_dilated(
            x_nchw, w, window_strides=(1, 1), padding=((1, 1), (1, 1)),
            dimension_numbers=("NCHW", "OIHW", "NCHW"),
            precision=jax.lax.Precision.HIGHEST)

    def bn(y, gamma, beta):
        mean = jnp.mean(y, axis=(0, 2, 3), keepdims=True)
        var = jnp.mean((y - mean) ** 2, axis=(0, 2, 3), keepdims=True)
        return ((y - mean) * jax.lax.rsqrt(var + BN_EPS)
                * gamma.reshape(1, -1, 1, 1) + beta.reshape(1, -1, 1, 1))

    out = jax.nn.relu(bn(conv3x3(x, params["conv1_w"]),
                         params["bn1_gamma"], params["bn1_beta"]))
    out = bn(conv3x3(out, params["conv2_w"]),
             params["bn2_gamma"], params["bn2_beta"])
    return jax.nn.relu(out + x)


if __name__ == "__main__":
    key = jax.random.PRNGKey(0)
    kx, kp = jax.random.split(key)

    N, C, H, W = 2, 4, 16, 16          # inplanes = planes = 4, stride = 1
    x = jax.random.normal(kx, (N, C, H, W), jnp.float32)
    params = init_params(kp, inplanes=C, planes=C)

    out = basic_block_forward(x, params)
    jax.block_until_ready(out)

    assert out.shape == (N, C, H, W)
    assert bool(jnp.all(out >= 0.0))   # final ReLU

    ref = _reference_forward(x, params)
    err = float(jnp.max(jnp.abs(out - ref)))
    assert err < 0.25, f"max abs error vs reference too large: {err}"

    print("KERNEL_OK")
</pallas_src>

<mosaic_0001>
module attributes {stable_mosaic.version = 11 : i64} {
  func.func @_conv3x3_stats_kernel(%arg0: i32, %arg1: memref<1x18x18x128xbf16, #tpu.memory_space<vmem>>, %arg2: memref<1152x128xbf16, #tpu.memory_space<vmem>>, %arg3: memref<1x256x128xf32, #tpu.memory_space<vmem>>, %arg4: memref<1x2x128xf32, #tpu.memory_space<vmem>>) attributes {dimension_semantics = [#tpu.dimension_semantics<parallel>], iteration_bounds = array<i64: 2>, scalar_prefetch = 0 : i64, scratch_operands = 0 : i64, tpu.core_type = #tpu.core_type<tc>, window_params = [{transform_indices = @transform_0, window_bounds = array<i64: 1, 18, 18, 128>}, {pipeline_mode = #tpu.pipeline_mode<synchronous>, transform_indices = @transform_1, window_bounds = array<i64: 1152, 128>}, {transform_indices = @transform_2, window_bounds = array<i64: 1, 256, 128>}, {transform_indices = @transform_3, window_bounds = array<i64: 1, 2, 128>}]} {
    %cst = arith.constant 0.000000e+00 : f32
    %0 = vector.broadcast %cst : f32 to vector<256x128xf32>
    %c0 = arith.constant 0 : index
    %c0_0 = arith.constant 0 : index
    %c0_1 = arith.constant 0 : index
    %c0_2 = arith.constant 0 : index
    %1 = vector.load %arg1[%c0, %c0_0, %c0_1, %c0_2] : memref<1x18x18x128xbf16, #tpu.memory_space<vmem>>, vector<1x16x16x128xbf16>
    %2 = vector.shape_cast %1 : vector<1x16x16x128xbf16> to vector<16x16x128xbf16>
    %3 = vector.shape_cast %2 : vector<16x16x128xbf16> to vector<256x128xbf16>
    %c0_3 = arith.constant 0 : index
    %c0_4 = arith.constant 0 : index
    %4 = vector.load %arg2[%c0_3, %c0_4] : memref<1152x128xbf16, #tpu.memory_space<vmem>>, vector<128x128xbf16>
    %cst_5 = arith.constant dense<0.000000e+00> : vector<256x128xf32>
    %5 = tpu.matmul %3, %4, %cst_5 {dimension_numbers = #tpu.dot_dimension_numbers<[1], [0], [0], [1], [0, 0, 1, 1], [], []>} : vector<256x128xbf16>, vector<128x128xbf16>, vector<256x128xf32> -> vector<256x128xf32>
    %6 = arith.addf %0, %5 : vector<256x128xf32>
    %c0_6 = arith.constant 0 : index
    %c0_7 = arith.constant 0 : index
    %c1 = arith.constant 1 : index
    %c0_8 = arith.constant 0 : index
    %7 = vector.load %arg1[%c0_6, %c0_7, %c1, %c0_8] : memref<1x18x18x128xbf16, #tpu.memory_space<vmem>>, vector<1x16x16x128xbf16>
    %8 = vector.shape_cast %7 : vector<1x16x16x128xbf16> to vector<16x16x128xbf16>
    %9 = vector.shape_cast %8 : vector<16x16x128xbf16> to vector<256x128xbf16>
    %c128 = arith.constant 128 : index
    %c0_9 = arith.constant 0 : index
    %10 = vector.load %arg2[%c128, %c0_9] : memref<1152x128xbf16, #tpu.memory_space<vmem>>, vector<128x128xbf16>
    %cst_10 = arith.constant dense<0.000000e+00> : vector<256x128xf32>
    %11 = tpu.matmul %9, %10, %cst_10 {dimension_numbers = #tpu.dot_dimension_numbers<[1], [0], [0], [1], [0, 0, 1, 1], [], []>} : vector<256x128xbf16>, vector<128x128xbf16>, vector<256x128xf32> -> vector<256x128xf32>
    %12 = arith.addf %6, %11 : vector<256x128xf32>
    %c0_11 = arith.constant 0 : index
    %c0_12 = arith.constant 0 : index
    %c2 = arith.constant 2 : index
    %c0_13 = arith.constant 0 : index
    %13 = vector.load %arg1[%c0_11, %c0_12, %c2, %c0_13] : memref<1x18x18x128xbf16, #tpu.memory_space<vmem>>, vector<1x16x16x128xbf16>
    %14 = vector.shape_cast %13 : vector<1x16x16x128xbf16> to vector<16x16x128xbf16>
    %15 = vector.shape_cast %14 : vector<16x16x128xbf16> to vector<256x128xbf16>
    %c256 = arith.constant 256 : index
    %c0_14 = arith.constant 0 : index
    %16 = vector.load %arg2[%c256, %c0_14] : memref<1152x128xbf16, #tpu.memory_space<vmem>>, vector<128x128xbf16>
    %cst_15 = arith.constant dense<0.000000e+00> : vector<256x128xf32>
    %17 = tpu.matmul %15, %16, %cst_15 {dimension_numbers = #tpu.dot_dimension_numbers<[1], [0], [0], [1], [0, 0, 1, 1], [], []>} : vector<256x128xbf16>, vector<128x128xbf16>, vector<256x128xf32> -> vector<256x128xf32>
    %18 = arith.addf %12, %17 : vector<256x128xf32>
    %c0_16 = arith.constant 0 : index
    %c1_17 = arith.constant 1 : index
    %c0_18 = arith.constant 0 : index
    %c0_19 = arith.constant 0 : index
    %19 = vector.load %arg1[%c0_16, %c1_17, %c0_18, %c0_19] : memref<1x18x18x128xbf16, #tpu.memory_space<vmem>>, vector<1x16x16x128xbf16>
    %20 = vector.shape_cast %19 : vector<1x16x16x128xbf16> to vector<16x16x128xbf16>
    %21 = vector.shape_cast %20 : vector<16x16x128xbf16> to vector<256x128xbf16>
    %c384 = arith.constant 384 : index
    %c0_20 = arith.constant 0 : index
    %22 = vector.load %arg2[%c384, %c0_20] : memref<1152x128xbf16, #tpu.memory_space<vmem>>, vector<128x128xbf16>
    %cst_21 = arith.constant dense<0.000000e+00> : vector<256x128xf32>
    %23 = tpu.matmul %21, %22, %cst_21 {dimension_numbers = #tpu.dot_dimension_numbers<[1], [0], [0], [1], [0, 0, 1, 1], [], []>} : vector<256x128xbf16>, vector<128x128xbf16>, vector<256x128xf32> -> vector<256x128xf32>
    %24 = arith.addf %18, %23 : vector<256x128xf32>
    %c0_22 = arith.constant 0 : index
    %c1_23 = arith.constant 1 : index
    %c1_24 = arith.constant 1 : index
    %c0_25 = arith.constant 0 : index
    %25 = vector.load %arg1[%c0_22, %c1_23, %c1_24, %c0_25] : memref<1x18x18x128xbf16, #tpu.memory_space<vmem>>, vector<1x16x16x128xbf16>
    %26 = vector.shape_cast %25 : vector<1x16x16x128xbf16> to vector<16x16x128xbf16>
    %27 = vector.shape_cast %26 : vector<16x16x128xbf16> to vector<256x128xbf16>
    %c512 = arith.constant 512 : index
    %c0_26 = arith.constant 0 : index
    %28 = vector.load %arg2[%c512, %c0_26] : memref<1152x128xbf16, #tpu.memory_space<vmem>>, vector<128x128xbf16>
    %cst_27 = arith.constant dense<0.000000e+00> : vector<256x128xf32>
    %29 = tpu.matmul %27, %28, %cst_27 {dimension_numbers = #tpu.dot_dimension_numbers<[1], [0], [0], [1], [0, 0, 1, 1], [], []>} : vector<256x128xbf16>, vector<128x128xbf16>, vector<256x128xf32> -> vector<256x128xf32>
    %30 = arith.addf %24, %29 : vector<256x128xf32>
    %c0_28 = arith.constant 0 : index
    %c1_29 = arith.constant 1 : index
    %c2_30 = arith.constant 2 : index
    %c0_31 = arith.constant 0 : index
    %31 = vector.load %arg1[%c0_28, %c1_29, %c2_30, %c0_31] : memref<1x18x18x128xbf16, #tpu.memory_space<vmem>>, vector<1x16x16x128xbf16>
    %32 = vector.shape_cast %31 : vector<1x16x16x128xbf16> to vector<16x16x128xbf16>
    %33 = vector.shape_cast %32 : vector<16x16x128xbf16> to vector<256x128xbf16>
    %c640 = arith.constant 640 : index
    %c0_32 = arith.constant 0 : index
    %34 = vector.load %arg2[%c640, %c0_32] : memref<1152x128xbf16, #tpu.memory_space<vmem>>, vector<128x128xbf16>
    %cst_33 = arith.constant dense<0.000000e+00> : vector<256x128xf32>
    %35 = tpu.matmul %33, %34, %cst_33 {dimension_numbers = #tpu.dot_dimension_numbers<[1], [0], [0], [1], [0, 0, 1, 1], [], []>} : vector<256x128xbf16>, vector<128x128xbf16>, vector<256x128xf32> -> vector<256x128xf32>
    %36 = arith.addf %30, %35 : vector<256x128xf32>
    %c0_34 = arith.constant 0 : index
    %c2_35 = arith.constant 2 : index
    %c0_36 = arith.constant 0 : index
    %c0_37 = arith.constant 0 : index
    %37 = vector.load %arg1[%c0_34, %c2_35, %c0_36, %c0_37] : memref<1x18x18x128xbf16, #tpu.memory_space<vmem>>, vector<1x16x16x128xbf16>
    %38 = vector.shape_cast %37 : vector<1x16x16x128xbf16> to vector<16x16x128xbf16>
    %39 = vector.shape_cast %38 : vector<16x16x128xbf16> to vector<256x128xbf16>
    %c768 = arith.constant 768 : index
    %c0_38 = arith.constant 0 : index
    %40 = vector.load %arg2[%c768, %c0_38] : memref<1152x128xbf16, #tpu.memory_space<vmem>>, vector<128x128xbf16>
    %cst_39 = arith.constant dense<0.000000e+00> : vector<256x128xf32>
    %41 = tpu.matmul %39, %40, %cst_39 {dimension_numbers = #tpu.dot_dimension_numbers<[1], [0], [0], [1], [0, 0, 1, 1], [], []>} : vector<256x128xbf16>, vector<128x128xbf16>, vector<256x128xf32> -> vector<256x128xf32>
    %42 = arith.addf %36, %41 : vector<256x128xf32>
    %c0_40 = arith.constant 0 : index
    %c2_41 = arith.constant 2 : index
    %c1_42 = arith.constant 1 : index
    %c0_43 = arith.constant 0 : index
    %43 = vector.load %arg1[%c0_40, %c2_41, %c1_42, %c0_43] : memref<1x18x18x128xbf16, #tpu.memory_space<vmem>>, vector<1x16x16x128xbf16>
    %44 = vector.shape_cast %43 : vector<1x16x16x128xbf16> to vector<16x16x128xbf16>
    %45 = vector.shape_cast %44 : vector<16x16x128xbf16> to vector<256x128xbf16>
    %c896 = arith.constant 896 : index
    %c0_44 = arith.constant 0 : index
    %46 = vector.load %arg2[%c896, %c0_44] : memref<1152x128xbf16, #tpu.memory_space<vmem>>, vector<128x128xbf16>
    %cst_45 = arith.constant dense<0.000000e+00> : vector<256x128xf32>
    %47 = tpu.matmul %45, %46, %cst_45 {dimension_numbers = #tpu.dot_dimension_numbers<[1], [0], [0], [1], [0, 0, 1, 1], [], []>} : vector<256x128xbf16>, vector<128x128xbf16>, vector<256x128xf32> -> vector<256x128xf32>
    %48 = arith.addf %42, %47 : vector<256x128xf32>
    %c0_46 = arith.constant 0 : index
    %c2_47 = arith.constant 2 : index
    %c2_48 = arith.constant 2 : index
    %c0_49 = arith.constant 0 : index
    %49 = vector.load %arg1[%c0_46, %c2_47, %c2_48, %c0_49] : memref<1x18x18x128xbf16, #tpu.memory_space<vmem>>, vector<1x16x16x128xbf16>
    %50 = vector.shape_cast %49 : vector<1x16x16x128xbf16> to vector<16x16x128xbf16>
    %51 = vector.shape_cast %50 : vector<16x16x128xbf16> to vector<256x128xbf16>
    %c1024 = arith.constant 1024 : index
    %c0_50 = arith.constant 0 : index
    %52 = vector.load %arg2[%c1024, %c0_50] : memref<1152x128xbf16, #tpu.memory_space<vmem>>, vector<128x128xbf16>
    %cst_51 = arith.constant dense<0.000000e+00> : vector<256x128xf32>
    %53 = tpu.matmul %51, %52, %cst_51 {dimension_numbers = #tpu.dot_dimension_numbers<[1], [0], [0], [1], [0, 0, 1, 1], [], []>} : vector<256x128xbf16>, vector<128x128xbf16>, vector<256x128xf32> -> vector<256x128xf32>
    %54 = arith.addf %48, %53 : vector<256x128xf32>
    %c0_52 = arith.constant 0 : index
    %c0_53 = arith.constant 0 : index
    %c0_54 = arith.constant 0 : index
    %55 = vector.load %arg3[%c0_52, %c0_53, %c0_54] : memref<1x256x128xf32, #tpu.memory_space<vmem>>, vector<1x256x128xf32>
    %56 = vector.shape_cast %55 : vector<1x256x128xf32> to vector<256x128xf32>
    %57 = vector.shape_cast %54 : vector<256x128xf32> to vector<1x256x128xf32>
    tpu.vector_store %arg3[%c0_52, %c0_53, %c0_54], %57 {strides = array<i32>} : memref<1x256x128xf32, #tpu.memory_space<vmem>>, vector<1x256x128xf32>,
    %cst_55 = arith.constant dense<0.000000e+00> : vector<128xf32>
    %58 = vector.multi_reduction <add>, %54, %cst_55 [0] : vector<256x128xf32> to vector<128xf32>
    %59 = vector.shape_cast %58 : vector<128xf32> to vector<1x128xf32>
    %c0_56 = arith.constant 0 : index
    %c0_57 = arith.constant 0 : index
    %c0_58 = arith.constant 0 : index
    %60 = vector.load %arg4[%c0_56, %c0_57, %c0_58] : memref<1x2x128xf32, #tpu.memory_space<vmem>>, vector<1x1x128xf32>
    %61 = vector.shape_cast %60 : vector<1x1x128xf32> to vector<1x128xf32>
    %62 = vector.shape_cast %59 : vector<1x128xf32> to vector<1x1x128xf32>
    tpu.vector_store %arg4[%c0_56, %c0_57, %c0_58], %62 {strides = array<i32>} : memref<1x2x128xf32, #tpu.memory_space<vmem>>, vector<1x1x128xf32>,
    %63 = arith.mulf %54, %54 : vector<256x128xf32>
    %cst_59 = arith.constant dense<0.000000e+00> : vector<128xf32>
    %64 = vector.multi_reduction <add>, %63, %cst_59 [0] : vector<256x128xf32> to vector<128xf32>
    %65 = vector.shape_cast %64 : vector<128xf32> to vector<1x128xf32>
    %c0_60 = arith.constant 0 : index
    %c1_61 = arith.constant 1 : index
    %c0_62 = arith.constant 0 : index
    %66 = vector.load %arg4[%c0_60, %c1_61, %c0_62] : memref<1x2x128xf32, #tpu.memory_space<vmem>>, vector<1x1x128xf32>
    %67 = vector.shape_cast %66 : vector<1x1x128xf32> to vector<1x128xf32>
    %68 = vector.shape_cast %65 : vector<1x128xf32> to vector<1x1x128xf32>
    tpu.vector_store %arg4[%c0_60, %c1_61, %c0_62], %68 {strides = array<i32>} : memref<1x2x128xf32, #tpu.memory_space<vmem>>, vector<1x1x128xf32>,
    return
  }
  func.func @transform_0(%arg0: i32) -> (i32, i32, i32, i32) {
    %c0_i32 = arith.constant 0 : i32
    %c0_i32_0 = arith.constant 0 : i32
    %c0_i32_1 = arith.constant 0 : i32
    %c0_i32_2 = arith.constant 0 : i32
    return %arg0, %c0_i32, %c0_i32_0, %c0_i32_1 : i32, i32, i32, i32
  }
  func.func @transform_1(%arg0: i32) -> (i32, i32) {
    %c0_i32 = arith.constant 0 : i32
    %c0_i32_0 = arith.constant 0 : i32
    %c0_i32_1 = arith.constant 0 : i32
    return %c0_i32, %c0_i32_0 : i32, i32
  }
  func.func @transform_2(%arg0: i32) -> (i32, i32, i32) {
    %c0_i32 = arith.constant 0 : i32
    %c0_i32_0 = arith.constant 0 : i32
    %c0_i32_1 = arith.constant 0 : i32
    return %arg0, %c0_i32, %c0_i32_0 : i32, i32, i32
  }
  func.func @transform_3(%arg0: i32) -> (i32, i32, i32) {
    %c0_i32 = arith.constant 0 : i32
    %c0_i32_0 = arith.constant 0 : i32
    %c0_i32_1 = arith.constant 0 : i32
    return %arg0, %c0_i32, %c0_i32_0 : i32, i32, i32
  }
}

module attributes {stable_mosaic.version = 11 : i64} {
  func.func @_bn_relu_conv3x3_stats_kernel(%arg0: i32, %arg1: memref<1x256x128xf32, #tpu.memory_space<vmem>>, %arg2: memref<1x128xf32, #tpu.memory_space<vmem>>, %arg3: memref<1x128xf32, #tpu.memory_space<vmem>>, %arg4: memref<1152x128xbf16, #tpu.memory_space<vmem>>, %arg5: memref<1x256x128xf32, #tpu.memory_space<vmem>>, %arg6: memref<1x2x128xf32, #tpu.memory_space<vmem>>, %arg7: memref<18x18x128xbf16, #tpu.memory_space<vmem>>) attributes {dimension_semantics = [#tpu.dimension_semantics<parallel>], iteration_bounds = array<i64: 2>, scalar_prefetch = 0 : i64, scratch_operands = 1 : i64, tpu.core_type = #tpu.core_type<tc>, window_params = [{transform_indices = @transform_0, window_bounds = array<i64: 1, 256, 128>}, {pipeline_mode = #tpu.pipeline_mode<synchronous>, transform_indices = @transform_1, window_bounds = array<i64: 1, 128>}, {pipeline_mode = #tpu.pipeline_mode<synchronous>, transform_indices = @transform_2, window_bounds = array<i64: 1, 128>}, {pipeline_mode = #tpu.pipeline_mode<synchronous>, transform_indices = @transform_3, window_bounds = array<i64: 1152, 128>}, {transform_indices = @transform_4, window_bounds = array<i64: 1, 256, 128>}, {transform_indices = @transform_5, window_bounds = array<i64: 1, 2, 128>}]} {
    %c0 = arith.constant 0 : index
    %c0_0 = arith.constant 0 : index
    %c0_1 = arith.constant 0 : index
    %0 = vector.load %arg1[%c0, %c0_0, %c0_1] : memref<1x256x128xf32, #tpu.memory_space<vmem>>, vector<1x256x128xf32>
    %1 = vector.shape_cast %0 : vector<1x256x128xf32> to vector<256x128xf32>
    %c0_2 = arith.constant 0 : index
    %c0_3 = arith.constant 0 : index
    %2 = vector.load %arg2[%c0_2, %c0_3] : memref<1x128xf32, #tpu.memory_space<vmem>>, vector<1x128xf32>
    %3 = vector.broadcast %2 : vector<1x128xf32> to vector<256x128xf32>
    %4 = arith.mulf %1, %3 : vector<256x128xf32>
    %c0_4 = arith.constant 0 : index
    %c0_5 = arith.constant 0 : index
    %5 = vector.load %arg3[%c0_4, %c0_5] : memref<1x128xf32, #tpu.memory_space<vmem>>, vector<1x128xf32>
    %6 = vector.broadcast %5 : vector<1x128xf32> to vector<256x128xf32>
    %7 = arith.addf %4, %6 : vector<256x128xf32>
    %cst = arith.constant 0.000000e+00 : f32
    %8 = vector.broadcast %cst : f32 to vector<256x128xf32>
    %9 = arith.maximumf %7, %8 : vector<256x128xf32>
    %cst_6 = arith.constant 0.000000e+00 : bf16
    %10 = vector.broadcast %cst_6 : bf16 to vector<18x18x128xbf16>
    %c0_7 = arith.constant 0 : index
    %c0_8 = arith.constant 0 : index
    %c0_9 = arith.constant 0 : index
    %11 = vector.load %arg7[%c0_7, %c0_8, %c0_9] : memref<18x18x128xbf16, #tpu.memory_space<vmem>>, vector<18x18x128xbf16>
    tpu.vector_store %arg7[%c0_7, %c0_8, %c0_9], %10 {strides = array<i32>} : memref<18x18x128xbf16, #tpu.memory_space<vmem>>, vector<18x18x128xbf16>,
    %12 = vector.shape_cast %9 : vector<256x128xf32> to vector<16x16x128xf32>
    %13 = arith.truncf %12 : vector<16x16x128xf32> to vector<16x16x128xbf16>
    %c1 = arith.constant 1 : index
    %c1_10 = arith.constant 1 : index
    %c0_11 = arith.constant 0 : index
    %14 = vector.load %arg7[%c1, %c1_10, %c0_11] : memref<18x18x128xbf16, #tpu.memory_space<vmem>>, vector<16x16x128xbf16>
    tpu.vector_store %arg7[%c1, %c1_10, %c0_11], %13 {strides = array<i32>} : memref<18x18x128xbf16, #tpu.memory_space<vmem>>, vector<16x16x128xbf16>,
    %cst_12 = arith.constant 0.000000e+00 : f32
    %15 = vector.broadcast %cst_12 : f32 to vector<256x128xf32>
    %c0_13 = arith.constant 0 : index
    %c0_14 = arith.constant 0 : index
    %c0_15 = arith.constant 0 : index
    %16 = vector.load %arg7[%c0_13, %c0_14, %c0_15] : memref<18x18x128xbf16, #tpu.memory_space<vmem>>, vector<16x16x128xbf16>
    %17 = vector.shape_cast %16 : vector<16x16x128xbf16> to vector<256x128xbf16>
    %c0_16 = arith.constant 0 : index
    %c0_17 = arith.constant 0 : index
    %18 = vector.load %arg4[%c0_16, %c0_17] : memref<1152x128xbf16, #tpu.memory_space<vmem>>, vector<128x128xbf16>
    %cst_18 = arith.constant dense<0.000000e+00> : vector<256x128xf32>
    %19 = tpu.matmul %17, %18, %cst_18 {dimension_numbers = #tpu.dot_dimension_numbers<[1], [0], [0], [1], [0, 0, 1, 1], [], []>} : vector<256x128xbf16>, vector<128x128xbf16>, vector<256x128xf32> -> vector<256x128xf32>
    %20 = arith.addf %15, %19 : vector<256x128xf32>
    %c0_19 = arith.constant 0 : index
    %c1_20 = arith.constant 1 : index
    %c0_21 = arith.constant 0 : index
    %21 = vector.load %arg7[%c0_19, %c1_20, %c0_21] : memref<18x18x128xbf16, #tpu.memory_space<vmem>>, vector<16x16x128xbf16>
    %22 = vector.shape_cast %21 : vector<16x16x128xbf16> to vector<256x128xbf16>
    %c128 = arith.constant 128 : index
    %c0_22 = arith.constant 0 : index
    %23 = vector.load %arg4[%c128, %c0_22] : memref<1152x128xbf16, #tpu.memory_space<vmem>>, vector<128x128xbf16>
    %cst_23 = arith.constant dense<0.000000e+00> : vector<256x128xf32>
    %24 = tpu.matmul %22, %23, %cst_23 {dimension_numbers = #tpu.dot_dimension_numbers<[1], [0], [0], [1], [0, 0, 1, 1], [], []>} : vector<256x128xbf16>, vector<128x128xbf16>, vector<256x128xf32> -> vector<256x128xf32>
    %25 = arith.addf %20, %24 : vector<256x128xf32>
    %c0_24 = arith.constant 0 : index
    %c2 = arith.constant 2 : index
    %c0_25 = arith.constant 0 : index
    %26 = vector.load %arg7[%c0_24, %c2, %c0_25] : memref<18x18x128xbf16, #tpu.memory_space<vmem>>, vector<16x16x128xbf16>
    %27 = vector.shape_cast %26 : vector<16x16x128xbf16> to vector<256x128xbf16>
    %c256 = arith.constant 256 : index
    %c0_26 = arith.constant 0 : index
    %28 = vector.load %arg4[%c256, %c0_26] : memref<1152x128xbf16, #tpu.memory_space<vmem>>, vector<128x128xbf16>
    %cst_27 = arith.constant dense<0.000000e+00> : vector<256x128xf32>
    %29 = tpu.matmul %27, %28, %cst_27 {dimension_numbers = #tpu.dot_dimension_numbers<[1], [0], [0], [1], [0, 0, 1, 1], [], []>} : vector<256x128xbf16>, vector<128x128xbf16>, vector<256x128xf32> -> vector<256x128xf32>
    %30 = arith.addf %25, %29 : vector<256x128xf32>
    %c1_28 = arith.constant 1 : index
    %c0_29 = arith.constant 0 : index
    %c0_30 = arith.constant 0 : index
    %31 = vector.load %arg7[%c1_28, %c0_29, %c0_30] : memref<18x18x128xbf16, #tpu.memory_space<vmem>>, vector<16x16x128xbf16>
    %32 = vector.shape_cast %31 : vector<16x16x128xbf16> to vector<256x128xbf16>
    %c384 = arith.constant 384 : index
    %c0_31 = arith.constant 0 : index
    %33 = vector.load %arg4[%c384, %c0_31] : memref<1152x128xbf16, #tpu.memory_space<vmem>>, vector<128x128xbf16>
    %cst_32 = arith.constant dense<0.000000e+00> : vector<256x128xf32>
    %34 = tpu.matmul %32, %33, %cst_32 {dimension_numbers = #tpu.dot_dimension_numbers<[1], [0], [0], [1], [0, 0, 1, 1], [], []>} : vector<256x128xbf16>, vector<128x128xbf16>, vector<256x128xf32> -> vector<256x128xf32>
    %35 = arith.addf %30, %34 : vector<256x128xf32>
    %c1_33 = arith.constant 1 : index
    %c1_34 = arith.constant 1 : index
    %c0_35 = arith.constant 0 : index
    %36 = vector.load %arg7[%c1_33, %c1_34, %c0_35] : memref<18x18x128xbf16, #tpu.memory_space<vmem>>, vector<16x16x128xbf16>
    %37 = vector.shape_cast %36 : vector<16x16x128xbf16> to vector<256x128xbf16>
    %c512 = arith.constant 512 : index
    %c0_36 = arith.constant 0 : index
    %38 = vector.load %arg4[%c512, %c0_36] : memref<1152x128xbf16, #tpu.memory_space<vmem>>, vector<128x128xbf16>
    %cst_37 = arith.constant dense<0.000000e+00> : vector<256x128xf32>
    %39 = tpu.matmul %37, %38, %cst_37 {dimension_numbers = #tpu.dot_dimension_numbers<[1], [0], [0], [1], [0, 0, 1, 1], [], []>} : vector<256x128xbf16>, vector<128x128xbf16>, vector<256x128xf32> -> vector<256x128xf32>
    %40 = arith.addf %35, %39 : vector<256x128xf32>
    %c1_38 = arith.constant 1 : index
    %c2_39 = arith.constant 2 : index
    %c0_40 = arith.constant 0 : index
    %41 = vector.load %arg7[%c1_38, %c2_39, %c0_40] : memref<18x18x128xbf16, #tpu.memory_space<vmem>>, vector<16x16x128xbf16>
    %42 = vector.shape_cast %41 : vector<16x16x128xbf16> to vector<256x128xbf16>
    %c640 = arith.constant 640 : index
    %c0_41 = arith.constant 0 : index
    %43 = vector.load %arg4[%c640, %c0_41] : memref<1152x128xbf16, #tpu.memory_space<vmem>>, vector<128x128xbf16>
    %cst_42 = arith.constant dense<0.000000e+00> : vector<256x128xf32>
    %44 = tpu.matmul %42, %43, %cst_42 {dimension_numbers = #tpu.dot_dimension_numbers<[1], [0], [0], [1], [0, 0, 1, 1], [], []>} : vector<256x128xbf16>, vector<128x128xbf16>, vector<256x128xf32> -> vector<256x128xf32>
    %45 = arith.addf %40, %44 : vector<256x128xf32>
    %c2_43 = arith.constant 2 : index
    %c0_44 = arith.constant 0 : index
    %c0_45 = arith.constant 0 : index
    %46 = vector.load %arg7[%c2_43, %c0_44, %c0_45] : memref<18x18x128xbf16, #tpu.memory_space<vmem>>, vector<16x16x128xbf16>
    %47 = vector.shape_cast %46 : vector<16x16x128xbf16> to vector<256x128xbf16>
    %c768 = arith.constant 768 : index
    %c0_46 = arith.constant 0 : index
    %48 = vector.load %arg4[%c768, %c0_46] : memref<1152x128xbf16, #tpu.memory_space<vmem>>, vector<128x128xbf16>
    %cst_47 = arith.constant dense<0.000000e+00> : vector<256x128xf32>
    %49 = tpu.matmul %47, %48, %cst_47 {dimension_numbers = #tpu.dot_dimension_numbers<[1], [0], [0], [1], [0, 0, 1, 1], [], []>} : vector<256x128xbf16>, vector<128x128xbf16>, vector<256x128xf32> -> vector<256x128xf32>
    %50 = arith.addf %45, %49 : vector<256x128xf32>
    %c2_48 = arith.constant 2 : index
    %c1_49 = arith.constant 1 : index
    %c0_50 = arith.constant 0 : index
    %51 = vector.load %arg7[%c2_48, %c1_49, %c0_50] : memref<18x18x128xbf16, #tpu.memory_space<vmem>>, vector<16x16x128xbf16>
    %52 = vector.shape_cast %51 : vector<16x16x128xbf16> to vector<256x128xbf16>
    %c896 = arith.constant 896 : index
    %c0_51 = arith.constant 0 : index
    %53 = vector.load %arg4[%c896, %c0_51] : memref<1152x128xbf16, #tpu.memory_space<vmem>>, vector<128x128xbf16>
    %cst_52 = arith.constant dense<0.000000e+00> : vector<256x128xf32>
    %54 = tpu.matmul %52, %53, %cst_52 {dimension_numbers = #tpu.dot_dimension_numbers<[1], [0], [0], [1], [0, 0, 1, 1], [], []>} : vector<256x128xbf16>, vector<128x128xbf16>, vector<256x128xf32> -> vector<256x128xf32>
    %55 = arith.addf %50, %54 : vector<256x128xf32>
    %c2_53 = arith.constant 2 : index
    %c2_54 = arith.constant 2 : index
    %c0_55 = arith.constant 0 : index
    %56 = vector.load %arg7[%c2_53, %c2_54, %c0_55] : memref<18x18x128xbf16, #tpu.memory_space<vmem>>, vector<16x16x128xbf16>
    %57 = vector.shape_cast %56 : vector<16x16x128xbf16> to vector<256x128xbf16>
    %c1024 = arith.constant 1024 : index
    %c0_56 = arith.constant 0 : index
    %58 = vector.load %arg4[%c1024, %c0_56] : memref<1152x128xbf16, #tpu.memory_space<vmem>>, vector<128x128xbf16>
    %cst_57 = arith.constant dense<0.000000e+00> : vector<256x128xf32>
    %59 = tpu.matmul %57, %58, %cst_57 {dimension_numbers = #tpu.dot_dimension_numbers<[1], [0], [0], [1], [0, 0, 1, 1], [], []>} : vector<256x128xbf16>, vector<128x128xbf16>, vector<256x128xf32> -> vector<256x128xf32>
    %60 = arith.addf %55, %59 : vector<256x128xf32>
    %c0_58 = arith.constant 0 : index
    %c0_59 = arith.constant 0 : index
    %c0_60 = arith.constant 0 : index
    %61 = vector.load %arg5[%c0_58, %c0_59, %c0_60] : memref<1x256x128xf32, #tpu.memory_space<vmem>>, vector<1x256x128xf32>
    %62 = vector.shape_cast %61 : vector<1x256x128xf32> to vector<256x128xf32>
    %63 = vector.shape_cast %60 : vector<256x128xf32> to vector<1x256x128xf32>
    tpu.vector_store %arg5[%c0_58, %c0_59, %c0_60], %63 {strides = array<i32>} : memref<1x256x128xf32, #tpu.memory_space<vmem>>, vector<1x256x128xf32>,
    %cst_61 = arith.constant dense<0.000000e+00> : vector<128xf32>
    %64 = vector.multi_reduction <add>, %60, %cst_61 [0] : vector<256x128xf32> to vector<128xf32>
    %65 = vector.shape_cast %64 : vector<128xf32> to vector<1x128xf32>
    %c0_62 = arith.constant 0 : index
    %c0_63 = arith.constant 0 : index
    %c0_64 = arith.constant 0 : index
    %66 = vector.load %arg6[%c0_62, %c0_63, %c0_64] : memref<1x2x128xf32, #tpu.memory_space<vmem>>, vector<1x1x128xf32>
    %67 = vector.shape_cast %66 : vector<1x1x128xf32> to vector<1x128xf32>
    %68 = vector.shape_cast %65 : vector<1x128xf32> to vector<1x1x128xf32>
    tpu.vector_store %arg6[%c0_62, %c0_63, %c0_64], %68 {strides = array<i32>} : memref<1x2x128xf32, #tpu.memory_space<vmem>>, vector<1x1x128xf32>,
    %69 = arith.mulf %60, %60 : vector<256x128xf32>
    %cst_65 = arith.constant dense<0.000000e+00> : vector<128xf32>
    %70 = vector.multi_reduction <add>, %69, %cst_65 [0] : vector<256x128xf32> to vector<128xf32>
    %71 = vector.shape_cast %70 : vector<128xf32> to vector<1x128xf32>
    %c0_66 = arith.constant 0 : index
    %c1_67 = arith.constant 1 : index
    %c0_68 = arith.constant 0 : index
    %72 = vector.load %arg6[%c0_66, %c1_67, %c0_68] : memref<1x2x128xf32, #tpu.memory_space<vmem>>, vector<1x1x128xf32>
    %73 = vector.shape_cast %72 : vector<1x1x128xf32> to vector<1x128xf32>
    %74 = vector.shape_cast %71 : vector<1x128xf32> to vector<1x1x128xf32>
    tpu.vector_store %arg6[%c0_66, %c1_67, %c0_68], %74 {strides = array<i32>} : memref<1x2x128xf32, #tpu.memory_space<vmem>>, vector<1x1x128xf32>,
    return
  }
  func.func @transform_0(%arg0: i32) -> (i32, i32, i32) {
    %c0_i32 = arith.constant 0 : i32
    %c0_i32_0 = arith.constant 0 : i32
    %c0_i32_1 = arith.constant 0 : i32
    return %arg0, %c0_i32, %c0_i32_0 : i32, i32, i32
  }
  func.func @transform_1(%arg0: i32) -> (i32, i32) {
    %c0_i32 = arith.constant 0 : i32
    %c0_i32_0 = arith.constant 0 : i32
    %c0_i32_1 = arith.constant 0 : i32
    return %c0_i32, %c0_i32_0 : i32, i32
  }
  func.func @transform_2(%arg0: i32) -> (i32, i32) {
    %c0_i32 = arith.constant 0 : i32
    %c0_i32_0 = arith.constant 0 : i32
    %c0_i32_1 = arith.constant 0 : i32
    return %c0_i32, %c0_i32_0 : i32, i32
  }
  func.func @transform_3(%arg0: i32) -> (i32, i32) {
    %c0_i32 = arith.constant 0 : i32
    %c0_i32_0 = arith.constant 0 : i32
    %c0_i32_1 = arith.constant 0 : i32
    return %c0_i32, %c0_i32_0 : i32, i32
  }
  func.func @transform_4(%arg0: i32) -> (i32, i32, i32) {
    %c0_i32 = arith.constant 0 : i32
    %c0_i32_0 = arith.constant 0 : i32
    %c0_i32_1 = arith.constant 0 : i32
    return %arg0, %c0_i32, %c0_i32_0 : i32, i32, i32
  }
  func.func @transform_5(%arg0: i32) -> (i32, i32, i32) {
    %c0_i32 = arith.constant 0 : i32
    %c0_i32_0 = arith.constant 0 : i32
    %c0_i32_1 = arith.constant 0 : i32
    return %arg0, %c0_i32, %c0_i32_0 : i32, i32, i32
  }
}

module attributes {stable_mosaic.version = 11 : i64} {
  func.func @_bn_add_relu_kernel(%arg0: i32, %arg1: memref<1x256x128xf32, #tpu.memory_space<vmem>>, %arg2: memref<1x128xf32, #tpu.memory_space<vmem>>, %arg3: memref<1x128xf32, #tpu.memory_space<vmem>>, %arg4: memref<1x256x128xf32, #tpu.memory_space<vmem>>, %arg5: memref<1x256x128xf32, #tpu.memory_space<vmem>>) attributes {dimension_semantics = [#tpu.dimension_semantics<parallel>], iteration_bounds = array<i64: 2>, scalar_prefetch = 0 : i64, scratch_operands = 0 : i64, tpu.core_type = #tpu.core_type<tc>, window_params = [{transform_indices = @transform_0, window_bounds = array<i64: 1, 256, 128>}, {pipeline_mode = #tpu.pipeline_mode<synchronous>, transform_indices = @transform_1, window_bounds = array<i64: 1, 128>}, {pipeline_mode = #tpu.pipeline_mode<synchronous>, transform_indices = @transform_2, window_bounds = array<i64: 1, 128>}, {transform_indices = @transform_3, window_bounds = array<i64: 1, 256, 128>}, {transform_indices = @transform_4, window_bounds = array<i64: 1, 256, 128>}]} {
    %c0 = arith.constant 0 : index
    %c0_0 = arith.constant 0 : index
    %c0_1 = arith.constant 0 : index
    %0 = vector.load %arg1[%c0, %c0_0, %c0_1] : memref<1x256x128xf32, #tpu.memory_space<vmem>>, vector<1x256x128xf32>
    %1 = vector.shape_cast %0 : vector<1x256x128xf32> to vector<256x128xf32>
    %c0_2 = arith.constant 0 : index
    %c0_3 = arith.constant 0 : index
    %2 = vector.load %arg2[%c0_2, %c0_3] : memref<1x128xf32, #tpu.memory_space<vmem>>, vector<1x128xf32>
    %3 = vector.broadcast %2 : vector<1x128xf32> to vector<256x128xf32>
    %4 = arith.mulf %1, %3 : vector<256x128xf32>
    %c0_4 = arith.constant 0 : index
    %c0_5 = arith.constant 0 : index
    %5 = vector.load %arg3[%c0_4, %c0_5] : memref<1x128xf32, #tpu.memory_space<vmem>>, vector<1x128xf32>
    %6 = vector.broadcast %5 : vector<1x128xf32> to vector<256x128xf32>
    %7 = arith.addf %4, %6 : vector<256x128xf32>
    %c0_6 = arith.constant 0 : index
    %c0_7 = arith.constant 0 : index
    %c0_8 = arith.constant 0 : index
    %8 = vector.load %arg4[%c0_6, %c0_7, %c0_8] : memref<1x256x128xf32, #tpu.memory_space<vmem>>, vector<1x256x128xf32>
    %9 = vector.shape_cast %8 : vector<1x256x128xf32> to vector<256x128xf32>
    %10 = arith.addf %7, %9 : vector<256x128xf32>
    %cst = arith.constant 0.000000e+00 : f32
    %11 = vector.broadcast %cst : f32 to vector<256x128xf32>
    %12 = arith.maximumf %10, %11 : vector<256x128xf32>
    %c0_9 = arith.constant 0 : index
    %c0_10 = arith.constant 0 : index
    %c0_11 = arith.constant 0 : index
    %13 = vector.load %arg5[%c0_9, %c0_10, %c0_11] : memref<1x256x128xf32, #tpu.memory_space<vmem>>, vector<1x256x128xf32>
    %14 = vector.shape_cast %13 : vector<1x256x128xf32> to vector<256x128xf32>
    %15 = vector.shape_cast %12 : vector<256x128xf32> to vector<1x256x128xf32>
    tpu.vector_store %arg5[%c0_9, %c0_10, %c0_11], %15 {strides = array<i32>} : memref<1x256x128xf32, #tpu.memory_space<vmem>>, vector<1x256x128xf32>,
    return
  }
  func.func @transform_0(%arg0: i32) -> (i32, i32, i32) {
    %c0_i32 = arith.constant 0 : i32
    %c0_i32_0 = arith.constant 0 : i32
    %c0_i32_1 = arith.constant 0 : i32
    return %arg0, %c0_i32, %c0_i32_0 : i32, i32, i32
  }
  func.func @transform_1(%arg0: i32) -> (i32, i32) {
    %c0_i32 = arith.constant 0 : i32
    %c0_i32_0 = arith.constant 0 : i32
    %c0_i32_1 = arith.constant 0 : i32
    return %c0_i32, %c0_i32_0 : i32, i32
  }
  func.func @transform_2(%arg0: i32) -> (i32, i32) {
    %c0_i32 = arith.constant 0 : i32
    %c0_i32_0 = arith.constant 0 : i32
    %c0_i32_1 = arith.constant 0 : i32
    return %c0_i32, %c0_i32_0 : i32, i32
  }
  func.func @transform_3(%arg0: i32) -> (i32, i32, i32) {
    %c0_i32 = arith.constant 0 : i32
    %c0_i32_0 = arith.constant 0 : i32
    %c0_i32_1 = arith.constant 0 : i32
    return %arg0, %c0_i32, %c0_i32_0 : i32, i32, i32
  }
  func.func @transform_4(%arg0: i32) -> (i32, i32, i32) {
    %c0_i32 = arith.constant 0 : i32
    %c0_i32_0 = arith.constant 0 : i32
    %c0_i32_1 = arith.constant 0 : i32
    return %arg0, %c0_i32, %c0_i32_0 : i32, i32, i32
  }
}

</mosaic_0001>

<bundles_post_ra>
// kernel: basic_block_forward.5
= control target key start
LH: loop header
LB: loop body
LE: loop exit
PB: predicated region body
PF: predicated region fallthrough
CT: control target
= control target key end

     0   :  { %s582_s15 = smov 0   ;;  %s783_s0 = inlined_call_operand.vmem [shape: f32[2,256,128], index: 0, kind: input, shape index: {}]   ;;  %s784_s1 = inlined_call_operand.vmem [shape: f32[1,128], index: 1, kind: input, shape index: {}]   ;;  %s785_s2 = inlined_call_operand.vmem [shape: f32[1,128], index: 2, kind: input, shape index: {}]   ;;  %s786_s3 = inlined_call_operand.vmem [shape: f32[2,256,128], index: 3, kind: input, shape index: {}]   ;;  %s787_s4 = inlined_call_operand.vmem [shape: f32[2,256,128], index: 4, kind: output, shape index: {}]  }
   0x1 LB: > { %s523_s16 = sadd.s32 4294967295, %s555_s15   ;;  %p527_p0 = scmp.ge.s32.totalorder %s555_s15, 1  ;;  %s555_s15 = sphi %s582_s15, %s14_s15  }
   0x2   : > { %p172_p1 = scmp.lt.s32.totalorder %s555_s15, 3 }
   0x4   : > { %p173_p2 = pnand %p527_p0, %p172_p1 }
   0x5   : > { %p203_p3 = scmp.lt.s32.totalorder (!%p173_p2), %s523_s16, 1  ;;  %v595_v0 = vld [vmem:[%s784_s1] ss:$0 sm:$0xff] (!%p173_p2) }
   0x6   : > { %176 = sbr.rel (%p173_p2) target bundleno = 55 (0x37), region = 36  ;;  %v613_v2 = vld [vmem:[%s785_s2] ss:$0 sm:$0xff] (!%p173_p2) }
   0xd   : > { %s789_s16 = smov (!%p203_p3, %s523_s16), 1 }
   0xe   : > { %s590_s17 = sshll.u32 %s789_s16, 8 }
   0xf   : > { %s601_s22 = scalar_lea.vmem %s783_s0, %s590_s17  ;;  %s607_s25 = scalar_lea.vmem %s786_s3, %s590_s17 }
  0x10   : > { %v218_v1 = vld [vmem:[%s601_s22] sm:$0xff]  ;;  %v219_v3 = vld [vmem:[%s601_s22 + $0x8] sm:$0xff]  ;;  %v220_v7 = vld [vmem:[%s601_s22 + $0x10] sm:$0xff]  ;;  %s643_s30 = scalar_lea.vmem %s787_s4, %s590_s17 }
  0x11   : > { %v257_v4 = vmul.f32 %v595_v0, %v218_v1  ;;  %v328_v5 = vld [vmem:[%s607_s25] sm:$0xff]  ;;  %v258_v6 = vmul.f32 %v595_v0, %v219_v3  ;;  %v329_v8 = vld [vmem:[%s607_s25 + $0x8] sm:$0xff]  ;;  %v259_v9 = vmul.f32 %v595_v0, %v220_v7  ;;  %v221_v10 = vld [vmem:[%s601_s22 + $0x18] sm:$0xff] }
  0x12   : > { %v222_v11 = vld [vmem:[%s601_s22 + $0x20] sm:$0xff]  ;;  %v330_v14 = vld [vmem:[%s607_s25 + $0x10] sm:$0xff]  ;;  %v260_v15 = vmul.f32 %v595_v0, %v221_v10  ;;  %v331_v16 = vld [vmem:[%s607_s25 + $0x18] sm:$0xff] }
  0x13   : > { %v296_v12 = vadd.f32 %v613_v2, %v257_v4  ;;  %v297_v13 = vadd.f32 %v613_v2, %v258_v6  ;;  %v261_v17 = vmul.f32 %v595_v0, %v222_v11  ;;  %v223_v18 = vld [vmem:[%s601_s22 + $0x28] sm:$0xff]  ;;  %v298_v19 = vadd.f32 %v613_v2, %v259_v9  ;;  %v332_v20 = vld [vmem:[%s607_s25 + $0x20] sm:$0xff]  ;;  %v224_v22 = vld [vmem:[%s601_s22 + $0x30] sm:$0xff] }
  0x14   : > { %v262_v21 = vmul.f32 %v595_v0, %v223_v18  ;;  %v225_v23 = vld [vmem:[%s601_s22 + $0x38] sm:$0xff]  ;;  %v299_v26 = vadd.f32 %v613_v2, %v260_v15  ;;  %v333_v28 = vld [vmem:[%s607_s25 + $0x28] sm:$0xff]  ;;  %v263_v31 = vmul.f32 %v595_v0, %v224_v22  ;;  %v226_v33 = vld [vmem:[%s601_s22 + $0x40] sm:$0xff] }
  0x15   : > { %v360_v24 = vadd.f32 %v328_v5, %v296_v12  ;;  %v361_v25 = vadd.f32 %v329_v8, %v297_v13  ;;  %v300_v27 = vadd.f32 %v613_v2, %v261_v17  ;;  %v362_v29 = vadd.f32 %v330_v14, %v298_v19  ;;  %v227_v34 = vld [vmem:[%s601_s22 + $0x48] sm:$0xff]  ;;  %v334_v39 = vld [vmem:[%s607_s25 + $0x30] sm:$0xff]  ;;  %v335_v40 = vld [vmem:[%s607_s25 + $0x38] sm:$0xff] }
  0x16   : > { %v301_v30 = vadd.f32 %v613_v2, %v262_v21  ;;  %v264_v32 = vmul.f32 %v595_v0, %v225_v23  ;;  %v363_v37 = vadd.f32 %v331_v16, %v299_v26  ;;  %v228_v41 = vld [vmem:[%s601_s22 + $0x50] sm:$0xff]  ;;  %v302_v44 = vadd.f32 %v613_v2, %v263_v31  ;;  %v229_v46 = vld [vmem:[%s601_s22 + $0x58] sm:$0xff]  ;;  %v230_v47 = vld [vmem:[%s601_s22 + $0x60] sm:$0xff] }
  0x17   : > { %v392_v35 = vmax.f32 %v360_v24, 0.0  ;;  %v393_v36 = vmax.f32 %v361_v25, 0.0  ;;  %v364_v38 = vadd.f32 %v332_v20, %v300_v27  ;;  %v394_v42 = vmax.f32 %v362_v29, 0.0  ;;  %v231_v52 = vld [vmem:[%s601_s22 + $0x68] sm:$0xff]  ;;  %v336_v56 = vld [vmem:[%s607_s25 + $0x40] sm:$0xff]  ;;  %v338_v61 = vld [vmem:[%s607_s25 + $0x50] sm:$0xff] }
  0x18   : > { %v365_v43 = vadd.f32 %v333_v28, %v301_v30  ;;  %v303_v45 = vadd.f32 %v613_v2, %v264_v32  ;;  %v395_v48 = vmax.f32 %v363_v37, 0.0  ;;  %v265_v50 = vmul.f32 %v595_v0, %v226_v33  ;;  %v337_v57 = vld [vmem:[%s607_s25 + $0x48] sm:$0xff]  ;;  %v232_v1 = vld [vmem:[%s601_s22 + $0x70] sm:$0xff]  ;;  %v233_v3 = vld [vmem:[%s601_s22 + $0x78] sm:$0xff] }
  0x19   : > { %424 = vst [vmem:[%s643_s30] sm:$0xff] %v392_v35  ;;  %425 = vst [vmem:[%s643_s30 + $0x8] sm:$0xff] %v393_v36  ;;  %v396_v49 = vmax.f32 %v364_v38, 0.0  ;;  %v266_v51 = vmul.f32 %v595_v0, %v227_v34  ;;  %v366_v54 = vadd.f32 %v334_v39, %v302_v44  ;;  %v267_v58 = vmul.f32 %v595_v0, %v228_v41  ;;  %v339_v7 = vld [vmem:[%s607_s25 + $0x58] sm:$0xff]  ;;  %v340_v8 = vld [vmem:[%s607_s25 + $0x60] sm:$0xff] }
  0x1a   : > { %426 = vst [vmem:[%s643_s30 + $0x10] sm:$0xff] %v394_v42  ;;  %v397_v53 = vmax.f32 %v365_v43, 0.0  ;;  %v367_v55 = vadd.f32 %v335_v40, %v303_v45  ;;  %427 = vst [vmem:[%s643_s30 + $0x18] sm:$0xff] %v395_v48  ;;  %v304_v59 = vadd.f32 %v613_v2, %v265_v50  ;;  %v268_v62 = vmul.f32 %v595_v0, %v229_v46  ;;  %v341_v14 = vld [vmem:[%s607_s25 + $0x68] sm:$0xff]  ;;  %v234_v19 = vld [vmem:[%s601_s22 + $0x80] sm:$0xff] }
  0x1b   : > { %428 = vst [vmem:[%s643_s30 + $0x20] sm:$0xff] %v396_v49  ;;  %v305_v60 = vadd.f32 %v613_v2, %v266_v51  ;;  %v269_v63 = vmul.f32 %v595_v0, %v230_v47  ;;  %v398_v4 = vmax.f32 %v366_v54, 0.0  ;;  %v306_v6 = vadd.f32 %v613_v2, %v267_v58  ;;  %v235_v20 = vld [vmem:[%s601_s22 + $0x88] sm:$0xff]  ;;  %v342_v25 = vld [vmem:[%s607_s25 + $0x70] sm:$0xff]  ;;  %v343_v26 = vld [vmem:[%s607_s25 + $0x78] sm:$0xff] }
  0x1c   : > { %429 = vst [vmem:[%s643_s30 + $0x28] sm:$0xff] %v397_v53  ;;  %v399_v5 = vmax.f32 %v367_v55, 0.0  ;;  %v270_v9 = vmul.f32 %v595_v0, %v231_v52  ;;  %v368_v10 = vadd.f32 %v336_v56, %v304_v59  ;;  %v307_v12 = vadd.f32 %v613_v2, %v268_v62  ;;  %v236_v27 = vld [vmem:[%s601_s22 + $0x90] sm:$0xff]  ;;  %v237_v32 = vld [vmem:[%s601_s22 + $0x98] sm:$0xff]  ;;  %v238_v33 = vld [vmem:[%s601_s22 + $0xa0] sm:$0xff] }
  0x1d   : > { %v369_v11 = vadd.f32 %v337_v57, %v305_v60  ;;  %v308_v13 = vadd.f32 %v613_v2, %v269_v63  ;;  %430 = vst [vmem:[%s643_s30 + $0x30] sm:$0xff] %v398_v4  ;;  %v370_v15 = vadd.f32 %v338_v61, %v306_v6  ;;  %v271_v17 = vmul.f32 %v595_v0, %v232_v1  ;;  %v239_v38 = vld [vmem:[%s601_s22 + $0xa8] sm:$0xff]  ;;  %v344_v42 = vld [vmem:[%s607_s25 + $0x80] sm:$0xff]  ;;  %v346_v47 = vld [vmem:[%s607_s25 + $0x90] sm:$0xff] }
  0x1e   : > { %431 = vst [vmem:[%s643_s30 + $0x38] sm:$0xff] %v399_v5  ;;  %v309_v16 = vadd.f32 %v613_v2, %v270_v9  ;;  %v272_v18 = vmul.f32 %v595_v0, %v233_v3  ;;  %v400_v21 = vmax.f32 %v368_v10, 0.0  ;;  %v371_v23 = vadd.f32 %v339_v7, %v307_v12  ;;  %v345_v43 = vld [vmem:[%s607_s25 + $0x88] sm:$0xff]  ;;  %v240_v50 = vld [vmem:[%s601_s22 + $0xb0] sm:$0xff]  ;;  %v241_v51 = vld [vmem:[%s601_s22 + $0xb8] sm:$0xff] }
  0x1f   : > { %v401_v22 = vmax.f32 %v369_v11, 0.0  ;;  %v372_v24 = vadd.f32 %v340_v8, %v308_v13  ;;  %v402_v28 = vmax.f32 %v370_v15, 0.0  ;;  %v310_v30 = vadd.f32 %v613_v2, %v271_v17  ;;  %v347_v55 = vld [vmem:[%s607_s25 + $0x98] sm:$0xff]  ;;  %v348_v56 = vld [vmem:[%s607_s25 + $0xa0] sm:$0xff]  ;;  %v349_v62 = vld [vmem:[%s607_s25 + $0xa8] sm:$0xff] }
  0x20   : > { %v373_v29 = vadd.f32 %v341_v14, %v309_v16  ;;  %v311_v31 = vadd.f32 %v613_v2, %v272_v18  ;;  %432 = vst [vmem:[%s643_s30 + $0x40] sm:$0xff] %v400_v21  ;;  %v403_v34 = vmax.f32 %v371_v23, 0.0  ;;  %v273_v36 = vmul.f32 %v595_v0, %v234_v19  ;;  %v242_v5 = vld [vmem:[%s601_s22 + $0xc0] sm:$0xff]  ;;  %v243_v6 = vld [vmem:[%s601_s22 + $0xc8] sm:$0xff]  ;;  %v350_v11 = vld [vmem:[%s607_s25 + $0xb0] sm:$0xff] }
  0x21   : > { %433 = vst [vmem:[%s643_s30 + $0x48] sm:$0xff] %v401_v22  ;;  %v404_v35 = vmax.f32 %v372_v24, 0.0  ;;  %v274_v37 = vmul.f32 %v595_v0, %v235_v20  ;;  %434 = vst [vmem:[%s643_s30 + $0x50] sm:$0xff] %v402_v28  ;;  %v374_v40 = vadd.f32 %v342_v25, %v310_v30  ;;  %v275_v44 = vmul.f32 %v595_v0, %v236_v27  ;;  %v351_v12 = vld [vmem:[%s607_s25 + $0xb8] sm:$0xff]  ;;  %v244_v13 = vld [vmem:[%s601_s22 + $0xd0] sm:$0xff] }
  0x22   : > { %v405_v39 = vmax.f32 %v373_v29, 0.0  ;;  %v375_v41 = vadd.f32 %v343_v26, %v311_v31  ;;  %435 = vst [vmem:[%s643_s30 + $0x58] sm:$0xff] %v403_v34  ;;  %v312_v45 = vadd.f32 %v613_v2, %v273_v36  ;;  %v276_v48 = vmul.f32 %v595_v0, %v237_v32  ;;  %v245_v18 = vld [vmem:[%s601_s22 + $0xd8] sm:$0xff]  ;;  %v246_v19 = vld [vmem:[%s601_s22 + $0xe0] sm:$0xff]  ;;  %v247_v24 = vld [vmem:[%s601_s22 + $0xe8] sm:$0xff] }
  0x23   : > { %436 = vst [vmem:[%s643_s30 + $0x60] sm:$0xff] %v404_v35  ;;  %v313_v46 = vadd.f32 %v613_v2, %v274_v37  ;;  %v277_v49 = vmul.f32 %v595_v0, %v238_v33  ;;  %v406_v52 = vmax.f32 %v374_v40, 0.0  ;;  %v314_v54 = vadd.f32 %v613_v2, %v275_v44  ;;  %v352_v28 = vld [vmem:[%s607_s25 + $0xc0] sm:$0xff]  ;;  %v353_v29 = vld [vmem:[%s607_s25 + $0xc8] sm:$0xff]  ;;  %v354_v33 = vld [vmem:[%s607_s25 + $0xd0] sm:$0xff] }
  0x24   : > { %437 = vst [vmem:[%s643_s30 + $0x68] sm:$0xff] %v405_v39  ;;  %v407_v53 = vmax.f32 %v375_v41, 0.0  ;;  %v278_v57 = vmul.f32 %v595_v0, %v239_v38  ;;  %v376_v58 = vadd.f32 %v344_v42, %v312_v45  ;;  %v315_v60 = vadd.f32 %v613_v2, %v276_v48  ;;  %v248_v36 = vld [vmem:[%s601_s22 + $0xf0] sm:$0xff]  ;;  %v249_v37 = vld [vmem:[%s601_s22 + $0xf8] sm:$0xff]  ;;  %v356_v42 = vld [vmem:[%s607_s25 + $0xe0] sm:$0xff] }
  0x25   : > { %v377_v59 = vadd.f32 %v345_v43, %v313_v46  ;;  %v316_v61 = vadd.f32 %v613_v2, %v277_v49  ;;  %438 = vst [vmem:[%s643_s30 + $0x70] sm:$0xff] %v406_v52  ;;  %v378_v63 = vadd.f32 %v346_v47, %v314_v54  ;;  %v279_v3 = vmul.f32 %v595_v0, %v240_v50  ;;  %v355_v41 = vld [vmem:[%s607_s25 + $0xd8] sm:$0xff]  ;;  %v357_v48 = vld [vmem:[%s607_s25 + $0xe8] sm:$0xff] }
  0x26   : > { %439 = vst [vmem:[%s643_s30 + $0x78] sm:$0xff] %v407_v53  ;;  %v317_v1 = vadd.f32 %v613_v2, %v278_v57  ;;  %v280_v4 = vmul.f32 %v595_v0, %v241_v51  ;;  %v408_v7 = vmax.f32 %v376_v58, 0.0  ;;  %v379_v9 = vadd.f32 %v347_v55, %v315_v60  ;;  %v358_v57 = vld [vmem:[%s607_s25 + $0xf0] sm:$0xff]  ;;  %v359_v58 = vld [vmem:[%s607_s25 + $0xf8] sm:$0xff] }
  0x27   : > { %v409_v8 = vmax.f32 %v377_v59, 0.0  ;;  %v380_v10 = vadd.f32 %v348_v56, %v316_v61  ;;  %v410_v14 = vmax.f32 %v378_v63, 0.0  ;;  %v318_v16 = vadd.f32 %v613_v2, %v279_v3 }
  0x28   : > { %v381_v15 = vadd.f32 %v349_v62, %v317_v1  ;;  %v319_v17 = vadd.f32 %v613_v2, %v280_v4  ;;  %440 = vst [vmem:[%s643_s30 + $0x80] sm:$0xff] %v408_v7  ;;  %v411_v20 = vmax.f32 %v379_v9, 0.0  ;;  %v281_v22 = vmul.f32 %v595_v0, %v242_v5 }
  0x29   : > { %441 = vst [vmem:[%s643_s30 + $0x88] sm:$0xff] %v409_v8  ;;  %v412_v21 = vmax.f32 %v380_v10, 0.0  ;;  %v282_v23 = vmul.f32 %v595_v0, %v243_v6  ;;  %442 = vst [vmem:[%s643_s30 + $0x90] sm:$0xff] %v410_v14  ;;  %v382_v26 = vadd.f32 %v350_v11, %v318_v16  ;;  %v283_v30 = vmul.f32 %v595_v0, %v244_v13 }
  0x2a   : > { %v413_v25 = vmax.f32 %v381_v15, 0.0  ;;  %v383_v27 = vadd.f32 %v351_v12, %v319_v17  ;;  %443 = vst [vmem:[%s643_s30 + $0x98] sm:$0xff] %v411_v20  ;;  %v320_v31 = vadd.f32 %v613_v2, %v281_v22  ;;  %v284_v34 = vmul.f32 %v595_v0, %v245_v18 }
  0x2b   : > { %444 = vst [vmem:[%s643_s30 + $0xa0] sm:$0xff] %v412_v21  ;;  %v321_v32 = vadd.f32 %v613_v2, %v282_v23  ;;  %v285_v35 = vmul.f32 %v595_v0, %v246_v19  ;;  %v414_v38 = vmax.f32 %v382_v26, 0.0  ;;  %v322_v40 = vadd.f32 %v613_v2, %v283_v30 }
  0x2c   : > { %445 = vst [vmem:[%s643_s30 + $0xa8] sm:$0xff] %v413_v25  ;;  %v415_v39 = vmax.f32 %v383_v27, 0.0  ;;  %v286_v43 = vmul.f32 %v595_v0, %v247_v24  ;;  %v384_v44 = vadd.f32 %v352_v28, %v320_v31  ;;  %v323_v46 = vadd.f32 %v613_v2, %v284_v34 }
  0x2d   : > { %v385_v45 = vadd.f32 %v353_v29, %v321_v32  ;;  %v324_v47 = vadd.f32 %v613_v2, %v285_v35  ;;  %446 = vst [vmem:[%s643_s30 + $0xb0] sm:$0xff] %v414_v38  ;;  %v386_v49 = vadd.f32 %v354_v33, %v322_v40  ;;  %v287_v51 = vmul.f32 %v595_v0, %v248_v36 }
  0x2e   : > { %447 = vst [vmem:[%s643_s30 + $0xb8] sm:$0xff] %v415_v39  ;;  %v325_v50 = vadd.f32 %v613_v2, %v286_v43  ;;  %v288_v52 = vmul.f32 %v595_v0, %v249_v37  ;;  %v416_v53 = vmax.f32 %v384_v44, 0.0  ;;  %v387_v55 = vadd.f32 %v355_v41, %v323_v46 }
  0x2f   : > { %v417_v54 = vmax.f32 %v385_v45, 0.0  ;;  %v388_v56 = vadd.f32 %v356_v42, %v324_v47  ;;  %v418_v59 = vmax.f32 %v386_v49, 0.0  ;;  %v326_v61 = vadd.f32 %v613_v2, %v287_v51 }
  0x30   : > { %v389_v60 = vadd.f32 %v357_v48, %v325_v50  ;;  %v327_v62 = vadd.f32 %v613_v2, %v288_v52  ;;  %448 = vst [vmem:[%s643_s30 + $0xc0] sm:$0xff] %v416_v53  ;;  %v419_v0 = vmax.f32 %v387_v55, 0.0 }
  0x31   : > { %449 = vst [vmem:[%s643_s30 + $0xc8] sm:$0xff] %v417_v54  ;;  %v420_v63 = vmax.f32 %v388_v56, 0.0  ;;  %450 = vst [vmem:[%s643_s30 + $0xd0] sm:$0xff] %v418_v59  ;;  %v390_v3 = vadd.f32 %v358_v57, %v326_v61 }
  0x32   : > { %v421_v1 = vmax.f32 %v389_v60, 0.0  ;;  %v391_v4 = vadd.f32 %v359_v58, %v327_v62  ;;  %451 = vst [vmem:[%s643_s30 + $0xd8] sm:$0xff] %v419_v0 }
  0x33   : > { %452 = vst [vmem:[%s643_s30 + $0xe0] sm:$0xff] %v420_v63  ;;  %v422_v5 = vmax.f32 %v390_v3, 0.0 }
  0x34   : > { %453 = vst [vmem:[%s643_s30 + $0xe8] sm:$0xff] %v421_v1  ;;  %v423_v6 = vmax.f32 %v391_v4, 0.0 }
  0x35   : > { %454 = vst [vmem:[%s643_s30 + $0xf0] sm:$0xff] %v422_v5 }
  0x36   : > { %455 = vst [vmem:[%s643_s30 + $0xf8] sm:$0xff] %v423_v6 }
  0x37 PF: > { %s14_s15 = sadd.s32 1, %s555_s15  }
  0x38   : > { %p11_p4 = scmp.ge.s32.totalorder %s14_s15, 4  }
  0x3a   :  { %13 = sbr.rel (!%p11_p4) target bundleno = 1 (0x1), region = 69 }

// kernel: basic_block_forward.3
= control target key start
LH: loop header
LB: loop body
LE: loop exit
PB: predicated region body
PF: predicated region fallthrough
CT: control target
= control target key end

     0   :  { %s6825_s12 = smov 0   ;;  %s8657_s0 = inlined_call_operand.vmem [shape: bf16[2,18,18,128], index: 0, kind: input, shape index: {}]   ;;  %s8658_s1 = inlined_call_operand.vmem [shape: bf16[1152,128], index: 1, kind: input, shape index: {}]   ;;  %s8659_s2 = inlined_call_operand.vmem [shape: f32[2,256,128], index: 2, kind: output, shape index: {0}]   ;;  %s8660_s3 = inlined_call_operand.vmem [shape: f32[2,2,128], index: 3, kind: output, shape index: {1}]  }
   0x1 LB: > { %s5210_s13 = sadd.s32 4294967295, %s6803_s12   ;;  %p5214_p0 = scmp.ge.s32.totalorder %s6803_s12, 1  ;;  %s6803_s12 = sphi %s6825_s12, %s14_s12  }
   0x2   : > { %p140_p1 = scmp.lt.s32.totalorder %s6803_s12, 3 }
   0x4   : > { %p141_p2 = pnand %p5214_p0, %p140_p1 }
   0x6   : > { %144 = sbr.rel (%p141_p2) target bundleno = 603 (0x25b), region = 28 }
   0xd   : > { %v6607_v0 = vld [vmem:[%s8658_s1 + $0x40] sm:$0xff]   ;;  %p168_p3 = scmp.lt.s32.totalorder %s5210_s13, 1  ;;  %v6609_v2 = vld [vmem:[%s8658_s1 + $0x48] sm:$0xff]   ;;  %v6611_v4 = vld [vmem:[%s8658_s1 + $0x50] sm:$0xff]   ;;  %vm247_vm0 = vsmask.f32 3328 }
   0xe   : > { %v6608_v1 = vld [vmem:[%s8658_s1 + $0x100] sm:$0xff]   ;;  %5894 = vmatprep.subr.bf16.mxu1 %v6607_v0  ;;  %v6610_v3 = vld [vmem:[%s8658_s1 + $0x108] sm:$0xff]   ;;  %v6612_v5 = vld [vmem:[%s8658_s1 + $0x110] sm:$0xff]   ;;  %vm248_vm1 = vsmask.f32 7440  ;;  %vm1276_vm3 = vcmask 1042432  }
   0xf   : > { %6086 = vmatprep.subr.bf16.mxu0 %v6608_v1  ;;  %5895 = vmatpush3.bf16.msra.mxu1 %v6607_v0  ;;  %s8728_s13 = smov (!%p168_p3, %s5210_s13), 1  ;;  %v6613_v6 = vld [vmem:[%s8658_s1 + $0x58] sm:$0xff]   ;;  %v6615_v8 = vld [vmem:[%s8658_s1 + $0x60] sm:$0xff]   ;;  %v6617_v10 = vld [vmem:[%s8658_s1 + $0x68] sm:$0xff]   ;;  %vm1277_vm4 = vcmask 1046532  }
  0x10   : > { %6087 = vmatpush3.bf16.msra.mxu0 %v6608_v1  ;;  %5896 = vmatprep.subr.bf16.mxu1 %v6609_v2  ;;  %v6614_v7 = vld [vmem:[%s8658_s1 + $0x118] sm:$0xff]   ;;  %s6598_s30 = smul.u32 216, %s8728_s13  ;;  %v6616_v9 = vld [vmem:[%s8658_s1 + $0x120] sm:$0xff]   ;;  %v6618_v11 = vld [vmem:[%s8658_s1 + $0x128] sm:$0xff]   ;;  %s5218_s9 = sshll.u32 %s8728_s13, 1 }
  0x11   : > { %6088 = vmatprep.subr.bf16.mxu0 %v6610_v3  ;;  %v6619_v25 = vld [vmem:[%s8658_s1 + $0x70] sm:$0xff]   ;;  %v6621_v36 = vld [vmem:[%s8658_s1 + $0x78] sm:$0xff]   ;;  %vm6901_vm2 = vmor %vm247_vm0, %vm248_vm1  ;;  %s181_s15 = scalar_lea.vmem %s8660_s3, %s5218_s9 }
  0x12   : > { %s6869_s10 = scalar_lea.vmem %s8657_s0, %s6598_s30  ;;  %v6620_v30 = vld [vmem:[%s8658_s1 + $0x130] sm:$0xff]   ;;  %v6622_v51 = vld [vmem:[%s8658_s1 + $0x138] sm:$0xff]   ;;  %vm7147_vm5 = vmor %vm1276_vm3, %vm1277_vm4 }
  0x13   : > { %5897 = vmatpush3.bf16.msra.mxu1 %v6609_v2  ;;  %v183_v12 = vld [vmem:[%s6869_s10] sm:$0xf]  ;;  %v184_v13 = vld [vmem:[%s6869_s10 + $0x4] sm:$0xf]  ;;  %v231_v14 = vld [vmem:[%s6869_s10 + $0x8] sm:$0x1] }
  0x14   : > { %6089 = vmatpush3.bf16.msra.mxu0 %v6610_v3  ;;  %5898 = vmatprep.subr.bf16.mxu1 %v6611_v4  ;;  %v251_v15 = vshrl.u32 %v183_v12, 16  ;;  %v254_v16 = vshll.u32 %v183_v12, 16  ;;  %v260_v17 = vshll.u32 %v184_v13, 16  ;;  %v264_v18 = vshrl.u32 %v184_v13, 16  ;;  %v5363_v20 = vld [vmem:[%s6869_s10 + $0xc] sm:$0xf] }
  0x15   : > { %6090 = vmatprep.subr.bf16.mxu0 %v6612_v5  ;;  %v270_v19 = vshll.u32 %v231_v14, 16  ;;  %v6882_v23 = vld [vmem:[%s6869_s10 + $0x10] sm:$0xf]  ;;  %v6885_v24 = vld [vmem:[%s6869_s10 + $0x14] sm:$0x1]  ;;  %v2147_v29 = vshrl.u32 %v5363_v20, 16 }
  0x16   : > { %v253_v21 = vrot.slane %v251_v15, 4  ;;  %v256_v22 = vrot.slane %v254_v16, 5  ;;  %v262_v26 = vrot.slane %v260_v17, 5  ;;  %v266_v27 = vrot.slane %v264_v18, 4  ;;  %v185_v35 = vld [vmem:[%s6869_s10 + $0xc] sm:$0xf] }
  0x17   : > { %5899 = vmatpush3.bf16.msra.mxu1 %v6611_v4  ;;  %v272_v28 = vrot.slane %v270_v19, 5  ;;  %v2150_v32 = vshll.u32 %v5363_v20, 16  ;;  %v2156_v33 = vshll.u32 %v6882_v23, 16  ;;  %v2160_v34 = vshrl.u32 %v6882_v23, 16  ;;  %v186_v42 = vld [vmem:[%s6869_s10 + $0x10] sm:$0xf] }
  0x18   : > { %6091 = vmatpush3.bf16.msra.mxu0 %v6612_v5  ;;  %5900 = vmatprep.subr.bf16.mxu1 %v6613_v6  ;;  %v257_v31 = vor.u32 %v256_v22, %v253_v21  ;;  %v267_v38 = vor.u32 %v266_v27, %v262_v26  ;;  %v2149_v39 = vrot.slane %v2147_v29, 4  ;;  %v2166_v40 = vshll.u32 %v6885_v24, 16  ;;  %v232_v55 = vld [vmem:[%s6869_s10 + $0x14] sm:$0x1]  ;;  %v5366_v57 = vld [vmem:[%s6869_s10 + $0x18] sm:$0xf] }
  0x19   : > { %6092 = vmatprep.subr.bf16.mxu0 %v6614_v7  ;;  %v2920_v41 = vrot.slane %v6885_v24, 5  ;;  %v2152_v44 = vrot.slane %v2150_v32, 5  ;;  %v2158_v45 = vrot.slane %v2156_v33, 5  ;;  %v2162_v46 = vrot.slane %v2160_v34, 4  ;;  %v6918_v62 = vld [vmem:[%s6869_s10 + $0x1c] sm:$0xf] }
  0x1a   : > { %v258_v43 = vrot.slane %v257_v31, 4  ;;  %v268_v47 = vrot.slane %v267_v38, 4  ;;  %v2168_v48 = vrot.slane %v2166_v40, 5  ;;  %v275_v49 = vshrl.u32 %v185_v35, 16  ;;  %v6623_v3 = vld [vmem:[%s8658_s1] sm:$0xff]  }
  0x1b   : > { %5901 = vmatpush3.bf16.msra.mxu1 %v6613_v6  ;;  %v278_v50 = vshll.u32 %v185_v35, 16  ;;  %v2153_v53 = vor.u32 %v2152_v44, %v2149_v39  ;;  %v2163_v54 = vor.u32 %v2162_v46, %v2158_v45  ;;  %v284_v56 = vshll.u32 %v186_v42, 16  ;;  %v6926_v4 = vld [vmem:[%s8658_s1 + $0x140] sm:$0xff]   ;;  %v187_v21 = vld [vmem:[%s6869_s10 + $0x18] sm:$0xf]  ;;  %v6626_v46 = vld [vmem:[%s8658_s1 + $0x8] sm:$0xff]  }
  0x1c   : > { %6093 = vmatpush3.bf16.msra.mxu0 %v6614_v7  ;;  %5902 = vmatprep.subr.bf16.mxu1 %v6615_v8  ;;  %v263_v52 = vsel %vm6901_vm2, %v258_v43, %v262_v26  ;;  %v273_v58 = vsel %vm6901_vm2, %v268_v47, %v272_v28  ;;  %v277_v59 = vrot.slane %v275_v49, 4  ;;  %v288_v61 = vshrl.u32 %v186_v42, 16  ;;  %v188_v28 = vld [vmem:[%s6869_s10 + $0x1c] sm:$0xf]  ;;  %v233_v33 = vld [vmem:[%s6869_s10 + $0x20] sm:$0x1] }
  0x1d   : > { %6094 = vmatprep.subr.bf16.mxu0 %v6616_v9  ;;  %v280_v60 = vrot.slane %v278_v50, 5  ;;  %v5219_v63 = vcombine.low %v263_v52, %v273_v58  ;;  %v2154_v0 = vrot.slane %v2153_v53, 4  ;;  %v2164_v1 = vrot.slane %v2163_v54, 4  ;;  %v5369_v39 = vld [vmem:[%s6869_s10 + $0x24] sm:$0xf] }
  0x1e   : > { %v286_v2 = vrot.slane %v284_v56, 5  ;;  %v290_v6 = vrot.slane %v288_v61, 4  ;;  %v294_v7 = vshll.u32 %v232_v55, 16  ;;  %v2174_v12 = vshll.u32 %v5366_v57, 16  ;;  %v189_v52 = vld [vmem:[%s6869_s10 + $0x24] sm:$0xf] }
  0x1f   : > { %5903 = vmatpush3.bf16.msra.mxu1 %v6615_v8  ;;  %v281_v5 = vor.u32 %v280_v60, %v277_v59  ;;  %v6929_v8 = vld [vmem:[%s6869_s10 + $0x20] sm:$0x1]  ;;  %5910 = vmatprep.mubr.bf16.mxu1 %v5219_v63  ;;  %v2180_v19 = vshll.u32 %v6918_v62, 16  ;;  %v2184_v20 = vshrl.u32 %v6918_v62, 16  ;;  %v2924_v27 = vrot.slane %v6918_v62, 5  ;;  %v6625_v63 = vld [vmem:[%s8658_s1 + $0x148] sm:$0xff]  }
  0x20   : > { %6095 = vmatpush3.bf16.msra.mxu0 %v6616_v9  ;;  %5904 = vmatprep.subr.bf16.mxu1 %v6617_v10  ;;  %v2159_v9 = vsel %vm6901_vm2, %v2154_v0, %v2158_v45  ;;  %v291_v15 = vor.u32 %v290_v6, %v286_v2  ;;  %v296_v16 = vrot.slane %v294_v7, 5  ;;  %v2176_v18 = vrot.slane %v2174_v12, 5  ;;  %v6954_v45 = vld [vmem:[%s6869_s10 + $0x28] sm:$0xf] }
  0x21   : > { %6096 = vmatprep.subr.bf16.mxu0 %v6618_v11  ;;  %v282_v14 = vrot.slane %v281_v5, 4  ;;  %v2190_v26 = vshll.u32 %v6929_v8, 16  ;;  %v2186_v31 = vrot.slane %v2184_v20, 4  ;;  %v2927_v32 = vrot.slane %v6929_v8, 5  ;;  %v190_v5 = vld [vmem:[%s6869_s10 + $0x28] sm:$0xf] }
  0x22   : > { %v299_v38 = vshrl.u32 %v187_v21, 16  ;;  %v302_v44 = vshll.u32 %v187_v21, 16  ;;  %v312_v49 = vshrl.u32 %v188_v28, 16  ;;  %v318_v50 = vshll.u32 %v233_v33, 16  ;;  %v6985_v33 = vld [vmem:[%s6869_s10 + $0x34] sm:$0xf] }
  0x23   : > { %5905 = vmatpush3.bf16.msra.mxu1 %v6617_v10  ;;  %v2169_v10 = vsel %vm6901_vm2, %v2164_v1, %v2168_v48  ;;  %v287_v22 = vsel %vm6901_vm2, %v282_v14, %v286_v2  ;;  %v2192_v35 = vrot.slane %v2190_v26, 5  ;;  %v308_v48 = vshll.u32 %v188_v28, 16 }
  0x24   : > { %6097 = vmatpush3.bf16.msra.mxu0 %v6618_v11  ;;  %5906 = vmatprep.subr.bf16.mxu1 %v6619_v25  ;;  %v2171_v11 = vshrl.u32 %v5366_v57, 16  ;;  %v5411_v13 = vcombine.low %v2159_v9, %v2169_v10  ;;  %v301_v47 = vrot.slane %v299_v38, 4  ;;  %v304_v55 = vrot.slane %v302_v44, 5 }
  0x25   : > { %6098 = vmatprep.subr.bf16.mxu0 %v6620_v30  ;;  %v2195_v56 = vshrl.u32 %v5369_v39, 16  ;;  %v310_v57 = vrot.slane %v308_v48, 5  ;;  %v314_v58 = vrot.slane %v312_v49, 4  ;;  %v320_v59 = vrot.slane %v318_v50, 5  ;;  %v6628_v48 = vld [vmem:[%s8658_s1 + $0x158] sm:$0xff]  }
  0x26   : > { %v2173_v17 = vrot.slane %v2171_v11, 4  ;;  %6102 = vmatprep.mubr.bf16.mxu0 %v5411_v13  ;;  %v2198_v60 = vshll.u32 %v5369_v39, 16  ;;  %v305_v0 = vor.u32 %v304_v55, %v301_v47  ;;  %v2204_v2 = vshll.u32 %v6954_v45, 16  ;;  %v234_v11 = vld [vmem:[%s6869_s10 + $0x2c] sm:$0x1] }
  0x27   : > { %5907 = vmatpush3.bf16.msra.mxu1 %v6619_v25  ;;  %v292_v25 = vrot.slane %v291_v15, 4  ;;  %v2197_v1 = vrot.slane %v2195_v56, 4  ;;  %v315_v7 = vor.u32 %v314_v58, %v310_v57  ;;  %v2208_v10 = vshrl.u32 %v6954_v45, 16 }
  0x28   : > { %6099 = vmatpush3.bf16.msra.mxu0 %v6620_v30  ;;  %5908 = vmatprep.subr.bf16.mxu1 %v6621_v36  ;;  %v2177_v29 = vor.u32 %v2176_v18, %v2173_v17  ;;  %v2182_v30 = vrot.slane %v2180_v19, 5  ;;  %v2200_v9 = vrot.slane %v2198_v60, 5  ;;  %v306_v12 = vrot.slane %v305_v0, 4  ;;  %v6635_v60 = vld [vmem:[%s8658_s1 + $0x20] sm:$0xff]  }
  0x29   : > { %6100 = vmatprep.subr.bf16.mxu0 %v6622_v51  ;;  %v297_v34 = vsel %vm6901_vm2, %v292_v25, %v296_v16  ;;  %v2206_v13 = vrot.slane %v2204_v2, 5  ;;  %v323_v15 = vshrl.u32 %v189_v52, 16  ;;  %v5372_v16 = vld [vmem:[%s6869_s10 + $0x30] sm:$0xf]  ;;  %v316_v17 = vrot.slane %v315_v7, 4 }
  0x2a   : > { %v5220_v40 = vcombine.low %v287_v22, %v297_v34  ;;  %v2178_v42 = vrot.slane %v2177_v29, 4  ;;  %v2187_v43 = vor.u32 %v2186_v31, %v2182_v30  ;;  %v2201_v18 = vor.u32 %v2200_v9, %v2197_v1  ;;  %v6632_v34 = vld [vmem:[%s8658_s1 + $0x18] sm:$0xff]  }
  0x2b   : > { %5909 = vmatpush3.bf16.msra.mxu1 %v6621_v36  ;;  %v6950_v36 = vrot.slane %v2924_v27, 4  ;;  %v2210_v19 = vrot.slane %v2208_v10, 4  ;;  %v326_v20 = vshll.u32 %v189_v52, 16  ;;  %v311_v21 = vsel %vm6901_vm2, %v306_v12, %v310_v57  ;;  %v235_v2 = vld [vmem:[%s6869_s10 + $0x38] sm:$0x1] }
  0x2c   : > { %6101 = vmatpush3.bf16.msra.mxu0 %v6622_v51  ;;  %5942 = vmatprep.subr.bf16.mxu1 %v6623_v3  ;;  %v6960_v51 = vld [vmem:[%s6869_s10 + $0x2c] sm:$0x1]  ;;  %v2183_v53 = vsel %vm6901_vm2, %v2178_v42, %v2182_v30  ;;  %v2188_v54 = vrot.slane %v2187_v43, 4  ;;  %v325_v25 = vrot.slane %v323_v15, 4  ;;  %v332_v26 = vshll.u32 %v190_v5, 16 }
  0x2d   : > { %6134 = vmatprep.subr.bf16.mxu0 %v6926_v4  ;;  %v2214_v14 = vshll.u32 %v6960_v51, 16  ;;  %v321_v28 = vsel %vm6901_vm2, %v316_v17, %v320_v59  ;;  %v2202_v29 = vrot.slane %v2201_v18, 4  ;;  %v2211_v30 = vor.u32 %v2210_v19, %v2206_v13  ;;  %v192_v59 = vld [vmem:[%s6869_s10 + $0x34] sm:$0xf]  ;;  %v5375_v9 = vld [vmem:[%s6869_s10 + $0x3c] sm:$0xf] }
  0x2e   : > { %5911 = vmatmul.mubr.bf16.vlgmr.msra.gmra.mrb[0].mxu1 %v5220_v40  ;;  %v2193_v61 = vsel %vm6901_vm2, %v2188_v54, %v2192_v35  ;;  %v328_v31 = vrot.slane %v326_v20, 5  ;;  %v5221_v35 = vcombine.low %v311_v21, %v321_v28  ;;  %v334_v38 = vrot.slane %v332_v26, 5  ;;  %v191_v54 = vld [vmem:[%s6869_s10 + $0x30] sm:$0xf]  ;;  %v7019_v19 = vld [vmem:[%s6869_s10 + $0x40] sm:$0xf] }
  0x2f   : > { %5943 = vmatpush3.bf16.msra.mxu1 %v6623_v3  ;;  %v6629_v3 = vld [vmem:[%s8658_s1 + $0x10] sm:$0xff]   ;;  %v5412_v6 = vcombine.low %v2183_v53, %v2193_v61  ;;  %v2216_v22 = vrot.slane %v2214_v14, 5  ;;  %v336_v39 = vshrl.u32 %v190_v5, 16  ;;  %v342_v40 = vshll.u32 %v234_v11, 16  ;;  %v6637_v14 = vld [vmem:[%s8658_s1 + $0x28] sm:$0xff]   ;;  %v6630_v20 = vld [vmem:[%s8658_s1 + $0x160] sm:$0xff]  }
  0x30   : > { %5944 = vmatprep.subr.bf16.mxu1 %v6626_v46  ;;  %v2207_v42 = vsel %vm6901_vm2, %v2202_v29, %v2206_v13  ;;  %v2212_v43 = vrot.slane %v2211_v30, 4  ;;  %v329_v44 = vor.u32 %v328_v31, %v325_v25  ;;  %v2219_v47 = vshrl.u32 %v5372_v16, 16  ;;  %5914 = vmatprep.mubr.bf16.mxu1 %v5221_v35  ;;  %v7027_v28 = vld [vmem:[%s6869_s10 + $0x44] sm:$0x1]  ;;  %v6639_v35 = vld [vmem:[%s8658_s1 + $0x30] sm:$0xff]  }
  0x31   : > { %6103 = vmatmul.mubr.bf16.vlgmr.msra.gmra.mrb[0].mxu0 %v5412_v6  ;;  %v338_v49 = vrot.slane %v336_v39, 4  ;;  %v344_v50 = vrot.slane %v342_v40, 5  ;;  %v2222_v52 = vshll.u32 %v5372_v16, 16  ;;  %v2228_v53 = vshll.u32 %v6985_v33, 16 }
  0x32   : > { %6135 = vmatpush3.bf16.msra.mxu0 %v6926_v4  ;;  %v6627_v4 = vld [vmem:[%s8658_s1 + $0x150] sm:$0xff]   ;;  %v2217_v55 = vsel %vm6901_vm2, %v2212_v43, %v2216_v22  ;;  %v330_v56 = vrot.slane %v329_v44, 4  ;;  %v2221_v57 = vrot.slane %v2219_v47, 4  ;;  %v2232_v58 = vshrl.u32 %v6985_v33, 16 }
  0x33   : > { %5945 = vmatpush3.bf16.msra.mxu1 %v6626_v46  ;;  %6136 = vmatprep.subr.bf16.mxu0 %v6625_v63  ;;  %v6996_v46 = vld [vmem:[%s6869_s10 + $0x38] sm:$0x1]  ;;  %v5413_v61 = vcombine.low %v2207_v42, %v2217_v55  ;;  %v2224_v0 = vrot.slane %v2222_v52, 5  ;;  %v2230_v1 = vrot.slane %v2228_v53, 5  ;;  %v347_v7 = vshrl.u32 %v191_v54, 16 }
  0x34   : > { %5946 = vmatprep.subr.bf16.mxu1 %v6629_v3  ;;  %v335_v5 = vsel %vm6901_vm2, %v330_v56, %v334_v38  ;;  %v2238_v6 = vshll.u32 %v6996_v46, 16  ;;  %v350_v12 = vshll.u32 %v191_v54, 16  ;;  %v356_v13 = vshll.u32 %v192_v59, 16  ;;  %v194_v55 = vld [vmem:[%s6869_s10 + $0x40] sm:$0xf] }
  0x35   : > { %6106 = vmatprep.mubr.bf16.mxu0 %v5413_v61  ;;  %v2225_v11 = vor.u32 %v2224_v0, %v2221_v57  ;;  %v349_v17 = vrot.slane %v347_v7, 4  ;;  %v360_v18 = vshrl.u32 %v192_v59, 16  ;;  %v2243_v40 = vshrl.u32 %v5375_v9, 16 }
  0x36   : > { %6137 = vmatpush3.bf16.msra.mxu0 %v6625_v63  ;;  %v339_v63 = vor.u32 %v338_v49, %v334_v38  ;;  %v2240_v16 = vrot.slane %v2238_v6, 5  ;;  %v352_v25 = vrot.slane %v350_v12, 5  ;;  %v358_v26 = vrot.slane %v356_v13, 5 }
  0x37   : > { %5947 = vmatpush3.bf16.msra.mxu1 %v6629_v3  ;;  %6138 = vmatprep.subr.bf16.mxu0 %v6627_v4  ;;  %v2234_v3 = vrot.slane %v2232_v58, 4  ;;  %v2226_v22 = vrot.slane %v2225_v11, 4  ;;  %v362_v31 = vrot.slane %v360_v18, 4  ;;  %v2246_v42 = vshll.u32 %v5375_v9, 16  ;;  %v5378_v9 = vld [vmem:[%s6869_s10 + $0x48] sm:$0xf] }
  0x38   : > { %5948 = vmatprep.subr.bf16.mxu1 %v6632_v34  ;;  %v340_v10 = vrot.slane %v339_v63, 4  ;;  %v353_v39 = vor.u32 %v352_v25, %v349_v17  ;;  %v2252_v49 = vshll.u32 %v7019_v19, 16  ;;  %v2245_v53 = vrot.slane %v2243_v40, 4  ;;  %v236_v63 = vld [vmem:[%s6869_s10 + $0x44] sm:$0x1] }
  0x39   : > { %v2235_v15 = vor.u32 %v2234_v3, %v2230_v1  ;;  %v2231_v38 = vsel %vm6901_vm2, %v2226_v22, %v2230_v1  ;;  %v363_v44 = vor.u32 %v362_v31, %v358_v26  ;;  %v2248_v54 = vrot.slane %v2246_v42, 5  ;;  %v7060_v22 = vld [vmem:[%s6869_s10 + $0x50] sm:$0x1]  ;;  %v6634_v31 = vld [vmem:[%s8658_s1 + $0x178] sm:$0xff]  }
  0x3a   : > { %6139 = vmatpush3.bf16.msra.mxu0 %v6627_v4  ;;  %v345_v21 = vsel %vm6901_vm2, %v340_v10, %v344_v50  ;;  %v366_v4 = vshll.u32 %v235_v2, 16  ;;  %v354_v52 = vrot.slane %v353_v39, 4  ;;  %v2254_v57 = vrot.slane %v2252_v49, 5  ;;  %v6641_v2 = vld [vmem:[%s8658_s1 + $0x38] sm:$0xff]  }
  0x3b   : > { %5949 = vmatpush3.bf16.msra.mxu1 %v6632_v34  ;;  %6140 = vmatprep.subr.bf16.mxu0 %v6628_v48  ;;  %v5222_v29 = vcombine.low %v335_v5, %v345_v21  ;;  %v2236_v30 = vrot.slane %v2235_v15, 4  ;;  %v193_v34 = vld [vmem:[%s6869_s10 + $0x3c] sm:$0xf]  ;;  %v364_v56 = vrot.slane %v363_v44, 4  ;;  %v2256_v58 = vshrl.u32 %v7019_v19, 16  ;;  %v6633_v15 = vld [vmem:[%s8658_s1 + $0x170] sm:$0xff]  }
  0x3c   : > { %5950 = vmatprep.subr.bf16.mxu1 %v6635_v60  ;;  %v368_v47 = vrot.slane %v366_v4, 5  ;;  %v2262_v59 = vshll.u32 %v7027_v28, 16  ;;  %v2249_v61 = vor.u32 %v2248_v54, %v2245_v53  ;;  %v371_v0 = vshrl.u32 %v193_v34, 16  ;;  %v7071_v4 = vld [vmem:[%s8658_s1 + $0x80] sm:$0xff]   ;;  %v196_v53 = vld [vmem:[%s6869_s10 + $0x4c] sm:$0xf] }
  0x3d   : > { %5915 = vmatmul.mubr.bf16.gmra.mrb[4].mxu1 %v5222_v29  ;;  %v2241_v43 = vsel %vm6901_vm2, %v2236_v30, %v2240_v16  ;;  %v374_v1 = vshll.u32 %v193_v34, 16  ;;  %v2258_v3 = vrot.slane %v2256_v58, 4  ;;  %v380_v7 = vshll.u32 %v194_v55, 16  ;;  %v195_v30 = vld [vmem:[%s6869_s10 + $0x48] sm:$0xf] }
  0x3e   : > { %6141 = vmatpush3.bf16.msra.mxu0 %v6628_v48  ;;  %v5414_v50 = vcombine.low %v2231_v38, %v2241_v43  ;;  %v6631_v48 = vld [vmem:[%s8658_s1 + $0x168] sm:$0xff]   ;;  %v369_v5 = vsel %vm6901_vm2, %v364_v56, %v368_v47  ;;  %v2264_v6 = vrot.slane %v2262_v59, 5  ;;  %v2250_v11 = vrot.slane %v2249_v61, 4  ;;  %v237_v54 = vld [vmem:[%s6869_s10 + $0x50] sm:$0x1] }
  0x3f   : > { %5951 = vmatpush3.bf16.msra.mxu1 %v6635_v60  ;;  %6142 = vmatprep.subr.bf16.mxu0 %v6630_v20  ;;  %v359_v60 = vsel %vm6901_vm2, %v354_v52, %v358_v26  ;;  %v373_v12 = vrot.slane %v371_v0, 4  ;;  %v376_v13 = vrot.slane %v374_v1, 5  ;;  %v2259_v16 = vor.u32 %v2258_v3, %v2254_v57  ;;  %v5381_v58 = vld [vmem:[%s6869_s10 + $0x54] sm:$0xf]  ;;  %v7085_v0 = vld [vmem:[%s6869_s10 + $0x58] sm:$0xf] }
  0x40   : > { %5952 = vmatprep.subr.bf16.mxu1 %v6637_v14  ;;  %6107 = vmatmul.mubr.bf16.gmra.mrb[4].mxu0 %v5414_v50  ;;  %v5223_v10 = vcombine.low %v359_v60, %v369_v5  ;;  %v382_v17 = vrot.slane %v380_v7, 5  ;;  %v384_v18 = vshrl.u32 %v194_v55, 16  ;;  %v390_v21 = vshll.u32 %v236_v63, 16 }
  0x41   : > { %v377_v25 = vor.u32 %v376_v13, %v373_v12  ;;  %v2267_v26 = vshrl.u32 %v5378_v9, 16  ;;  %v2270_v29 = vshll.u32 %v5378_v9, 16  ;;  %v2260_v34 = vrot.slane %v2259_v16, 4 }
  0x42   : > { %6143 = vmatpush3.bf16.msra.mxu0 %v6630_v20  ;;  %5918 = vmatprep.mubr.bf16.mxu1 %v5223_v10  ;;  %v2255_v20 = vsel %vm6901_vm2, %v2250_v11, %v2254_v57  ;;  %v392_v38 = vrot.slane %v390_v21, 5  ;;  %v2286_v52 = vshll.u32 %v7060_v22, 16  ;;  %v395_v61 = vshrl.u32 %v195_v30, 16 }
  0x43   : > { %5953 = vmatpush3.bf16.msra.mxu1 %v6637_v14  ;;  %v7054_v14 = vld [vmem:[%s6869_s10 + $0x4c] sm:$0xf]  ;;  %6144 = vmatprep.subr.bf16.mxu0 %v6631_v48  ;;  %v378_v40 = vrot.slane %v377_v25, 4  ;;  %v2269_v42 = vrot.slane %v2267_v26, 4  ;;  %v2272_v43 = vrot.slane %v2270_v29, 5  ;;  %v2265_v47 = vsel %vm6901_vm2, %v2260_v34, %v2264_v6  ;;  %v7090_v6 = vld [vmem:[%s8658_s1 + $0x180] sm:$0xff]  }
  0x44   : > { %5954 = vmatprep.subr.bf16.mxu1 %v6639_v35  ;;  %v2276_v39 = vshll.u32 %v7054_v14, 16  ;;  %v2280_v44 = vshrl.u32 %v7054_v14, 16  ;;  %v5415_v55 = vcombine.low %v2255_v20, %v2265_v47  ;;  %v2288_v60 = vrot.slane %v2286_v52, 5  ;;  %v7097_v20 = vld [vmem:[%s6869_s10 + $0x5c] sm:$0x1] }
  0x45   : > { %v2273_v56 = vor.u32 %v2272_v43, %v2269_v42  ;;  %v398_v63 = vshll.u32 %v195_v30, 16  ;;  %v408_v3 = vshrl.u32 %v196_v53, 16  ;;  %v397_v9 = vrot.slane %v395_v61, 4  ;;  %v198_v43 = vld [vmem:[%s6869_s10 + $0x58] sm:$0xf] }
  0x46   : > { %6145 = vmatpush3.bf16.msra.mxu0 %v6631_v48  ;;  %v2278_v50 = vrot.slane %v2276_v39, 5  ;;  %v383_v48 = vsel %vm6901_vm2, %v378_v40, %v382_v17  ;;  %v2282_v57 = vrot.slane %v2280_v44, 4  ;;  %6110 = vmatprep.mubr.bf16.mxu0 %v5415_v55  ;;  %v414_v11 = vshll.u32 %v237_v54, 16  ;;  %v5384_v52 = vld [vmem:[%s6869_s10 + $0x60] sm:$0xf] }
  0x47   : > { %5955 = vmatpush3.bf16.msra.mxu1 %v6639_v35  ;;  %v386_v35 = vrot.slane %v384_v18, 4  ;;  %6146 = vmatprep.subr.bf16.mxu0 %v6633_v15  ;;  %v2274_v1 = vrot.slane %v2273_v56, 4  ;;  %v400_v10 = vrot.slane %v398_v63, 5  ;;  %v410_v18 = vrot.slane %v408_v3, 4 }
  0x48   : > { %5956 = vmatprep.subr.bf16.mxu1 %v6641_v2  ;;  %v2283_v5 = vor.u32 %v2282_v57, %v2278_v50  ;;  %v416_v21 = vrot.slane %v414_v11, 5  ;;  %v2291_v25 = vshrl.u32 %v5381_v58, 16  ;;  %v2294_v29 = vshll.u32 %v5381_v58, 16 }
  0x49   : > { %v387_v49 = vor.u32 %v386_v35, %v382_v17  ;;  %v2279_v13 = vsel %vm6901_vm2, %v2274_v1, %v2278_v50  ;;  %v401_v17 = vor.u32 %v400_v10, %v397_v9  ;;  %v2300_v30 = vshll.u32 %v7085_v0, 16  ;;  %v197_v35 = vld [vmem:[%s6869_s10 + $0x54] sm:$0xf]  ;;  %v238_v50 = vld [vmem:[%s6869_s10 + $0x5c] sm:$0x1] }
  0x4a   : > { %6147 = vmatpush3.bf16.msra.mxu0 %v6633_v15  ;;  %v2284_v15 = vrot.slane %v2283_v5, 4  ;;  %v2304_v34 = vshrl.u32 %v7085_v0, 16  ;;  %v2293_v42 = vrot.slane %v2291_v25, 4  ;;  %v419_v55 = vshrl.u32 %v197_v35, 16  ;;  %v7125_v25 = vld [vmem:[%s6869_s10 + $0x60] sm:$0xf] }
  0x4b   : > { %5957 = vmatpush3.bf16.msra.mxu1 %v6641_v2  ;;  %v388_v59 = vrot.slane %v387_v49, 4  ;;  %v404_v2 = vshll.u32 %v196_v53, 16  ;;  %6148 = vmatprep.subr.bf16.mxu0 %v6634_v31  ;;  %v402_v39 = vrot.slane %v401_v17, 4  ;;  %v2302_v44 = vrot.slane %v2300_v30, 5  ;;  %v7121_v17 = vld [vmem:[%s6869_s10 + $0x68] sm:$0x1] }
  0x4c   : > { %5990 = vmatprep.subr.bf16.mxu1 %v7071_v4  ;;  %v2289_v26 = vsel %vm6901_vm2, %v2284_v15, %v2288_v60  ;;  %v2306_v47 = vrot.slane %v2304_v34, 4  ;;  %v2310_v49 = vshll.u32 %v7097_v20, 16  ;;  %v7112_v60 = vld [vmem:[%s6869_s10 + $0x64] sm:$0xf]  ;;  %v421_v63 = vrot.slane %v419_v55, 4 }
  0x4d   : > { %v393_v7 = vsel %vm6901_vm2, %v388_v59, %v392_v38  ;;  %v406_v16 = vrot.slane %v404_v2, 5  ;;  %v5416_v38 = vcombine.low %v2279_v13, %v2289_v26  ;;  %v428_v59 = vshll.u32 %v198_v43, 16 }
  0x4e   : > { %v5224_v12 = vcombine.low %v383_v48, %v393_v7  ;;  %6149 = vmatpush3.bf16.msra.mxu0 %v6634_v31  ;;  %v2296_v31 = vrot.slane %v2294_v29, 5  ;;  %v422_v48 = vshll.u32 %v197_v35, 16  ;;  %v2307_v57 = vor.u32 %v2306_v47, %v2302_v44  ;;  %v7128_v35 = vld [vmem:[%s6869_s10 + $0x64] sm:$0xf] }
  0x4f   : > { %6182 = vmatprep.subr.bf16.mxu0 %v7090_v6  ;;  %v411_v40 = vor.u32 %v410_v18, %v406_v16  ;;  %6111 = vmatmul.mubr.bf16.gmra.mrb[8].mxu0 %v5416_v38  ;;  %v407_v53 = vsel %vm6901_vm2, %v402_v39, %v406_v16  ;;  %v2312_v58 = vrot.slane %v2310_v49, 5  ;;  %v432_v5 = vshrl.u32 %v198_v43, 16  ;;  %v239_v43 = vld [vmem:[%s6869_s10 + $0x68] sm:$0x1] }
  0x50   : > { %5919 = vmatmul.mubr.bf16.gmra.mrb[8].mxu1 %v5224_v12  ;;  %v2297_v56 = vor.u32 %v2296_v31, %v2293_v42  ;;  %v424_v1 = vrot.slane %v422_v48, 5  ;;  %v2308_v7 = vrot.slane %v2307_v57, 4  ;;  %v430_v9 = vrot.slane %v428_v59, 5 }
  0x51   : > { %v412_v54 = vrot.slane %v411_v40, 4  ;;  %v434_v11 = vrot.slane %v432_v5, 4  ;;  %v438_v12 = vshll.u32 %v238_v50, 16  ;;  %v2315_v13 = vshrl.u32 %v5384_v52, 16  ;;  %v5435_v50 = vld [vmem:[%s6869_s10 + $0xc] sm:$0xe] }
  0x52   : > { %v2298_v3 = vrot.slane %v2297_v56, 4  ;;  %v425_v10 = vor.u32 %v424_v1, %v421_v63  ;;  %v2313_v16 = vsel %vm6901_vm2, %v2308_v7, %v2312_v58  ;;  %v2318_v18 = vshll.u32 %v5384_v52, 16  ;;  %v7143_v5 = vld [vmem:[%s6869_s10 + $0x6c] sm:$0xf] }
  0x53   : > { %v417_v61 = vsel %vm6901_vm2, %v412_v54, %v416_v21  ;;  %v2324_v21 = vshll.u32 %v7112_v60, 16  ;;  %v435_v30 = vor.u32 %v434_v11, %v430_v9  ;;  %v440_v34 = vrot.slane %v438_v12, 5 }
  0x54   : > { %v5225_v2 = vcombine.low %v407_v53, %v417_v61  ;;  %v2303_v15 = vsel %vm6901_vm2, %v2298_v3, %v2302_v44  ;;  %v426_v29 = vrot.slane %v425_v10, 4  ;;  %v2317_v38 = vrot.slane %v2315_v13, 4 }
  0x55   : > { %v5417_v26 = vcombine.low %v2303_v15, %v2313_v16  ;;  %v2320_v39 = vrot.slane %v2318_v18, 5  ;;  %v2326_v40 = vrot.slane %v2324_v21, 5  ;;  %v2328_v42 = vshrl.u32 %v7112_v60, 16  ;;  %v7155_v21 = vld [vmem:[%s6869_s10 + $0x70] sm:$0xf] }
  0x56   : > { %5922 = vmatprep.mubr.bf16.mxu1 %v5225_v2  ;;  %v431_v31 = vsel %vm6901_vm2, %v426_v29, %v430_v9  ;;  %v436_v44 = vrot.slane %v435_v30, 4  ;;  %v2334_v47 = vshll.u32 %v7121_v17, 16  ;;  %v443_v49 = vshrl.u32 %v7125_v25, 16  ;;  %v6725_v9 = vld [vmem:[%s6869_s10 + $0xb4] sm:$0xff]  }
  0x57   : > { %6114 = vmatprep.mubr.bf16.mxu0 %v5417_v26  ;;  %v2321_v52 = vor.u32 %v2320_v39, %v2317_v38  ;;  %v2330_v53 = vrot.slane %v2328_v42, 4  ;;  %v446_v54 = vshll.u32 %v7125_v25, 16  ;;  %v452_v55 = vshll.u32 %v7128_v35, 16 }
  0x58   : > { %v441_v48 = vsel %vm6901_vm2, %v436_v44, %v440_v34  ;;  %v2336_v56 = vrot.slane %v2334_v47, 5  ;;  %v445_v57 = vrot.slane %v443_v49, 4  ;;  %v456_v58 = vshrl.u32 %v7128_v35, 16  ;;  %v7166_v47 = vld [vmem:[%s6869_s10 + $0x78] sm:$0xf] }
  0x59   : > { %v5226_v59 = vcombine.low %v431_v31, %v441_v48  ;;  %v2322_v61 = vrot.slane %v2321_v52, 4  ;;  %v2331_v63 = vor.u32 %v2330_v53, %v2326_v40  ;;  %v448_v1 = vrot.slane %v446_v54, 5  ;;  %v7177_v54 = vld [vmem:[%s6869_s10 + $0x7c] sm:$0xf] }
  0x5a   : > { %v454_v2 = vrot.slane %v452_v55, 5  ;;  %v458_v3 = vrot.slane %v456_v58, 4  ;;  %v462_v7 = vshll.u32 %v239_v43, 16  ;;  %v5451_v10 = vrot.slane %v5435_v50, 9  ;;  %v241_v58 = vld [vmem:[%s6869_s10 + $0x80] sm:$0x1] }
  0x5b   : > { %5923 = vmatmul.mubr.bf16.gmra.mrb[12].mxu1 %v5226_v59  ;;  %v2327_v11 = vsel %vm6901_vm2, %v2322_v61, %v2326_v40  ;;  %v2332_v12 = vrot.slane %v2331_v63, 4  ;;  %v449_v13 = vor.u32 %v448_v1, %v445_v57  ;;  %v2917_v15 = vrot.slane %v6882_v23, 5  ;;  %v240_v40 = vld [vmem:[%s6869_s10 + $0x74] sm:$0x1]  ;;  %v5436_v23 = vld [vmem:[%s6869_s10 + $0x18] sm:$0xe] }
  0x5c   : > { %v459_v16 = vor.u32 %v458_v3, %v454_v2  ;;  %v464_v18 = vrot.slane %v462_v7, 5  ;;  %v467_v26 = vshrl.u32 %v7143_v5, 16  ;;  %v470_v29 = vshll.u32 %v7143_v5, 16 }
  0x5d   : > { %v2337_v30 = vsel %vm6901_vm2, %v2332_v12, %v2336_v56  ;;  %v450_v34 = vrot.slane %v449_v13, 4  ;;  %v2918_v38 = vsel %vm7147_vm5, %v5451_v10, %v2917_v15  ;;  %v2919_v39 = vrot.slane %v2917_v15, 4  ;;  %v5437_v13 = vld [vmem:[%s6869_s10 + $0x24] sm:$0xe] }
  0x5e   : > { %v5418_v42 = vcombine.low %v2327_v11, %v2337_v30  ;;  %v460_v43 = vrot.slane %v459_v16, 4  ;;  %v469_v31 = vrot.slane %v467_v26, 4  ;;  %v472_v44 = vrot.slane %v470_v29, 5  ;;  %v7199_v16 = vld [vmem:[%s6869_s10 + $0x84] sm:$0xf]  ;;  %v6638_v29 = vld [vmem:[%s8658_s1 + $0x188] sm:$0xff]  }
  0x5f   : > { %v455_v49 = vsel %vm6901_vm2, %v450_v34, %v454_v2  ;;  %v2921_v50 = vsel %vm7147_vm5, %v2919_v39, %v2920_v41  ;;  %v476_v52 = vshll.u32 %v7155_v21, 16  ;;  %v480_v53 = vshrl.u32 %v7155_v21, 16 }
  0x60   : > { %6115 = vmatmul.mubr.bf16.gmra.mrb[12].mxu0 %v5418_v42  ;;  %v465_v55 = vsel %vm6901_vm2, %v460_v43, %v464_v18  ;;  %v5467_v48 = vcombine.low %v2918_v38, %v2921_v50  ;;  %v473_v56 = vor.u32 %v472_v44, %v469_v31  ;;  %v486_v57 = vshll.u32 %v240_v40, 16  ;;  %v7207_v40 = vld [vmem:[%s6869_s10 + $0x88] sm:$0xf]  ;;  %v242_v31 = vld [vmem:[%s6869_s10 + $0x8c] sm:$0x1] }
  0x61   : > { %v5227_v59 = vcombine.low %v455_v49, %v465_v55  ;;  %v478_v24 = vrot.slane %v476_v52, 5  ;;  %v482_v61 = vrot.slane %v480_v53, 4  ;;  %v5452_v63 = vrot.slane %v5436_v23, 9 }
  0x62   : > { %6150 = vmatprep.mubr.bf16.mxu0 %v5467_v48  ;;  %v474_v41 = vrot.slane %v473_v56, 4  ;;  %v488_v1 = vrot.slane %v486_v57, 5  ;;  %v2928_v2 = vsel %vm7147_vm5, %v6950_v36, %v2927_v32  ;;  %v491_v3 = vshrl.u32 %v7166_v47, 16 }
  0x63   : > { %5926 = vmatprep.mubr.bf16.mxu1 %v5227_v59  ;;  %v483_v7 = vor.u32 %v482_v61, %v478_v24  ;;  %v2925_v10 = vsel %vm7147_vm5, %v5452_v63, %v2924_v27  ;;  %v494_v11 = vshll.u32 %v7166_v47, 16  ;;  %v500_v12 = vshll.u32 %v7177_v54, 16 }
  0x64   : > { %v479_v8 = vsel %vm6901_vm2, %v474_v41, %v478_v24  ;;  %v5468_v15 = vcombine.low %v2925_v10, %v2928_v2  ;;  %v493_v32 = vrot.slane %v491_v3, 4  ;;  %v504_v36 = vshrl.u32 %v7177_v54, 16  ;;  %v7228_v2 = vld [vmem:[%s6869_s10 + $0x90] sm:$0xf]  ;;  %v7231_v3 = vld [vmem:[%s6869_s10 + $0x94] sm:$0xf] }
  0x65   : > { %v484_v62 = vrot.slane %v483_v7, 4  ;;  %v496_v18 = vrot.slane %v494_v11, 5  ;;  %v502_v26 = vrot.slane %v500_v12, 5  ;;  %v510_v27 = vshll.u32 %v241_v58, 16 }
  0x66   : > { %v506_v30 = vrot.slane %v504_v36, 4  ;;  %v5453_v34 = vrot.slane %v5437_v13, 9  ;;  %v2931_v38 = vrot.slane %v6954_v45, 5  ;;  %v2934_v39 = vrot.slane %v6960_v51, 5  ;;  %v5438_v45 = vld [vmem:[%s6869_s10 + $0x30] sm:$0xe] }
  0x67   : > { %v489_v23 = vsel %vm6901_vm2, %v484_v62, %v488_v1  ;;  %v497_v42 = vor.u32 %v496_v18, %v493_v32  ;;  %v512_v43 = vrot.slane %v510_v27, 5  ;;  %v515_v44 = vshrl.u32 %v7199_v16, 16  ;;  %v243_v62 = vld [vmem:[%s6869_s10 + $0x98] sm:$0x1] }
  0x68   : > { %v5228_v49 = vcombine.low %v479_v8, %v489_v23  ;;  %6151 = vmatmul.mubr.bf16.vlgmr.msra.gmra.mrb[0].mxu0 %v5468_v15  ;;  %v507_v50 = vor.u32 %v506_v30, %v502_v26  ;;  %v2932_v52 = vsel %vm7147_vm5, %v5453_v34, %v2931_v38  ;;  %v2933_v53 = vrot.slane %v2931_v38, 4  ;;  %v6642_v30 = vld [vmem:[%s8658_s1 + $0x198] sm:$0xff]  }
  0x69   : > { %6183 = vmatpush3.bf16.msra.mxu0 %v7090_v6  ;;  %v498_v51 = vrot.slane %v497_v42, 4  ;;  %v517_v55 = vrot.slane %v515_v44, 4  ;;  %v518_v48 = vshll.u32 %v7199_v16, 16  ;;  %v524_v56 = vshll.u32 %v7207_v40, 16  ;;  %v6640_v6 = vld [vmem:[%s8658_s1 + $0x190] sm:$0xff]  }
  0x6a   : > { %5927 = vmatmul.mubr.bf16.gmra.mrb[16].mxu1 %v5228_v49  ;;  %v508_v57 = vrot.slane %v507_v50, 4  ;;  %v2935_v58 = vsel %vm7147_vm5, %v2933_v53, %v2934_v39  ;;  %v528_v59 = vshrl.u32 %v7207_v40, 16  ;;  %v534_v24 = vshll.u32 %v242_v31, 16  ;;  %6184 = vmatprep.subr.bf16.mxu0 %v6638_v29  ;;  %v5439_v38 = vld [vmem:[%s6869_s10 + $0x3c] sm:$0xe] }
  0x6b   : > { %v503_v61 = vsel %vm6901_vm2, %v498_v51, %v502_v26  ;;  %v5469_v63 = vcombine.low %v2932_v52, %v2935_v58  ;;  %v520_v41 = vrot.slane %v518_v48, 5  ;;  %v526_v1 = vrot.slane %v524_v56, 5  ;;  %v7249_v31 = vld [vmem:[%s6869_s10 + $0x9c] sm:$0xf]  ;;  %v7258_v48 = vld [vmem:[%s6869_s10 + $0xa0] sm:$0xf] }
  0x6c   : > { %v513_v7 = vsel %vm6901_vm2, %v508_v57, %v512_v43  ;;  %v530_v10 = vrot.slane %v528_v59, 4  ;;  %v536_v11 = vrot.slane %v534_v24, 5  ;;  %v5454_v12 = vrot.slane %v5438_v45, 9  ;;  %v6646_v56 = vld [vmem:[%s8658_s1 + $0x1a0] sm:$0xff]  }
  0x6d   : > { %v5229_v13 = vcombine.low %v503_v61, %v513_v7  ;;  %6154 = vmatprep.mubr.bf16.mxu0 %v5469_v63  ;;  %v521_v8 = vor.u32 %v520_v41, %v517_v55  ;;  %v2938_v15 = vrot.slane %v6985_v33, 5  ;;  %v2941_v32 = vrot.slane %v6996_v46, 5  ;;  %6185 = vmatpush3.bf16.msra.mxu0 %v6638_v29  ;;  %v244_v61 = vld [vmem:[%s6869_s10 + $0xa4] sm:$0x1] }
  0x6e   : > { %v531_v36 = vor.u32 %v530_v10, %v526_v1  ;;  %v539_v18 = vshrl.u32 %v7228_v2, 16  ;;  %v542_v26 = vshll.u32 %v7228_v2, 16  ;;  %v548_v27 = vshll.u32 %v7231_v3, 16  ;;  %6186 = vmatprep.subr.bf16.mxu0 %v6640_v6 }
  0x6f   : > { %5930 = vmatprep.mubr.bf16.mxu1 %v5229_v13  ;;  %v522_v34 = vrot.slane %v521_v8, 4  ;;  %v2939_v33 = vsel %vm7147_vm5, %v5454_v12, %v2938_v15  ;;  %v2940_v46 = vrot.slane %v2938_v15, 4  ;;  %v552_v29 = vshrl.u32 %v7231_v3, 16  ;;  %v5440_v15 = vld [vmem:[%s6869_s10 + $0x48] sm:$0xe] }
  0x70   : > { %v532_v39 = vrot.slane %v531_v36, 4  ;;  %v541_v23 = vrot.slane %v539_v18, 4  ;;  %v544_v42 = vrot.slane %v542_v26, 5  ;;  %v550_v43 = vrot.slane %v548_v27, 5  ;;  %v7283_v27 = vld [vmem:[%s6869_s10 + $0xa8] sm:$0xf] }
  0x71   : > { %v527_v44 = vsel %vm6901_vm2, %v522_v34, %v526_v1  ;;  %v2942_v49 = vsel %vm7147_vm5, %v2940_v46, %v2941_v32  ;;  %v554_v50 = vrot.slane %v552_v29, 4  ;;  %v558_v52 = vshll.u32 %v243_v62, 16  ;;  %6187 = vmatpush3.bf16.msra.mxu0 %v6640_v6  ;;  %v6650_v32 = vld [vmem:[%s8658_s1 + $0x1a8] sm:$0xff]  }
  0x72   : > { %v537_v53 = vsel %vm6901_vm2, %v532_v39, %v536_v11  ;;  %v5470_v45 = vcombine.low %v2939_v33, %v2942_v49  ;;  %v545_v51 = vor.u32 %v544_v42, %v541_v23  ;;  %v5455_v55 = vrot.slane %v5439_v38, 9  ;;  %6188 = vmatprep.subr.bf16.mxu0 %v6642_v30  ;;  %v7286_v29 = vld [vmem:[%s6869_s10 + $0xac] sm:$0xf] }
  0x73   : > { %v5230_v57 = vcombine.low %v527_v44, %v537_v53  ;;  %v555_v58 = vor.u32 %v554_v50, %v550_v43  ;;  %v560_v59 = vrot.slane %v558_v52, 5  ;;  %v2945_v24 = vrot.slane %v7019_v19, 5  ;;  %v5441_v53 = vld [vmem:[%s6869_s10 + $0x54] sm:$0xe] }
  0x74   : > { %6155 = vmatmul.mubr.bf16.gmra.mrb[4].mxu0 %v5470_v45  ;;  %v546_v6 = vrot.slane %v545_v51, 4  ;;  %v2948_v63 = vrot.slane %v7027_v28, 5  ;;  %v563_v41 = vshrl.u32 %v7249_v31, 16  ;;  %v566_v1 = vshll.u32 %v7249_v31, 16  ;;  %v6654_v45 = vld [vmem:[%s8658_s1 + $0x1b0] sm:$0xff]  }
  0x75   : > { %5931 = vmatmul.mubr.bf16.gmra.mrb[20].mxu1 %v5230_v57  ;;  %v556_v7 = vrot.slane %v555_v58, 4  ;;  %v2946_v10 = vsel %vm7147_vm5, %v5455_v55, %v2945_v24  ;;  %v2947_v11 = vrot.slane %v2945_v24, 4  ;;  %v572_v12 = vshll.u32 %v7258_v48, 16  ;;  %6189 = vmatpush3.bf16.msra.mxu0 %v6642_v30 }
  0x76   : > { %v551_v19 = vsel %vm6901_vm2, %v546_v6, %v550_v43  ;;  %v565_v13 = vrot.slane %v563_v41, 4  ;;  %v568_v28 = vrot.slane %v566_v1, 5  ;;  %v576_v8 = vshrl.u32 %v7258_v48, 16  ;;  %6190 = vmatprep.subr.bf16.mxu0 %v6646_v56  ;;  %v245_v43 = vld [vmem:[%s6869_s10 + $0xb0] sm:$0x1] }
  0x77   : > { %v561_v36 = vsel %vm6901_vm2, %v556_v7, %v560_v59  ;;  %v2949_v62 = vsel %vm7147_vm5, %v2947_v11, %v2948_v63  ;;  %v574_v18 = vrot.slane %v572_v12, 5  ;;  %v582_v26 = vshll.u32 %v244_v61, 16  ;;  %v7306_v41 = vld [vmem:[%s6869_s10 + $0xb4] sm:$0xf]  ;;  %v7311_v12 = vld [vmem:[%s6869_s10 + $0xb8] sm:$0xf] }
  0x78   : > { %v5231_v30 = vcombine.low %v551_v19, %v561_v36  ;;  %v5471_v34 = vcombine.low %v2946_v10, %v2949_v62  ;;  %v569_v33 = vor.u32 %v568_v28, %v565_v13  ;;  %v578_v46 = vrot.slane %v576_v8, 4  ;;  %v246_v19 = vld [vmem:[%s6869_s10 + $0xbc] sm:$0x1] }
  0x79   : > { %v584_v38 = vrot.slane %v582_v26, 5  ;;  %v5456_v39 = vrot.slane %v5440_v15, 9  ;;  %v2952_v23 = vrot.slane %v7054_v14, 5  ;;  %v2955_v42 = vrot.slane %v7060_v22, 5  ;;  %6191 = vmatpush3.bf16.msra.mxu0 %v6646_v56  ;;  %v6658_v13 = vld [vmem:[%s8658_s1 + $0x1b8] sm:$0xff]  }
  0x7a   : > { %5934 = vmatprep.mubr.bf16.mxu1 %v5231_v30  ;;  %6158 = vmatprep.mubr.bf16.mxu0 %v5471_v34  ;;  %v570_v44 = vrot.slane %v569_v33, 4  ;;  %v579_v49 = vor.u32 %v578_v46, %v574_v18  ;;  %v587_v50 = vshrl.u32 %v7283_v27, 16  ;;  %v590_v52 = vshll.u32 %v7283_v27, 16  ;;  %v5442_v30 = vld [vmem:[%s6869_s10 + $0x60] sm:$0xe] }
  0x7b   : > { %v2953_v14 = vsel %vm7147_vm5, %v5456_v39, %v2952_v23  ;;  %v2954_v22 = vrot.slane %v2952_v23, 4  ;;  %v596_v51 = vshll.u32 %v7286_v29, 16  ;;  %v600_v55 = vshrl.u32 %v7286_v29, 16  ;;  %6192 = vmatprep.subr.bf16.mxu0 %v6650_v32  ;;  %v5388_v39 = vld [vmem:[%s6869_s10 + $0x70] sm:$0xf] }
  0x7c   : > { %v575_v56 = vsel %vm6901_vm2, %v570_v44, %v574_v18  ;;  %v580_v57 = vrot.slane %v579_v49, 4  ;;  %v589_v58 = vrot.slane %v587_v50, 4  ;;  %v592_v59 = vrot.slane %v590_v52, 5  ;;  %v7333_v44 = vld [vmem:[%s8658_s1 + $0x1c0] sm:$0xff]  }
  0x7d   : > { %v2956_v24 = vsel %vm7147_vm5, %v2954_v22, %v2955_v42  ;;  %v598_v61 = vrot.slane %v596_v51, 5  ;;  %v602_v6 = vrot.slane %v600_v55, 4  ;;  %v606_v63 = vshll.u32 %v245_v43, 16  ;;  %6193 = vmatpush3.bf16.msra.mxu0 %v6650_v32  ;;  %v5443_v43 = vld [vmem:[%s6869_s10 + $0x6c] sm:$0xe] }
  0x7e   : > { %v585_v1 = vsel %vm6901_vm2, %v580_v57, %v584_v38  ;;  %v5472_v7 = vcombine.low %v2953_v14, %v2956_v24  ;;  %v593_v10 = vor.u32 %v592_v59, %v589_v58  ;;  %v5457_v11 = vrot.slane %v5441_v53, 9  ;;  %6194 = vmatprep.subr.bf16.mxu0 %v6654_v45  ;;  %v5389_v55 = vld [vmem:[%s6869_s10 + $0x74] sm:$0x1]  ;;  %v5444_v24 = vld [vmem:[%s6869_s10 + $0x78] sm:$0xe] }
  0x7f   : > { %v5232_v28 = vcombine.low %v575_v56, %v585_v1  ;;  %v603_v8 = vor.u32 %v602_v6, %v598_v61  ;;  %v608_v15 = vrot.slane %v606_v63, 5  ;;  %v2959_v32 = vrot.slane %v7085_v0, 5 }
  0x80   : > { %6159 = vmatmul.mubr.bf16.gmra.mrb[8].mxu0 %v5472_v7  ;;  %v594_v36 = vrot.slane %v593_v10, 4  ;;  %v2962_v62 = vrot.slane %v7097_v20, 5  ;;  %v611_v18 = vshrl.u32 %v7306_v41, 16  ;;  %v614_v26 = vshll.u32 %v7306_v41, 16 }
  0x81   : > { %5935 = vmatmul.mubr.bf16.gmra.mrb[24].mxu1 %v5232_v28  ;;  %v604_v34 = vrot.slane %v603_v8, 4  ;;  %v2960_v33 = vsel %vm7147_vm5, %v5457_v11, %v2959_v32  ;;  %v2961_v46 = vrot.slane %v2959_v32, 4  ;;  %v620_v38 = vshll.u32 %v7311_v12, 16  ;;  %6195 = vmatpush3.bf16.msra.mxu0 %v6654_v45  ;;  %v7346_v11 = vld [vmem:[%s6869_s10 + $0x7c] sm:$0xf] }
  0x82   : > { %v599_v0 = vsel %vm6901_vm2, %v594_v36, %v598_v61  ;;  %v613_v20 = vrot.slane %v611_v18, 4  ;;  %v616_v23 = vrot.slane %v614_v26, 5  ;;  %v624_v42 = vshrl.u32 %v7311_v12, 16  ;;  %6196 = vmatprep.subr.bf16.mxu0 %v6658_v13  ;;  %v6727_v36 = vld [vmem:[%s6869_s10] sm:$0xf] }
  0x83   : > { %v609_v49 = vsel %vm6901_vm2, %v604_v34, %v608_v15  ;;  %v2963_v50 = vsel %vm7147_vm5, %v2961_v46, %v2962_v62  ;;  %v622_v52 = vrot.slane %v620_v38, 5  ;;  %v630_v53 = vshll.u32 %v246_v19, 16  ;;  %v5394_v15 = vld [vmem:[%s6869_s10 + $0x88] sm:$0xf]  ;;  %v7361_v62 = vld [vmem:[%s6869_s10 + $0x4] sm:$0xf] }
  0x84   : > { %v5233_v45 = vcombine.low %v599_v0, %v609_v49  ;;  %v5473_v14 = vcombine.low %v2960_v33, %v2963_v50  ;;  %v617_v22 = vor.u32 %v616_v23, %v613_v20  ;;  %v626_v51 = vrot.slane %v624_v42, 4  ;;  %v5395_v26 = vld [vmem:[%s6869_s10 + $0x8c] sm:$0x1]  ;;  %v5398_v23 = vld [vmem:[%s6869_s10 + $0x98] sm:$0x1] }
  0x85   : > { %v632_v56 = vrot.slane %v630_v53, 5  ;;  %v5458_v57 = vrot.slane %v5442_v30, 9  ;;  %v2966_v58 = vrot.slane %v7112_v60, 5  ;;  %v2969_v59 = vrot.slane %v7121_v17, 5  ;;  %6197 = vmatpush3.bf16.msra.mxu0 %v6658_v13  ;;  %v7349_v17 = vld [vmem:[%s6869_s10 + $0x80] sm:$0x1] }
  0x86   : > { %5938 = vmatprep.mubr.bf16.mxu1 %v5233_v45  ;;  %6162 = vmatprep.mubr.bf16.mxu0 %v5473_v14  ;;  %v618_v61 = vrot.slane %v617_v22, 4  ;;  %v627_v6 = vor.u32 %v626_v51, %v622_v52  ;;  %v5459_v63 = vrot.slane %v5443_v43, 9  ;;  %v2973_v1 = vrot.slane %v5388_v39, 5  ;;  %v5445_v30 = vld [vmem:[%s6869_s10 + $0x84] sm:$0xe] }
  0x87   : > { %v2967_v7 = vsel %vm7147_vm5, %v5458_v57, %v2966_v58  ;;  %v2968_v10 = vrot.slane %v2966_v58, 4  ;;  %v2976_v60 = vrot.slane %v5389_v55, 5  ;;  %6230 = vmatprep.subr.bf16.mxu0 %v7333_v44  ;;  %v5243_v18 = vcombine.low %v6727_v36, %v7361_v62  ;;  %v5397_v39 = vld [vmem:[%s6869_s10 + $0x94] sm:$0xf]  ;;  %v5446_v42 = vld [vmem:[%s6869_s10 + $0x90] sm:$0xe] }
  0x88   : > { %v623_v19 = vsel %vm6901_vm2, %v618_v61, %v622_v52  ;;  %v628_v13 = vrot.slane %v627_v6, 4  ;;  %v2974_v28 = vsel %vm7147_vm5, %v5459_v63, %v2973_v1  ;;  %v2975_v8 = vrot.slane %v2973_v1, 4  ;;  %v5447_v50 = vld [vmem:[%s6869_s10 + $0x9c] sm:$0xe]  ;;  %v5400_v14 = vld [vmem:[%s6869_s10 + $0xa0] sm:$0xf] }
  0x89   : > { %v2970_v32 = vsel %vm7147_vm5, %v2968_v10, %v2969_v59  ;;  %v5460_v38 = vrot.slane %v5444_v24, 9  ;;  %v2980_v43 = vrot.slane %v7346_v11, 5  ;;  %v2983_v49 = vrot.slane %v7349_v17, 5  ;;  %v5401_v22 = vld [vmem:[%s6869_s10 + $0xa4] sm:$0x1] }
  0x8a   : > { %v633_v34 = vsel %vm6901_vm2, %v628_v13, %v632_v56  ;;  %v5474_v33 = vcombine.low %v2967_v7, %v2970_v32  ;;  %v2977_v46 = vsel %vm7147_vm5, %v2975_v8, %v2976_v60  ;;  %v5461_v52 = vrot.slane %v5445_v30, 9  ;;  %v5403_v59 = vld [vmem:[%s6869_s10 + $0xac] sm:$0xf]  ;;  %v7385_v61 = vld [vmem:[%s6869_s10 + $0x10] sm:$0xf] }
  0x8b   : > { %v5234_v0 = vcombine.low %v623_v19, %v633_v34  ;;  %v5475_v20 = vcombine.low %v2974_v28, %v2977_v46  ;;  %v2987_v53 = vrot.slane %v5394_v15, 5  ;;  %v2990_v45 = vrot.slane %v5395_v26, 5  ;;  %v6729_v24 = vld [vmem:[%s6869_s10 + $0xc] sm:$0xf]  ;;  %v6731_v8 = vld [vmem:[%s6869_s10 + $0x18] sm:$0xf] }
  0x8c   : > { %6163 = vmatmul.mubr.bf16.gmra.mrb[12].mxu0 %v5474_v33  ;;  %v2981_v51 = vsel %vm7147_vm5, %v5460_v38, %v2980_v43  ;;  %v2982_v55 = vrot.slane %v2980_v43, 4  ;;  %v2994_v58 = vrot.slane %v5397_v39, 5  ;;  %v5244_v6 = vcombine.low %v6729_v24, %v7385_v61  ;;  %v6649_v19 = vld [vmem:[%s8658_s1 + $0x88] sm:$0xff]   ;;  %v7397_v15 = vld [vmem:[%s6869_s10 + $0x1c] sm:$0xf] }
  0x8d   : > { %5939 = vmatmul.mubr.bf16.gmra.mrb[28].mxu1 %v5234_v0  ;;  %6166 = vmatprep.mubr.bf16.mxu0 %v5475_v20  ;;  %v2988_v56 = vsel %vm7147_vm5, %v5461_v52, %v2987_v53  ;;  %v2989_v57 = vrot.slane %v2987_v53, 4  ;;  %v5462_v1 = vrot.slane %v5446_v42, 9  ;;  %v2997_v7 = vrot.slane %v5398_v23, 5  ;;  %v5404_v30 = vld [vmem:[%s6869_s10 + $0xb0] sm:$0x1] }
  0x8e   : > { %5958 = vmatprep.mubr.bf16.mxu1 %v5243_v18  ;;  %v2984_v63 = vsel %vm7147_vm5, %v2982_v55, %v2983_v49  ;;  %v2996_v13 = vrot.slane %v2994_v58, 4  ;;  %v5463_v28 = vrot.slane %v5447_v50, 9  ;;  %v5245_v32 = vcombine.low %v6731_v8, %v7397_v15  ;;  %v5448_v34 = vld [vmem:[%s6869_s10 + $0xa8] sm:$0xe]  ;;  %v5406_v33 = vld [vmem:[%s6869_s10 + $0xb8] sm:$0xf] }
  0x8f   : > { %v5476_v10 = vcombine.low %v2981_v51, %v2984_v63  ;;  %v2991_v60 = vsel %vm7147_vm5, %v2989_v57, %v2990_v45  ;;  %v3001_v18 = vrot.slane %v5400_v14, 5  ;;  %v3004_v26 = vrot.slane %v5401_v22, 5  ;;  %v5407_v20 = vld [vmem:[%s6869_s10 + $0xbc] sm:$0x1]  ;;  %v5449_v23 = vld [vmem:[%s6869_s10 + $0xb4] sm:$0xe] }
  0x90   : > { %v5477_v36 = vcombine.low %v2988_v56, %v2991_v60  ;;  %v3008_v38 = vrot.slane %v5403_v59, 5  ;;  %v2995_v39 = vsel %vm7147_vm5, %v5462_v1, %v2994_v58  ;;  %v2998_v0 = vsel %vm7147_vm5, %v2996_v13, %v2997_v7  ;;  %v6653_v50 = vld [vmem:[%s8658_s1 + $0x90] sm:$0xff]   ;;  %v5409_v53 = vld [vmem:[%s6869_s10 + $0xc4] sm:$0xf]  ;;  %v7420_v51 = vld [vmem:[%s6869_s10 + $0x28] sm:$0xf] }
  0x91   : > { %v3003_v46 = vrot.slane %v3001_v18, 4  ;;  %v3002_v42 = vsel %vm7147_vm5, %v5463_v28, %v3001_v18  ;;  %v3015_v49 = vrot.slane %v5406_v33, 5  ;;  %v5464_v52 = vrot.slane %v5448_v34, 9  ;;  %v6733_v22 = vld [vmem:[%s6869_s10 + $0x24] sm:$0xf]  ;;  %v6657_v1 = vld [vmem:[%s8658_s1 + $0x98] sm:$0xff]  }
  0x92   : > { %v5478_v45 = vcombine.low %v2995_v39, %v2998_v0  ;;  %v3010_v14 = vrot.slane %v3008_v38, 4  ;;  %v5246_v55 = vcombine.low %v6733_v22, %v7420_v51  ;;  %v6735_v57 = vld [vmem:[%s6869_s10 + $0x30] sm:$0xf]  ;;  %v7425_v58 = vld [vmem:[%s6869_s10 + $0x34] sm:$0xf]  ;;  %v5465_v24 = vrot.slane %v5449_v23, 9 }
  0x93   : > { %v3005_v43 = vsel %vm7147_vm5, %v3003_v46, %v3004_v26  ;;  %v5247_v59 = vcombine.low %v6735_v57, %v7425_v58  ;;  %v3018_v63 = vrot.slane %v5407_v20, 5  ;;  %v5450_v7 = vld [vmem:[%s6869_s10 + $0xc0] sm:$0xe]  ;;  %v3009_v60 = vsel %vm7147_vm5, %v5464_v52, %v3008_v38  ;;  %v5410_v8 = vld [vmem:[%s6869_s10 + $0xc8] sm:$0x1]  ;;  %v6660_v22 = vld [vmem:[%s6869_s10 + $0x18] sm:$0xff]  }
  0x94   : > { %6167 = vmatmul.mubr.bf16.gmra.mrb[16].mxu0 %v5476_v10  ;;  %v5479_v56 = vcombine.low %v3002_v42, %v3005_v43  ;;  %v3022_v10 = vrot.slane %v5409_v53, 5  ;;  %v3016_v13 = vsel %vm7147_vm5, %v5465_v24, %v3015_v49  ;;  %v5466_v18 = vrot.slane %v5450_v7, 9  ;;  %v6737_v26 = vld [vmem:[%s6869_s10 + $0x3c] sm:$0xf]  ;;  %v6739_v39 = vld [vmem:[%s6869_s10 + $0x48] sm:$0xf] }
  0x95   : > { %5959 = vmatmul.mubr.bf16.vlgmr.msra.gmra.mrb[0].mxu1 %v5244_v6  ;;  %6170 = vmatprep.mubr.bf16.mxu0 %v5477_v36  ;;  %v3017_v6 = vrot.slane %v3015_v49, 4  ;;  %v3025_v38 = vrot.slane %v5410_v8, 5  ;;  %v7451_v0 = vld [vmem:[%s6869_s10 + $0x4c] sm:$0xf]  ;;  %v6674_v49 = vld [vmem:[%s8658_s1 + $0xb0] sm:$0xff]   ;;  %v2376_v52 = vshrl.u32 %v7346_v11, 16 }
  0x96   : > { %5991 = vmatpush3.bf16.msra.mxu1 %v7071_v4  ;;  %5962 = vmatprep.mubr.bf16.mxu1 %v5245_v32  ;;  %v3011_v4 = vrot.slane %v5404_v30, 5  ;;  %v6662_v32 = vld [vmem:[%s8658_s1 + $0xa0] sm:$0xff]   ;;  %v3024_v46 = vrot.slane %v3022_v10, 4  ;;  %v5249_v20 = vcombine.low %v6739_v39, %v7451_v0  ;;  %v6668_v23 = vld [vmem:[%s8658_s1 + $0xa8] sm:$0xff]   ;;  %v3023_v42 = vsel %vm7147_vm5, %v5466_v18, %v3022_v10  ;;  %v6666_v18 = vld [vmem:[%s6869_s10 + $0x30] sm:$0xff]  }
  0x97   : > { %5992 = vmatprep.subr.bf16.mxu1 %v6649_v19  ;;  %v3019_v28 = vsel %vm7147_vm5, %v3017_v6, %v3018_v63  ;;  %v7446_v30 = vld [vmem:[%s6869_s10 + $0x40] sm:$0xf]  ;;  %v7479_v57 = vrot.slane %v2376_v52, 4  ;;  %v6663_v6 = vld [vmem:[%s6869_s10 + $0x24] sm:$0xff]   ;;  %v1288_v7 = vrot.slane %v7385_v61, 5  ;;  %v2382_v8 = vshll.u32 %v7349_v17, 16 }
  0x98   : > { %v5248_v34 = vcombine.low %v6737_v26, %v7446_v30  ;;  %v5481_v33 = vcombine.low %v3016_v13, %v3019_v28  ;;  %v3026_v43 = vsel %vm7147_vm5, %v3024_v46, %v3025_v38  ;;  %v1228_v63 = vld [vmem:[%s6869_s10] sm:$0xe]  ;;  %v1229_v10 = vld [vmem:[%s6869_s10 + $0xc] sm:$0xe]  ;;  %v1295_v13 = vrot.slane %v7397_v15, 5 }
  0x99   : > { %v5482_v53 = vcombine.low %v3023_v42, %v3026_v43  ;;  %v1231_v61 = vld [vmem:[%s6869_s10 + $0x24] sm:$0xe]  ;;  %v5254_v15 = vcombine.low %v7199_v16, %v7207_v40  ;;  %v5255_v26 = vcombine.low %v7228_v2, %v7231_v3  ;;  %v5267_v17 = vrot.slane %v1228_v63, 9  ;;  %v6745_v38 = vld [vmem:[%s6869_s10 + $0x20] sm:$0x1]  ;;  %v6675_v2 = vld [vmem:[%s6869_s10 + $0x54] sm:$0xff]  }
  0x9a   : > { %5993 = vmatpush3.bf16.msra.mxu1 %v6649_v19  ;;  %v3012_v19 = vsel %vm7147_vm5, %v3010_v14, %v3011_v4  ;;  %v7468_v14 = vld [vmem:[%s6869_s10 + $0x58] sm:$0xf]  ;;  %v1297_v46 = vrot.slane %v1295_v13, 4  ;;  %v1298_v39 = vrot.slane %v6745_v38, 5  ;;  %v6746_v43 = vld [vmem:[%s6869_s10 + $0x2c] sm:$0x1] }
  0x9b   : > { %5994 = vmatprep.subr.bf16.mxu1 %v6653_v50  ;;  %v5480_v36 = vcombine.low %v3009_v60, %v3012_v19  ;;  %v7494_v60 = vld [vmem:[%s8658_s1 + $0xc0] sm:$0xff]   ;;  %v1230_v19 = vld [vmem:[%s6869_s10 + $0x18] sm:$0xe]  ;;  %v6749_v38 = vld [vmem:[%s6869_s10 + $0x50] sm:$0x1]  ;;  %v1330_v16 = vrot.slane %v7468_v14, 5 }
  0x9c   : > { %6171 = vmatmul.mubr.bf16.gmra.mrb[20].mxu0 %v5478_v45  ;;  %v6741_v45 = vld [vmem:[%s6869_s10 + $0x54] sm:$0xf]  ;;  %v7617_v40 = vld [vmem:[%s6869_s10 + $0x64] sm:$0xf] }
  0x9d   : > { %5963 = vmatmul.mubr.bf16.gmra.mrb[4].mxu1 %v5246_v55  ;;  %6174 = vmatprep.mubr.bf16.mxu0 %v5479_v56  ;;  %v5250_v4 = vcombine.low %v6741_v45, %v7468_v14  ;;  %v5251_v55 = vcombine.low %v7125_v25, %v7128_v35  ;;  %v6680_v56 = vld [vmem:[%s8658_s1 + $0xb8] sm:$0xff]   ;;  %v6744_v25 = vld [vmem:[%s6869_s10 + $0x14] sm:$0x1]  ;;  %v6678_v3 = vld [vmem:[%s6869_s10 + $0x60] sm:$0xff]  }
  0x9e   : > { %5966 = vmatprep.mubr.bf16.mxu1 %v5247_v59  ;;  %5995 = vmatpush3.bf16.msra.mxu1 %v6653_v50  ;;  %v2372_v50 = vshll.u32 %v7346_v11, 16  ;;  %v7482_v59 = vld [vmem:[%s6869_s10 + $0x8] sm:$0x1]  ;;  %v1291_v35 = vrot.slane %v6744_v25, 5 }
  0x9f   : > { %5996 = vmatprep.subr.bf16.mxu1 %v6657_v1  ;;  %v1284_v24 = vrot.slane %v7482_v59, 5 }
  0xa0   : > { %v7477_v11 = vrot.slane %v2372_v50, 5 }
  0xa2   : > { %5997 = vmatpush3.bf16.msra.mxu1 %v6657_v1  ;;  %v1281_v1 = vrot.slane %v7361_v62, 5  ;;  %v5252_v62 = vcombine.low %v7143_v5, %v7155_v21  ;;  %v5268_v21 = vrot.slane %v1229_v10, 9  ;;  %v5547_v10 = vld [vmem:[%s6869_s10 + $0x18] sm:$0xf] }
  0xa3   : > { %5998 = vmatprep.subr.bf16.mxu1 %v6662_v32 }
  0xa4   : > { %6175 = vmatmul.mubr.bf16.gmra.mrb[24].mxu0 %v5480_v36  ;;  %v5253_v36 = vcombine.low %v7166_v47, %v7177_v54  ;;  %v1283_v5 = vrot.slane %v1281_v1, 4  ;;  %v6670_v47 = vld [vmem:[%s8658_s1 + $0x1c8] sm:$0xff]   ;;  %v5269_v54 = vrot.slane %v1230_v19, 9  ;;  %v7537_v59 = vsel %vm7147_vm5, %v5267_v17, %v1281_v1  ;;  %v5548_v19 = vld [vmem:[%s6869_s10 + $0x1c] sm:$0xf] }
  0xa5   : > { %5967 = vmatmul.mubr.bf16.gmra.mrb[8].mxu1 %v5248_v34  ;;  %6178 = vmatprep.mubr.bf16.mxu0 %v5481_v33  ;;  %v1309_v34 = vrot.slane %v7425_v58, 5  ;;  %v1290_v33 = vrot.slane %v1288_v7, 4  ;;  %v5270_v58 = vrot.slane %v1231_v61, 9  ;;  %v1323_v1 = vrot.slane %v7451_v0, 5  ;;  %v6672_v0 = vld [vmem:[%s6869_s10 + $0x48] sm:$0xff]  }
  0xa6   : > { %5970 = vmatprep.mubr.bf16.mxu1 %v5249_v20  ;;  %5999 = vmatpush3.bf16.msra.mxu1 %v6662_v32  ;;  %v1302_v32 = vrot.slane %v7420_v51, 5  ;;  %v1232_v51 = vld [vmem:[%s6869_s10 + $0x30] sm:$0xe]  ;;  %v5256_v20 = vcombine.low %v7249_v31, %v7258_v48  ;;  %v7545_v25 = vsel %vm7147_vm5, %v1283_v5, %v1284_v24  ;;  %v7553_v63 = vsel %vm7147_vm5, %v5269_v54, %v1295_v13  ;;  %v1234_v13 = vld [vmem:[%s6869_s10 + $0x48] sm:$0xe] }
  0xa7   : > { %6000 = vmatprep.subr.bf16.mxu1 %v6668_v23  ;;  %v5271_v50 = vrot.slane %v1232_v51, 9  ;;  %v1311_v52 = vrot.slane %v1309_v34, 4  ;;  %v3783_v5 = vshrl.u32 %v5547_v10, 16  ;;  %v3796_v51 = vshrl.u32 %v5548_v19, 16  ;;  %v6681_v48 = vld [vmem:[%s6869_s10 + $0x6c] sm:$0xff]  }
  0xa8   : > { %v1304_v42 = vrot.slane %v1302_v32, 4  ;;  %v7565_v24 = vsel %vm7147_vm5, %v5270_v58, %v1302_v32  ;;  %v6748_v32 = vld [vmem:[%s6869_s10 + $0x44] sm:$0x1]  ;;  %v5273_v54 = vrot.slane %v1234_v13, 9  ;;  %v5551_v13 = vld [vmem:[%s6869_s10 + $0x28] sm:$0xf] }
  0xa9   : > { %v7575_v61 = vsel %vm7147_vm5, %v5271_v50, %v1309_v34  ;;  %v1319_v17 = vrot.slane %v6748_v32, 5  ;;  %v5549_v50 = vld [vmem:[%s6869_s10 + $0x20] sm:$0x1]  ;;  %v1236_v32 = vld [vmem:[%s6869_s10 + $0x60] sm:$0xe] }
  0xaa   : > { %6001 = vmatpush3.bf16.msra.mxu1 %v6668_v23  ;;  %v5257_v23 = vcombine.low %v7283_v27, %v7286_v29 }
  0xab   : > { %6002 = vmatprep.subr.bf16.mxu1 %v6674_v49 }
  0xac   : > { %6179 = vmatmul.mubr.bf16.gmra.mrb[28].mxu0 %v5482_v53  ;;  %v6747_v53 = vld [vmem:[%s6869_s10 + $0x38] sm:$0x1] }
  0xad   : > { %5971 = vmatmul.mubr.bf16.gmra.mrb[12].mxu1 %v5250_v4  ;;  %6198 = vmatprep.mubr.bf16.mxu0 %v6660_v22  ;;  %v1312_v45 = vrot.slane %v6747_v53, 5  ;;  %v1233_v4 = vld [vmem:[%s6869_s10 + $0x3c] sm:$0xe]  ;;  %v1316_v22 = vrot.slane %v7446_v30, 5  ;;  %v7541_v30 = vsel %vm7147_vm5, %v5268_v21, %v1288_v7  ;;  %v3786_v21 = vshll.u32 %v5547_v10, 16  ;;  %v6686_v53 = vld [vmem:[%s8658_s1 + $0x1e0] sm:$0xff]  }
  0xae   : > { %5974 = vmatprep.mubr.bf16.mxu1 %v5251_v55  ;;  %6003 = vmatpush3.bf16.msra.mxu1 %v6674_v49  ;;  %v1305_v49 = vrot.slane %v6746_v43, 5  ;;  %v7528_v55 = vrot.slane %v2382_v8, 5  ;;  %v6669_v7 = vld [vmem:[%s6869_s10 + $0x3c] sm:$0xff]   ;;  %v7561_v8 = vsel %vm7147_vm5, %v1297_v46, %v1298_v39  ;;  %v1325_v46 = vrot.slane %v1323_v1, 4  ;;  %v5553_v43 = vld [vmem:[%s6869_s10 + $0x30] sm:$0xf] }
  0xaf   : > { %6004 = vmatprep.subr.bf16.mxu1 %v6680_v56  ;;  %v1326_v39 = vrot.slane %v6749_v38, 5  ;;  %v3785_v10 = vrot.slane %v3783_v5, 4 }
  0xb0   : > { %8679 = vst [vmem:[#allocation2_spill] sm:$0xff] %v7528_v55 }
  0xb2   : > { %6005 = vmatpush3.bf16.msra.mxu1 %v6680_v56  ;;  %v6676_v56 = vld [vmem:[%s8658_s1 + $0x1d0] sm:$0xff]  }
  0xb3   : > { %6038 = vmatprep.subr.bf16.mxu1 %v7494_v60 }
  0xb4   : > { %6199 = vmatmul.mubr.bf16.vlgmr.msra.gmra.mrb[0].mxu0 %v6663_v6  ;;  %v7549_v6 = vsel %vm7147_vm5, %v1290_v33, %v1291_v35  ;;  %v7569_v35 = vsel %vm7147_vm5, %v1304_v42, %v1305_v49  ;;  %v3792_v33 = vshll.u32 %v5548_v19, 16  ;;  %v3788_v19 = vrot.slane %v3786_v21, 5  ;;  %v1237_v21 = vld [vmem:[%s6869_s10 + $0x6c] sm:$0xe] }
  0xb5   : > { %5975 = vmatmul.mubr.bf16.gmra.mrb[16].mxu1 %v5252_v62  ;;  %6231 = vmatpush3.bf16.msra.mxu0 %v7333_v44  ;;  %v5272_v62 = vrot.slane %v1233_v4, 9  ;;  %v5276_v58 = vrot.slane %v1237_v21, 9 }
  0xb6   : > { %5978 = vmatprep.mubr.bf16.mxu1 %v5253_v36  ;;  %6202 = vmatprep.mubr.bf16.mxu0 %v6666_v18  ;;  %v7579_v36 = vsel %vm7147_vm5, %v1311_v52, %v1312_v45  ;;  %v1318_v18 = vrot.slane %v1316_v22, 4  ;;  %v5550_v52 = vld [vmem:[%s6869_s10 + $0x24] sm:$0xf]  ;;  %v3820_v45 = vshrl.u32 %v5551_v13, 16 }
  0xb7   : > { %6232 = vmatprep.subr.bf16.mxu0 %v6670_v47  ;;  %v7596_v49 = vsel %vm7147_vm5, %v5272_v62, %v1316_v22  ;;  %v7613_v22 = vld [vmem:[%s6869_s10 + $0x54] sm:$0xe]  ;;  %v3798_v62 = vrot.slane %v3796_v51, 4  ;;  %v3807_v38 = vshrl.u32 %v5550_v52, 16  ;;  %v3810_v28 = vshll.u32 %v5550_v52, 16 }
  0xb8   : > { %v7610_v4 = vsel %vm7147_vm5, %v1318_v18, %v1319_v17  ;;  %v3802_v17 = vshll.u32 %v5549_v50, 16  ;;  %v5274_v5 = vrot.slane %v7613_v22, 9  ;;  %v6690_v50 = vld [vmem:[%s8658_s1 + $0x1e8] sm:$0xff]   ;;  %v1332_v52 = vrot.slane %v1330_v16, 4 }
  0xb9   : > { %6233 = vmatpush3.bf16.msra.mxu0 %v6670_v47  ;;  %v6682_v47 = vld [vmem:[%s8658_s1 + $0x1d8] sm:$0xff]   ;;  %v3789_v22 = vor.u32 %v3788_v19, %v3785_v10  ;;  %v3809_v34 = vrot.slane %v3807_v38, 4  ;;  %v3812_v44 = vrot.slane %v3810_v28, 5  ;;  %v6754_v10 = vld [vmem:[%s6869_s10 + $0x74] sm:$0x1]  ;;  %v3822_v28 = vrot.slane %v3820_v45, 4 }
  0xba   : > { %6234 = vmatprep.subr.bf16.mxu0 %v6676_v56  ;;  %v7651_v42 = vrot.slane %v3802_v17, 5  ;;  %v1347_v19 = vrot.slane %v6754_v10, 5  ;;  %v3831_v38 = vshrl.u32 %v5553_v43, 16  ;;  %v7676_v27 = vsel %vm7147_vm5, %v5274_v5, %v1330_v16 }
  0xbb   : > { %v3790_v21 = vrot.slane %v3789_v22, 4 }
  0xbc   : > { %6203 = vmatmul.mubr.bf16.gmra.mrb[4].mxu0 %v6669_v7  ;;  %v7623_v7 = vrot.slane %v3792_v33, 5  ;;  %v6752_v33 = vld [vmem:[%s6869_s10 + $0x70] sm:$0xf] }
  0xbd   : > { %5979 = vmatmul.mubr.bf16.gmra.mrb[20].mxu1 %v5254_v15  ;;  %6206 = vmatprep.mubr.bf16.mxu0 %v6672_v0  ;;  %v1337_v15 = vrot.slane %v7617_v40, 5  ;;  %v6751_v0 = vld [vmem:[%s6869_s10 + $0x5c] sm:$0x1]  ;;  %v1344_v51 = vrot.slane %v6752_v33, 5 }
  0xbe   : > { %5982 = vmatprep.mubr.bf16.mxu1 %v5255_v26  ;;  %6235 = vmatpush3.bf16.msra.mxu0 %v6676_v56  ;;  %v1333_v18 = vrot.slane %v6751_v0, 5  ;;  %v7632_v26 = vsel %vm7147_vm5, %v5273_v54, %v1323_v1  ;;  %v7636_v56 = vsel %vm7147_vm5, %v1325_v46, %v1326_v39  ;;  %v6753_v1 = vld [vmem:[%s6869_s10 + $0x68] sm:$0x1]  ;;  %v3816_v0 = vshll.u32 %v5551_v13, 16  ;;  %v6698_v40 = vld [vmem:[%s8658_s1 + $0x1f8] sm:$0xff]  }
  0xbf   : > { %6236 = vmatprep.subr.bf16.mxu0 %v6682_v47  ;;  %v1340_v54 = vrot.slane %v6753_v1, 5  ;;  %v5275_v46 = vrot.slane %v1236_v32, 9  ;;  %v1339_v39 = vrot.slane %v1337_v15, 4  ;;  %v3799_v33 = vor.u32 %v3798_v62, %v7623_v7  ;;  %v5554_v1 = vld [vmem:[%s6869_s10 + $0x34] sm:$0xf] }
  0xc0   : > { %v1346_v32 = vrot.slane %v1344_v51, 4  ;;  %v5552_v62 = vld [vmem:[%s6869_s10 + $0x2c] sm:$0x1]  ;;  %v7663_v17 = vrot.slane %v3816_v0, 5  ;;  %v3840_v13 = vshll.u32 %v5554_v1, 16  ;;  %v3844_v31 = vshrl.u32 %v5554_v1, 16 }
  0xc1   : > { %v3800_v10 = vrot.slane %v3799_v33, 4  ;;  %v7680_v29 = vsel %vm7147_vm5, %v1332_v52, %v1333_v18  ;;  %v7687_v45 = vsel %vm7147_vm5, %v5275_v46, %v1337_v15  ;;  %v7691_v14 = vsel %vm7147_vm5, %v1339_v39, %v1340_v54  ;;  %v1238_v18 = vld [vmem:[%s6869_s10 + $0x78] sm:$0xe] }
  0xc2   : > { %6237 = vmatpush3.bf16.msra.mxu0 %v6682_v47  ;;  %v7695_v16 = vsel %vm7147_vm5, %v5276_v58, %v1344_v51  ;;  %v7705_v15 = vsel %vm7147_vm5, %v1346_v32, %v1347_v19  ;;  %v3823_v5 = vor.u32 %v3822_v28, %v7663_v17  ;;  %v3833_v52 = vrot.slane %v3831_v38, 4  ;;  %v5556_v58 = vld [vmem:[%s6869_s10 + $0x3c] sm:$0xf]  ;;  %v5557_v51 = vld [vmem:[%s6869_s10 + $0x40] sm:$0xf] }
  0xc3   : > { %6238 = vmatprep.subr.bf16.mxu0 %v6686_v53  ;;  %v3795_v0 = vsel %vm6901_vm2, %v3790_v21, %v7623_v7  ;;  %v3805_v46 = vsel %vm6901_vm2, %v3800_v10, %v7651_v42  ;;  %v7716_v39 = vrot.slane %v3840_v13, 5  ;;  %v3846_v22 = vrot.slane %v3844_v31, 4  ;;  %v6756_v19 = vld [vmem:[%s6869_s10 + $0x80] sm:$0x1]  ;;  %v7875_v47 = vld [vmem:[%s6869_s10 + $0x68] sm:$0x1] }
  0xc4   : > { %6207 = vmatmul.mubr.bf16.gmra.mrb[8].mxu0 %v6675_v2  ;;  %v3834_v2 = vshll.u32 %v5553_v43, 16  ;;  %v3826_v43 = vshll.u32 %v5552_v62, 16  ;;  %v5277_v32 = vrot.slane %v1238_v18, 9  ;;  %v1239_v62 = vld [vmem:[%s6869_s10 + $0x84] sm:$0xe]  ;;  %v3855_v28 = vshrl.u32 %v5556_v58, 16 }
  0xc5   : > { %5983 = vmatmul.mubr.bf16.gmra.mrb[24].mxu1 %v5256_v20  ;;  %6210 = vmatprep.mubr.bf16.mxu0 %v6678_v3  ;;  %v6694_v20 = vld [vmem:[%s8658_s1 + $0x1f0] sm:$0xff]   ;;  %v6755_v3 = vld [vmem:[%s6869_s10 + $0x7c] sm:$0xf]  ;;  %v3858_v7 = vshll.u32 %v5556_v58, 16  ;;  %v3864_v38 = vshll.u32 %v5557_v51, 16  ;;  %v8680_v42 = vcombine.low %v7306_v41, %v7311_v12  ;;  %v7727_v13 = vrot.slane %v3823_v5, 4 }
  0xc6   : > { %5986 = vmatprep.mubr.bf16.mxu1 %v5257_v23  ;;  %6239 = vmatpush3.bf16.msra.mxu0 %v6686_v53  ;;  %v3813_v23 = vor.u32 %v3812_v44, %v3809_v34  ;;  %v6683_v53 = vld [vmem:[%s6869_s10 + $0x78] sm:$0xff]   ;;  %v1351_v44 = vrot.slane %v6755_v3, 5  ;;  %v3836_v54 = vrot.slane %v3834_v2, 5  ;;  %v7720_v1 = vrot.slane %v3826_v43, 5  ;;  %v7732_v21 = vld [vmem:[%s8658_s1 + $0x200] sm:$0xff]   ;;  %8688 = vst [vmem:[#allocation5_spill] sm:$0xff] %v7875_v47 }
  0xc7   : > { %6240 = vmatprep.subr.bf16.mxu0 %v6690_v50  ;;  %v5555_v34 = vld [vmem:[%s6869_s10 + $0x38] sm:$0x1]  ;;  %v3868_v2 = vshrl.u32 %v5557_v51, 16  ;;  %v6685_v43 = vld [vmem:[%s6869_s10 + $0x84] sm:$0xff]   ;;  %v3847_v12 = vor.u32 %v3846_v22, %v7716_v39  ;;  %v3860_v58 = vrot.slane %v3858_v7, 5  ;;  %v7754_v51 = vrot.slane %v3864_v38, 5 }
  0xc8   : > { %v7718_v33 = vrot.slane %v3813_v23, 4  ;;  %v1353_v10 = vrot.slane %v1351_v44, 4  ;;  %v3837_v31 = vor.u32 %v3836_v54, %v3833_v52  ;;  %v8681_v23 = vcombine.low %v7537_v59, %v7545_v25  ;;  %v6757_v18 = vld [vmem:[%s6869_s10 + $0x88] sm:$0xf]  ;;  %v5558_v5 = vld [vmem:[%s6869_s10 + $0x44] sm:$0x1] }
  0xc9   : > { %v1358_v3 = vrot.slane %v6757_v18, 5  ;;  %v7745_v59 = vcombine.low %v3795_v0, %v3805_v46  ;;  %v5559_v52 = vld [vmem:[%s6869_s10 + $0x48] sm:$0xf]  ;;  %v3857_v54 = vrot.slane %v3855_v28, 4  ;;  %v3870_v22 = vrot.slane %v3868_v2, 4 }
  0xca   : > { %6241 = vmatpush3.bf16.msra.mxu0 %v6690_v50  ;;  %v1354_v50 = vrot.slane %v6756_v19, 5  ;;  %v6687_v19 = vld [vmem:[%s6869_s10 + $0x90] sm:$0xff]   ;;  %v3819_v0 = vsel %vm6901_vm2, %v7718_v33, %v7663_v17  ;;  %v3838_v46 = vrot.slane %v3837_v31, 4  ;;  %v3829_v28 = vsel %vm6901_vm2, %v7727_v13, %v7720_v1  ;;  %v7776_v33 = vld [vmem:[%s6869_s10 + $0x58] sm:$0xf]  ;;  %v6688_v31 = vld [vmem:[%s8658_s1 + $0xc8] sm:$0xff]  }
  0xcb   : > { %6242 = vmatprep.subr.bf16.mxu0 %v6694_v20  ;;  %v3848_v38 = vrot.slane %v3847_v12, 4  ;;  %v1360_v2 = vrot.slane %v1358_v3, 4  ;;  %v5562_v17 = vld [vmem:[%s6869_s10 + $0x54] sm:$0xf]  ;;  %v3874_v1 = vshll.u32 %v5558_v5, 16  ;;  %v3879_v13 = vshrl.u32 %v5559_v52, 16 }
  0xcc   : > { %6211 = vmatmul.mubr.bf16.gmra.mrb[12].mxu0 %v6681_v48  ;;  %v3850_v48 = vshll.u32 %v5555_v34, 16  ;;  %v7772_v7 = vsel %vm7147_vm5, %v1353_v10, %v1354_v50  ;;  %v3882_v50 = vshll.u32 %v5559_v52, 16  ;;  %v3861_v10 = vor.u32 %v3860_v58, %v3857_v54  ;;  %v6689_v54 = vld [vmem:[%s6869_s10 + $0x9c] sm:$0xff]   ;;  %v6763_v41 = vld [vmem:[%s6869_s10 + $0xac] sm:$0xf] }
  0xcd   : > { %5987 = vmatmul.mubr.bf16.gmra.mrb[28].mxu1 %v8680_v42  ;;  %6214 = vmatprep.mubr.bf16.mxu0 %v6683_v53  ;;  %v5278_v53 = vrot.slane %v1239_v62, 9  ;;  %v6758_v42 = vld [vmem:[%s6869_s10 + $0x8c] sm:$0x1]  ;;  %v3912_v5 = vshll.u32 %v7776_v33, 16  ;;  %v8683_v52 = vcombine.low %v7553_v63, %v7561_v8  ;;  %v7812_v63 = vld [vmem:[%s6869_s10 + $0x50] sm:$0x1] }
  0xce   : > { %6006 = vmatprep.mubr.bf16.mxu1 %v8681_v23  ;;  %6243 = vmatpush3.bf16.msra.mxu0 %v6694_v20  ;;  %v7751_v20 = vsel %vm7147_vm5, %v5277_v32, %v1351_v44  ;;  %v3852_v62 = vrot.slane %v3850_v48, 5  ;;  %v1361_v23 = vrot.slane %v6758_v42, 5  ;;  %v1240_v44 = vld [vmem:[%s6869_s10 + $0x90] sm:$0xe]  ;;  %v7764_v32 = vld [vmem:[%s6869_s10 + $0x4c] sm:$0xf]  ;;  %v3871_v48 = vor.u32 %v3870_v22, %v7754_v51 }
  0xcf   : > { %6244 = vmatprep.subr.bf16.mxu0 %v6698_v40  ;;  %v3888_v12 = vshll.u32 %v7764_v32, 16  ;;  %v3892_v18 = vshrl.u32 %v7764_v32, 16  ;;  %v8682_v42 = vcombine.low %v7541_v30, %v7549_v6  ;;  %v6692_v30 = vld [vmem:[%s8658_s1 + $0xd0] sm:$0xff]   ;;  %v3843_v6 = vsel %vm6901_vm2, %v3838_v46, %v7716_v39  ;;  %v6691_v8 = vld [vmem:[%s6869_s10 + $0xa8] sm:$0xff]   ;;  %v7819_v39 = vld [vmem:[%s6869_s10 + $0x5c] sm:$0x1] }
  0xd0   : > { %v3853_v58 = vsel %vm6901_vm2, %v3848_v38, %v3852_v62  ;;  %v5279_v22 = vrot.slane %v1240_v44, 9  ;;  %v3884_v25 = vrot.slane %v3882_v50, 5  ;;  %8684 = vst [vmem:[#allocation3_spill] sm:$0xff] %v7819_v39  ;;  %v3862_v46 = vrot.slane %v3861_v10, 4 }
  0xd1   : > { %v3872_v62 = vrot.slane %v3871_v48, 4  ;;  %v7821_v38 = vrot.slane %v3888_v12, 5  ;;  %v7823_v34 = vrot.slane %v3912_v5, 5  ;;  %v7828_v50 = vcombine.low %v3819_v0, %v3829_v28  ;;  %v5565_v28 = vld [vmem:[%s6869_s10 + $0x60] sm:$0xf] }
  0xd2   : > { %6245 = vmatpush3.bf16.msra.mxu0 %v6698_v40  ;;  %v7784_v40 = vsel %vm7147_vm5, %v5278_v53, %v1358_v3  ;;  %v3903_v53 = vshrl.u32 %v5562_v17, 16  ;;  %v3906_v3 = vshll.u32 %v5562_v17, 16  ;;  %v6759_v17 = vld [vmem:[%s6869_s10 + $0x94] sm:$0xf]  ;;  %v7832_v48 = vcombine.low %v3843_v6, %v3853_v58 }
  0xd3   : > { %6278 = vmatprep.subr.bf16.mxu0 %v7732_v21  ;;  %v3898_v0 = vshll.u32 %v7812_v63, 16  ;;  %v3867_v6 = vsel %vm6901_vm2, %v3862_v46, %v7754_v51  ;;  %v8687_v46 = vcombine.low %v7575_v61, %v7579_v36 }
  0xd4   : > { %6215 = vmatmul.mubr.bf16.gmra.mrb[16].mxu0 %v6685_v43  ;;  %v3916_v43 = vshrl.u32 %v7776_v33, 16  ;;  %v3905_v44 = vrot.slane %v3903_v53, 4  ;;  %v6760_v53 = vld [vmem:[%s6869_s10 + $0x98] sm:$0x1] }
  0xd5   : > { %6007 = vmatmul.mubr.bf16.vlgmr.msra.gmra.mrb[0].mxu1 %v8682_v42  ;;  %6218 = vmatprep.mubr.bf16.mxu0 %v6687_v19  ;;  %v7815_v19 = vrot.slane %v3874_v1, 5  ;;  %v1365_v42 = vrot.slane %v6759_v17, 5  ;;  %v6761_v17 = vld [vmem:[%s6869_s10 + $0xa0] sm:$0xf]  ;;  %v3900_v36 = vrot.slane %v3898_v0, 5 }
  0xd6   : > { %6039 = vmatpush3.bf16.msra.mxu1 %v7494_v60  ;;  %6010 = vmatprep.mubr.bf16.mxu1 %v8683_v52  ;;  %v7809_v60 = vsel %vm7147_vm5, %v1360_v2, %v1361_v23  ;;  %v3881_v52 = vrot.slane %v3879_v13, 4  ;;  %v3894_v23 = vrot.slane %v3892_v18, 4  ;;  %v3908_v2 = vrot.slane %v3906_v3, 5  ;;  %v6696_v13 = vld [vmem:[%s8658_s1 + $0xd8] sm:$0xff]  }
  0xd7   : > { %6040 = vmatprep.subr.bf16.mxu1 %v6688_v31  ;;  %v3918_v1 = vrot.slane %v3916_v43, 4  ;;  %v1241_v18 = vld [vmem:[%s6869_s10 + $0x9c] sm:$0xe]  ;;  %v1368_v3 = vrot.slane %v6760_v53, 5  ;;  %v7845_v43 = vld [vmem:[%s6869_s10 + $0x64] sm:$0xf] }
  0xd8   : > { %v3885_v5 = vor.u32 %v3884_v25, %v3881_v52  ;;  %8685 = vst [vmem:[#allocation4_spill] sm:$0xff] %v7845_v43  ;;  %v3895_v58 = vor.u32 %v3894_v23, %v7821_v38  ;;  %v1372_v12 = vrot.slane %v6761_v17, 5  ;;  %v8686_v25 = vcombine.low %v7565_v24, %v7569_v35  ;;  %v6693_v23 = vld [vmem:[%s6869_s10 + $0xb4] sm:$0xff]   ;;  %v6699_v24 = vld [vmem:[%s8658_s1 + $0xe0] sm:$0xff]   ;;  %v5568_v17 = vld [vmem:[%s6869_s10 + $0x6c] sm:$0xf] }
  0xd9   : > { %v1367_v52 = vrot.slane %v1365_v42, 4  ;;  %v3909_v53 = vor.u32 %v3908_v2, %v3905_v44  ;;  %v3919_v51 = vor.u32 %v3918_v1, %v7823_v34  ;;  %v3927_v35 = vshrl.u32 %v5565_v28, 16  ;;  %v6762_v2 = vld [vmem:[%s6869_s10 + $0xa4] sm:$0x1] }
  0xda   : > { %6041 = vmatpush3.bf16.msra.mxu1 %v6688_v31  ;;  %v7839_v31 = vsel %vm7147_vm5, %v5279_v22, %v1365_v42  ;;  %v3922_v22 = vshll.u32 %v7819_v39, 16  ;;  %v3940_v42 = vshrl.u32 %v7845_v43, 16  ;;  %v3886_v61 = vrot.slane %v3885_v5, 4  ;;  %v8014_v39 = vld [vmem:[%s6869_s10 + $0x98] sm:$0x1] }
  0xdb   : > { %6042 = vmatprep.subr.bf16.mxu1 %v6692_v30  ;;  %v5280_v44 = vrot.slane %v1241_v18, 9  ;;  %v1375_v1 = vrot.slane %v6762_v2, 5  ;;  %v3910_v5 = vrot.slane %v3909_v53, 4  ;;  %v3920_v18 = vrot.slane %v3919_v51, 4  ;;  %8701 = vst [vmem:[#allocation14_spill] sm:$0xff] %v8014_v39 }
  0xdc   : > { %6219 = vmatmul.mubr.bf16.gmra.mrb[20].mxu0 %v6689_v54  ;;  %v3877_v54 = vsel %vm6901_vm2, %v3872_v62, %v7815_v19  ;;  %v3936_v19 = vshll.u32 %v7845_v43, 16  ;;  %v6695_v62 = vld [vmem:[%s6869_s10 + $0xc0] sm:$0xff]   ;;  %v3924_v10 = vrot.slane %v3922_v22, 5  ;;  %v7881_v43 = vsel %vm7147_vm5, %v1367_v52, %v1368_v3 }
  0xdd   : > { %6011 = vmatmul.mubr.bf16.gmra.mrb[4].mxu1 %v8686_v25  ;;  %6222 = vmatprep.mubr.bf16.mxu0 %v6691_v8  ;;  %v3930_v8 = vshll.u32 %v5565_v28, 16  ;;  %v3896_v25 = vrot.slane %v3895_v58, 4  ;;  %v1379_v28 = vrot.slane %v6763_v41, 5  ;;  %v7877_v55 = vcombine.low %v3867_v6, %v3877_v54  ;;  %v6701_v41 = vld [vmem:[%s8658_s1 + $0xe8] sm:$0xff]  }
  0xde   : > { %6014 = vmatprep.mubr.bf16.mxu1 %v8687_v46  ;;  %6043 = vmatpush3.bf16.msra.mxu1 %v6692_v30  ;;  %v1242_v30 = vld [vmem:[%s6869_s10 + $0xa8] sm:$0xe]  ;;  %v1374_v46 = vrot.slane %v1372_v12, 4  ;;  %v3929_v0 = vrot.slane %v3927_v35, 4  ;;  %v7883_v58 = vrot.slane %v3936_v19, 5  ;;  %v3942_v22 = vrot.slane %v3940_v42, 4 }
  0xdf   : > { %6044 = vmatprep.subr.bf16.mxu1 %v6696_v13  ;;  %v3932_v2 = vrot.slane %v3930_v8, 5  ;;  %v3891_v3 = vsel %vm6901_vm2, %v3886_v61, %v7821_v38  ;;  %v7893_v6 = vsel %vm7147_vm5, %v5280_v44, %v1372_v12  ;;  %v3951_v54 = vshrl.u32 %v5568_v17, 16  ;;  %v6764_v38 = vld [vmem:[%s6869_s10 + $0xb0] sm:$0x1]  ;;  %v1243_v19 = vld [vmem:[%s6869_s10 + $0xb4] sm:$0xe] }
  0xe0   : > { %v3954_v52 = vshll.u32 %v5568_v17, 16  ;;  %v3901_v53 = vsel %vm6901_vm2, %v3896_v25, %v3900_v36  ;;  %v7902_v51 = vsel %vm7147_vm5, %v1374_v46, %v1375_v1  ;;  %v5281_v35 = vrot.slane %v1242_v30, 9  ;;  %v7924_v30 = vld [vmem:[%s6869_s10 + $0x74] sm:$0x1]  ;;  %v6765_v25 = vld [vmem:[%s6869_s10 + $0xb8] sm:$0xf] }
  0xe1   : > { %v1382_v8 = vrot.slane %v6764_v38, 5  ;;  %v8690_v12 = vcombine.low %v7596_v49, %v7610_v4  ;;  %v3915_v42 = vsel %vm6901_vm2, %v3910_v5, %v7823_v34  ;;  %v3925_v61 = vsel %vm6901_vm2, %v3920_v18, %v3924_v10  ;;  %v6697_v4 = vld [vmem:[%s6869_s10 + $0xcc] sm:$0xff]   ;;  %8692 = vst [vmem:[#allocation7_spill] sm:$0xff] %v7924_v30  ;;  %v5574_v38 = vld [vmem:[%s6869_s10 + $0x84] sm:$0xf] }
  0xe2   : > { %6045 = vmatpush3.bf16.msra.mxu1 %v6696_v13  ;;  %v7896_v13 = vld [vmem:[%s6869_s10 + $0x70] sm:$0xf]  ;;  %v1381_v36 = vrot.slane %v1379_v28, 4  ;;  %v3946_v44 = vshll.u32 %v7875_v47, 16  ;;  %v8691_v49 = vcombine.low %v7632_v26, %v7636_v56  ;;  %v3943_v1 = vor.u32 %v3942_v22, %v7883_v58  ;;  %v7941_v22 = vld [vmem:[%s6869_s10 + $0x7c] sm:$0xf] }
  0xe3   : > { %6046 = vmatprep.subr.bf16.mxu1 %v6699_v24  ;;  %8689 = vst [vmem:[#allocation6_spill] sm:$0xff] %v7896_v13  ;;  %v3960_v34 = vshll.u32 %v7896_v13, 16  ;;  %v3964_v10 = vshrl.u32 %v7896_v13, 16  ;;  %v5282_v17 = vrot.slane %v1243_v19, 9  ;;  %v1386_v46 = vrot.slane %v6765_v25, 5  ;;  %8693 = vst [vmem:[#allocation8_spill] sm:$0xff] %v7941_v22 }
  0xe4   : > { %6223 = vmatmul.mubr.bf16.gmra.mrb[24].mxu0 %v6693_v23  ;;  %v6703_v23 = vld [vmem:[%s8658_s1 + $0xf0] sm:$0xff]   ;;  %v3953_v26 = vrot.slane %v3951_v54, 4  ;;  %v3956_v56 = vrot.slane %v3954_v52, 5  ;;  %v7932_v18 = vcombine.low %v3891_v3, %v3901_v53  ;;  %v7944_v19 = vcombine.low %v3915_v42, %v3925_v61  ;;  %v6766_v3 = vld [vmem:[%s6869_s10 + $0xbc] sm:$0x1] }
  0xe5   : > { %6015 = vmatmul.mubr.bf16.gmra.mrb[8].mxu1 %v8690_v12  ;;  %6226 = vmatprep.mubr.bf16.mxu0 %v6695_v62  ;;  %v3933_v62 = vor.u32 %v3932_v2, %v3929_v0  ;;  %v7938_v2 = vsel %vm7147_vm5, %v5281_v35, %v1379_v28  ;;  %v7948_v54 = vsel %vm7147_vm5, %v1381_v36, %v1382_v8  ;;  %v7950_v52 = vrot.slane %v3946_v44, 5  ;;  %v6705_v12 = vld [vmem:[%s8658_s1 + $0xf8] sm:$0xff]   ;;  %v7957_v28 = vld [vmem:[%s6869_s10 + $0x88] sm:$0xf] }
  0xe6   : > { %6018 = vmatprep.mubr.bf16.mxu1 %v8691_v49  ;;  %6047 = vmatpush3.bf16.msra.mxu1 %v6699_v24  ;;  %v5571_v24 = vld [vmem:[%s6869_s10 + $0x78] sm:$0xf]  ;;  %v1389_v53 = vrot.slane %v6766_v3, 5  ;;  %8694 = vst [vmem:[#allocation9_spill] sm:$0xff] %v7957_v28  ;;  %v7961_v42 = vrot.slane %v3943_v1, 4  ;;  %v7963_v61 = vrot.slane %v3960_v34, 5  ;;  %v7967_v36 = vsel %vm7147_vm5, %v5282_v17, %v1386_v46 }
  0xe7   : > { %6048 = vmatprep.subr.bf16.mxu1 %v6701_v41  ;;  %v7959_v35 = vrot.slane %v3933_v62, 4  ;;  %v3966_v8 = vrot.slane %v3964_v10, 4  ;;  %v1388_v44 = vrot.slane %v1386_v46, 4  ;;  %v3957_v49 = vor.u32 %v3956_v56, %v3953_v26  ;;  %v5577_v3 = vld [vmem:[%s6869_s10 + $0x90] sm:$0xf] }
  0xe8   : > { %v3970_v25 = vshll.u32 %v7924_v30, 16  ;;  %v3978_v0 = vshll.u32 %v5571_v24, 16  ;;  %v3984_v62 = vshll.u32 %v7941_v22, 16  ;;  %v3988_v1 = vshrl.u32 %v7941_v22, 16  ;;  %v7974_v34 = vld [vmem:[%s6869_s10 + $0x94] sm:$0xf] }
  0xe9   : > { %8695 = vst [vmem:[#allocation10_spill] sm:$0xff] %v7974_v34  ;;  %v8696_v10 = vcombine.low %v7676_v27, %v7680_v29  ;;  %v3999_v17 = vshrl.u32 %v5574_v38, 16  ;;  %v4002_v46 = vshll.u32 %v5574_v38, 16  ;;  %v4012_v26 = vshrl.u32 %v7957_v28, 16  ;;  %v5580_v38 = vld [vmem:[%s6869_s10 + $0x9c] sm:$0xf] }
  0xea   : > { %6049 = vmatpush3.bf16.msra.mxu1 %v6701_v41  ;;  %v3975_v41 = vshrl.u32 %v5571_v24, 16  ;;  %v8697_v56 = vcombine.low %v7687_v45, %v7691_v14  ;;  %v3967_v29 = vor.u32 %v3966_v8, %v7963_v61  ;;  %v4026_v24 = vshll.u32 %v5577_v3, 16  ;;  %v7996_v45 = vld [vmem:[%s6869_s10 + $0x80] sm:$0x1] }
  0xeb   : > { %6050 = vmatprep.subr.bf16.mxu1 %v6703_v23  ;;  %v7993_v5 = vrot.slane %v3970_v25, 5  ;;  %8698 = vst [vmem:[#allocation11_spill] sm:$0xff] %v7996_v45  ;;  %v4032_v14 = vshll.u32 %v7974_v34, 16  ;;  %v3980_v27 = vrot.slane %v3978_v0, 5  ;;  %v3990_v8 = vrot.slane %v3988_v1, 4 }
  0xec   : > { %6227 = vmatmul.mubr.bf16.gmra.mrb[28].mxu0 %v6697_v4  ;;  %v4008_v4 = vshll.u32 %v7957_v28, 16  ;;  %v8000_v28 = vrot.slane %v3984_v62, 5  ;;  %v8006_v22 = vld [vmem:[%s6869_s10 + $0xa0] sm:$0xf]  ;;  %v4001_v25 = vrot.slane %v3999_v17, 4  ;;  %v4004_v30 = vrot.slane %v4002_v46, 5 }
  0xed   : > { %6019 = vmatmul.mubr.bf16.gmra.mrb[12].mxu1 %v8696_v10  ;;  %6246 = vmatprep.mubr.bf16.mxu0 %v7745_v59  ;;  %v4023_v59 = vshrl.u32 %v5577_v3, 16  ;;  %v7991_v10 = vrot.slane %v3957_v49, 4  ;;  %v8003_v3 = vld [vmem:[%s6869_s10 + $0x8c] sm:$0x1]  ;;  %8700 = vst [vmem:[#allocation13_spill] sm:$0xff] %v8006_v22  ;;  %v4014_v47 = vrot.slane %v4012_v26, 4  ;;  %v8023_v62 = vsel %vm7147_vm5, %v1388_v44, %v1389_v53 }
  0xee   : > { %6022 = vmatprep.mubr.bf16.mxu1 %v8697_v56  ;;  %6051 = vmatpush3.bf16.msra.mxu1 %v6703_v23  ;;  %v4036_v23 = vshrl.u32 %v7974_v34, 16  ;;  %v3977_v56 = vrot.slane %v3975_v41, 4  ;;  %8699 = vst [vmem:[#allocation12_spill] sm:$0xff] %v8003_v3  ;;  %v6702_v49 = vld [vmem:[%s8658_s1 + $0x208] sm:$0xff]   ;;  %v8011_v13 = vrot.slane %v4008_v4, 5  ;;  %v4028_v34 = vrot.slane %v4026_v24, 5 }
  0xef   : > { %6052 = vmatprep.subr.bf16.mxu1 %v6705_v12  ;;  %v5583_v41 = vld [vmem:[%s6869_s10 + $0xa8] sm:$0xf]  ;;  %v4025_v1 = vrot.slane %v4023_v59, 4  ;;  %v8028_v17 = vld [vmem:[%s8658_s1 + $0x100] sm:$0xff]   ;;  %v8031_v46 = vrot.slane %v4032_v14, 5  ;;  %v4047_v26 = vshrl.u32 %v5580_v38, 16  ;;  %v8703_v24 = vcombine.low %v7695_v16, %v7705_v15 }
  0xf0   : > { %8702 = vst [vmem:[#allocation15_spill] sm:$0xff] %v8028_v17  ;;  %v4038_v4 = vrot.slane %v4036_v23, 4  ;;  %v4050_v0 = vshll.u32 %v5580_v38, 16  ;;  %v8034_v53 = vrot.slane %v3967_v29, 4  ;;  %v4056_v44 = vshll.u32 %v8006_v22, 16  ;;  %v6704_v16 = vld [vmem:[%s8658_s1 + $0x210] sm:$0xff]  }
  0xf1   : > { %v4060_v59 = vshrl.u32 %v8006_v22, 16  ;;  %v3981_v14 = vor.u32 %v3980_v27, %v3977_v56  ;;  %v3991_v38 = vor.u32 %v3990_v8, %v8000_v28  ;;  %v4005_v23 = vor.u32 %v4004_v30, %v4001_v25  ;;  %v8046_v29 = vld [vmem:[%s6869_s10 + $0xac] sm:$0xf]  ;;  %v8059_v25 = vld [vmem:[%s6869_s10 + $0xa4] sm:$0x1] }
  0xf2   : > { %6053 = vmatpush3.bf16.msra.mxu1 %v6705_v12  ;;  %v3994_v12 = vshll.u32 %v7996_v45, 16  ;;  %8704 = vst [vmem:[#allocation16_spill] sm:$0xff] %v8046_v29  ;;  %v4015_v15 = vor.u32 %v4014_v47, %v8011_v13  ;;  %v4071_v27 = vshrl.u32 %v5583_v41, 16  ;;  %v4074_v30 = vshll.u32 %v5583_v41, 16 }
  0xf3   : > { %6326 = vmatprep.subr.bf16.mxu1 %v8028_v17  ;;  %v8705_v17 = vcombine.low %v7751_v20, %v7772_v7  ;;  %v4029_v56 = vor.u32 %v4028_v34, %v4025_v1  ;;  %v4039_v8 = vor.u32 %v4038_v4, %v8031_v46  ;;  %v4049_v20 = vrot.slane %v4047_v26, 4 }
  0xf4   : > { %6247 = vmatmul.mubr.bf16.vlgmr.msra.gmra.mrb[0].mxu0 %v7828_v50  ;;  %v4018_v50 = vshll.u32 %v8003_v3, 16  ;;  %v4052_v7 = vrot.slane %v4050_v0, 5  ;;  %v4084_v22 = vshrl.u32 %v8046_v29, 16  ;;  %v3982_v47 = vrot.slane %v3981_v14, 4  ;;  %v6706_v0 = vld [vmem:[%s8658_s1 + $0x218] sm:$0xff]  }
  0xf5   : > { %6023 = vmatmul.mubr.bf16.gmra.mrb[16].mxu1 %v8703_v24  ;;  %6279 = vmatpush3.bf16.msra.mxu0 %v7732_v21  ;;  %v4042_v21 = vshll.u32 %v8014_v39, 16  ;;  %v4080_v24 = vshll.u32 %v8046_v29, 16  ;;  %v3992_v39 = vrot.slane %v3991_v38, 4  ;;  %v3996_v3 = vrot.slane %v3994_v12, 5 }
  0xf6   : > { %6026 = vmatprep.mubr.bf16.mxu1 %v8705_v17  ;;  %6250 = vmatprep.mubr.bf16.mxu0 %v7832_v48  ;;  %v8061_v17 = vrot.slane %v4056_v44, 5  ;;  %v4062_v48 = vrot.slane %v4060_v59, 4  ;;  %v4020_v41 = vrot.slane %v4018_v50, 5  ;;  %v4006_v34 = vrot.slane %v4005_v23, 4 }
  0xf7   : > { %6280 = vmatprep.subr.bf16.mxu0 %v6702_v49  ;;  %v4016_v1 = vrot.slane %v4015_v15, 4  ;;  %v4073_v4 = vrot.slane %v4071_v27, 4  ;;  %v4076_v45 = vrot.slane %v4074_v30, 5  ;;  %v4030_v26 = vrot.slane %v4029_v56, 4  ;;  %v8127_v27 = vld [vmem:[%s6869_s10 + $0xbc] sm:$0x1] }
  0xf8   : > { %v4044_v44 = vrot.slane %v4042_v21, 5  ;;  %v4053_v59 = vor.u32 %v4052_v7, %v4049_v20  ;;  %v4066_v29 = vshll.u32 %v8059_v25, 16  ;;  %v4063_v12 = vor.u32 %v4062_v48, %v8061_v17  ;;  %v8094_v21 = vld [vmem:[%s6869_s10 + $0xb0] sm:$0x1] }
  0xf9   : > { %6281 = vmatpush3.bf16.msra.mxu0 %v6702_v49  ;;  %v4040_v49 = vrot.slane %v4039_v8, 4  ;;  %v8071_v14 = vrot.slane %v4080_v24, 5  ;;  %v4086_v38 = vrot.slane %v4084_v22, 4  ;;  %v8706_v23 = vor.u32 %v7479_v57, %v7477_v11 }
  0xfa   : > { %6282 = vmatprep.subr.bf16.mxu0 %v6704_v16  ;;  %v8707_v15 = vcombine.low %v7784_v40, %v7809_v60  ;;  %v3973_v22 = vsel %vm6901_vm2, %v8034_v53, %v7993_v5  ;;  %v3987_v57 = vsel %vm6901_vm2, %v3982_v47, %v8000_v28  ;;  %v8708_v40 = vcombine.low %v7839_v31, %v7881_v43  ;;  %v6709_v31 = vld [vmem:[%s8658_s1 + $0x220] sm:$0xff]  }
  0xfb   : > { %v8076_v50 = vrot.slane %v8706_v23, 4  ;;  %v3997_v60 = vsel %vm6901_vm2, %v3992_v39, %v3996_v3  ;;  %v4077_v5 = vor.u32 %v4076_v45, %v4073_v4  ;;  %v4021_v28 = vsel %vm6901_vm2, %v4016_v1, %v4020_v41  ;;  %v5623_v41 = vld [vmem:[%s6869_s10 + $0x48] sm:$0xe] }
  0xfc   : > { %6251 = vmatmul.mubr.bf16.gmra.mrb[4].mxu0 %v7877_v55  ;;  %v3963_v55 = vsel %vm6901_vm2, %v7991_v10, %v7963_v61  ;;  %v5586_v61 = vld [vmem:[%s6869_s10 + $0xb4] sm:$0xf]  ;;  %v8106_v10 = vld [vmem:[%s6869_s10 + $0xb8] sm:$0xf]  ;;  %v4035_v39 = vsel %vm6901_vm2, %v4030_v26, %v8031_v46  ;;  %v8116_v43 = vrot.slane %v4053_v59, 4  ;;  %v8118_v3 = vrot.slane %v4066_v29, 5 }
  0xfd   : > { %6027 = vmatmul.mubr.bf16.gmra.mrb[20].mxu1 %v8707_v15  ;;  %6254 = vmatprep.mubr.bf16.mxu0 %v7932_v18  ;;  %v4011_v18 = vsel %vm6901_vm2, %v4006_v34, %v8011_v13  ;;  %v4045_v13 = vsel %vm6901_vm2, %v4040_v49, %v4044_v44  ;;  %v8122_v45 = vrot.slane %v4063_v12, 4  ;;  %v4087_v53 = vor.u32 %v4086_v38, %v8071_v14  ;;  %v5624_v26 = vld [vmem:[%s6869_s10 + $0x54] sm:$0xe] }
  0xfe   : > { %6030 = vmatprep.mubr.bf16.mxu1 %v8708_v40  ;;  %6283 = vmatpush3.bf16.msra.mxu0 %v6704_v16  ;;  %v4090_v16 = vshll.u32 %v8094_v21, 16  ;;  %v8709_v46 = vsel %vm6901_vm2, %v7961_v42, %v7950_v52  ;;  %v8710_v29 = vsel %vm6901_vm2, %v7959_v35, %v7883_v58  ;;  %v4095_v56 = vshrl.u32 %v5586_v61, 16 }
  0xff   : > { %6284 = vmatprep.subr.bf16.mxu0 %v6706_v0  ;;  %v5601_v30 = vcombine.low %v8710_v29, %v8709_v46  ;;  %v4098_v8 = vshll.u32 %v5586_v61, 16  ;;  %v4104_v20 = vshll.u32 %v8106_v10, 16  ;;  %v5297_v7 = vcombine.low %v7938_v2, %v7948_v54  ;;  %v6712_v2 = vld [vmem:[%s8658_s1 + $0x228] sm:$0xff]   ;;  %v5589_v54 = vld [vmem:[%s6869_s10 + $0xc0] sm:$0xf]  ;;  %v8714_v29 = vld [vmem:[#allocation5_spill] sm:$0xff] }
 0x100   : > { %v5298_v48 = vcombine.low %v7967_v36, %v8023_v62  ;;  %v5602_v24 = vcombine.low %v3963_v55, %v3973_v22  ;;  %v8144_v52 = vrot.slane %v4077_v5, 4  ;;  %v5603_v42 = vcombine.low %v3987_v57, %v3997_v60 }
 0x101   : > { %v8146_v58 = vcombine.low %v4011_v18, %v4021_v28  ;;  %v8148_v35 = vcombine.low %v4035_v39, %v4045_v13  ;;  %v4059_v47 = vsel %vm6901_vm2, %v8116_v43, %v8061_v17  ;;  %v4069_v34 = vsel %vm6901_vm2, %v8122_v45, %v8118_v3  ;;  %v5626_v28 = vld [vmem:[%s6869_s10 + $0x6c] sm:$0xe] }
 0x102   : > { %6285 = vmatpush3.bf16.msra.mxu0 %v6706_v0  ;;  %v8164_v1 = vrot.slane %v4087_v53, 4  ;;  %v8166_v4 = vrot.slane %v4090_v16, 5  ;;  %v4108_v0 = vshrl.u32 %v8106_v10, 16  ;;  %v8711_v44 = vcombine.low %v7893_v6, %v7902_v51  ;;  %v6715_v6 = vld [vmem:[%s8658_s1 + $0x230] sm:$0xff]   ;;  %v8188_v51 = vld [vmem:[%s6869_s10 + $0xc4] sm:$0xf] }
 0x103   : > { %6286 = vmatprep.subr.bf16.mxu0 %v6709_v31  ;;  %v8173_v59 = vrot.slane %v4095_v56, 4  ;;  %v8177_v49 = vrot.slane %v4104_v20, 5  ;;  %v4114_v12 = vshll.u32 %v8127_v27, 16  ;;  %v4083_v38 = vsel %vm6901_vm2, %v8144_v52, %v8071_v14  ;;  %v5625_v14 = vld [vmem:[%s6869_s10 + $0x60] sm:$0xe]  ;;  %v8712_v39 = vld [vmem:[#allocation3_spill] sm:$0xff] }
 0x104   : > { %6255 = vmatmul.mubr.bf16.gmra.mrb[8].mxu0 %v7944_v19  ;;  %v8175_v19 = vrot.slane %v4098_v8, 5  ;;  %v4119_v23 = vshrl.u32 %v5589_v54, 16  ;;  %v5639_v15 = vrot.slane %v5623_v41, 9  ;;  %v4581_v55 = vrot.slane %v7764_v32, 5  ;;  %v6707_v13 = vld [vmem:[%s6869_s10 + $0xc] sm:$0xff]   ;;  %v6718_v56 = vld [vmem:[%s8658_s1 + $0x238] sm:$0xff]  }
 0x105   : > { %6031 = vmatmul.mubr.bf16.gmra.mrb[24].mxu1 %v8711_v44  ;;  %6258 = vmatprep.mubr.bf16.mxu0 %v5601_v30  ;;  %v4122_v22 = vshll.u32 %v5589_v54, 16  ;;  %v4584_v57 = vrot.slane %v7812_v63, 5  ;;  %v5640_v40 = vrot.slane %v5624_v26, 9  ;;  %v4588_v60 = vrot.slane %v7776_v33, 5  ;;  %v8713_v16 = vld [vmem:[#allocation4_spill] sm:$0xff]  ;;  %v8715_v52 = vld [vmem:[#allocation6_spill] sm:$0xff] }
 0x106   : > { %6034 = vmatprep.mubr.bf16.mxu1 %v5297_v7  ;;  %6287 = vmatpush3.bf16.msra.mxu0 %v6709_v31  ;;  %v4093_v18 = vsel %vm6901_vm2, %v8164_v1, %v8166_v4  ;;  %v8198_v5 = vrot.slane %v4108_v0, 4  ;;  %v8202_v61 = vsel %vm7147_vm5, %v5639_v15, %v4581_v55  ;;  %v4583_v32 = vrot.slane %v4581_v55, 4  ;;  %v8716_v4 = vld [vmem:[#allocation7_spill] sm:$0xff] }
 0x107   : > { %6288 = vmatprep.subr.bf16.mxu0 %v6712_v2  ;;  %v4128_v31 = vshll.u32 %v8188_v51, 16  ;;  %v8208_v63 = vsel %vm7147_vm5, %v5640_v40, %v4588_v60  ;;  %v4590_v33 = vrot.slane %v4588_v60, 4  ;;  %v4591_v3 = vrot.slane %v8712_v39, 5  ;;  %v8239_v26 = vld [vmem:[%s6869_s10 + $0xc8] sm:$0x1]  ;;  %v6708_v40 = vld [vmem:[%s6869_s10 + $0x18] sm:$0xff]  }
 0x108   : > { %v8214_v45 = vsel %vm7147_vm5, %v4583_v32, %v4584_v57  ;;  %v5641_v53 = vrot.slane %v5625_v14, 9  ;;  %v4595_v46 = vrot.slane %v8713_v16, 5  ;;  %v4598_v30 = vrot.slane %v8714_v29, 5  ;;  %v6710_v39 = vld [vmem:[%s6869_s10 + $0x24] sm:$0xff]  }
 0x109   : > { %v5655_v8 = vcombine.low %v8202_v61, %v8214_v45  ;;  %v8225_v20 = vsel %vm7147_vm5, %v4590_v33, %v4591_v3  ;;  %v5642_v7 = vrot.slane %v5626_v28, 9  ;;  %v4605_v0 = vrot.slane %v8716_v4, 5  ;;  %v8718_v28 = vld [vmem:[#allocation11_spill] sm:$0xff]  ;;  %v5396_v61 = vld [vmem:[%s6869_s10 + $0x90] sm:$0xf] }
 0x10a   : > { %6289 = vmatpush3.bf16.msra.mxu0 %v6712_v2  ;;  %v4602_v2 = vrot.slane %v8715_v52, 5  ;;  %v5656_v54 = vcombine.low %v8208_v63, %v8225_v20  ;;  %v8232_v41 = vsel %vm7147_vm5, %v5641_v53, %v4595_v46  ;;  %v4597_v1 = vrot.slane %v4595_v46, 4  ;;  %v8719_v53 = vld [vmem:[#allocation2_spill] sm:$0xff]  ;;  %v6724_v45 = vld [vmem:[%s6869_s10 + $0xa8] sm:$0xff]  }
 0x10b   : > { %6290 = vmatprep.subr.bf16.mxu0 %v6715_v6  ;;  %v8241_v44 = vrot.slane %v4119_v23, 4  ;;  %v8254_v36 = vcombine.low %v4059_v47, %v4069_v34  ;;  %v4101_v62 = vor.u32 %v8175_v19, %v8173_v59  ;;  %v5627_v23 = vld [vmem:[%s6869_s10 + $0x78] sm:$0xe]  ;;  %v8266_v57 = vrot.slane %v4114_v12, 5  ;;  %v5592_v12 = vld [vmem:[%s6869_s10 + $0xcc] sm:$0xf] }
 0x10c   : > { %6259 = vmatmul.mubr.bf16.gmra.mrb[12].mxu0 %v5602_v24  ;;  %v8243_v24 = vrot.slane %v4122_v22, 5  ;;  %v8247_v15 = vsel %vm7147_vm5, %v5642_v7, %v4602_v2  ;;  %v4604_v55 = vrot.slane %v4602_v2, 4  ;;  %v8264_v22 = vcombine.low %v4083_v38, %v4093_v18  ;;  %v5390_v47 = vld [vmem:[%s6869_s10 + $0x78] sm:$0xf]  ;;  %v8717_v18 = vld [vmem:[#allocation8_spill] sm:$0xff] }
 0x10d   : > { %6035 = vmatmul.mubr.bf16.gmra.mrb[28].mxu1 %v5298_v48  ;;  %6262 = vmatprep.mubr.bf16.mxu0 %v5603_v42  ;;  %v4132_v48 = vshrl.u32 %v8188_v51, 16  ;;  %v8261_v42 = vsel %vm7147_vm5, %v4597_v1, %v4598_v30  ;;  %v4111_v34 = vor.u32 %v8198_v5, %v8177_v49  ;;  %v8277_v59 = vrot.slane %v4128_v31, 5  ;;  %v8291_v31 = vld [vmem:[%s6869_s10 + $0xd0] sm:$0xf]  ;;  %v8720_v1 = vld [vmem:[#allocation9_spill] sm:$0xff] }
 0x10e   : > { %6054 = vmatprep.mubr.bf16.mxu1 %v6707_v13  ;;  %6291 = vmatpush3.bf16.msra.mxu0 %v6715_v6  ;;  %v5657_v17 = vcombine.low %v8232_v41, %v8261_v42  ;;  %v8272_v43 = vsel %vm7147_vm5, %v4604_v55, %v4605_v0  ;;  %v4138_v19 = vshll.u32 %v8239_v26, 16  ;;  %v5628_v6 = vld [vmem:[%s6869_s10 + $0x84] sm:$0xe]  ;;  %v4125_v60 = vor.u32 %v8243_v24, %v8241_v44  ;;  %v8721_v24 = vld [vmem:[#allocation12_spill] sm:$0xff]  ;;  %v6788_v63 = vld [vmem:[%s6869_s10 + $0x8c] sm:$0x1] }
 0x10f   : > { %6292 = vmatprep.subr.bf16.mxu0 %v6718_v56  ;;  %v5658_v38 = vcombine.low %v8247_v15, %v8272_v43  ;;  %v5643_v14 = vrot.slane %v5627_v23, 9  ;;  %v4609_v32 = vrot.slane %v8717_v18, 5  ;;  %v4612_v33 = vrot.slane %v8718_v28, 5 }
 0x110   : > { %v4134_v5 = vrot.slane %v4132_v48, 4  ;;  %v2363_v3 = vshrl.u32 %v5390_v47, 16  ;;  %v2366_v13 = vshll.u32 %v5390_v47, 16  ;;  %v2385_v16 = vsel %vm6901_vm2, %v8076_v50, %v8719_v53 }
 0x111   : > { %v4143_v46 = vshrl.u32 %v5592_v12, 16  ;;  %v8299_v29 = vsel %vm7147_vm5, %v5643_v14, %v4609_v32  ;;  %v4611_v30 = vrot.slane %v4609_v32, 4  ;;  %v5644_v7 = vrot.slane %v5628_v6, 9  ;;  %v6768_v6 = vld [vmem:[%s8658_s1 + $0x108] sm:$0xff]  }
 0x112   : > { %6293 = vmatpush3.bf16.msra.mxu0 %v6718_v56  ;;  %v4146_v52 = vshll.u32 %v5592_v12, 16  ;;  %v2365_v2 = vrot.slane %v2363_v3, 4  ;;  %v2368_v56 = vrot.slane %v2366_v13, 5  ;;  %v4616_v4 = vrot.slane %v8720_v1, 5  ;;  %v5629_v12 = vld [vmem:[%s6869_s10 + $0x90] sm:$0xe] }
 0x113   : > { %v4152_v50 = vshll.u32 %v8291_v31, 16  ;;  %v4156_v0 = vshrl.u32 %v8291_v31, 16  ;;  %v8308_v44 = vsel %vm7147_vm5, %v4611_v30, %v4612_v33  ;;  %v4619_v55 = vrot.slane %v8721_v24, 5  ;;  %v6711_v3 = vld [vmem:[%s6869_s10 + $0x30] sm:$0xff]  }
 0x114   : > { %6263 = vmatmul.mubr.bf16.gmra.mrb[16].mxu0 %v8146_v58  ;;  %v8722_v58 = vld [vmem:[#allocation15_spill] sm:$0xff]  ;;  %v4135_v48 = vor.u32 %v4134_v5, %v8277_v59  ;;  %v2369_v23 = vor.u32 %v2368_v56, %v2365_v2  ;;  %v4618_v47 = vrot.slane %v4616_v4, 4  ;;  %v4112_v14 = vrot.slane %v4111_v34, 4  ;;  %v8329_v13 = vld [vmem:[%s6869_s10 + $0xd4] sm:$0x1]  ;;  %v8723_v2 = vld [vmem:[#allocation10_spill] sm:$0xff] }
 0x115   : > { %6055 = vmatmul.mubr.bf16.vlgmr.msra.gmra.mrb[0].mxu1 %v6708_v40  ;;  %6266 = vmatprep.mubr.bf16.mxu0 %v8148_v35  ;;  %v5659_v35 = vcombine.low %v8299_v29, %v8308_v44  ;;  %v4102_v40 = vrot.slane %v4101_v62, 4  ;;  %v4140_v18 = vrot.slane %v4138_v19, 5  ;;  %v8321_v32 = vsel %vm7147_vm5, %v5644_v7, %v4616_v4  ;;  %v6713_v19 = vld [vmem:[%s6869_s10 + $0x3c] sm:$0xff]   ;;  %v6769_v1 = vld [vmem:[%s8658_s1 + $0x110] sm:$0xff]  }
 0x116   : > { %6334 = vmatpush3.bf16.msra.mxu1 %v8722_v58  ;;  %6058 = vmatprep.mubr.bf16.mxu1 %v6710_v39  ;;  %v4145_v28 = vrot.slane %v4143_v46, 4  ;;  %v4148_v33 = vrot.slane %v4146_v52, 5  ;;  %v2370_v39 = vrot.slane %v2369_v23, 4  ;;  %v8325_v5 = vsel %vm7147_vm5, %v4618_v47, %v4619_v55  ;;  %v6770_v47 = vld [vmem:[%s6869_s10 + $0x1c] sm:$0xf] }
 0x117   : > { %6327 = vmatprep.subr.bf16.mxu1 %v6768_v6  ;;  %v8331_v53 = vrot.slane %v4152_v50, 5  ;;  %v4158_v30 = vrot.slane %v4156_v0, 4  ;;  %v5660_v62 = vcombine.low %v8321_v32, %v8325_v5  ;;  %v5645_v34 = vrot.slane %v5629_v12, 9 }
 0x118   : > { %v4126_v7 = vrot.slane %v4125_v60, 4  ;;  %v4136_v46 = vrot.slane %v4135_v48, 4  ;;  %v2375_v52 = vsel %vm6901_vm2, %v2370_v39, %v7477_v11  ;;  %v4623_v56 = vrot.slane %v8723_v2, 5  ;;  %v8724_v11 = vld [vmem:[#allocation14_spill] sm:$0xff]  ;;  %v6714_v39 = vld [vmem:[%s6869_s10 + $0x48] sm:$0xff]  }
 0x119   : > { %v4107_v4 = vsel %vm6901_vm2, %v4102_v40, %v8177_v49  ;;  %v4117_v60 = vsel %vm6901_vm2, %v4112_v14, %v8266_v57  ;;  %v8349_v50 = vcombine.low %v2375_v52, %v2385_v16  ;;  %v4626_v0 = vrot.slane %v8724_v11, 5  ;;  %v5619_v57 = vld [vmem:[%s6869_s10 + $0x18] sm:$0xe]  ;;  %v5630_v16 = vld [vmem:[%s6869_s10 + $0x9c] sm:$0xe] }
 0x11a   : > { %6335 = vmatpush3.bf16.msra.mxu1 %v6768_v6  ;;  %v4149_v24 = vor.u32 %v4148_v33, %v4145_v28  ;;  %v4162_v55 = vshll.u32 %v8329_v13, 16  ;;  %v8356_v58 = vsel %vm7147_vm5, %v5645_v34, %v4623_v56  ;;  %v4625_v48 = vrot.slane %v4623_v56, 4  ;;  %v6771_v40 = vld [vmem:[%s8658_s1 + $0x118] sm:$0xff]   ;;  %v6772_v2 = vld [vmem:[%s6869_s10 + $0x20] sm:$0x1] }
 0x11b   : > { %6328 = vmatprep.subr.bf16.mxu1 %v6769_v1  ;;  %v4159_v49 = vor.u32 %v4158_v30, %v8331_v53  ;;  %v4141_v23 = vsel %vm6901_vm2, %v4136_v46, %v4140_v18  ;;  %v4553_v12 = vrot.slane %v6770_v47, 5  ;;  %v5608_v6 = vcombine.low %v4107_v4, %v4117_v60  ;;  %v8725_v34 = vld [vmem:[#allocation13_spill] sm:$0xff]  ;;  %v5631_v11 = vld [vmem:[%s6869_s10 + $0xa8] sm:$0xe] }
 0x11c   : > { %6267 = vmatmul.mubr.bf16.gmra.mrb[20].mxu0 %v8254_v36  ;;  %v4131_v36 = vsel %vm6901_vm2, %v4126_v7, %v8277_v59  ;;  %v4150_v14 = vrot.slane %v4149_v24, 4  ;;  %v4164_v28 = vrot.slane %v4162_v55, 5  ;;  %v5635_v18 = vrot.slane %v5619_v57, 9  ;;  %v6716_v46 = vld [vmem:[%s6869_s10 + $0x54] sm:$0xff]   ;;  %v5620_v55 = vld [vmem:[%s6869_s10 + $0x24] sm:$0xe] }
 0x11d   : > { %6059 = vmatmul.mubr.bf16.gmra.mrb[4].mxu1 %v6711_v3  ;;  %6270 = vmatprep.mubr.bf16.mxu0 %v8264_v22  ;;  %v8370_v22 = vsel %vm7147_vm5, %v4625_v48, %v4626_v0  ;;  %v5646_v33 = vrot.slane %v5630_v16, 9  ;;  %v5609_v3 = vcombine.low %v4131_v36, %v4141_v23  ;;  %v4160_v30 = vrot.slane %v4159_v49, 4  ;;  %v6774_v48 = vld [vmem:[%s6869_s10 + $0x28] sm:$0xf]  ;;  %v6775_v36 = vld [vmem:[%s6869_s10 + $0x34] sm:$0xf] }
 0x11e   : > { %6062 = vmatprep.mubr.bf16.mxu1 %v6713_v19  ;;  %6336 = vmatpush3.bf16.msra.mxu1 %v6769_v1  ;;  %v5661_v59 = vcombine.low %v8356_v58, %v8370_v22  ;;  %v4630_v19 = vrot.slane %v8725_v34, 5  ;;  %v4633_v7 = vrot.slane %v8059_v25, 5  ;;  %v4555_v52 = vrot.slane %v4553_v12, 4  ;;  %v6773_v1 = vld [vmem:[%s8658_s1 + $0x120] sm:$0xff]  }
 0x11f   : > { %6329 = vmatprep.subr.bf16.mxu1 %v6771_v40  ;;  %v4556_v56 = vrot.slane %v6772_v2, 5  ;;  %v4554_v25 = vsel %vm7147_vm5, %v5635_v18, %v4553_v12  ;;  %v4155_v0 = vsel %vm6901_vm2, %v4150_v14, %v8331_v53  ;;  %v4165_v24 = vsel %vm6901_vm2, %v4160_v30, %v4164_v28  ;;  %v5621_v12 = vld [vmem:[%s6869_s10 + $0x30] sm:$0xe]  ;;  %v6717_v30 = vld [vmem:[%s6869_s10 + $0x60] sm:$0xff]  }
 0x120   : > { %v8387_v4 = vsel %vm7147_vm5, %v5646_v33, %v4630_v19  ;;  %v4632_v60 = vrot.slane %v4630_v19, 4  ;;  %v4560_v49 = vrot.slane %v6774_v48, 5  ;;  %v4567_v23 = vrot.slane %v6775_v36, 5  ;;  %v6777_v33 = vld [vmem:[%s6869_s10 + $0x2c] sm:$0x1] }
 0x121   : > { %v4557_v16 = vsel %vm7147_vm5, %v4555_v52, %v4556_v56  ;;  %v5647_v47 = vrot.slane %v5631_v11, 9  ;;  %v5610_v28 = vcombine.low %v4155_v0, %v4165_v24  ;;  %v5636_v18 = vrot.slane %v5620_v55, 9  ;;  %v6719_v52 = vld [vmem:[%s6869_s10 + $0x6c] sm:$0xff]   ;;  %v5632_v11 = vld [vmem:[%s6869_s10 + $0xb4] sm:$0xe] }
 0x122   : > { %6337 = vmatpush3.bf16.msra.mxu1 %v6771_v40  ;;  %v8401_v57 = vsel %vm7147_vm5, %v4632_v60, %v4633_v7  ;;  %v8726_v40 = vld [vmem:[#allocation16_spill] sm:$0xff]  ;;  %v5651_v34 = vcombine.low %v4554_v25, %v4557_v16  ;;  %v4562_v19 = vrot.slane %v4560_v49, 4  ;;  %v5637_v2 = vrot.slane %v5621_v12, 9  ;;  %v5622_v0 = vld [vmem:[%s6869_s10 + $0x3c] sm:$0xe] }
 0x123   : > { %6330 = vmatprep.subr.bf16.mxu1 %v6773_v1  ;;  %v5662_v53 = vcombine.low %v8387_v4, %v8401_v57  ;;  %v4637_v14 = vrot.slane %v8726_v40, 5  ;;  %v4569_v56 = vrot.slane %v4567_v23, 4  ;;  %v6779_v24 = vld [vmem:[%s6869_s10 + $0x40] sm:$0xf]  ;;  %v4561_v48 = vsel %vm7147_vm5, %v5636_v18, %v4560_v49  ;;  %v6781_v18 = vld [vmem:[%s6869_s10 + $0x44] sm:$0x1] }
 0x124   : > { %6271 = vmatmul.mubr.bf16.gmra.mrb[24].mxu0 %v5608_v6  ;;  %v6776_v6 = vld [vmem:[%s8658_s1 + $0x128] sm:$0xff]   ;;  %v4574_v55 = vrot.slane %v6779_v24, 5  ;;  %v4644_v12 = vrot.slane %v8106_v10, 5  ;;  %v4568_v49 = vsel %vm7147_vm5, %v5637_v2, %v4567_v23  ;;  %v6782_v10 = vld [vmem:[%s8658_s1 + $0x138] sm:$0xff]   ;;  %v5633_v23 = vld [vmem:[%s6869_s10 + $0xc0] sm:$0xe] }
 0x125   : > { %6063 = vmatmul.mubr.bf16.gmra.mrb[8].mxu1 %v6714_v39  ;;  %6274 = vmatprep.mubr.bf16.mxu0 %v5609_v3  ;;  %v4563_v39 = vrot.slane %v6777_v33, 5  ;;  %v4640_v3 = vrot.slane %v8094_v21, 5  ;;  %v8418_v7 = vsel %vm7147_vm5, %v5647_v47, %v4637_v14  ;;  %v6780_v21 = vld [vmem:[%s8658_s1 + $0x130] sm:$0xff]   ;;  %v5648_v47 = vrot.slane %v5632_v11, 9 }
 0x126   : > { %6066 = vmatprep.mubr.bf16.mxu1 %v6716_v46  ;;  %6338 = vmatpush3.bf16.msra.mxu1 %v6773_v1  ;;  %v4639_v46 = vrot.slane %v4637_v14, 4  ;;  %v6778_v1 = vld [vmem:[%s6869_s10 + $0x38] sm:$0x1]  ;;  %v5638_v14 = vrot.slane %v5622_v0, 9  ;;  %v4577_v33 = vrot.slane %v6781_v18, 5  ;;  %v4651_v11 = vrot.slane %v8188_v51, 5 }
 0x127   : > { %6331 = vmatprep.subr.bf16.mxu1 %v6776_v6  ;;  %v4570_v60 = vrot.slane %v6778_v1, 5  ;;  %v4564_v36 = vsel %vm7147_vm5, %v4562_v19, %v4563_v39  ;;  %v4646_v39 = vrot.slane %v4644_v12, 4  ;;  %v5387_v19 = vld [vmem:[%s6869_s10 + $0x6c] sm:$0xf]  ;;  %v6722_v18 = vld [vmem:[%s6869_s10 + $0x90] sm:$0xff]   ;;  %v2406_v20 = vshll.u32 %v6788_v63, 16 }
 0x128   : > { %v8430_v25 = vsel %vm7147_vm5, %v4639_v46, %v4640_v3  ;;  %v5652_v3 = vcombine.low %v4561_v48, %v4564_v36  ;;  %v4575_v1 = vsel %vm7147_vm5, %v5638_v14, %v4574_v55  ;;  %v2339_v0 = vshrl.u32 %v5387_v19, 16  ;;  %v5634_v51 = vld [vmem:[%s6869_s10 + $0xcc] sm:$0xe] }
 0x129   : > { %v5663_v16 = vcombine.low %v8418_v7, %v8430_v25  ;;  %v4571_v40 = vsel %vm7147_vm5, %v4569_v56, %v4570_v60  ;;  %v5649_v56 = vrot.slane %v5633_v23, 9  ;;  %v2342_v24 = vshll.u32 %v5387_v19, 16 }
 0x12a   : > { %6339 = vmatpush3.bf16.msra.mxu1 %v6776_v6  ;;  %v4647_v6 = vrot.slane %v8127_v27, 5  ;;  %v8450_v27 = vsel %vm7147_vm5, %v5648_v47, %v4644_v12  ;;  %v4654_v36 = vrot.slane %v8239_v26, 5  ;;  %v4653_v12 = vrot.slane %v4651_v11, 4 }
 0x12b   : > { %6332 = vmatprep.subr.bf16.mxu1 %v6780_v21  ;;  %v2344_v26 = vrot.slane %v2342_v24, 5  ;;  %v4661_v23 = vrot.slane %v8329_v13, 5 }
 0x12c   : > { %6275 = vmatmul.mubr.bf16.gmra.mrb[28].mxu0 %v5610_v28  ;;  %v4576_v28 = vrot.slane %v4574_v55, 4  ;;  %v8457_v46 = vsel %vm7147_vm5, %v4646_v39, %v4647_v6  ;;  %v8471_v55 = vsel %vm7147_vm5, %v5649_v56, %v4651_v11  ;;  %v4658_v39 = vrot.slane %v8291_v31, 5  ;;  %v6784_v56 = vld [vmem:[%s6869_s10 + $0x74] sm:$0x1] }
 0x12d   : > { %6067 = vmatmul.mubr.bf16.gmra.mrb[12].mxu1 %v6717_v30  ;;  %6294 = vmatprep.mubr.bf16.mxu0 %v5651_v34  ;;  %v6720_v30 = vld [vmem:[%s6869_s10 + $0x78] sm:$0xff]   ;;  %v5653_v34 = vcombine.low %v4568_v49, %v4571_v40  ;;  %v5664_v2 = vcombine.low %v8450_v27, %v8457_v46  ;;  %v8476_v49 = vsel %vm7147_vm5, %v4653_v12, %v4654_v36  ;;  %v2341_v40 = vrot.slane %v2339_v0, 4  ;;  %v6785_v0 = vld [vmem:[%s6869_s10 + $0x88] sm:$0xf] }
 0x12e   : > { %6070 = vmatprep.mubr.bf16.mxu1 %v6719_v52  ;;  %6340 = vmatpush3.bf16.msra.mxu1 %v6780_v21  ;;  %v6721_v52 = vld [vmem:[%s6869_s10 + $0x84] sm:$0xff]   ;;  %v4578_v60 = vsel %vm7147_vm5, %v4576_v28, %v4577_v33  ;;  %v6783_v21 = vld [vmem:[%s6869_s10 + $0x70] sm:$0xf]  ;;  %v5665_v28 = vcombine.low %v8471_v55, %v8476_v49  ;;  %v4660_v19 = vrot.slane %v4658_v39, 4  ;;  %v2396_v24 = vshll.u32 %v6785_v0, 16 }
 0x12f   : > { %6333 = vmatprep.subr.bf16.mxu1 %v6782_v10  ;;  %v2348_v48 = vshll.u32 %v6783_v21, 16  ;;  %v2352_v47 = vshrl.u32 %v6783_v21, 16  ;;  %v5654_v6 = vcombine.low %v4575_v1, %v4578_v60  ;;  %v2358_v1 = vshll.u32 %v6784_v56, 16 }
 0x130   : > { %v8498_v11 = vsel %vm7147_vm5, %v4660_v19, %v4661_v23  ;;  %v2400_v21 = vshrl.u32 %v6785_v0, 16  ;;  %v6787_v19 = vld [vmem:[%s6869_s10 + $0xa0] sm:$0xf] }
 0x131   : > { %v8478_v14 = vrot.slane %v2348_v48, 5  ;;  %v2354_v33 = vrot.slane %v2352_v47, 4  ;;  %v2448_v56 = vshrl.u32 %v6787_v19, 16 }
 0x132   : > { %6341 = vmatpush3.bf16.msra.mxu1 %v6782_v10  ;;  %v5650_v10 = vrot.slane %v5634_v51, 9 }
 0x133   : > { %v2355_v31 = vor.u32 %v2354_v33, %v8478_v14  ;;  %v2414_v33 = vshll.u32 %v5396_v61, 16 }
 0x134   : > { %6295 = vmatmul.mubr.bf16.vlgmr.msra.gmra.mrb[0].mxu0 %v5652_v3  ;;  %v6723_v3 = vld [vmem:[%s6869_s10 + $0x9c] sm:$0xff]  }
 0x135   : > { %6071 = vmatmul.mubr.bf16.gmra.mrb[16].mxu1 %v6720_v30  ;;  %6298 = vmatprep.mubr.bf16.mxu0 %v5653_v34  ;;  %v5393_v30 = vld [vmem:[%s6869_s10 + $0x84] sm:$0xf]  ;;  %v8489_v34 = vsel %vm7147_vm5, %v5650_v10, %v4658_v39  ;;  %v2356_v47 = vrot.slane %v2355_v31, 4  ;;  %v6786_v10 = vld [vmem:[%s6869_s10 + $0x94] sm:$0xf]  ;;  %v2416_v0 = vrot.slane %v2414_v33, 5 }
 0x136   : > { %6074 = vmatprep.mubr.bf16.mxu1 %v6721_v52  ;;  %v2345_v52 = vor.u32 %v2344_v26, %v2341_v40  ;;  %v2387_v13 = vshrl.u32 %v5393_v30, 16  ;;  %v2390_v60 = vshll.u32 %v5393_v30, 16  ;;  %v5666_v48 = vcombine.low %v8489_v34, %v8498_v11 }
 0x137   : > { %v8507_v40 = vrot.slane %v2396_v24, 5  ;;  %v2402_v26 = vrot.slane %v2400_v21, 4  ;;  %v2420_v39 = vshll.u32 %v6786_v10, 16  ;;  %v2424_v23 = vshrl.u32 %v6786_v10, 16  ;;  %v6790_v10 = vld [vmem:[%s6869_s10 + $0xa4] sm:$0x1] }
 0x138   : > { %v2346_v36 = vrot.slane %v2345_v52, 4  ;;  %v2389_v12 = vrot.slane %v2387_v13, 4  ;;  %v2392_v51 = vrot.slane %v2390_v60, 5  ;;  %v2444_v52 = vshll.u32 %v6787_v19, 16  ;;  %v6791_v19 = vld [vmem:[%s6869_s10 + $0xac] sm:$0xf] }
 0x139   : > { %v2403_v13 = vor.u32 %v2402_v26, %v8507_v40  ;;  %v8524_v41 = vrot.slane %v2420_v39, 5  ;;  %v2426_v42 = vrot.slane %v2424_v23, 4  ;;  %v2450_v21 = vrot.slane %v2448_v56, 4  ;;  %v5405_v23 = vld [vmem:[%s6869_s10 + $0xb4] sm:$0xf] }
 0x13a   : > { %v2454_v39 = vshll.u32 %v6790_v10, 16  ;;  %v2472_v15 = vshrl.u32 %v6791_v19, 16  ;;  %v2486_v63 = vshll.u32 %v5405_v23, 16 }
 0x13b   : > { %v2427_v26 = vor.u32 %v2426_v42, %v8524_v41 }
 0x13c   : > { %6299 = vmatmul.mubr.bf16.gmra.mrb[4].mxu0 %v5654_v6  ;;  %v5399_v6 = vld [vmem:[%s6869_s10 + $0x9c] sm:$0xf] }
 0x13d   : > { %6075 = vmatmul.mubr.bf16.gmra.mrb[20].mxu1 %v6722_v18  ;;  %6302 = vmatprep.mubr.bf16.mxu0 %v5655_v8  ;;  %v2360_v8 = vrot.slane %v2358_v1, 5  ;;  %v2411_v18 = vshrl.u32 %v5396_v61, 16  ;;  %v2438_v30 = vshll.u32 %v5399_v6, 16  ;;  %v2351_v1 = vsel %vm6901_vm2, %v2346_v36, %v8478_v14  ;;  %v6726_v61 = vld [vmem:[%s6869_s10 + $0xc0] sm:$0xff]  }
 0x13e   : > { %6078 = vmatprep.mubr.bf16.mxu1 %v6723_v3  ;;  %v2435_v3 = vshrl.u32 %v5399_v6, 16  ;;  %v8526_v14 = vrot.slane %v2444_v52, 5  ;;  %v2468_v52 = vshll.u32 %v6791_v19, 16 }
 0x13f   : > { %v2361_v31 = vsel %vm6901_vm2, %v2356_v47, %v2360_v8  ;;  %v2413_v60 = vrot.slane %v2411_v18, 4  ;;  %v2440_v24 = vrot.slane %v2438_v30, 5  ;;  %v2408_v8 = vrot.slane %v2406_v20, 5  ;;  %v6792_v20 = vld [vmem:[%s6869_s10 + $0xb8] sm:$0xf] }
 0x140   : > { %v2404_v47 = vrot.slane %v2403_v13, 4  ;;  %v2451_v33 = vor.u32 %v2450_v21, %v8526_v14  ;;  %v2492_v29 = vshll.u32 %v6792_v20, 16  ;;  %v2496_v44 = vshrl.u32 %v6792_v20, 16 }
 0x142   : > { %v2452_v13 = vrot.slane %v2451_v33, 4 }
 0x144   : > { %6303 = vmatmul.mubr.bf16.gmra.mrb[8].mxu0 %v5656_v54  ;;  %v2393_v54 = vor.u32 %v2392_v51, %v2389_v12  ;;  %v2417_v12 = vor.u32 %v2416_v0, %v2413_v60  ;;  %v6789_v51 = vld [vmem:[%s6869_s10 + $0x98] sm:$0x1]  ;;  %v2456_v60 = vrot.slane %v2454_v39, 5 }
 0x145   : > { %6079 = vmatmul.mubr.bf16.gmra.mrb[24].mxu1 %v6724_v45  ;;  %6306 = vmatprep.mubr.bf16.mxu0 %v5657_v17  ;;  %v2437_v17 = vrot.slane %v2435_v3, 4  ;;  %v5419_v45 = vcombine.low %v2351_v1, %v2361_v31  ;;  %v2430_v6 = vshll.u32 %v6789_v51, 16  ;;  %v2483_v31 = vshrl.u32 %v5405_v23, 16 }
 0x146   : > { %6082 = vmatprep.mubr.bf16.mxu1 %v6725_v9  ;;  %v2394_v36 = vrot.slane %v2393_v54, 4  ;;  %v5402_v9 = vld [vmem:[%s6869_s10 + $0xa8] sm:$0xf]  ;;  %v2418_v56 = vrot.slane %v2417_v12, 4  ;;  %v2457_v32 = vsel %vm6901_vm2, %v2452_v13, %v2456_v60 }
 0x147   : > { %v2441_v18 = vor.u32 %v2440_v24, %v2437_v17  ;;  %v2459_v3 = vshrl.u32 %v5402_v9, 16  ;;  %v2462_v30 = vshll.u32 %v5402_v9, 16  ;;  %v2432_v1 = vrot.slane %v2430_v6, 5 }
 0x148   : > { %v2399_v43 = vsel %vm6901_vm2, %v2394_v36, %v8507_v40  ;;  %v2470_v17 = vrot.slane %v2468_v52, 5  ;;  %v2474_v24 = vrot.slane %v2472_v15, 4  ;;  %v2485_v21 = vrot.slane %v2483_v31, 4  ;;  %v5408_v36 = vld [vmem:[%s6869_s10 + $0xc0] sm:$0xf] }
 0x149   : > { %v2442_v54 = vrot.slane %v2441_v18, 4  ;;  %v2461_v0 = vrot.slane %v2459_v3, 4  ;;  %v2464_v42 = vrot.slane %v2462_v30, 5  ;;  %v2507_v9 = vshrl.u32 %v5408_v36, 16  ;;  %v6794_v18 = vld [vmem:[%s6869_s10 + $0xc4] sm:$0xf] }
 0x14a   : > { %v2516_v33 = vshll.u32 %v6794_v18, 16 }
 0x14b   : > { %v2447_v51 = vsel %vm6901_vm2, %v2442_v54, %v8526_v14  ;;  %v2465_v5 = vor.u32 %v2464_v42, %v2461_v0  ;;  %v2520_v14 = vshrl.u32 %v6794_v18, 16  ;;  %v2509_v19 = vrot.slane %v2507_v9, 4 }
 0x14c   : > { %6307 = vmatmul.mubr.bf16.gmra.mrb[12].mxu0 %v5658_v38  ;;  %v2409_v38 = vsel %vm6901_vm2, %v2404_v47, %v2408_v8  ;;  %v2498_v8 = vrot.slane %v2496_v44, 4  ;;  %v2423_v47 = vsel %vm6901_vm2, %v2418_v56, %v8524_v41  ;;  %v6793_v41 = vld [vmem:[%s6869_s10 + $0xb0] sm:$0x1]  ;;  %v5423_v58 = vcombine.low %v2447_v51, %v2457_v32  ;;  %v6796_v44 = vld [vmem:[%s6869_s10 + $0xc8] sm:$0x1] }
 0x14d   : > { %6083 = vmatmul.mubr.bf16.gmra.mrb[28].mxu1 %v6726_v61  ;;  %6310 = vmatprep.mubr.bf16.mxu0 %v5659_v35  ;;  %v2428_v35 = vrot.slane %v2427_v26, 4  ;;  %v5421_v40 = vcombine.low %v2399_v43, %v2409_v38  ;;  %v2488_v61 = vrot.slane %v2486_v63, 5  ;;  %v2478_v6 = vshll.u32 %v6793_v41, 16 }
 0x14e   : > { %6118 = vmatprep.mubr.bf16.mxu1 %v5419_v45  ;;  %v2494_v45 = vrot.slane %v2492_v29, 5  ;;  %v2510_v26 = vshll.u32 %v5408_v36, 16  ;;  %v2466_v22 = vrot.slane %v2465_v5, 4  ;;  %v2518_v15 = vrot.slane %v2516_v33, 5 }
 0x14f   : > { %v2433_v12 = vsel %vm6901_vm2, %v2428_v35, %v2432_v1  ;;  %v2489_v10 = vor.u32 %v2488_v61, %v2485_v21  ;;  %v2480_v30 = vrot.slane %v2478_v6, 5  ;;  %v2522_v43 = vrot.slane %v2520_v14, 4 }
 0x150   : > { %v2499_v39 = vor.u32 %v2498_v8, %v2494_v45  ;;  %v5422_v3 = vcombine.low %v2423_v47, %v2433_v12  ;;  %v2512_v52 = vrot.slane %v2510_v26, 5  ;;  %v2471_v31 = vsel %vm6901_vm2, %v2466_v22, %v2470_v17 }
 0x151   : > { %v2490_v38 = vrot.slane %v2489_v10, 4  ;;  %v2523_v29 = vor.u32 %v2522_v43, %v2518_v15  ;;  %v2526_v35 = vshll.u32 %v6796_v44, 16 }
 0x152   : > { %v2500_v56 = vrot.slane %v2499_v39, 4  ;;  %v2513_v20 = vor.u32 %v2512_v52, %v2509_v19 }
 0x153   : > { %v2495_v4 = vsel %vm6901_vm2, %v2490_v38, %v2494_v45  ;;  %v2528_v54 = vrot.slane %v2526_v35, 5 }
 0x154   : > { %6311 = vmatmul.mubr.bf16.gmra.mrb[16].mxu0 %v5660_v62  ;;  %v2475_v62 = vor.u32 %v2474_v24, %v2470_v17  ;;  %v2514_v25 = vrot.slane %v2513_v20, 4 }
 0x155   : > { %6119 = vmatmul.mubr.bf16.vlgmr.msra.gmra.mrb[16].mxu1 %v8349_v50  ;;  %6314 = vmatprep.mubr.bf16.mxu0 %v5661_v59  ;;  %v6795_v50 = vld [vmem:[%s6869_s10 + $0xbc] sm:$0x1]  ;;  %s5677_s10 = sshll.u32 %s8728_s13, 8 }
 0x156   : > { %6122 = vmatprep.mubr.bf16.mxu1 %v5421_v40  ;;  %v2502_v23 = vshll.u32 %v6795_v50, 16  ;;  %v2476_v59 = vrot.slane %v2475_v62, 4  ;;  %v2519_v13 = vsel %vm6901_vm2, %v2514_v25, %v2518_v15  ;;  %s8611_s8 = scalar_lea.vmem %s8659_s2, %s5677_s10 }
 0x158   : > { %v2504_v1 = vrot.slane %v2502_v23, 5  ;;  %v2481_v63 = vsel %vm6901_vm2, %v2476_v59, %v2480_v30 }
 0x15a   : > { %v2505_v57 = vsel %vm6901_vm2, %v2500_v56, %v2504_v1 }
 0x15b   : > { %v5425_v7 = vcombine.low %v2495_v4, %v2505_v57 }
 0x15c   : > { %6315 = vmatmul.mubr.bf16.gmra.mrb[20].mxu0 %v5662_v53  ;;  %v5424_v53 = vcombine.low %v2471_v31, %v2481_v63 }
 0x15d   : > { %6123 = vmatmul.mubr.bf16.gmra.mrb[20].mxu1 %v5422_v3  ;;  %6318 = vmatprep.mubr.bf16.mxu0 %v5663_v16  ;;  %v2524_v16 = vrot.slane %v2523_v29, 4 }
 0x15e   : > { %6126 = vmatprep.mubr.bf16.mxu1 %v5423_v58 }
 0x15f   : > { %v2529_v60 = vsel %vm6901_vm2, %v2524_v16, %v2528_v54 }
 0x160   : > { %v5426_v0 = vcombine.low %v2519_v13, %v2529_v60 }
 0x164   : > { %6319 = vmatmul.mubr.bf16.gmra.mrb[24].mxu0 %v5664_v2 }
 0x165   : > { %6127 = vmatmul.mubr.bf16.gmra.mrb[24].mxu1 %v5424_v53  ;;  %6322 = vmatprep.mubr.bf16.mxu0 %v5665_v28 }
 0x166   : > { %6130 = vmatprep.mubr.bf16.mxu1 %v5425_v7 }
 0x16c   : > { %6323 = vmatmul.mubr.bf16.gmra.mrb[28].mxu0 %v5666_v48 }
 0x16d   : > { %6131 = vmatmul.mubr.bf16.gmra.mrb[28].mxu1 %v5426_v0 }
 0x1e8   : > { %v6056_v27 = vpop.f32.mrb[0].mxu1 }
 0x1e9   : > { %v1939_v46 = vpop.f32.mrb[1].mxu1 }
 0x1ea   : > { %v6057_v2 = vpop.f32.mrb[2].mxu1 }
 0x1eb   : > { %v1942_v42 = vpop.f32.mrb[3].mxu1 }
 0x1f0   : > { %v6060_v55 = vpop.f32.mrb[4].mxu1 }
 0x1f1   : > { %v1955_v49 = vpop.f32.mrb[5].mxu1 }
 0x1f2   : > { %v6061_v28 = vpop.f32.mrb[6].mxu1 }
 0x1f3   : > { %v1958_v17 = vpop.f32.mrb[7].mxu1 }
 0x1f8   : > { %v6064_v24 = vpop.f32.mrb[8].mxu1 }
 0x1f9   : > { %v1971_v40 = vpop.f32.mrb[9].mxu1 }
 0x1fa   : > { %v6065_v21 = vpop.f32.mrb[10].mxu1 }
 0x1fb   : > { %v8597_v37 = vpop.f32.mrb[11].mxu1 }
 0x200   : > { %v8599_v61 = vpop.f32.mrb[12].mxu1 }
 0x201   : > { %v8601_v45 = vpop.f32.mrb[13].mxu1 }
 0x202   : > { %v8603_v34 = vpop.f32.mrb[14].mxu1 }
 0x203   : > { %v8605_v11 = vpop.f32.mrb[15].mxu1 }
 0x207   : > { %v6296_v48 = vpop.f32.mrb[0].mxu0 }
 0x208   : > { %v6342_v8 = vadd.f32 %v6296_v48, %v6056_v27  ;;  %v4825_v36 = vpop.f32.mrb[1].mxu0 }
 0x209   : > { %v6343_v47 = vadd.f32 %v4825_v36, %v1939_v46  ;;  %v6297_v12 = vpop.f32.mrb[2].mxu0 }
 0x20a   : > { %4986 = vst [vmem:[%s8611_s8 + $0x10] sm:$0xff] %v6342_v8  ;;  %v6344_v51 = vadd.f32 %v6297_v12, %v6057_v2  ;;  %v4828_v32 = vpop.f32.mrb[3].mxu0  ;;  %v5056_v9 = vmul.f32 %v6342_v8, %v6342_v8 }
 0x20b   : > { %4984 = vst [vmem:[%s8611_s8] sm:$0xff] %v6343_v47  ;;  %v6345_v5 = vadd.f32 %v4828_v32, %v1942_v42  ;;  %v5054_v62 = vmul.f32 %v6343_v47, %v6343_v47 }
 0x20c   : > { %4987 = vst [vmem:[%s8611_s8 + $0x18] sm:$0xff] %v6344_v51  ;;  %v5057_v39 = vmul.f32 %v6344_v51, %v6344_v51 }
 0x20d   : > { %4985 = vst [vmem:[%s8611_s8 + $0x8] sm:$0xff] %v6345_v5  ;;  %v5016_v41 = vadd.f32 %v6345_v5, %v6343_v47  ;;  %v5055_v6 = vmul.f32 %v6345_v5, %v6345_v5 }
 0x20f   : > { %v5017_v26 = vadd.f32 %v6342_v8, %v5016_v41  ;;  %v5086_v18 = vadd.f32 %v5055_v6, %v5054_v62  ;;  %v6300_v33 = vpop.f32.mrb[4].mxu0 }
 0x210   : > { %v6346_v14 = vadd.f32 %v6300_v33, %v6060_v55  ;;  %v4841_v10 = vpop.f32.mrb[5].mxu0 }
 0x211   : > { %v5087_v50 = vadd.f32 %v5086_v18, %v5056_v9  ;;  %v6347_v23 = vadd.f32 %v4841_v10, %v1955_v49  ;;  %v5018_v3 = vadd.f32 %v6344_v51, %v5017_v26  ;;  %v6301_v58 = vpop.f32.mrb[6].mxu0 }
 0x212   : > { %4990 = vst [vmem:[%s8611_s8 + $0x30] sm:$0xff] %v6346_v14  ;;  %v6348_v22 = vadd.f32 %v6301_v58, %v6061_v28  ;;  %v4844_v59 = vpop.f32.mrb[7].mxu0  ;;  %v5060_v1 = vmul.f32 %v6346_v14, %v6346_v14 }
 0x213   : > { %4988 = vst [vmem:[%s8611_s8 + $0x20] sm:$0xff] %v6347_v23  ;;  %v5019_v30 = vadd.f32 %v6347_v23, %v5018_v3  ;;  %v5058_v19 = vmul.f32 %v6347_v23, %v6347_v23  ;;  %v5088_v52 = vadd.f32 %v5087_v50, %v5057_v39  ;;  %v6349_v15 = vadd.f32 %v4844_v59, %v1958_v17 }
 0x214   : > { %4991 = vst [vmem:[%s8611_s8 + $0x38] sm:$0xff] %v6348_v22  ;;  %v5061_v35 = vmul.f32 %v6348_v22, %v6348_v22 }
 0x215   : > { %v5089_v43 = vadd.f32 %v5088_v52, %v5058_v19  ;;  %4989 = vst [vmem:[%s8611_s8 + $0x28] sm:$0xff] %v6349_v15  ;;  %v5020_v38 = vadd.f32 %v6349_v15, %v5019_v30  ;;  %v5059_v56 = vmul.f32 %v6349_v15, %v6349_v15 }
 0x217   : > { %v5021_v31 = vadd.f32 %v6346_v14, %v5020_v38  ;;  %v5090_v63 = vadd.f32 %v5089_v43, %v5059_v56  ;;  %v6304_v20 = vpop.f32.mrb[8].mxu0 }
 0x218   : > { %v6350_v29 = vadd.f32 %v6304_v20, %v6064_v24  ;;  %v4857_v44 = vpop.f32.mrb[9].mxu0 }
 0x219   : > { %v5091_v4 = vadd.f32 %v5090_v63, %v5060_v1  ;;  %v6351_v57 = vadd.f32 %v4857_v44, %v1971_v40  ;;  %v5022_v53 = vadd.f32 %v6348_v22, %v5021_v31  ;;  %v6305_v7 = vpop.f32.mrb[10].mxu0 }
 0x21a   : > { %4994 = vst [vmem:[%s8611_s8 + $0x50] sm:$0xff] %v6350_v29  ;;  %v6352_v25 = vadd.f32 %v6305_v7, %v6065_v21  ;;  %v4860_v16 = vpop.f32.mrb[11].mxu0  ;;  %v5064_v42 = vmul.f32 %v6350_v29, %v6350_v29 }
 0x21b   : > { %4992 = vst [vmem:[%s8611_s8 + $0x40] sm:$0xff] %v6351_v57  ;;  %v5023_v54 = vadd.f32 %v6351_v57, %v5022_v53  ;;  %v5062_v13 = vmul.f32 %v6351_v57, %v6351_v57  ;;  %v5092_v60 = vadd.f32 %v5091_v4, %v5061_v35  ;;  %v6353_v0 = vadd.f32 %v4860_v16, %v8597_v37 }
 0x21c   : > { %4995 = vst [vmem:[%s8611_s8 + $0x58] sm:$0xff] %v6352_v25  ;;  %v5065_v40 = vmul.f32 %v6352_v25, %v6352_v25 }
 0x21d   : > { %v5093_v27 = vadd.f32 %v5092_v60, %v5062_v13  ;;  %4993 = vst [vmem:[%s8611_s8 + $0x48] sm:$0xff] %v6353_v0  ;;  %v5024_v46 = vadd.f32 %v6353_v0, %v5023_v54  ;;  %v5063_v2 = vmul.f32 %v6353_v0, %v6353_v0 }
 0x21f   : > { %v5025_v55 = vadd.f32 %v6350_v29, %v5024_v46  ;;  %v5094_v49 = vadd.f32 %v5093_v27, %v5063_v2  ;;  %v6308_v28 = vpop.f32.mrb[12].mxu0 }
 0x220   : > { %v6354_v17 = vadd.f32 %v6308_v28, %v8599_v61  ;;  %v4873_v24 = vpop.f32.mrb[13].mxu0 }
 0x221   : > { %v5095_v21 = vadd.f32 %v5094_v49, %v5064_v42  ;;  %v6355_v37 = vadd.f32 %v4873_v24, %v8601_v45  ;;  %v5026_v48 = vadd.f32 %v6352_v25, %v5025_v55  ;;  %v6309_v8 = vpop.f32.mrb[14].mxu0 }
 0x222   : > { %4998 = vst [vmem:[%s8611_s8 + $0x70] sm:$0xff] %v6354_v17  ;;  %v6356_v36 = vadd.f32 %v6309_v8, %v8603_v34  ;;  %v4876_v47 = vpop.f32.mrb[15].mxu0  ;;  %v5068_v6 = vmul.f32 %v6354_v17, %v6354_v17 }
 0x223   : > { %4996 = vst [vmem:[%s8611_s8 + $0x60] sm:$0xff] %v6355_v37  ;;  %v5027_v12 = vadd.f32 %v6355_v37, %v5026_v48  ;;  %v5066_v51 = vmul.f32 %v6355_v37, %v6355_v37  ;;  %v5096_v32 = vadd.f32 %v5095_v21, %v5065_v40  ;;  %v6357_v5 = vadd.f32 %v4876_v47, %v8605_v11 }
 0x224   : > { %4999 = vst [vmem:[%s8611_s8 + $0x78] sm:$0xff] %v6356_v36  ;;  %v5069_v33 = vmul.f32 %v6356_v36, %v6356_v36 }
 0x225   : > { %v5097_v61 = vadd.f32 %v5096_v32, %v5066_v51  ;;  %4997 = vst [vmem:[%s8611_s8 + $0x68] sm:$0xff] %v6357_v5  ;;  %v5028_v62 = vadd.f32 %v6357_v5, %v5027_v12  ;;  %v5067_v41 = vmul.f32 %v6357_v5, %v6357_v5 }
 0x227   : > { %v5029_v45 = vadd.f32 %v6354_v17, %v5028_v62  ;;  %v5098_v9 = vadd.f32 %v5097_v61, %v5067_v41  ;;  %v6312_v26 = vpop.f32.mrb[16].mxu0 }
 0x228   : > { %v6120_v18 = vpop.f32.mrb[16].mxu1  ;;  %v4889_v34 = vpop.f32.mrb[17].mxu0 }
 0x229   : > { %v5099_v14 = vadd.f32 %v5098_v9, %v5068_v6  ;;  %v6358_v10 = vadd.f32 %v6312_v26, %v6120_v18  ;;  %v2756_v39 = vpop.f32.mrb[17].mxu1  ;;  %v5030_v11 = vadd.f32 %v6356_v36, %v5029_v45  ;;  %v6313_v50 = vpop.f32.mrb[18].mxu0 }
 0x22a   : > { %v6359_v23 = vadd.f32 %v4889_v34, %v2756_v39  ;;  %v6121_v3 = vpop.f32.mrb[18].mxu1  ;;  %v4892_v58 = vpop.f32.mrb[19].mxu0 }
 0x22b   : > { %5002 = vst [vmem:[%s8611_s8 + $0x90] sm:$0xff] %v6358_v10  ;;  %v5100_v22 = vadd.f32 %v5099_v14, %v5069_v33  ;;  %v6360_v59 = vadd.f32 %v6313_v50, %v6121_v3  ;;  %v2759_v30 = vpop.f32.mrb[19].mxu1  ;;  %v5072_v31 = vmul.f32 %v6358_v10, %v6358_v10 }
 0x22c   : > { %5000 = vst [vmem:[%s8611_s8 + $0x80] sm:$0xff] %v6359_v23  ;;  %v5031_v19 = vadd.f32 %v6359_v23, %v5030_v11  ;;  %v5070_v52 = vmul.f32 %v6359_v23, %v6359_v23  ;;  %v6361_v15 = vadd.f32 %v4892_v58, %v2759_v30 }
 0x22d   : > { %5003 = vst [vmem:[%s8611_s8 + $0x98] sm:$0xff] %v6360_v59  ;;  %v5073_v53 = vmul.f32 %v6360_v59, %v6360_v59 }
 0x22e   : > { %v5101_v43 = vadd.f32 %v5100_v22, %v5070_v52  ;;  %5001 = vst [vmem:[%s8611_s8 + $0x88] sm:$0xff] %v6361_v15  ;;  %v5032_v38 = vadd.f32 %v6361_v15, %v5031_v19  ;;  %v5071_v56 = vmul.f32 %v6361_v15, %v6361_v15 }
 0x22f   : > { %v6316_v1 = vpop.f32.mrb[20].mxu0 }
 0x230   : > { %v5033_v63 = vadd.f32 %v6358_v10, %v5032_v38  ;;  %v5102_v20 = vadd.f32 %v5101_v43, %v5071_v56  ;;  %v6124_v29 = vpop.f32.mrb[20].mxu1  ;;  %v4905_v44 = vpop.f32.mrb[21].mxu0 }
 0x231   : > { %v6362_v35 = vadd.f32 %v6316_v1, %v6124_v29  ;;  %v2772_v4 = vpop.f32.mrb[21].mxu1  ;;  %v6317_v57 = vpop.f32.mrb[22].mxu0 }
 0x232   : > { %v5103_v7 = vadd.f32 %v5102_v20, %v5072_v31  ;;  %v6363_v25 = vadd.f32 %v4905_v44, %v2772_v4  ;;  %v5034_v16 = vadd.f32 %v6360_v59, %v5033_v63  ;;  %v6125_v54 = vpop.f32.mrb[22].mxu1  ;;  %v4908_v13 = vpop.f32.mrb[23].mxu0 }
 0x233   : > { %5006 = vst [vmem:[%s8611_s8 + $0xb0] sm:$0xff] %v6362_v35  ;;  %v6364_v60 = vadd.f32 %v6317_v57, %v6125_v54  ;;  %v2775_v0 = vpop.f32.mrb[23].mxu1  ;;  %v5076_v24 = vmul.f32 %v6362_v35, %v6362_v35 }
 0x234   : > { %5004 = vst [vmem:[%s8611_s8 + $0xa0] sm:$0xff] %v6363_v25  ;;  %v5035_v27 = vadd.f32 %v6363_v25, %v5034_v16  ;;  %v5074_v46 = vmul.f32 %v6363_v25, %v6363_v25  ;;  %v5104_v2 = vadd.f32 %v5103_v7, %v5073_v53  ;;  %v6365_v42 = vadd.f32 %v4908_v13, %v2775_v0 }
 0x235   : > { %5007 = vst [vmem:[%s8611_s8 + $0xb8] sm:$0xff] %v6364_v60  ;;  %v5077_v12 = vmul.f32 %v6364_v60, %v6364_v60 }
 0x236   : > { %v5105_v55 = vadd.f32 %v5104_v2, %v5074_v46  ;;  %5005 = vst [vmem:[%s8611_s8 + $0xa8] sm:$0xff] %v6365_v42  ;;  %v5036_v49 = vadd.f32 %v6365_v42, %v5035_v27  ;;  %v5075_v28 = vmul.f32 %v6365_v42, %v6365_v42 }
 0x237   : > { %v6320_v17 = vpop.f32.mrb[24].mxu0 }
 0x238   : > { %v5037_v40 = vadd.f32 %v6362_v35, %v5036_v49  ;;  %v5106_v21 = vadd.f32 %v5105_v55, %v5075_v28  ;;  %v6128_v37 = vpop.f32.mrb[24].mxu1  ;;  %v4921_v48 = vpop.f32.mrb[25].mxu0 }
 0x239   : > { %v6366_v8 = vadd.f32 %v6320_v17, %v6128_v37  ;;  %v2788_v36 = vpop.f32.mrb[25].mxu1  ;;  %v6321_v47 = vpop.f32.mrb[26].mxu0 }
 0x23a   : > { %v5107_v51 = vadd.f32 %v5106_v21, %v5076_v24  ;;  %v6367_v32 = vadd.f32 %v4921_v48, %v2788_v36  ;;  %v5038_v5 = vadd.f32 %v6364_v60, %v5037_v40  ;;  %v6129_v61 = vpop.f32.mrb[26].mxu1  ;;  %v4924_v62 = vpop.f32.mrb[27].mxu0 }
 0x23b   : > { %5010 = vst [vmem:[%s8611_s8 + $0xd0] sm:$0xff] %v6366_v8  ;;  %v6368_v41 = vadd.f32 %v6321_v47, %v6129_v61  ;;  %v2791_v6 = vpop.f32.mrb[27].mxu1  ;;  %v5080_v39 = vmul.f32 %v6366_v8, %v6366_v8 }
 0x23c   : > { %5008 = vst [vmem:[%s8611_s8 + $0xc0] sm:$0xff] %v6367_v32  ;;  %v5039_v45 = vadd.f32 %v6367_v32, %v5038_v5  ;;  %v5078_v9 = vmul.f32 %v6367_v32, %v6367_v32  ;;  %v5108_v26 = vadd.f32 %v5107_v51, %v5077_v12  ;;  %v6369_v18 = vadd.f32 %v4924_v62, %v2791_v6 }
 0x23d   : > { %5011 = vst [vmem:[%s8611_s8 + $0xd8] sm:$0xff] %v6368_v41  ;;  %v5081_v30 = vmul.f32 %v6368_v41, %v6368_v41 }
 0x23e   : > { %v5109_v34 = vadd.f32 %v5108_v26, %v5078_v9  ;;  %5009 = vst [vmem:[%s8611_s8 + $0xc8] sm:$0xff] %v6369_v18  ;;  %v5040_v33 = vadd.f32 %v6369_v18, %v5039_v45  ;;  %v5079_v14 = vmul.f32 %v6369_v18, %v6369_v18 }
 0x23f   : > { %v6324_v10 = vpop.f32.mrb[28].mxu0 }
 0x240   : > { %v5041_v11 = vadd.f32 %v6366_v8, %v5040_v33  ;;  %v5110_v50 = vadd.f32 %v5109_v34, %v5079_v14  ;;  %v6132_v23 = vpop.f32.mrb[28].mxu1  ;;  %v4937_v3 = vpop.f32.mrb[29].mxu0 }
 0x241   : > { %v6370_v58 = vadd.f32 %v6324_v10, %v6132_v23  ;;  %v2804_v22 = vpop.f32.mrb[29].mxu1  ;;  %v6325_v59 = vpop.f32.mrb[30].mxu0 }
 0x242   : > { %v5111_v19 = vadd.f32 %v5110_v50, %v5080_v39  ;;  %v6371_v52 = vadd.f32 %v4937_v3, %v2804_v22  ;;  %v5042_v15 = vadd.f32 %v6368_v41, %v5041_v11  ;;  %v6133_v43 = vpop.f32.mrb[30].mxu1  ;;  %v4940_v38 = vpop.f32.mrb[31].mxu0 }
 0x243   : > { %5014 = vst [vmem:[%s8611_s8 + $0xf0] sm:$0xff] %v6370_v58  ;;  %v6372_v56 = vadd.f32 %v6325_v59, %v6133_v43  ;;  %v2807_v1 = vpop.f32.mrb[31].mxu1  ;;  %v5084_v57 = vmul.f32 %v6370_v58, %v6370_v58 }
 0x244   : > { %5012 = vst [vmem:[%s8611_s8 + $0xe0] sm:$0xff] %v6371_v52  ;;  %v5043_v31 = vadd.f32 %v6371_v52, %v5042_v15  ;;  %v5082_v63 = vmul.f32 %v6371_v52, %v6371_v52  ;;  %v5112_v20 = vadd.f32 %v5111_v19, %v5081_v30  ;;  %v6373_v29 = vadd.f32 %v4940_v38, %v2807_v1 }
 0x245   : > { %5015 = vst [vmem:[%s8611_s8 + $0xf8] sm:$0xff] %v6372_v56  ;;  %v5085_v25 = vmul.f32 %v6372_v56, %v6372_v56 }
 0x246   : > { %v5113_v44 = vadd.f32 %v5112_v20, %v5082_v63  ;;  %5013 = vst [vmem:[%s8611_s8 + $0xe8] sm:$0xff] %v6373_v29  ;;  %v5044_v35 = vadd.f32 %v6373_v29, %v5043_v31  ;;  %v5083_v4 = vmul.f32 %v6373_v29, %v6373_v29 }
 0x248   : > { %v5045_v53 = vadd.f32 %v6370_v58, %v5044_v35  ;;  %v5114_v7 = vadd.f32 %v5113_v44, %v5083_v4 }
 0x24a   : > { %v5046_v16 = vadd.f32 %v6372_v56, %v5045_v53  ;;  %v5115_v54 = vadd.f32 %v5114_v7, %v5084_v57 }
 0x24c   : > { %v5047_v13 = vrot.slane %v5046_v16, 4  ;;  %v5116_v60 = vadd.f32 %v5115_v54, %v5085_v25 }
 0x24e   : > { %v5048_v0 = vadd.f32 %v5047_v13, %v5046_v16  ;;  %v5117_v27 = vrot.slane %v5116_v60, 4 }
 0x250   : > { %v5049_v46 = vrot.slane %v5048_v0, 2  ;;  %v5118_v2 = vadd.f32 %v5117_v27, %v5116_v60 }
 0x252   : > { %v5050_v42 = vadd.f32 %v5049_v46, %v5048_v0  ;;  %v5119_v55 = vrot.slane %v5118_v2, 2 }
 0x254   : > { %v5051_v49 = vrot.slane %v5050_v42, 1  ;;  %v5120_v28 = vadd.f32 %v5119_v55, %v5118_v2 }
 0x256   : > { %v5052_v17 = vadd.f32 %v5051_v49, %v5050_v42  ;;  %v5121_v24 = vrot.slane %v5120_v28, 1 }
 0x258   : > { %5053 = vst [vmem:[%s181_s15] sm:$0x1] %v5052_v17  ;;  %v5122_v40 = vadd.f32 %v5121_v24, %v5120_v28 }
 0x25a   : > { %5123 = vst [vmem:[%s181_s15 + $0x1] sm:$0x1] %v5122_v40 }
 0x25b PF: > { %s14_s12 = sadd.s32 1, %s6803_s12  }
 0x25c   : > { %p11_p4 = scmp.ge.s32.totalorder %s14_s12, 4  }
 0x25e   :  { %13 = sbr.rel (!%p11_p4) target bundleno = 1 (0x1), region = 72 }

// kernel: basic_block_forward.4
= control target key start
LH: loop header
LB: loop body
LE: loop exit
PB: predicated region body
PF: predicated region fallthrough
CT: control target
= control target key end

     0   :  { %s7507_s18 = smov 0   ;;  %s9390_s0 = inlined_call_operand.vmem [shape: f32[2,256,128], index: 0, kind: input, shape index: {}]   ;;  %s9391_s1 = inlined_call_operand.vmem [shape: f32[1,128], index: 1, kind: input, shape index: {}]   ;;  %s9392_s2 = inlined_call_operand.vmem [shape: f32[1,128], index: 2, kind: input, shape index: {}]   ;;  %s9393_s3 = inlined_call_operand.vmem [shape: bf16[1152,128], index: 3, kind: input, shape index: {}]   ;;  %s9394_s4 = inlined_call_operand.vmem [shape: f32[2,256,128], index: 4, kind: output, shape index: {0}]   ;;  %s9395_s5 = inlined_call_operand.vmem [shape: f32[2,2,128], index: 5, kind: output, shape index: {1}]  }
   0x1 LB: > { %s5996_s19 = sadd.s32 4294967295, %s7474_s18   ;;  %p6000_p0 = scmp.ge.s32.totalorder %s7474_s18, 1  ;;  %s7474_s18 = sphi %s7507_s18, %s16_s18  }
   0x2   : > { %p190_p1 = scmp.lt.s32.totalorder %s7474_s18, 3 }
   0x4   : > { %p191_p2 = pnand %p6000_p0, %p190_p1 }
   0x6   : > { %194 = sbr.rel (%p191_p2) target bundleno = 705 (0x2c1), region = 36 }
   0xd   : > { %v7269_v0 = vld [vmem:[%s9393_s3 + $0x40] sm:$0xff]   ;;  %v7476_v2 = vmov 0   ;;  %v7271_v3 = vld [vmem:[%s9393_s3 + $0x48] sm:$0xff]   ;;  %v7273_v5 = vld [vmem:[%s9393_s3 + $0x50] sm:$0xff]   ;;  %p222_p3 = scmp.lt.s32.totalorder %s5996_s19, 1  ;;  %vm853_vm3 = vcmask 1043456  }
   0xe   : > { %v7270_v1 = vld [vmem:[%s9393_s3 + $0x100] sm:$0xff]   ;;  %379 = vst [vmem:[#allocation2] sm:$0xf] %v7476_v2  ;;  %380 = vst [vmem:[#allocation2 + $0x4] sm:$0xf] %v7476_v2  ;;  %6556 = vmatprep.subr.bf16.mxu1 %v7269_v0  ;;  %v7272_v4 = vld [vmem:[%s9393_s3 + $0x108] sm:$0xff]  }
   0xf   : > { %381 = vst [vmem:[#allocation2 + $0x8] sm:$0x1] %v7476_v2  ;;  %382 = vst [vmem:[#allocation2 + $0xc] sm:$0xf] %v7476_v2  ;;  %6748 = vmatprep.subr.bf16.mxu0 %v7270_v1  ;;  %6557 = vmatpush3.bf16.msra.mxu1 %v7269_v0  ;;  %v7274_v6 = vld [vmem:[%s9393_s3 + $0x110] sm:$0xff]   ;;  %v7275_v7 = vld [vmem:[%s9393_s3 + $0x58] sm:$0xff]  }
  0x10   : > { %383 = vst [vmem:[#allocation2 + $0x10] sm:$0xf] %v7476_v2  ;;  %384 = vst [vmem:[#allocation2 + $0x14] sm:$0x1] %v7476_v2  ;;  %6749 = vmatpush3.bf16.msra.mxu0 %v7270_v1  ;;  %6558 = vmatprep.subr.bf16.mxu1 %v7271_v3  ;;  %s9456_s19 = smov (!%p222_p3, %s5996_s19), 1  ;;  %v7276_v8 = vld [vmem:[%s9393_s3 + $0x118] sm:$0xff]  }
  0x11   : > { %385 = vst [vmem:[#allocation2 + $0x18] sm:$0xf] %v7476_v2  ;;  %386 = vst [vmem:[#allocation2 + $0x1c] sm:$0xf] %v7476_v2  ;;  %6750 = vmatprep.subr.bf16.mxu0 %v7272_v4  ;;  %v7277_v9 = vld [vmem:[%s9393_s3 + $0x60] sm:$0xff]   ;;  %s6306_s13 = sshll.u32 %s9456_s19, 8 }
  0x12   : > { %387 = vst [vmem:[#allocation2 + $0x20] sm:$0x1] %v7476_v2  ;;  %388 = vst [vmem:[#allocation2 + $0x24] sm:$0xf] %v7476_v2  ;;  %v7278_v10 = vld [vmem:[%s9393_s3 + $0x120] sm:$0xff]   ;;  %v7279_v11 = vld [vmem:[%s9393_s3 + $0x68] sm:$0xff]   ;;  %s7563_s24 = scalar_lea.vmem %s9390_s0, %s6306_s13  ;;  %s9344_s26 = scalar_lea.vmem %s9394_s4, %s6306_s13 }
  0x13   : > { %389 = vst [vmem:[#allocation2 + $0x28] sm:$0xf] %v7476_v2  ;;  %390 = vst [vmem:[#allocation2 + $0x2c] sm:$0x1] %v7476_v2  ;;  %6559 = vmatpush3.bf16.msra.mxu1 %v7271_v3  ;;  %v7280_v12 = vld [vmem:[%s9393_s3 + $0x128] sm:$0xff]   ;;  %v237_v21 = vld [vmem:[%s7563_s24] sm:$0xff] }
  0x14   : > { %391 = vst [vmem:[#allocation2 + $0x30] sm:$0xf] %v7476_v2  ;;  %392 = vst [vmem:[#allocation2 + $0x34] sm:$0xf] %v7476_v2  ;;  %6751 = vmatpush3.bf16.msra.mxu0 %v7272_v4  ;;  %6560 = vmatprep.subr.bf16.mxu1 %v7273_v5  ;;  %vm1034_vm0 = vsmask.f32 3328 }
  0x15   : > { %393 = vst [vmem:[#allocation2 + $0x38] sm:$0x1] %v7476_v2  ;;  %394 = vst [vmem:[#allocation2 + $0x3c] sm:$0xf] %v7476_v2  ;;  %6752 = vmatprep.subr.bf16.mxu0 %v7274_v6  ;;  %v970_v13 = vld [vmem:[#allocation2] sm:$0xf] }
  0x16   : > { %395 = vst [vmem:[#allocation2 + $0x40] sm:$0xf] %v7476_v2  ;;  %396 = vst [vmem:[#allocation2 + $0x44] sm:$0x1] %v7476_v2  ;;  %v971_v14 = vld [vmem:[#allocation2 + $0x4] sm:$0xf] }
  0x17   : > { %397 = vst [vmem:[#allocation2 + $0x48] sm:$0xf] %v7476_v2  ;;  %398 = vst [vmem:[#allocation2 + $0x4c] sm:$0xf] %v7476_v2  ;;  %6561 = vmatpush3.bf16.msra.mxu1 %v7273_v5  ;;  %v1018_v15 = vld [vmem:[#allocation2 + $0x8] sm:$0x1] }
  0x18   : > { %399 = vst [vmem:[#allocation2 + $0x50] sm:$0x1] %v7476_v2  ;;  %400 = vst [vmem:[#allocation2 + $0x54] sm:$0xf] %v7476_v2  ;;  %6753 = vmatpush3.bf16.msra.mxu0 %v7274_v6  ;;  %6562 = vmatprep.subr.bf16.mxu1 %v7275_v7  ;;  %vm1035_vm1 = vsmask.f32 7440 }
  0x19   : > { %401 = vst [vmem:[#allocation2 + $0x58] sm:$0xf] %v7476_v2  ;;  %402 = vst [vmem:[#allocation2 + $0x5c] sm:$0x1] %v7476_v2  ;;  %6754 = vmatprep.subr.bf16.mxu0 %v7276_v8  ;;  %v1038_v16 = vshrl.u32 %v970_v13, 16  ;;  %v1041_v17 = vshll.u32 %v970_v13, 16 }
  0x1a   : > { %403 = vst [vmem:[#allocation2 + $0x60] sm:$0xf] %v7476_v2  ;;  %404 = vst [vmem:[#allocation2 + $0x64] sm:$0xf] %v7476_v2  ;;  %v1047_v18 = vshll.u32 %v971_v14, 16  ;;  %v1051_v19 = vshrl.u32 %v971_v14, 16 }
  0x1b   : > { %405 = vst [vmem:[#allocation2 + $0x68] sm:$0x1] %v7476_v2  ;;  %406 = vst [vmem:[#allocation2 + $0x6c] sm:$0xf] %v7476_v2  ;;  %6563 = vmatpush3.bf16.msra.mxu1 %v7275_v7  ;;  %v1057_v20 = vshll.u32 %v1018_v15, 16  ;;  %v238_v22 = vld [vmem:[%s7563_s24 + $0x8] sm:$0xff] }
  0x1c   : > { %407 = vst [vmem:[#allocation2 + $0x70] sm:$0xf] %v7476_v2  ;;  %408 = vst [vmem:[#allocation2 + $0x74] sm:$0x1] %v7476_v2  ;;  %6755 = vmatpush3.bf16.msra.mxu0 %v7276_v8  ;;  %6564 = vmatprep.subr.bf16.mxu1 %v7277_v9  ;;  %v1040_v23 = vrot.slane %v1038_v16, 4  ;;  %v1043_v24 = vrot.slane %v1041_v17, 5 }
  0x1d   : > { %409 = vst [vmem:[#allocation2 + $0x78] sm:$0xf] %v7476_v2  ;;  %410 = vst [vmem:[#allocation2 + $0x7c] sm:$0xf] %v7476_v2  ;;  %6756 = vmatprep.subr.bf16.mxu0 %v7278_v10  ;;  %v7570_v25 = vld [vmem:[%s9391_s1] ss:$0 sm:$0xff] }
  0x1e   : > { %411 = vst [vmem:[#allocation2 + $0x80] sm:$0x1] %v7476_v2  ;;  %412 = vst [vmem:[#allocation2 + $0x84] sm:$0xf] %v7476_v2  ;;  %v7575_v26 = vld [vmem:[%s9392_s2] ss:$0 sm:$0xff]  ;;  %v276_v30 = vmul.f32 %v7570_v25, %v237_v21  ;;  %v1044_v32 = vor.u32 %v1043_v24, %v1040_v23  ;;  %v277_v33 = vmul.f32 %v7570_v25, %v238_v22 }
  0x1f   : > { %413 = vst [vmem:[#allocation2 + $0x88] sm:$0xf] %v7476_v2  ;;  %414 = vst [vmem:[#allocation2 + $0x8c] sm:$0x1] %v7476_v2  ;;  %6565 = vmatpush3.bf16.msra.mxu1 %v7277_v9  ;;  %v7281_v27 = vld [vmem:[%s9393_s3 + $0x70] sm:$0xff]   ;;  %v1049_v28 = vrot.slane %v1047_v18, 5 }
  0x20   : > { %415 = vst [vmem:[#allocation2 + $0x90] sm:$0xf] %v7476_v2  ;;  %416 = vst [vmem:[#allocation2 + $0x94] sm:$0xf] %v7476_v2  ;;  %6757 = vmatpush3.bf16.msra.mxu0 %v7278_v10  ;;  %6566 = vmatprep.subr.bf16.mxu1 %v7279_v11  ;;  %v1053_v29 = vrot.slane %v1051_v19, 4  ;;  %v7282_v31 = vld [vmem:[%s9393_s3 + $0x130] sm:$0xff]   ;;  %v315_v37 = vadd.f32 %v7575_v26, %v276_v30  ;;  %v316_v39 = vadd.f32 %v7575_v26, %v277_v33 }
  0x21   : > { %417 = vst [vmem:[#allocation2 + $0x98] sm:$0x1] %v7476_v2  ;;  %418 = vst [vmem:[#allocation2 + $0x9c] sm:$0xf] %v7476_v2  ;;  %6758 = vmatprep.subr.bf16.mxu0 %v7280_v12  ;;  %v1059_v36 = vrot.slane %v1057_v20, 5  ;;  %v1045_v38 = vrot.slane %v1044_v32, 4 }
  0x22   : > { %419 = vst [vmem:[#allocation2 + $0xa0] sm:$0xf] %v7476_v2  ;;  %420 = vst [vmem:[#allocation2 + $0xa4] sm:$0x1] %v7476_v2  ;;  %v1054_v35 = vor.u32 %v1053_v29, %v1049_v28  ;;  %v7283_v40 = vld [vmem:[%s9393_s3 + $0x78] sm:$0xff]   ;;  %v347_v42 = vmax.f32 %v315_v37, 0.0 }
  0x23   : > { %421 = vst [vmem:[#allocation2 + $0xa8] sm:$0xf] %v7476_v2  ;;  %422 = vst [vmem:[#allocation2 + $0xac] sm:$0xf] %v7476_v2  ;;  %6567 = vmatpush3.bf16.msra.mxu1 %v7279_v11  ;;  %vm860_vm4 = vcmask 1040384   ;;  %v239_v43 = vld [vmem:[%s7563_s24 + $0x10] sm:$0xff] }
  0x24   : > { %423 = vst [vmem:[#allocation2 + $0xb0] sm:$0x1] %v7476_v2  ;;  %424 = vst [vmem:[#allocation2 + $0xb4] sm:$0xf] %v7476_v2  ;;  %6759 = vmatpush3.bf16.msra.mxu0 %v7280_v12  ;;  %6568 = vmatprep.subr.bf16.mxu1 %v7281_v27  ;;  %v1055_v41 = vrot.slane %v1054_v35, 4  ;;  %v7284_v44 = vld [vmem:[%s9393_s3 + $0x138] sm:$0xff]   ;;  %v278_v48 = vmul.f32 %v7570_v25, %v239_v43  ;;  %v6308_v50 = vpack.c.bf16 %v347_v42, %v347_v42 }
  0x25   : > { %425 = vst [vmem:[#allocation2 + $0xb8] sm:$0xf] %v7476_v2  ;;  %426 = vst [vmem:[#allocation2 + $0xbc] sm:$0x1] %v7476_v2  ;;  %6760 = vmatprep.subr.bf16.mxu0 %v7282_v31  ;;  %v348_v46 = vmax.f32 %v316_v39, 0.0  ;;  %v240_v47 = vld [vmem:[%s7563_s24 + $0x18] sm:$0xff] }
  0x26   : > { %427 = vst [vmem:[#allocation2 + $0xc0] sm:$0xf] %v7476_v2  ;;  %428 = vst [vmem:[#allocation2 + $0xc4] sm:$0xf] %v7476_v2  ;;  %vm529_vm5 = vsmask.f32 256  ;;  %v279_v51 = vmul.f32 %v7570_v25, %v240_v47  ;;  %v317_v54 = vadd.f32 %v7575_v26, %v278_v48 }
  0x27   : > { %429 = vst [vmem:[#allocation2 + $0xc8] sm:$0x1] %v7476_v2  ;;  %430 = vst [vmem:[#allocation2 + $0xcc] sm:$0xf] %v7476_v2  ;;  %vm530_vm6 = vsmask.f32 4368  ;;  %6569 = vmatpush3.bf16.msra.mxu1 %v7281_v27  ;;  %v6309_v53 = vpack.c.bf16 %v348_v46, %v348_v46 }
  0x28   : > { %431 = vst [vmem:[#allocation2 + $0xd0] sm:$0xf] %v7476_v2  ;;  %432 = vst [vmem:[#allocation2 + $0xd4] sm:$0x1] %v7476_v2  ;;  %vm854_vm7 = vsmask.f32 7938  ;;  %6761 = vmatpush3.bf16.msra.mxu0 %v7282_v31  ;;  %6570 = vmatprep.subr.bf16.mxu1 %v7283_v40  ;;  %v318_v60 = vadd.f32 %v7575_v26, %v279_v51 }
  0x29   : > { %vm7587_vm2 = vmor %vm1034_vm0, %vm1035_vm1  ;;  %v241_v55 = vld [vmem:[%s7563_s24 + $0x20] sm:$0xff]  ;;  %v242_v56 = vld [vmem:[%s7563_s24 + $0x28] sm:$0xff]  ;;  %v533_v57 = vshrl.u32 %v6308_v50, 16  ;;  %v536_v58 = vshll.u32 %v6308_v50, 16  ;;  %6762 = vmatprep.subr.bf16.mxu0 %v7284_v44  ;;  %v541_v62 = vshrl.u32 %v6309_v53, 16  ;;  %v544_v63 = vshll.u32 %v6309_v53, 16 }
  0x2a   : > { %v1050_v45 = vsel %vm7587_vm2, %v1045_v38, %v1049_v28  ;;  %v1060_v49 = vsel %vm7587_vm2, %v1055_v41, %v1059_v36  ;;  %v7613_v59 = vld [vmem:[%s9393_s3] sm:$0xff]   ;;  %v280_v61 = vmul.f32 %v7570_v25, %v241_v55  ;;  %v349_v1 = vmax.f32 %v317_v54, 0.0  ;;  %vm7625_vm8 = vmor %vm529_vm5, %vm530_vm6  ;;  %v856_v9 = vld [vmem:[#allocation2 + $0xc] sm:$0xf]  ;;  %s6005_s13 = sshll.u32 %s9456_s19, 1 }
  0x2b   : > { %v6040_v52 = vcombine.low %v1050_v45, %v1060_v49  ;;  %v7620_v0 = vld [vmem:[%s9393_s3 + $0x140] sm:$0xff]   ;;  %v281_v2 = vmul.f32 %v7570_v25, %v242_v56  ;;  %v535_v4 = vrot.slane %v533_v57, 7  ;;  %v350_v5 = vmax.f32 %v318_v60, 0.0  ;;  %6571 = vmatpush3.bf16.msra.mxu1 %v7283_v40  ;;  %vm7632_vm9 = vmand %vm853_vm3, %vm854_vm7  ;;  %v862_v15 = vld [vmem:[#allocation2 + $0x14] sm:$0x1]  ;;  %s235_s29 = scalar_lea.vmem %s9395_s5, %s6005_s13 }
  0x2c   : > { %v319_v6 = vadd.f32 %v7575_v26, %v280_v61  ;;  %v543_v7 = vrot.slane %v541_v62, 7  ;;  %v6310_v10 = vpack.c.bf16 %v349_v1, %v349_v1  ;;  %6763 = vmatpush3.bf16.msra.mxu0 %v7284_v44  ;;  %vm7639_vm10 = vmand %vm860_vm4, %vm529_vm5  ;;  %6604 = vmatprep.subr.bf16.mxu1 %v7613_v59  ;;  %v243_v18 = vld [vmem:[%s7563_s24 + $0x30] sm:$0xff]  ;;  %v244_v23 = vld [vmem:[%s7563_s24 + $0x38] sm:$0xff]  ;;  %vm2063_vm11 = vcmask 1042432  }
  0x2d   : > { %6572 = vmatprep.mubr.bf16.mxu1 %v6040_v52  ;;  %v320_v11 = vadd.f32 %v7575_v26, %v281_v2  ;;  %v538_v12 = vor.u32 %v536_v58, %v535_v4  ;;  %v539_v13 = vrot.slane %v535_v4, 4  ;;  %v6311_v16 = vpack.c.bf16 %v350_v5, %v350_v5  ;;  %6796 = vmatprep.subr.bf16.mxu0 %v7620_v0  ;;  %v865_v33 = vld [vmem:[#allocation2 + $0x18] sm:$0xf]  ;;  %v869_v35 = vld [vmem:[#allocation2 + $0x20] sm:$0x1]  ;;  %v246_v55 = vld [vmem:[%s7563_s24 + $0x48] sm:$0xff] }
  0x2e   : > { %v351_v17 = vmax.f32 %v319_v6, 0.0  ;;  %v546_v19 = vor.u32 %v544_v63, %v543_v7  ;;  %v548_v20 = vrot.slane %v543_v7, 4  ;;  %v550_v21 = vshrl.u32 %v6310_v10, 16  ;;  %v245_v45 = vld [vmem:[%s7563_s24 + $0x40] sm:$0xff]  ;;  %v7329_v14 = vld [vmem:[%s9393_s3 + $0xa8] sm:$0xff]  }
  0x2f   : > { %v553_v22 = vshll.u32 %v6310_v10, 16  ;;  %v857_v24 = vsel %vm7632_vm9, %v538_v12, %v856_v9  ;;  %v558_v27 = vshrl.u32 %v6311_v16, 16  ;;  %v561_v28 = vshll.u32 %v6311_v16, 16  ;;  %v872_v52 = vld [vmem:[#allocation2 + $0x24] sm:$0xf] }
  0x30   : > { %v352_v29 = vmax.f32 %v320_v11, 0.0  ;;  %v547_v30 = vsel %vm7625_vm8, %v539_v13, %v546_v19  ;;  %858 = vst [vmem:[#allocation2 + $0xc] sm:$0xf] %v857_v24  ;;  %v863_v31 = vsel %vm7639_vm10, %v548_v20, %v862_v15  ;;  %v552_v32 = vrot.slane %v550_v21, 7 }
  0x31   : > { %v6312_v36 = vpack.c.bf16 %v351_v17, %v351_v17  ;;  %859 = vst [vmem:[#allocation2 + $0x10] sm:$0xf] %v547_v30  ;;  %864 = vst [vmem:[#allocation2 + $0x14] sm:$0x1] %v863_v31  ;;  %v560_v37 = vrot.slane %v558_v27, 7  ;;  %v282_v39 = vmul.f32 %v7570_v25, %v243_v18  ;;  %v283_v40 = vmul.f32 %v7570_v25, %v244_v23 }
  0x32   : > { %v6313_v38 = vpack.c.bf16 %v352_v29, %v352_v29  ;;  %v555_v41 = vor.u32 %v553_v22, %v552_v32  ;;  %v556_v42 = vrot.slane %v552_v32, 4  ;;  %v284_v60 = vmul.f32 %v7570_v25, %v245_v45 }
  0x33   : > { %v567_v43 = vshrl.u32 %v6312_v36, 16  ;;  %v570_v44 = vshll.u32 %v6312_v36, 16  ;;  %v563_v46 = vor.u32 %v561_v28, %v560_v37  ;;  %v565_v47 = vrot.slane %v560_v37, 4 }
  0x34   : > { %v575_v48 = vshrl.u32 %v6313_v38, 16  ;;  %v578_v49 = vshll.u32 %v6313_v38, 16  ;;  %v866_v50 = vsel %vm7632_vm9, %v555_v41, %v865_v33  ;;  %v321_v53 = vadd.f32 %v7575_v26, %v282_v39 }
  0x35   : > { %v7658_v51 = vrot.slane %v567_v43, 7  ;;  %v7662_v54 = vadd.f32 %v7575_v26, %v283_v40  ;;  %v564_v56 = vsel %vm7625_vm8, %v556_v42, %v563_v46  ;;  %867 = vst [vmem:[#allocation2 + $0x18] sm:$0xf] %v866_v50  ;;  %v870_v57 = vsel %vm7639_vm10, %v565_v47, %v869_v35 }
  0x36   : > { %v7669_v58 = vrot.slane %v575_v48, 7  ;;  %868 = vst [vmem:[#allocation2 + $0x1c] sm:$0xf] %v564_v56  ;;  %871 = vst [vmem:[#allocation2 + $0x20] sm:$0x1] %v870_v57  ;;  %v353_v63 = vmax.f32 %v321_v53, 0.0  ;;  %v7680_v7 = vmul.f32 %v7570_v25, %v246_v55  ;;  %v7685_v15 = vadd.f32 %v7575_v26, %v284_v60 }
  0x37   : > { %v572_v61 = vor.u32 %v570_v44, %v7658_v51  ;;  %v573_v62 = vrot.slane %v7658_v51, 4  ;;  %v972_v1 = vld [vmem:[#allocation2 + $0xc] sm:$0xf]  ;;  %v354_v6 = vmax.f32 %v7662_v54, 0.0  ;;  %vm2064_vm12 = vcmask 1046532  }
  0x38   : > { %v2884_v2 = vld [vmem:[#allocation2 + $0xc] sm:$0xf]  ;;  %v7675_v4 = vor.u32 %v578_v49, %v7669_v58  ;;  %v582_v5 = vrot.slane %v7669_v58, 4  ;;  %v973_v9 = vld [vmem:[#allocation2 + $0x10] sm:$0xf]  ;;  %v1062_v11 = vshrl.u32 %v972_v1, 16  ;;  %v7689_v20 = vpack.c.bf16 %v353_v63, %v353_v63  ;;  %vm7892_vm13 = vmor %vm2063_vm11, %vm2064_vm12 }
  0x39   : > { %v1019_v10 = vld [vmem:[#allocation2 + $0x14] sm:$0x1]  ;;  %v1065_v12 = vshll.u32 %v972_v1, 16  ;;  %v873_v13 = vsel %vm7632_vm9, %v572_v61, %v872_v52  ;;  %v1071_v16 = vshll.u32 %v973_v9, 16  ;;  %v1075_v17 = vshrl.u32 %v973_v9, 16  ;;  %v7288_v9 = vld [vmem:[%s9393_s3 + $0x8] sm:$0xff]  }
  0x3a   : > { %v1081_v18 = vshll.u32 %v1019_v10, 16  ;;  %v7687_v19 = vld [vmem:[#allocation2 + $0x10] sm:$0xf]  ;;  %874 = vst [vmem:[#allocation2 + $0x24] sm:$0xf] %v873_v13  ;;  %v1064_v21 = vrot.slane %v1062_v11, 4 }
  0x3b   : > { %v1067_v22 = vrot.slane %v1065_v12, 5  ;;  %v7691_v23 = vld [vmem:[#allocation2 + $0x14] sm:$0x1]  ;;  %v2933_v24 = vshrl.u32 %v2884_v2, 16  ;;  %v2936_v27 = vshll.u32 %v2884_v2, 16  ;;  %v1073_v28 = vrot.slane %v1071_v16, 5 }
  0x3c   : > { %v1077_v29 = vrot.slane %v1075_v17, 4  ;;  %v1083_v30 = vrot.slane %v1081_v18, 5  ;;  %v2942_v31 = vshll.u32 %v7687_v19, 16  ;;  %v2946_v36 = vshrl.u32 %v7687_v19, 16  ;;  %v2887_v37 = vld [vmem:[#allocation2 + $0x18] sm:$0xf] }
  0x3d   : > { %v1068_v32 = vor.u32 %v1067_v22, %v1064_v21  ;;  %v2935_v33 = vrot.slane %v2933_v24, 4  ;;  %v2938_v35 = vrot.slane %v2936_v27, 5  ;;  %v2952_v40 = vshll.u32 %v7691_v23, 16  ;;  %v7697_v42 = vld [vmem:[#allocation2 + $0x1c] sm:$0xf]  ;;  %v7287_v51 = vld [vmem:[%s9393_s3 + $0x148] sm:$0xff]  }
  0x3e   : > { %v1078_v38 = vor.u32 %v1077_v29, %v1073_v28  ;;  %v2944_v39 = vrot.slane %v2942_v31, 5  ;;  %v3706_v41 = vrot.slane %v7691_v23, 5  ;;  %v2948_v45 = vrot.slane %v2946_v36, 4  ;;  %v7699_v49 = vld [vmem:[#allocation2 + $0x20] sm:$0x1] }
  0x3f   : > { %v1069_v43 = vrot.slane %v1068_v32, 4  ;;  %v2939_v44 = vor.u32 %v2938_v35, %v2935_v33  ;;  %v2957_v46 = vshrl.u32 %v2887_v37, 16  ;;  %v2954_v48 = vrot.slane %v2952_v40, 5  ;;  %v974_v2 = vld [vmem:[#allocation2 + $0x18] sm:$0xf]  ;;  %v7291_v32 = vld [vmem:[%s9393_s3 + $0x10] sm:$0xff]  }
  0x40   : > { %v1079_v47 = vrot.slane %v1078_v38, 4  ;;  %v2960_v50 = vshll.u32 %v2887_v37, 16  ;;  %v2966_v52 = vshll.u32 %v7697_v42, 16  ;;  %v2949_v56 = vor.u32 %v2948_v45, %v2944_v39  ;;  %v975_v16 = vld [vmem:[#allocation2 + $0x1c] sm:$0xf] }
  0x41   : > { %v1074_v53 = vsel %vm7587_vm2, %v1069_v43, %v1073_v28  ;;  %v2940_v55 = vrot.slane %v2939_v44, 4  ;;  %v2959_v57 = vrot.slane %v2957_v46, 4  ;;  %v2970_v1 = vshrl.u32 %v7697_v42, 16  ;;  %v1020_v17 = vld [vmem:[#allocation2 + $0x20] sm:$0x1] }
  0x42   : > { %v1084_v60 = vsel %vm7587_vm2, %v1079_v47, %v1083_v30  ;;  %v2962_v61 = vrot.slane %v2960_v50, 5  ;;  %v2968_v63 = vrot.slane %v2966_v52, 5  ;;  %v2950_v12 = vrot.slane %v2949_v56, 4  ;;  %v876_v27 = vld [vmem:[#allocation2 + $0x2c] sm:$0x1] }
  0x43   : > { %v6041_v10 = vcombine.low %v1074_v53, %v1084_v60  ;;  %v2945_v11 = vsel %vm7587_vm2, %v2940_v55, %v2944_v39  ;;  %v2976_v13 = vshll.u32 %v7699_v49, 16  ;;  %v2972_v21 = vrot.slane %v2970_v1, 4  ;;  %v976_v44 = vld [vmem:[#allocation2 + $0x24] sm:$0xf]  ;;  %v7294_v60 = vld [vmem:[%s9393_s3 + $0x18] sm:$0xff]  }
  0x44   : > { %v2963_v18 = vor.u32 %v2962_v61, %v2959_v57  ;;  %v3710_v22 = vrot.slane %v7697_v42, 5  ;;  %v3713_v24 = vrot.slane %v7699_v49, 5  ;;  %v2955_v28 = vsel %vm7587_vm2, %v2950_v12, %v2954_v48  ;;  %v2890_v48 = vld [vmem:[#allocation2 + $0x24] sm:$0xf]  ;;  %v8049_v23 = vld [vmem:[%s9392_s2] ss:$0 sm:$0xff] }
  0x45   : > { %6573 = vmatmul.mubr.bf16.vlgmr.msra.gmra.mrb[0].mxu1 %v6041_v10  ;;  %v2978_v29 = vrot.slane %v2976_v13, 5  ;;  %v1086_v30 = vshrl.u32 %v974_v2, 16  ;;  %v1089_v31 = vshll.u32 %v974_v2, 16  ;;  %v6152_v33 = vcombine.low %v2945_v11, %v2955_v28  ;;  %v247_v28 = vld [vmem:[%s7563_s24 + $0x50] sm:$0xff] }
  0x46   : > { %6605 = vmatpush3.bf16.msra.mxu1 %v7613_v59  ;;  %v2964_v35 = vrot.slane %v2963_v18, 4  ;;  %v2973_v36 = vor.u32 %v2972_v21, %v2968_v63  ;;  %v7723_v37 = vrot.slane %v3710_v22, 4  ;;  %v1095_v40 = vshll.u32 %v975_v16, 16 }
  0x47   : > { %v1088_v38 = vrot.slane %v1086_v30, 4  ;;  %v1091_v39 = vrot.slane %v1089_v31, 5  ;;  %v1099_v43 = vshrl.u32 %v975_v16, 16  ;;  %6606 = vmatprep.subr.bf16.mxu1 %v7288_v9  ;;  %6764 = vmatprep.mubr.bf16.mxu0 %v6152_v33  ;;  %v1105_v47 = vshll.u32 %v1020_v17, 16 }
  0x48   : > { %v2969_v45 = vsel %vm7587_vm2, %v2964_v35, %v2968_v63  ;;  %v2974_v46 = vrot.slane %v2973_v36, 4  ;;  %v581_v59 = vsel %vm7625_vm8, %v573_v62, %v7675_v4  ;;  %v1097_v52 = vrot.slane %v1095_v40, 5 }
  0x49   : > { %v1092_v50 = vor.u32 %v1091_v39, %v1088_v38  ;;  %v1101_v53 = vrot.slane %v1099_v43, 4  ;;  %875 = vst [vmem:[#allocation2 + $0x28] sm:$0xf] %v581_v59  ;;  %v877_v55 = vsel %vm7639_vm10, %v582_v5, %v876_v27  ;;  %v1107_v57 = vrot.slane %v1105_v47, 5 }
  0x4a   : > { %v2979_v56 = vsel %vm7587_vm2, %v2974_v46, %v2978_v29  ;;  %878 = vst [vmem:[#allocation2 + $0x2c] sm:$0x1] %v877_v55  ;;  %v1110_v62 = vshrl.u32 %v976_v44, 16  ;;  %v1113_v4 = vshll.u32 %v976_v44, 16  ;;  %6607 = vmatpush3.bf16.msra.mxu1 %v7288_v9  ;;  %v2981_v5 = vshrl.u32 %v2890_v48, 16 }
  0x4b   : > { %v6153_v58 = vcombine.low %v2969_v45, %v2979_v56  ;;  %v1093_v61 = vrot.slane %v1092_v50, 4  ;;  %v1102_v63 = vor.u32 %v1101_v53, %v1097_v52  ;;  %6608 = vmatprep.subr.bf16.mxu1 %v7291_v32  ;;  %v2984_v10 = vshll.u32 %v2890_v48, 16  ;;  %v879_v50 = vld [vmem:[#allocation2 + $0x30] sm:$0xf] }
  0x4c   : > { %v1112_v1 = vrot.slane %v1110_v62, 4  ;;  %v1115_v2 = vrot.slane %v1113_v4, 5  ;;  %v6315_v11 = vpack.c.bf16 %v354_v6, %v354_v6  ;;  %v2983_v13 = vrot.slane %v2981_v5, 4  ;;  %v7289_v6 = vld [vmem:[%s9393_s3 + $0x150] sm:$0xff]  }
  0x4d   : > { %6765 = vmatmul.mubr.bf16.vlgmr.msra.gmra.mrb[0].mxu0 %v6153_v58  ;;  %v1098_v9 = vsel %vm7587_vm2, %v1093_v61, %v1097_v52  ;;  %v1103_v12 = vrot.slane %v1102_v63, 4  ;;  %v584_v16 = vshrl.u32 %v7689_v20, 16  ;;  %v2986_v18 = vrot.slane %v2984_v10, 5  ;;  %v883_v61 = vld [vmem:[#allocation2 + $0x38] sm:$0x1]  ;;  %v7299_v63 = vld [vmem:[%s9393_s3 + $0x28] sm:$0xff]  }
  0x4e   : > { %6797 = vmatpush3.bf16.msra.mxu0 %v7620_v0  ;;  %v1116_v17 = vor.u32 %v1115_v2, %v1112_v1  ;;  %v587_v21 = vshll.u32 %v7689_v20, 16  ;;  %v592_v27 = vshrl.u32 %v6315_v11, 16  ;;  %6609 = vmatpush3.bf16.msra.mxu1 %v7291_v32  ;;  %v595_v30 = vshll.u32 %v6315_v11, 16  ;;  %v7297_v20 = vld [vmem:[%s9393_s3 + $0x20] sm:$0xff]   ;;  %v248_v11 = vld [vmem:[%s7563_s24 + $0x58] sm:$0xff] }
  0x4f   : > { %6798 = vmatprep.subr.bf16.mxu0 %v7287_v51  ;;  %v1108_v54 = vsel %vm7587_vm2, %v1103_v12, %v1107_v57  ;;  %v586_v29 = vrot.slane %v584_v16, 7  ;;  %v7760_v0 = vadd.f32 %v7575_v26, %v7680_v7  ;;  %6610 = vmatprep.subr.bf16.mxu1 %v7294_v60  ;;  %v2987_v36 = vor.u32 %v2986_v18, %v2983_v13  ;;  %v7290_v57 = vld [vmem:[%s9393_s3 + $0x158] sm:$0xff]  }
  0x50   : > { %v6042_v31 = vcombine.low %v1098_v9, %v1108_v54  ;;  %v977_v32 = vld [vmem:[#allocation2 + $0x28] sm:$0xf]  ;;  %v7765_v33 = vrot.slane %v1116_v17, 4  ;;  %v594_v38 = vrot.slane %v592_v27, 7  ;;  %v286_v7 = vmul.f32 %v7570_v25, %v247_v28  ;;  %v7292_v54 = vld [vmem:[%s9393_s3 + $0x160] sm:$0xff]  }
  0x51   : > { %v2891_v35 = vld [vmem:[#allocation2 + $0x28] sm:$0xf]  ;;  %v1021_v39 = vld [vmem:[#allocation2 + $0x2c] sm:$0x1]  ;;  %v1119_v40 = vshll.u32 %v977_v32, 16  ;;  %v1123_v43 = vshrl.u32 %v977_v32, 16  ;;  %v589_v45 = vor.u32 %v587_v21, %v586_v29 }
  0x52   : > { %v2892_v44 = vld [vmem:[#allocation2 + $0x2c] sm:$0x1]  ;;  %6799 = vmatpush3.bf16.msra.mxu0 %v7287_v51  ;;  %6576 = vmatprep.mubr.bf16.mxu1 %v6042_v31  ;;  %v1129_v46 = vshll.u32 %v1021_v39, 16  ;;  %v2988_v47 = vrot.slane %v2987_v36, 4  ;;  %v2990_v59 = vshll.u32 %v2891_v35, 16  ;;  %v2994_v48 = vshrl.u32 %v2891_v35, 16 }
  0x53   : > { %v1121_v52 = vrot.slane %v1119_v40, 5  ;;  %v1125_v53 = vrot.slane %v1123_v43, 4  ;;  %v3000_v55 = vshll.u32 %v2892_v44, 16  ;;  %6800 = vmatprep.subr.bf16.mxu0 %v7289_v6  ;;  %v590_v56 = vrot.slane %v586_v29, 4  ;;  %6611 = vmatpush3.bf16.msra.mxu1 %v7294_v60  ;;  %v249_v60 = vld [vmem:[%s7563_s24 + $0x60] sm:$0xff]  ;;  %v250_v17 = vld [vmem:[%s7563_s24 + $0x68] sm:$0xff] }
  0x54   : > { %v1131_v62 = vrot.slane %v1129_v46, 5  ;;  %v2992_v51 = vrot.slane %v2990_v59, 5  ;;  %v2996_v4 = vrot.slane %v2994_v48, 4  ;;  %v597_v58 = vor.u32 %v595_v30, %v594_v38  ;;  %6612 = vmatprep.subr.bf16.mxu1 %v7297_v20  ;;  %v251_v35 = vld [vmem:[%s7563_s24 + $0x70] sm:$0xff]  ;;  %v252_v43 = vld [vmem:[%s7563_s24 + $0x78] sm:$0xff]  ;;  %v253_v44 = vld [vmem:[%s7563_s24 + $0x80] sm:$0xff] }
  0x55   : > { %v1122_v5 = vsel %vm7587_vm2, %v7765_v33, %v1121_v52  ;;  %v1126_v1 = vor.u32 %v1125_v53, %v1121_v52  ;;  %v3002_v2 = vrot.slane %v3000_v55, 5  ;;  %v599_v10 = vrot.slane %v594_v38, 4  ;;  %v254_v59 = vld [vmem:[%s7563_s24 + $0x88] sm:$0xff]  ;;  %v7301_v55 = vld [vmem:[%s9393_s3 + $0x30] sm:$0xff]  }
  0x56   : > { %v2993_v9 = vsel %vm7587_vm2, %v2988_v47, %v2992_v51  ;;  %v2997_v12 = vor.u32 %v2996_v4, %v2992_v51  ;;  %v598_v13 = vsel %vm7625_vm8, %v590_v56, %v597_v58  ;;  %v880_v16 = vsel %vm7632_vm9, %v589_v45, %v879_v50  ;;  %6801 = vmatpush3.bf16.msra.mxu0 %v7289_v6  ;;  %v7295_v51 = vld [vmem:[%s9393_s3 + $0x170] sm:$0xff]  }
  0x57   : > { %v1127_v18 = vrot.slane %v1126_v1, 4  ;;  %881 = vst [vmem:[#allocation2 + $0x30] sm:$0xf] %v880_v16  ;;  %882 = vst [vmem:[#allocation2 + $0x34] sm:$0xf] %v598_v13  ;;  %v884_v21 = vsel %vm7639_vm10, %v599_v10, %v883_v61  ;;  %6802 = vmatprep.subr.bf16.mxu0 %v7290_v57  ;;  %v355_v27 = vmax.f32 %v7685_v15, 0.0  ;;  %6613 = vmatpush3.bf16.msra.mxu1 %v7297_v20 }
  0x58   : > { %v356_v28 = vmax.f32 %v7760_v0, 0.0  ;;  %v2998_v29 = vrot.slane %v2997_v12, 4  ;;  %885 = vst [vmem:[#allocation2 + $0x38] sm:$0x1] %v884_v21  ;;  %v287_v6 = vmul.f32 %v7570_v25, %v248_v11  ;;  %v325_v30 = vadd.f32 %v7575_v26, %v286_v7  ;;  %6614 = vmatprep.subr.bf16.mxu1 %v7299_v63  ;;  %v7293_v20 = vld [vmem:[%s9393_s3 + $0x168] sm:$0xff]  }
  0x59   : > { %v288_v31 = vmul.f32 %v7570_v25, %v249_v60  ;;  %v1132_v15 = vsel %vm7587_vm2, %v1127_v18, %v1131_v62  ;;  %v6316_v0 = vpack.c.bf16 %v355_v27, %v355_v27  ;;  %v289_v33 = vmul.f32 %v7570_v25, %v250_v17 }
  0x5a   : > { %v6317_v32 = vpack.c.bf16 %v356_v28, %v356_v28  ;;  %v6043_v36 = vcombine.low %v1122_v5, %v1132_v15  ;;  %v3003_v38 = vsel %vm7587_vm2, %v2998_v29, %v3002_v2  ;;  %6803 = vmatpush3.bf16.msra.mxu0 %v7290_v57  ;;  %v326_v39 = vadd.f32 %v7575_v26, %v287_v6 }
  0x5b   : > { %v357_v40 = vmax.f32 %v325_v30, 0.0  ;;  %v6154_v45 = vcombine.low %v2993_v9, %v3003_v38  ;;  %v601_v7 = vshrl.u32 %v6316_v0, 16  ;;  %v604_v46 = vshll.u32 %v6316_v0, 16  ;;  %6804 = vmatprep.subr.bf16.mxu0 %v7292_v54  ;;  %6615 = vmatpush3.bf16.msra.mxu1 %v7299_v63 }
  0x5c   : > { %v609_v47 = vshrl.u32 %v6317_v32, 16  ;;  %6577 = vmatmul.mubr.bf16.gmra.mrb[4].mxu1 %v6043_v36  ;;  %v612_v48 = vshll.u32 %v6317_v32, 16  ;;  %v358_v50 = vmax.f32 %v326_v39, 0.0  ;;  %v7812_v53 = vadd.f32 %v7575_v26, %v288_v31  ;;  %6616 = vmatprep.subr.bf16.mxu1 %v7301_v55  ;;  %v886_v32 = vld [vmem:[#allocation2 + $0x3c] sm:$0xf] }
  0x5d   : > { %v7809_v52 = vpack.c.bf16 %v357_v40, %v357_v40  ;;  %6768 = vmatprep.mubr.bf16.mxu0 %v6154_v45  ;;  %v603_v56 = vrot.slane %v601_v7, 7  ;;  %v7818_v62 = vadd.f32 %v7575_v26, %v289_v33  ;;  %v7824_v4 = vmul.f32 %v7570_v25, %v251_v35  ;;  %v890_v39 = vld [vmem:[#allocation2 + $0x44] sm:$0x1]  ;;  %v7296_v40 = vld [vmem:[%s9393_s3 + $0x178] sm:$0xff]  }
  0x5e   : > { %v611_v57 = vrot.slane %v609_v47, 7  ;;  %v2893_v58 = vld [vmem:[#allocation2 + $0x30] sm:$0xf]  ;;  %v7826_v61 = vld [vmem:[#allocation2 + $0x34] sm:$0xf]  ;;  %v7828_v5 = vpack.c.bf16 %v358_v50, %v358_v50  ;;  %6805 = vmatpush3.bf16.msra.mxu0 %v7292_v54  ;;  %v7831_v1 = vmul.f32 %v7570_v25, %v252_v43  ;;  %v7834_v2 = vmul.f32 %v7570_v25, %v253_v44 }
  0x5f   : > { %v978_v63 = vld [vmem:[#allocation2 + $0x30] sm:$0xf]  ;;  %v7837_v10 = vmul.f32 %v7570_v25, %v254_v59  ;;  %v7839_v11 = vld [vmem:[#allocation2 + $0x38] sm:$0x1]  ;;  %v3005_v60 = vshrl.u32 %v2893_v58, 16  ;;  %v3008_v9 = vshll.u32 %v2893_v58, 16  ;;  %6806 = vmatprep.subr.bf16.mxu0 %v7293_v20  ;;  %v606_v27 = vor.u32 %v604_v46, %v603_v56  ;;  %6617 = vmatpush3.bf16.msra.mxu1 %v7301_v55 }
  0x60   : > { %v3014_v12 = vshll.u32 %v7826_v61, 16  ;;  %v3018_v13 = vshrl.u32 %v7826_v61, 16  ;;  %v3024_v16 = vshll.u32 %v7839_v11, 16  ;;  %v979_v17 = vld [vmem:[#allocation2 + $0x34] sm:$0xf]  ;;  %v1134_v21 = vshrl.u32 %v978_v63, 16 }
  0x61   : > { %v1022_v18 = vld [vmem:[#allocation2 + $0x38] sm:$0x1]  ;;  %v614_v28 = vor.u32 %v612_v48, %v611_v57  ;;  %v3007_v25 = vrot.slane %v3005_v60, 4  ;;  %v3010_v54 = vrot.slane %v3008_v9, 5  ;;  %v1137_v15 = vshll.u32 %v978_v63, 16 }
  0x62   : > { %v3016_v29 = vrot.slane %v3014_v12, 5  ;;  %v3020_v6 = vrot.slane %v3018_v13, 4  ;;  %v3026_v30 = vrot.slane %v3024_v16, 5  ;;  %v1136_v31 = vrot.slane %v1134_v21, 4  ;;  %6807 = vmatpush3.bf16.msra.mxu0 %v7293_v20 }
  0x63   : > { %v1143_v0 = vshll.u32 %v979_v17, 16  ;;  %v3011_v33 = vor.u32 %v3010_v54, %v3007_v25  ;;  %v1147_v36 = vshrl.u32 %v979_v17, 16  ;;  %v1153_v38 = vshll.u32 %v1022_v18, 16  ;;  %6808 = vmatprep.subr.bf16.mxu0 %v7295_v51  ;;  %v7863_v17 = vld [vmem:[%s9393_s3 + $0x180] sm:$0xff]  }
  0x64   : > { %v3021_v35 = vor.u32 %v3020_v6, %v3016_v29  ;;  %v1139_v43 = vrot.slane %v1137_v15, 5  ;;  %v607_v45 = vrot.slane %v603_v56, 4  ;;  %v616_v7 = vrot.slane %v611_v57, 4 }
  0x65   : > { %v1145_v44 = vrot.slane %v1143_v0, 5  ;;  %v3012_v46 = vrot.slane %v3011_v33, 4  ;;  %v1149_v59 = vrot.slane %v1147_v36, 4  ;;  %v1155_v20 = vrot.slane %v1153_v38, 5 }
  0x66   : > { %v3022_v47 = vrot.slane %v3021_v35, 4  ;;  %v1140_v48 = vor.u32 %v1139_v43, %v1136_v31  ;;  %v615_v50 = vsel %vm7625_vm8, %v607_v45, %v614_v28  ;;  %v887_v55 = vsel %vm7632_vm9, %v606_v27, %v886_v32  ;;  %6809 = vmatpush3.bf16.msra.mxu0 %v7295_v51  ;;  %v893_v51 = vld [vmem:[#allocation2 + $0x48] sm:$0xf]  ;;  %v897_v28 = vld [vmem:[#allocation2 + $0x50] sm:$0x1] }
  0x67   : > { %v891_v58 = vsel %vm7639_vm10, %v616_v7, %v890_v39  ;;  %v3017_v63 = vsel %vm7587_vm2, %v3012_v46, %v3016_v29  ;;  %v1150_v57 = vor.u32 %v1149_v59, %v1145_v44  ;;  %888 = vst [vmem:[#allocation2 + $0x3c] sm:$0xf] %v887_v55  ;;  %889 = vst [vmem:[#allocation2 + $0x40] sm:$0xf] %v615_v50  ;;  %v618_v60 = vshrl.u32 %v7809_v52, 16 }
  0x68   : > { %v3027_v56 = vsel %vm7587_vm2, %v3022_v47, %v3026_v30  ;;  %892 = vst [vmem:[#allocation2 + $0x44] sm:$0x1] %v891_v58  ;;  %6810 = vmatprep.subr.bf16.mxu0 %v7296_v40  ;;  %v1141_v12 = vrot.slane %v1140_v48, 4  ;;  %v621_v13 = vshll.u32 %v7809_v52, 16  ;;  %v626_v16 = vshrl.u32 %v7828_v5, 16 }
  0x69   : > { %v6155_v9 = vcombine.low %v3017_v63, %v3027_v56  ;;  %v1151_v18 = vrot.slane %v1150_v57, 4  ;;  %v620_v21 = vrot.slane %v618_v60, 7  ;;  %v629_v27 = vshll.u32 %v7828_v5, 16 }
  0x6a   : > { %v359_v25 = vmax.f32 %v7812_v53, 0.0  ;;  %v1146_v52 = vsel %vm7587_vm2, %v1141_v12, %v1145_v44  ;;  %v628_v54 = vrot.slane %v626_v16, 7  ;;  %v360_v29 = vmax.f32 %v7818_v62, 0.0  ;;  %6811 = vmatpush3.bf16.msra.mxu0 %v7296_v40  ;;  %v255_v62 = vld [vmem:[%s7563_s24 + $0x90] sm:$0xff] }
  0x6b   : > { %6769 = vmatmul.mubr.bf16.gmra.mrb[4].mxu0 %v6155_v9  ;;  %v7872_v6 = vadd.f32 %v7575_v26, %v7824_v4  ;;  %v1156_v30 = vsel %vm7587_vm2, %v1151_v18, %v1155_v20  ;;  %v623_v31 = vor.u32 %v621_v13, %v620_v21  ;;  %v624_v5 = vrot.slane %v620_v21, 4  ;;  %6844 = vmatprep.subr.bf16.mxu0 %v7863_v17 }
  0x6c   : > { %v7876_v15 = vpack.c.bf16 %v359_v25, %v359_v25  ;;  %v6044_v53 = vcombine.low %v1146_v52, %v1156_v30  ;;  %v631_v0 = vor.u32 %v629_v27, %v628_v54  ;;  %v633_v32 = vrot.slane %v628_v54, 4 }
  0x6d   : > { %v7878_v33 = vpack.c.bf16 %v360_v29, %v360_v29  ;;  %v894_v4 = vsel %vm7632_vm9, %v623_v31, %v893_v51  ;;  %v7888_v38 = vadd.f32 %v7575_v26, %v7831_v1  ;;  %v7902_v1 = vadd.f32 %v7575_v26, %v7834_v2  ;;  %v7922_v2 = vld [vmem:[%s9391_s1] ss:$0 sm:$0xff] }
  0x6e   : > { %v635_v35 = vshrl.u32 %v7876_v15, 16  ;;  %v638_v36 = vshll.u32 %v7876_v15, 16  ;;  %6580 = vmatprep.mubr.bf16.mxu1 %v6044_v53  ;;  %v980_v40 = vld [vmem:[#allocation2 + $0x3c] sm:$0xf]  ;;  %v981_v43 = vld [vmem:[#allocation2 + $0x40] sm:$0xf]  ;;  %v632_v45 = vsel %vm7625_vm8, %v624_v5, %v631_v0  ;;  %v898_v7 = vsel %vm7639_vm10, %v633_v32, %v897_v28 }
  0x6f   : > { %v1023_v44 = vld [vmem:[#allocation2 + $0x44] sm:$0x1]  ;;  %895 = vst [vmem:[#allocation2 + $0x48] sm:$0xf] %v894_v4  ;;  %v7906_v46 = vadd.f32 %v7575_v26, %v7837_v10  ;;  %v1158_v47 = vshrl.u32 %v980_v40, 16  ;;  %v1161_v59 = vshll.u32 %v980_v40, 16  ;;  %v7917_v26 = vsel %vm7892_vm13, %v7723_v37, %v3713_v24 }
  0x70   : > { %v1167_v20 = vshll.u32 %v981_v43, 16  ;;  %v1171_v48 = vshrl.u32 %v981_v43, 16  ;;  %v2896_v50 = vld [vmem:[#allocation2 + $0x3c] sm:$0xf]  ;;  %896 = vst [vmem:[#allocation2 + $0x4c] sm:$0xf] %v632_v45  ;;  %v7925_v10 = vmul.f32 %v7922_v2, %v255_v62 }
  0x71   : > { %899 = vst [vmem:[#allocation2 + $0x50] sm:$0x1] %v898_v7  ;;  %v1177_v55 = vshll.u32 %v1023_v44, 16  ;;  %v7908_v58 = vld [vmem:[#allocation2 + $0x40] sm:$0xf]  ;;  %v3029_v56 = vshrl.u32 %v2896_v50, 16 }
  0x72   : > { %v7910_v63 = vld [vmem:[#allocation2 + $0x44] sm:$0x1]  ;;  %v1160_v57 = vrot.slane %v1158_v47, 4  ;;  %v1163_v60 = vrot.slane %v1161_v59, 5  ;;  %v1169_v9 = vrot.slane %v1167_v20, 5  ;;  %v1173_v12 = vrot.slane %v1171_v48, 4 }
  0x73   : > { %v1179_v13 = vrot.slane %v1177_v55, 5  ;;  %v3031_v16 = vrot.slane %v3029_v56, 4  ;;  %v3032_v49 = vshll.u32 %v2896_v50, 16  ;;  %v3038_v51 = vshll.u32 %v7908_v58, 16  ;;  %v7303_v24 = vld [vmem:[%s9393_s3 + $0x38] sm:$0xff]  }
  0x74   : > { %v1164_v37 = vor.u32 %v1163_v60, %v1160_v57  ;;  %v1174_v18 = vor.u32 %v1173_v12, %v1169_v9  ;;  %v3042_v21 = vshrl.u32 %v7908_v58, 16  ;;  %v3048_v27 = vshll.u32 %v7910_v63, 16  ;;  %6618 = vmatprep.subr.bf16.mxu1 %v7303_v24 }
  0x75   : > { %v3034_v28 = vrot.slane %v3032_v49, 5  ;;  %v3040_v25 = vrot.slane %v3038_v51, 5  ;;  %v7933_v52 = vrot.slane %v635_v35, 7  ;;  %v643_v54 = vshrl.u32 %v7878_v33, 16  ;;  %6619 = vmatpush3.bf16.msra.mxu1 %v7303_v24  ;;  %v7307_v49 = vld [vmem:[%s9393_s3 + $0x80] sm:$0xff]  }
  0x76   : > { %v1165_v29 = vrot.slane %v1164_v37, 4  ;;  %v1175_v30 = vrot.slane %v1174_v18, 4  ;;  %v3044_v31 = vrot.slane %v3042_v21, 4  ;;  %v3050_v5 = vrot.slane %v3048_v27, 5  ;;  %v2899_v15 = vld [vmem:[#allocation2 + $0x48] sm:$0xf]  ;;  %6652 = vmatprep.subr.bf16.mxu1 %v7307_v49 }
  0x77   : > { %v3035_v53 = vor.u32 %v3034_v28, %v3031_v16  ;;  %v7936_v0 = vld [vmem:[#allocation2 + $0x4c] sm:$0xf]  ;;  %v3053_v62 = vshrl.u32 %v2899_v15, 16  ;;  %v3056_v4 = vshll.u32 %v2899_v15, 16  ;;  %v640_v40 = vor.u32 %v638_v36, %v7933_v52  ;;  %v982_v7 = vld [vmem:[#allocation2 + $0x48] sm:$0xf] }
  0x78   : > { %v7938_v32 = vld [vmem:[#allocation2 + $0x50] sm:$0x1]  ;;  %v1170_v35 = vsel %vm7587_vm2, %v1165_v29, %v1169_v9  ;;  %v1180_v43 = vsel %vm7587_vm2, %v1175_v30, %v1179_v13  ;;  %v3045_v44 = vor.u32 %v3044_v31, %v3040_v25  ;;  %v3062_v45 = vshll.u32 %v7936_v0, 16  ;;  %v983_v50 = vld [vmem:[#allocation2 + $0x4c] sm:$0xf] }
  0x79   : > { %v6045_v47 = vcombine.low %v1170_v35, %v1180_v43  ;;  %v3036_v59 = vrot.slane %v3035_v53, 4  ;;  %v3055_v20 = vrot.slane %v3053_v62, 4  ;;  %v3058_v48 = vrot.slane %v3056_v4, 5  ;;  %v1024_v60 = vld [vmem:[#allocation2 + $0x50] sm:$0x1] }
  0x7a   : > { %v3046_v55 = vrot.slane %v3045_v44, 4  ;;  %v3064_v56 = vrot.slane %v3062_v45, 5  ;;  %v3066_v57 = vshrl.u32 %v7936_v0, 16  ;;  %v3072_v36 = vshll.u32 %v7938_v32, 16  ;;  %v900_v21 = vld [vmem:[#allocation2 + $0x54] sm:$0xf] }
  0x7b   : > { %6581 = vmatmul.mubr.bf16.gmra.mrb[8].mxu1 %v6045_v47  ;;  %v3041_v9 = vsel %vm7587_vm2, %v3036_v59, %v3040_v25  ;;  %v3059_v12 = vor.u32 %v3058_v48, %v3055_v20  ;;  %v1182_v13 = vshrl.u32 %v982_v7, 16  ;;  %v1185_v16 = vshll.u32 %v982_v7, 16  ;;  %v904_v62 = vld [vmem:[#allocation2 + $0x5c] sm:$0x1]  ;;  %v3637_v59 = vld [vmem:[#allocation2 + $0xc] sm:$0xe] }
  0x7c   : > { %v3051_v51 = vsel %vm7587_vm2, %v3046_v55, %v3050_v5  ;;  %v3068_v24 = vrot.slane %v3066_v57, 4  ;;  %v3074_v37 = vrot.slane %v3072_v36, 5  ;;  %v1191_v18 = vshll.u32 %v983_v50, 16 }
  0x7d   : > { %v6156_v27 = vcombine.low %v3041_v9, %v3051_v51  ;;  %v3060_v28 = vrot.slane %v3059_v12, 4  ;;  %v1184_v29 = vrot.slane %v1182_v13, 4  ;;  %v1187_v30 = vrot.slane %v1185_v16, 5 }
  0x7e   : > { %v3069_v25 = vor.u32 %v3068_v24, %v3064_v56  ;;  %v1193_v31 = vrot.slane %v1191_v18, 5  ;;  %v1195_v15 = vshrl.u32 %v983_v50, 16  ;;  %v1201_v53 = vshll.u32 %v1024_v60, 16  ;;  %v7973_v24 = vld [vmem:[#allocation2 + $0x18] sm:$0xe] }
  0x7f   : > { %6772 = vmatprep.mubr.bf16.mxu0 %v6156_v27  ;;  %v3065_v4 = vsel %vm7587_vm2, %v3060_v28, %v3064_v56  ;;  %v1188_v35 = vor.u32 %v1187_v30, %v1184_v29  ;;  %v641_v5 = vrot.slane %v7933_v52, 4  ;;  %v645_v43 = vrot.slane %v643_v54, 7  ;;  %v907_v27 = vld [vmem:[#allocation2 + $0x60] sm:$0xf] }
  0x80   : > { %v3070_v44 = vrot.slane %v3069_v25, 4  ;;  %v1197_v45 = vrot.slane %v1195_v15, 4  ;;  %v1203_v7 = vrot.slane %v1201_v53, 5  ;;  %v646_v47 = vshll.u32 %v7878_v33, 16 }
  0x81   : > { %v1189_v20 = vrot.slane %v1188_v35, 4  ;;  %v650_v48 = vrot.slane %v645_v43, 4  ;;  %v901_v50 = vsel %vm7632_vm9, %v640_v40, %v900_v21  ;;  %v361_v55 = vmax.f32 %v7872_v6, 0.0 }
  0x82   : > { %v3075_v56 = vsel %vm7587_vm2, %v3070_v44, %v3074_v37  ;;  %v1198_v57 = vor.u32 %v1197_v45, %v1193_v31  ;;  %v648_v36 = vor.u32 %v646_v47, %v645_v43  ;;  %902 = vst [vmem:[#allocation2 + $0x54] sm:$0xf] %v901_v50  ;;  %v362_v52 = vmax.f32 %v7888_v38, 0.0 }
  0x83   : > { %v6157_v54 = vcombine.low %v3065_v4, %v3075_v56  ;;  %v1194_v33 = vsel %vm7587_vm2, %v1189_v20, %v1193_v31  ;;  %v905_v60 = vsel %vm7639_vm10, %v650_v48, %v904_v62  ;;  %v6322_v9 = vpack.c.bf16 %v361_v55, %v361_v55 }
  0x84   : > { %v1199_v12 = vrot.slane %v1198_v57, 4  ;;  %v649_v6 = vsel %vm7625_vm8, %v641_v5, %v648_v36  ;;  %906 = vst [vmem:[#allocation2 + $0x5c] sm:$0x1] %v905_v60  ;;  %v6323_v40 = vpack.c.bf16 %v362_v52, %v362_v52  ;;  %v363_v13 = vmax.f32 %v7902_v1, 0.0 }
  0x85   : > { %6773 = vmatmul.mubr.bf16.gmra.mrb[8].mxu0 %v6157_v54  ;;  %903 = vst [vmem:[#allocation2 + $0x58] sm:$0xf] %v649_v6  ;;  %v652_v16 = vshrl.u32 %v6322_v9, 16  ;;  %v655_v38 = vshll.u32 %v6322_v9, 16  ;;  %v364_v49 = vmax.f32 %v7906_v46, 0.0  ;;  %v6176_v51 = vrot.slane %v3637_v59, 9 }
  0x86   : > { %v1204_v37 = vsel %vm7587_vm2, %v1199_v12, %v1203_v7  ;;  %v660_v18 = vshrl.u32 %v6323_v40, 16  ;;  %v663_v21 = vshll.u32 %v6323_v40, 16  ;;  %v6324_v28 = vpack.c.bf16 %v363_v13, %v363_v13  ;;  %v911_v9 = vld [vmem:[#allocation2 + $0x68] sm:$0x1] }
  0x87   : > { %v6046_v29 = vcombine.low %v1194_v33, %v1204_v37  ;;  %v654_v30 = vrot.slane %v652_v16, 7  ;;  %v7977_v25 = vpack.c.bf16 %v364_v49, %v364_v49  ;;  %v3703_v1 = vrot.slane %v7687_v19, 5 }
  0x88   : > { %v662_v31 = vrot.slane %v660_v18, 7  ;;  %v669_v15 = vshrl.u32 %v6324_v28, 16  ;;  %v672_v53 = vshll.u32 %v6324_v28, 16  ;;  %v6177_v46 = vrot.slane %v7973_v24, 9  ;;  %v914_v18 = vld [vmem:[#allocation2 + $0x6c] sm:$0xf] }
  0x89   : > { %6584 = vmatprep.mubr.bf16.mxu1 %v6046_v29  ;;  %v984_v62 = vld [vmem:[#allocation2 + $0x54] sm:$0xf]  ;;  %v657_v35 = vor.u32 %v655_v38, %v654_v30  ;;  %v658_v5 = vrot.slane %v654_v30, 4  ;;  %v677_v43 = vshrl.u32 %v7977_v25, 16  ;;  %v7986_v44 = vsel %vm7892_vm13, %v6176_v51, %v3703_v1 }
  0x8a   : > { %v2902_v4 = vld [vmem:[#allocation2 + $0x54] sm:$0xf]  ;;  %v1206_v45 = vshrl.u32 %v984_v62, 16  ;;  %v1209_v7 = vshll.u32 %v984_v62, 16  ;;  %v665_v50 = vor.u32 %v663_v21, %v662_v31  ;;  %v667_v55 = vrot.slane %v662_v31, 4 }
  0x8b   : > { %v3077_v47 = vshrl.u32 %v2902_v4, 16  ;;  %v3080_v59 = vshll.u32 %v2902_v4, 16  ;;  %v1025_v20 = vld [vmem:[#allocation2 + $0x5c] sm:$0x1]  ;;  %v908_v56 = vsel %vm7632_vm9, %v657_v35, %v907_v27  ;;  %v671_v57 = vrot.slane %v669_v15, 7 }
  0x8c   : > { %v7988_v48 = vld [vmem:[#allocation2 + $0x5c] sm:$0x1]  ;;  %v985_v36 = vld [vmem:[#allocation2 + $0x58] sm:$0xf]  ;;  %v1208_v52 = vrot.slane %v1206_v45, 4  ;;  %v1211_v54 = vrot.slane %v1209_v7, 5  ;;  %v666_v62 = vsel %vm7625_vm8, %v658_v5, %v665_v50  ;;  %v912_v45 = vsel %vm7639_vm10, %v667_v55, %v911_v9 }
  0x8d   : > { %v1225_v33 = vshll.u32 %v1025_v20, 16  ;;  %v3079_v60 = vrot.slane %v3077_v47, 4  ;;  %909 = vst [vmem:[#allocation2 + $0x60] sm:$0xf] %v908_v56  ;;  %v1215_v12 = vshll.u32 %v985_v36, 16  ;;  %v1219_v6 = vshrl.u32 %v985_v36, 16 }
  0x8e   : > { %v7992_v40 = vld [vmem:[#allocation2 + $0x58] sm:$0xf]  ;;  %v3082_v13 = vrot.slane %v3080_v59, 5  ;;  %v3096_v16 = vshll.u32 %v7988_v48, 16  ;;  %v1212_v38 = vor.u32 %v1211_v54, %v1208_v52  ;;  %910 = vst [vmem:[#allocation2 + $0x64] sm:$0xf] %v666_v62  ;;  %v674_v7 = vor.u32 %v672_v53, %v671_v57 }
  0x8f   : > { %v1227_v49 = vrot.slane %v1225_v33, 5  ;;  %v3086_v51 = vshll.u32 %v7992_v40, 16  ;;  %v3090_v37 = vshrl.u32 %v7992_v40, 16  ;;  %v1217_v21 = vrot.slane %v1215_v12, 5  ;;  %913 = vst [vmem:[#allocation2 + $0x68] sm:$0x1] %v912_v45 }
  0x90   : > { %v1221_v27 = vrot.slane %v1219_v6, 4  ;;  %v3083_v28 = vor.u32 %v3082_v13, %v3079_v60  ;;  %v3098_v29 = vrot.slane %v3096_v16, 5  ;;  %v1213_v30 = vrot.slane %v1212_v38, 4  ;;  %v918_v13 = vld [vmem:[#allocation2 + $0x74] sm:$0x1] }
  0x91   : > { %v3088_v31 = vrot.slane %v3086_v51, 5  ;;  %v3092_v15 = vrot.slane %v3090_v37, 4  ;;  %v675_v20 = vrot.slane %v671_v57, 4  ;;  %v679_v56 = vrot.slane %v677_v43, 7 }
  0x92   : > { %v1222_v4 = vor.u32 %v1221_v27, %v1217_v21  ;;  %v3084_v35 = vrot.slane %v3083_v28, 4  ;;  %v1218_v47 = vsel %vm7587_vm2, %v1213_v30, %v1217_v21  ;;  %v680_v50 = vshll.u32 %v7977_v25, 16 }
  0x93   : > { %v3093_v59 = vor.u32 %v3092_v15, %v3088_v31  ;;  %v915_v33 = vsel %vm7632_vm9, %v674_v7, %v914_v18  ;;  %v684_v6 = vrot.slane %v679_v56, 4  ;;  %v8026_v15 = vsel %vm7892_vm13, %v6177_v46, %v3710_v22 }
  0x94   : > { %v1223_v36 = vrot.slane %v1222_v4, 4  ;;  %v3089_v52 = vsel %vm7587_vm2, %v3084_v35, %v3088_v31  ;;  %v2905_v54 = vld [vmem:[#allocation2 + $0x60] sm:$0xf]  ;;  %916 = vst [vmem:[#allocation2 + $0x6c] sm:$0xf] %v915_v33  ;;  %v682_v12 = vor.u32 %v680_v50, %v679_v56  ;;  %v6193_v19 = vcombine.low %v8026_v15, %v7917_v26  ;;  %v256_v50 = vld [vmem:[%s7563_s24 + $0x98] sm:$0xff] }
  0x95   : > { %v986_v5 = vld [vmem:[#allocation2 + $0x60] sm:$0xf]  ;;  %v3094_v55 = vrot.slane %v3093_v59, 4  ;;  %v3101_v53 = vshrl.u32 %v2905_v54, 16  ;;  %v3104_v60 = vshll.u32 %v2905_v54, 16  ;;  %v919_v31 = vsel %vm7639_vm10, %v684_v6, %v918_v13 }
  0x96   : > { %v1230_v9 = vshrl.u32 %v986_v5, 16  ;;  %v1228_v57 = vsel %vm7587_vm2, %v1223_v36, %v1227_v49  ;;  %v1233_v43 = vshll.u32 %v986_v5, 16  ;;  %v683_v27 = vsel %vm7625_vm8, %v675_v20, %v682_v12  ;;  %v8014_v28 = vld [vmem:[#allocation2 + $0x64] sm:$0xf]  ;;  %v8028_v62 = vld [vmem:[#allocation2 + $0x68] sm:$0x1] }
  0x97   : > { %v6047_v16 = vcombine.low %v1218_v47, %v1228_v57  ;;  %v3099_v38 = vsel %vm7587_vm2, %v3094_v55, %v3098_v29  ;;  %v3103_v25 = vrot.slane %v3101_v53, 4  ;;  %v3106_v51 = vrot.slane %v3104_v60, 5  ;;  %v987_v30 = vld [vmem:[#allocation2 + $0x64] sm:$0xf]  ;;  %917 = vst [vmem:[#allocation2 + $0x70] sm:$0xf] %v683_v27 }
  0x98   : > { %v6158_v37 = vcombine.low %v3089_v52, %v3099_v38  ;;  %v1232_v18 = vrot.slane %v1230_v9, 4  ;;  %v1235_v21 = vrot.slane %v1233_v43, 5  ;;  %v3705_v29 = vrot.slane %v3703_v1, 4  ;;  %v1026_v45 = vld [vmem:[#allocation2 + $0x68] sm:$0x1] }
  0x99   : > { %6585 = vmatmul.mubr.bf16.gmra.mrb[12].mxu1 %v6047_v16  ;;  %v3107_v49 = vor.u32 %v3106_v51, %v3103_v25  ;;  %v3110_v4 = vshll.u32 %v8014_v28, 16  ;;  %v3114_v35 = vshrl.u32 %v8014_v28, 16  ;;  %920 = vst [vmem:[#allocation2 + $0x74] sm:$0x1] %v919_v31  ;;  %v3120_v24 = vshll.u32 %v8028_v62, 16  ;;  %v257_v31 = vld [vmem:[%s7563_s24 + $0xa0] sm:$0xff] }
  0x9a   : > { %6776 = vmatprep.mubr.bf16.mxu0 %v6158_v37  ;;  %v1236_v7 = vor.u32 %v1235_v21, %v1232_v18  ;;  %v1239_v1 = vshll.u32 %v987_v30, 16  ;;  %v1243_v22 = vshrl.u32 %v987_v30, 16  ;;  %v1249_v20 = vshll.u32 %v1026_v45, 16 }
  0x9b   : > { %v3108_v42 = vrot.slane %v3107_v49, 4  ;;  %v3112_v46 = vrot.slane %v3110_v4, 5  ;;  %v3116_v47 = vrot.slane %v3114_v35, 4  ;;  %v988_v56 = vld [vmem:[#allocation2 + $0x6c] sm:$0xf]  ;;  %v3122_v36 = vrot.slane %v3120_v24, 5 }
  0x9c   : > { %v1237_v59 = vrot.slane %v1236_v7, 4  ;;  %v1241_v52 = vrot.slane %v1239_v1, 5  ;;  %v1245_v54 = vrot.slane %v1243_v22, 4  ;;  %v1254_v5 = vshrl.u32 %v988_v56, 16 }
  0x9d   : > { %v3113_v33 = vsel %vm7587_vm2, %v3108_v42, %v3112_v46  ;;  %v3117_v55 = vor.u32 %v3116_v47, %v3112_v46  ;;  %v1251_v53 = vrot.slane %v1249_v20, 5  ;;  %v1257_v60 = vshll.u32 %v988_v56, 16  ;;  %v3639_v42 = vld [vmem:[#allocation2 + $0x24] sm:$0xe] }
  0x9e   : > { %v1242_v9 = vsel %vm7587_vm2, %v1237_v59, %v1241_v52  ;;  %v1246_v57 = vor.u32 %v1245_v54, %v1241_v52  ;;  %v1256_v43 = vrot.slane %v1254_v5, 4  ;;  %v3707_v12 = vsel %vm7892_vm13, %v3705_v29, %v3706_v41  ;;  %v989_v13 = vld [vmem:[#allocation2 + $0x70] sm:$0xf]  ;;  %v258_v29 = vld [vmem:[%s7563_s24 + $0xa8] sm:$0xff] }
  0x9f   : > { %v3118_v6 = vrot.slane %v3117_v55, 4  ;;  %v1259_v16 = vrot.slane %v1257_v60, 5  ;;  %v6192_v38 = vcombine.low %v7986_v44, %v3707_v12  ;;  %v295_v25 = vmul.f32 %v7922_v2, %v256_v50  ;;  %v7391_v54 = vld [vmem:[#allocation2 + $0x28] sm:$0xf]  ;;  %v3640_v50 = vld [vmem:[#allocation2 + $0x30] sm:$0xe] }
  0xa0   : > { %v1247_v51 = vrot.slane %v1246_v57, 4  ;;  %v1027_v37 = vld [vmem:[#allocation2 + $0x74] sm:$0x1]  ;;  %v1263_v18 = vshll.u32 %v989_v13, 16  ;;  %v1267_v21 = vshrl.u32 %v989_v13, 16  ;;  %v333_v41 = vadd.f32 %v8049_v23, %v7925_v10 }
  0xa1   : > { %v3123_v27 = vsel %vm7587_vm2, %v3118_v6, %v3122_v36  ;;  %v1260_v49 = vor.u32 %v1259_v16, %v1256_v43  ;;  %v1273_v30 = vshll.u32 %v1027_v37, 16  ;;  %v334_v44 = vadd.f32 %v8049_v23, %v295_v25 }
  0xa2   : > { %v6159_v4 = vcombine.low %v3113_v33, %v3123_v27  ;;  %v1252_v35 = vsel %vm7587_vm2, %v1247_v51, %v1251_v53  ;;  %v1265_v45 = vrot.slane %v1263_v18, 5  ;;  %v1269_v7 = vrot.slane %v1267_v21, 4  ;;  %v925_v18 = vld [vmem:[#allocation2 + $0x80] sm:$0x1] }
  0xa3   : > { %v6048_v24 = vcombine.low %v1242_v9, %v1252_v35  ;;  %v1261_v1 = vrot.slane %v1260_v49, 4  ;;  %v1275_v22 = vrot.slane %v1273_v30, 5  ;;  %v365_v10 = vmax.f32 %v333_v41, 0.0  ;;  %v7392_v41 = vld [vmem:[#allocation2 + $0x2c] sm:$0x1] }
  0xa4   : > { %6777 = vmatmul.mubr.bf16.gmra.mrb[12].mxu0 %v6159_v4  ;;  %v1270_v46 = vor.u32 %v1269_v7, %v1265_v45  ;;  %v366_v47 = vmax.f32 %v334_v44, 0.0  ;;  %v296_v59 = vmul.f32 %v7922_v2, %v257_v31  ;;  %v297_v20 = vmul.f32 %v7922_v2, %v258_v29  ;;  %v7300_v44 = vld [vmem:[%s9393_s3 + $0x188] sm:$0xff]  }
  0xa5   : > { %6588 = vmatprep.mubr.bf16.mxu1 %v6048_v24  ;;  %v1266_v56 = vsel %vm7587_vm2, %v1261_v1, %v1265_v45  ;;  %6812 = vmatprep.mubr.bf16.mxu0 %v6192_v38  ;;  %v6326_v36 = vpack.c.bf16 %v365_v10, %v365_v10  ;;  %v6178_v52 = vrot.slane %v3639_v42, 9  ;;  %v3717_v5 = vrot.slane %v7391_v54, 5  ;;  %v921_v38 = vld [vmem:[#allocation2 + $0x78] sm:$0xf]  ;;  %v259_v42 = vld [vmem:[%s7563_s24 + $0xb0] sm:$0xff] }
  0xa6   : > { %v1271_v33 = vrot.slane %v1270_v46, 4  ;;  %v6327_v55 = vpack.c.bf16 %v366_v47, %v366_v47  ;;  %v335_v53 = vadd.f32 %v8049_v23, %v296_v59  ;;  %v336_v60 = vadd.f32 %v8049_v23, %v297_v20  ;;  %v260_v24 = vld [vmem:[%s7563_s24 + $0xb8] sm:$0xff]  ;;  %v261_v47 = vld [vmem:[%s7563_s24 + $0xc0] sm:$0xff]  ;;  %v7302_v54 = vld [vmem:[%s9393_s3 + $0x190] sm:$0xff]  }
  0xa7   : > { %v686_v9 = vshrl.u32 %v6326_v36, 16  ;;  %v689_v57 = vshll.u32 %v6326_v36, 16  ;;  %v3718_v43 = vsel %vm7892_vm13, %v6178_v52, %v3717_v5  ;;  %v3719_v12 = vrot.slane %v3717_v5, 4 }
  0xa8   : > { %v1276_v6 = vsel %vm7587_vm2, %v1271_v33, %v1275_v22  ;;  %v694_v13 = vshrl.u32 %v6327_v55, 16  ;;  %v697_v16 = vshll.u32 %v6327_v55, 16  ;;  %v367_v25 = vmax.f32 %v335_v53, 0.0  ;;  %v262_v53 = vld [vmem:[%s7563_s24 + $0xc8] sm:$0xff] }
  0xa9   : > { %v6049_v51 = vcombine.low %v1266_v56, %v1276_v6  ;;  %v688_v37 = vrot.slane %v686_v9, 7  ;;  %v368_v21 = vmax.f32 %v336_v60, 0.0  ;;  %v3720_v27 = vrot.slane %v7392_v41, 5  ;;  %v928_v56 = vld [vmem:[#allocation2 + $0x84] sm:$0xf] }
  0xaa   : > { %v696_v49 = vrot.slane %v694_v13, 7  ;;  %v6328_v30 = vpack.c.bf16 %v367_v25, %v367_v25  ;;  %v6179_v31 = vrot.slane %v3640_v50, 9  ;;  %v3724_v29 = vrot.slane %v7826_v61, 5  ;;  %v3641_v60 = vld [vmem:[#allocation2 + $0x3c] sm:$0xe] }
  0xab   : > { %6589 = vmatmul.mubr.bf16.gmra.mrb[16].mxu1 %v6049_v51  ;;  %v691_v4 = vor.u32 %v689_v57, %v688_v37  ;;  %v692_v35 = vrot.slane %v688_v37, 4  ;;  %v6329_v45 = vpack.c.bf16 %v368_v21, %v368_v21  ;;  %v3721_v7 = vsel %vm7892_vm13, %v3719_v12, %v3720_v27  ;;  %v8109_v21 = vld [vmem:[#allocation2 + $0x48] sm:$0xe] }
  0xac   : > { %6813 = vmatmul.mubr.bf16.vlgmr.msra.gmra.mrb[0].mxu0 %v6193_v19  ;;  %v699_v1 = vor.u32 %v697_v16, %v696_v49  ;;  %v701_v22 = vrot.slane %v696_v49, 4  ;;  %v703_v10 = vshrl.u32 %v6328_v30, 16  ;;  %v706_v46 = vshll.u32 %v6328_v30, 16  ;;  %v932_v19 = vld [vmem:[#allocation2 + $0x8c] sm:$0x1] }
  0xad   : > { %6845 = vmatpush3.bf16.msra.mxu0 %v7863_v17  ;;  %v922_v61 = vsel %vm7632_vm9, %v691_v4, %v921_v38  ;;  %v711_v59 = vshrl.u32 %v6329_v45, 16  ;;  %v714_v20 = vshll.u32 %v6329_v45, 16  ;;  %v6194_v36 = vcombine.low %v3718_v43, %v3721_v7 }
  0xae   : > { %v700_v52 = vsel %vm7625_vm8, %v692_v35, %v699_v1  ;;  %923 = vst [vmem:[#allocation2 + $0x78] sm:$0xf] %v922_v61  ;;  %v926_v26 = vsel %vm7639_vm10, %v701_v22, %v925_v18  ;;  %v705_v15 = vrot.slane %v703_v10, 7  ;;  %6846 = vmatprep.subr.bf16.mxu0 %v7300_v44  ;;  %v3725_v17 = vsel %vm7892_vm13, %v6179_v31, %v3724_v29 }
  0xaf   : > { %924 = vst [vmem:[#allocation2 + $0x7c] sm:$0xf] %v700_v52  ;;  %927 = vst [vmem:[#allocation2 + $0x80] sm:$0x1] %v926_v26  ;;  %v713_v5 = vrot.slane %v711_v59, 7  ;;  %6816 = vmatprep.mubr.bf16.mxu0 %v6194_v36  ;;  %v3726_v50 = vrot.slane %v3724_v29, 4  ;;  %v298_v55 = vmul.f32 %v7922_v2, %v259_v42  ;;  %v299_v43 = vmul.f32 %v7922_v2, %v260_v24 }
  0xb0   : > { %v3727_v33 = vrot.slane %v7839_v11, 5  ;;  %v708_v9 = vor.u32 %v706_v46, %v705_v15  ;;  %v709_v57 = vrot.slane %v705_v15, 4  ;;  %v300_v12 = vmul.f32 %v7922_v2, %v261_v47  ;;  %v7304_v11 = vld [vmem:[%s9393_s3 + $0x198] sm:$0xff]   ;;  %v7308_v24 = vld [vmem:[%s9393_s3 + $0x1a0] sm:$0xff]  }
  0xb1   : > { %v716_v6 = vor.u32 %v714_v20, %v713_v5  ;;  %v718_v13 = vrot.slane %v713_v5, 4  ;;  %6847 = vmatpush3.bf16.msra.mxu0 %v7300_v44  ;;  %v337_v38 = vadd.f32 %v8049_v23, %v298_v55  ;;  %v338_v37 = vadd.f32 %v8049_v23, %v299_v43 }
  0xb2   : > { %v3728_v16 = vsel %vm7892_vm13, %v3726_v50, %v3727_v33  ;;  %v929_v25 = vsel %vm7632_vm9, %v708_v9, %v928_v56  ;;  %v301_v18 = vmul.f32 %v7922_v2, %v262_v53  ;;  %6848 = vmatprep.subr.bf16.mxu0 %v7302_v54  ;;  %v8116_v30 = vadd.f32 %v8049_v23, %v300_v12 }
  0xb3   : > { %v6195_v51 = vcombine.low %v3725_v17, %v3728_v16  ;;  %v717_v41 = vsel %vm7625_vm8, %v709_v57, %v716_v6  ;;  %930 = vst [vmem:[#allocation2 + $0x84] sm:$0xf] %v929_v25  ;;  %v933_v27 = vsel %vm7639_vm10, %v718_v13, %v932_v19  ;;  %v369_v49 = vmax.f32 %v337_v38, 0.0  ;;  %v7312_v57 = vld [vmem:[%s9393_s3 + $0x1a8] sm:$0xff]  }
  0xb4   : > { %931 = vst [vmem:[#allocation2 + $0x88] sm:$0xf] %v717_v41  ;;  %934 = vst [vmem:[#allocation2 + $0x8c] sm:$0x1] %v933_v27  ;;  %v370_v44 = vmax.f32 %v338_v37, 0.0  ;;  %v8119_v2 = vadd.f32 %v8049_v23, %v301_v18  ;;  %v6180_v31 = vrot.slane %v3641_v60, 9 }
  0xb5   : > { %6817 = vmatmul.mubr.bf16.gmra.mrb[4].mxu0 %v6195_v51  ;;  %v3731_v29 = vrot.slane %v7908_v58, 5  ;;  %v8122_v4 = vld [vmem:[#allocation2 + $0x78] sm:$0xf]  ;;  %v6330_v35 = vpack.c.bf16 %v369_v49, %v369_v49  ;;  %v371_v45 = vmax.f32 %v8116_v30, 0.0  ;;  %v3734_v7 = vrot.slane %v7910_v63, 5  ;;  %v8197_v63 = vld [vmem:[%s9393_s3 + $0x1c0] sm:$0xff]  }
  0xb6   : > { %v6181_v42 = vrot.slane %v8109_v21, 9  ;;  %6849 = vmatpush3.bf16.msra.mxu0 %v7302_v54  ;;  %v8130_v1 = vld [vmem:[#allocation2 + $0x7c] sm:$0xf]  ;;  %v1028_v22 = vld [vmem:[#allocation2 + $0x80] sm:$0x1]  ;;  %v1278_v10 = vshrl.u32 %v8122_v4, 16  ;;  %v6331_v47 = vpack.c.bf16 %v370_v44, %v370_v44 }
  0xb7   : > { %v1281_v46 = vshll.u32 %v8122_v4, 16  ;;  %v8138_v61 = vsel %vm7892_vm13, %v6180_v31, %v3731_v29  ;;  %6850 = vmatprep.subr.bf16.mxu0 %v7304_v11  ;;  %v1287_v59 = vshll.u32 %v8130_v1, 16  ;;  %v1291_v20 = vshrl.u32 %v8130_v1, 16  ;;  %v935_v44 = vld [vmem:[#allocation2 + $0x90] sm:$0xf] }
  0xb8   : > { %v1297_v56 = vshll.u32 %v1028_v22, 16  ;;  %v720_v36 = vshrl.u32 %v6330_v35, 16  ;;  %v1280_v52 = vrot.slane %v1278_v10, 4  ;;  %v723_v15 = vshll.u32 %v6330_v35, 16  ;;  %v939_v10 = vld [vmem:[#allocation2 + $0x98] sm:$0x1] }
  0xb9   : > { %v1283_v26 = vrot.slane %v1281_v46, 5  ;;  %v728_v19 = vshrl.u32 %v6331_v47, 16  ;;  %v1289_v17 = vrot.slane %v1287_v59, 5  ;;  %v1293_v54 = vrot.slane %v1291_v20, 4  ;;  %v7316_v46 = vld [vmem:[%s9393_s3 + $0x1b0] sm:$0xff]  }
  0xba   : > { %v1299_v5 = vrot.slane %v1297_v56, 5  ;;  %v722_v50 = vrot.slane %v720_v36, 7  ;;  %6851 = vmatpush3.bf16.msra.mxu0 %v7304_v11  ;;  %v8142_v55 = vld [vmem:[#allocation2 + $0x84] sm:$0xf]  ;;  %v731_v60 = vshll.u32 %v6331_v47, 16  ;;  %v372_v9 = vmax.f32 %v8119_v2, 0.0 }
  0xbb   : > { %v1284_v33 = vor.u32 %v1283_v26, %v1280_v52  ;;  %v730_v53 = vrot.slane %v728_v19, 7  ;;  %6852 = vmatprep.subr.bf16.mxu0 %v7308_v24  ;;  %v1294_v43 = vor.u32 %v1293_v54, %v1289_v17  ;;  %v8148_v12 = vld [vmem:[#allocation2 + $0x88] sm:$0xf]  ;;  %v1029_v6 = vld [vmem:[#allocation2 + $0x8c] sm:$0x1]  ;;  %v1302_v13 = vshrl.u32 %v8142_v55, 16 }
  0xbc   : > { %v1305_v16 = vshll.u32 %v8142_v55, 16  ;;  %v725_v38 = vor.u32 %v723_v15, %v722_v50  ;;  %v1311_v25 = vshll.u32 %v8148_v12, 16  ;;  %v1315_v51 = vshrl.u32 %v8148_v12, 16  ;;  %v7456_v39 = vld [vmem:[#allocation2 + $0x88] sm:$0xf] }
  0xbd   : > { %v1285_v11 = vrot.slane %v1284_v33, 4  ;;  %v1321_v37 = vshll.u32 %v1029_v6, 16  ;;  %v1295_v18 = vrot.slane %v1294_v43, 4  ;;  %v1304_v41 = vrot.slane %v1302_v13, 4  ;;  %v263_v6 = vld [vmem:[%s7563_s24 + $0xd0] sm:$0xff] }
  0xbe   : > { %v1307_v27 = vrot.slane %v1305_v16, 5  ;;  %v726_v49 = vrot.slane %v722_v50, 4  ;;  %6853 = vmatpush3.bf16.msra.mxu0 %v7308_v24  ;;  %v1313_v31 = vrot.slane %v1311_v25, 5  ;;  %v1317_v35 = vrot.slane %v1315_v51, 4  ;;  %v265_v25 = vld [vmem:[%s7563_s24 + $0xe0] sm:$0xff]  ;;  %v266_v51 = vld [vmem:[%s7563_s24 + $0xe8] sm:$0xff] }
  0xbf   : > { %v1290_v2 = vsel %vm7587_vm2, %v1285_v11, %v1289_v17  ;;  %v1323_v22 = vrot.slane %v1321_v37, 5  ;;  %6854 = vmatprep.subr.bf16.mxu0 %v7312_v57  ;;  %v1300_v47 = vsel %vm7587_vm2, %v1295_v18, %v1299_v5  ;;  %v733_v20 = vor.u32 %v731_v60, %v730_v53  ;;  %v7320_v5 = vld [vmem:[%s9393_s3 + $0x1b8] sm:$0xff]  }
  0xc0   : > { %v1308_v59 = vor.u32 %v1307_v27, %v1304_v41  ;;  %v735_v56 = vrot.slane %v730_v53, 4  ;;  %v6050_v36 = vcombine.low %v1290_v2, %v1300_v47  ;;  %v1318_v24 = vor.u32 %v1317_v35, %v1313_v31  ;;  %v264_v11 = vld [vmem:[%s7563_s24 + $0xd8] sm:$0xff] }
  0xc1   : > { %v936_v52 = vsel %vm7632_vm9, %v725_v38, %v935_v44  ;;  %v6332_v26 = vpack.c.bf16 %v371_v45, %v371_v45  ;;  %v734_v19 = vsel %vm7625_vm8, %v726_v49, %v733_v20  ;;  %v6333_v54 = vpack.c.bf16 %v372_v9, %v372_v9  ;;  %v946_v38 = vld [vmem:[#allocation2 + $0xa4] sm:$0x1]  ;;  %v8202_v49 = vld [vmem:[%s9391_s1] ss:$0 sm:$0xff] }
  0xc2   : > { %v1309_v15 = vrot.slane %v1308_v59, 4  ;;  %937 = vst [vmem:[#allocation2 + $0x90] sm:$0xf] %v936_v52  ;;  %v940_v17 = vsel %vm7639_vm10, %v735_v56, %v939_v10  ;;  %6855 = vmatpush3.bf16.msra.mxu0 %v7312_v57  ;;  %6592 = vmatprep.mubr.bf16.mxu1 %v6050_v36  ;;  %v1319_v50 = vrot.slane %v1318_v24, 4  ;;  %938 = vst [vmem:[#allocation2 + $0x94] sm:$0xf] %v734_v19 }
  0xc3   : > { %941 = vst [vmem:[#allocation2 + $0x98] sm:$0x1] %v940_v17  ;;  %v737_v30 = vshrl.u32 %v6332_v26, 16  ;;  %v740_v45 = vshll.u32 %v6332_v26, 16  ;;  %v3733_v33 = vrot.slane %v3731_v29, 4  ;;  %6856 = vmatprep.subr.bf16.mxu0 %v7316_v46  ;;  %v745_v60 = vshrl.u32 %v6333_v54, 16 }
  0xc4   : > { %v1314_v53 = vsel %vm7587_vm2, %v1309_v15, %v1313_v31  ;;  %v748_v9 = vshll.u32 %v6333_v54, 16  ;;  %v942_v57 = vld [vmem:[#allocation2 + $0x9c] sm:$0xf]  ;;  %v3738_v43 = vrot.slane %v7936_v0, 5  ;;  %v1324_v13 = vsel %vm7587_vm2, %v1319_v50, %v1323_v22 }
  0xc5   : > { %v739_v16 = vrot.slane %v737_v30, 7  ;;  %v3735_v58 = vsel %vm7892_vm13, %v3733_v33, %v3734_v7  ;;  %v3741_v29 = vrot.slane %v7938_v32, 5  ;;  %v6051_v37 = vcombine.low %v1314_v53, %v1324_v13 }
  0xc6   : > { %v747_v18 = vrot.slane %v745_v60, 7  ;;  %v6196_v0 = vcombine.low %v8138_v61, %v3735_v58  ;;  %v3739_v41 = vsel %vm7892_vm13, %v6181_v42, %v3738_v43  ;;  %6857 = vmatpush3.bf16.msra.mxu0 %v7316_v46  ;;  %v3740_v27 = vrot.slane %v3738_v43, 4 }
  0xc7   : > { %v742_v7 = vor.u32 %v740_v45, %v739_v16  ;;  %v743_v32 = vrot.slane %v739_v16, 4  ;;  %v302_v61 = vmul.f32 %v8202_v49, %v263_v6  ;;  %6858 = vmatprep.subr.bf16.mxu0 %v7320_v5  ;;  %6593 = vmatmul.mubr.bf16.gmra.mrb[20].mxu1 %v6051_v37  ;;  %v303_v44 = vmul.f32 %v8202_v49, %v264_v11  ;;  %v3643_v45 = vld [vmem:[#allocation2 + $0x54] sm:$0xe] }
  0xc8   : > { %v750_v21 = vor.u32 %v748_v9, %v747_v18  ;;  %v752_v42 = vrot.slane %v747_v18, 4  ;;  %6820 = vmatprep.mubr.bf16.mxu0 %v6196_v0  ;;  %v304_v2 = vmul.f32 %v8202_v49, %v265_v25  ;;  %v3742_v22 = vsel %vm7892_vm13, %v3740_v27, %v3741_v29 }
  0xc9   : > { %v8207_v31 = vld [vmem:[#allocation2 + $0x90] sm:$0xf]  ;;  %v943_v35 = vsel %vm7632_vm9, %v742_v7, %v942_v57  ;;  %v341_v10 = vadd.f32 %v8049_v23, %v302_v61  ;;  %v305_v46 = vmul.f32 %v8202_v49, %v266_v51  ;;  %v8215_v47 = vld [vmem:[#allocation2 + $0x94] sm:$0xf]  ;;  %v6197_v19 = vcombine.low %v3739_v41, %v3742_v22 }
  0xca   : > { %v1030_v59 = vld [vmem:[#allocation2 + $0x98] sm:$0x1]  ;;  %v1326_v20 = vshrl.u32 %v8207_v31, 16  ;;  %v1329_v56 = vshll.u32 %v8207_v31, 16  ;;  %v751_v36 = vsel %vm7625_vm8, %v743_v32, %v750_v21  ;;  %944 = vst [vmem:[#allocation2 + $0x9c] sm:$0xf] %v943_v35  ;;  %v947_v24 = vsel %vm7639_vm10, %v752_v42, %v946_v38  ;;  %6859 = vmatpush3.bf16.msra.mxu0 %v7320_v5 }
  0xcb   : > { %v1335_v52 = vshll.u32 %v8215_v47, 16  ;;  %v1339_v26 = vshrl.u32 %v8215_v47, 16  ;;  %v1345_v15 = vshll.u32 %v1030_v59, 16  ;;  %945 = vst [vmem:[#allocation2 + $0xa0] sm:$0xf] %v751_v36  ;;  %6892 = vmatprep.subr.bf16.mxu0 %v8197_v63  ;;  %v342_v50 = vadd.f32 %v8049_v23, %v303_v44  ;;  %6821 = vmatmul.mubr.bf16.gmra.mrb[8].mxu0 %v6197_v19 }
  0xcc   : > { %948 = vst [vmem:[#allocation2 + $0xa4] sm:$0x1] %v947_v24  ;;  %v1328_v17 = vrot.slane %v1326_v20, 4  ;;  %v1331_v54 = vrot.slane %v1329_v56, 5  ;;  %v373_v30 = vmax.f32 %v341_v10, 0.0  ;;  %v343_v5 = vadd.f32 %v8049_v23, %v304_v2 }
  0xcd   : > { %v1337_v33 = vrot.slane %v1335_v52, 5  ;;  %v1341_v53 = vrot.slane %v1339_v26, 4  ;;  %v374_v9 = vmax.f32 %v342_v50, 0.0  ;;  %v344_v43 = vadd.f32 %v8049_v23, %v305_v46  ;;  %v949_v59 = vld [vmem:[#allocation2 + $0xa8] sm:$0xf] }
  0xce   : > { %v1332_v60 = vor.u32 %v1331_v54, %v1328_v17  ;;  %v6334_v57 = vpack.c.bf16 %v373_v30, %v373_v30  ;;  %v1347_v13 = vrot.slane %v1345_v15, 5  ;;  %v375_v16 = vmax.f32 %v343_v5, 0.0 }
  0xcf   : > { %v1342_v6 = vor.u32 %v1341_v53, %v1337_v33  ;;  %v6182_v38 = vrot.slane %v3643_v45, 9  ;;  %v6335_v29 = vpack.c.bf16 %v374_v9, %v374_v9  ;;  %v3745_v25 = vrot.slane %v7992_v40, 5  ;;  %v953_v53 = vld [vmem:[#allocation2 + $0xb0] sm:$0x1] }
  0xd0   : > { %v1333_v58 = vrot.slane %v1332_v60, 4  ;;  %v754_v11 = vshrl.u32 %v6334_v57, 16  ;;  %v757_v18 = vshll.u32 %v6334_v57, 16  ;;  %v376_v0 = vmax.f32 %v344_v43, 0.0 }
  0xd1   : > { %v1343_v51 = vrot.slane %v1342_v6, 4  ;;  %v8230_v37 = vld [vmem:[#allocation2 + $0x9c] sm:$0xf]  ;;  %v6336_v41 = vpack.c.bf16 %v375_v16, %v375_v16  ;;  %v3746_v21 = vsel %vm7892_vm13, %v6182_v38, %v3745_v25  ;;  %v762_v24 = vshrl.u32 %v6335_v29, 16 }
  0xd2   : > { %v1338_v7 = vsel %vm7587_vm2, %v1333_v58, %v1337_v33  ;;  %v8234_v32 = vld [vmem:[#allocation2 + $0xa0] sm:$0xf]  ;;  %v1350_v27 = vshrl.u32 %v8230_v37, 16  ;;  %v1353_v61 = vshll.u32 %v8230_v37, 16  ;;  %v756_v46 = vrot.slane %v754_v11, 7 }
  0xd3   : > { %v1031_v23 = vld [vmem:[#allocation2 + $0xa4] sm:$0x1]  ;;  %v1348_v40 = vsel %vm7587_vm2, %v1343_v51, %v1347_v13  ;;  %v1359_v42 = vshll.u32 %v8234_v32, 16  ;;  %v1363_v44 = vshrl.u32 %v8234_v32, 16  ;;  %v765_v19 = vshll.u32 %v6335_v29, 16 }
  0xd4   : > { %v1369_v2 = vshll.u32 %v1031_v23, 16  ;;  %v6052_v35 = vcombine.low %v1338_v7, %v1348_v40  ;;  %v1352_v22 = vrot.slane %v1350_v27, 4  ;;  %v1355_v10 = vrot.slane %v1353_v61, 5  ;;  %v956_v13 = vld [vmem:[#allocation2 + $0xb4] sm:$0xf] }
  0xd5   : > { %v1361_v20 = vrot.slane %v1359_v42, 5  ;;  %v1365_v56 = vrot.slane %v1363_v44, 4  ;;  %v759_v26 = vor.u32 %v757_v18, %v756_v46  ;;  %v760_v15 = vrot.slane %v756_v46, 4  ;;  %v3644_v11 = vld [vmem:[#allocation2 + $0x60] sm:$0xe] }
  0xd6   : > { %v1371_v36 = vrot.slane %v1369_v2, 5  ;;  %6596 = vmatprep.mubr.bf16.mxu1 %v6052_v35  ;;  %v1356_v52 = vor.u32 %v1355_v10, %v1352_v22  ;;  %v764_v54 = vrot.slane %v762_v24, 7  ;;  %v6337_v50 = vpack.c.bf16 %v376_v0, %v376_v0  ;;  %v3645_v61 = vld [vmem:[#allocation2 + $0x6c] sm:$0xe]  ;;  %v960_v42 = vld [vmem:[#allocation2 + $0xbc] sm:$0x1] }
  0xd7   : > { %v1366_v17 = vor.u32 %v1365_v56, %v1361_v20  ;;  %v771_v30 = vshrl.u32 %v6336_v41, 16  ;;  %v950_v33 = vsel %vm7632_vm9, %v759_v26, %v949_v59  ;;  %v774_v5 = vshll.u32 %v6336_v41, 16  ;;  %v2910_v22 = vld [vmem:[#allocation2 + $0x74] sm:$0x1] }
  0xd8   : > { %v1357_v45 = vrot.slane %v1356_v52, 4  ;;  %v3747_v60 = vrot.slane %v3745_v25, 4  ;;  %v767_v57 = vor.u32 %v765_v19, %v764_v54  ;;  %v769_v43 = vrot.slane %v764_v54, 4  ;;  %951 = vst [vmem:[#allocation2 + $0xa8] sm:$0xf] %v950_v33 }
  0xd9   : > { %v1367_v9 = vrot.slane %v1366_v17, 4  ;;  %v773_v6 = vrot.slane %v771_v30, 7  ;;  %v779_v38 = vshrl.u32 %v6337_v50, 16  ;;  %v782_v58 = vshll.u32 %v6337_v50, 16 }
  0xda   : > { %v1362_v16 = vsel %vm7587_vm2, %v1357_v45, %v1361_v20  ;;  %v3748_v29 = vrot.slane %v7988_v48, 5  ;;  %v768_v25 = vsel %vm7625_vm8, %v760_v15, %v767_v57  ;;  %v954_v18 = vsel %vm7639_vm10, %v769_v43, %v953_v53  ;;  %v2909_v48 = vld [vmem:[#allocation2 + $0x70] sm:$0xf] }
  0xdb   : > { %v1372_v51 = vsel %vm7587_vm2, %v1367_v9, %v1371_v36  ;;  %v776_v0 = vor.u32 %v774_v5, %v773_v6  ;;  %952 = vst [vmem:[#allocation2 + $0xac] sm:$0xf] %v768_v25  ;;  %955 = vst [vmem:[#allocation2 + $0xb0] sm:$0x1] %v954_v18  ;;  %v777_v7 = vrot.slane %v773_v6, 4  ;;  %v781_v23 = vrot.slane %v779_v38, 7 }
  0xdc   : > { %v6053_v41 = vcombine.low %v1362_v16, %v1372_v51  ;;  %v3749_v27 = vsel %vm7892_vm13, %v3747_v60, %v3748_v29  ;;  %v6183_v2 = vrot.slane %v3644_v11, 9  ;;  %v3752_v35 = vrot.slane %v8014_v28, 5  ;;  %v8283_v16 = vld [vmem:[#allocation2 + $0x7c] sm:$0xf]  ;;  %v3646_v38 = vld [vmem:[#allocation2 + $0x78] sm:$0xe] }
  0xdd   : > { %v957_v40 = vsel %vm7632_vm9, %v776_v0, %v956_v13  ;;  %v6198_v44 = vcombine.low %v3746_v21, %v3749_v27  ;;  %v784_v10 = vor.u32 %v782_v58, %v781_v23  ;;  %v786_v46 = vrot.slane %v781_v23, 4  ;;  %v8286_v51 = vld [vmem:[#allocation2 + $0x80] sm:$0x1] }
  0xde   : > { %6597 = vmatmul.mubr.bf16.gmra.mrb[24].mxu1 %v6053_v41  ;;  %958 = vst [vmem:[#allocation2 + $0xb4] sm:$0xf] %v957_v40  ;;  %v3755_v59 = vrot.slane %v8028_v62, 5  ;;  %v3753_v20 = vsel %vm7892_vm13, %v6183_v2, %v3752_v35  ;;  %v3754_v56 = vrot.slane %v3752_v35, 4  ;;  %v6184_v36 = vrot.slane %v3645_v61, 9 }
  0xdf   : > { %6824 = vmatprep.mubr.bf16.mxu0 %v6198_v44  ;;  %v3759_v24 = vrot.slane %v2909_v48, 5  ;;  %v8263_v52 = vld [vmem:[#allocation2 + $0xa8] sm:$0xf]  ;;  %v785_v21 = vsel %vm7625_vm8, %v777_v7, %v784_v10  ;;  %v961_v28 = vsel %vm7639_vm10, %v786_v46, %v960_v42  ;;  %v3762_v26 = vrot.slane %v2910_v22, 5  ;;  %v2916_v2 = vld [vmem:[#allocation2 + $0x8c] sm:$0x1] }
  0xe0   : > { %v1374_v15 = vshrl.u32 %v8263_v52, 16  ;;  %v1377_v62 = vshll.u32 %v8263_v52, 16  ;;  %959 = vst [vmem:[#allocation2 + $0xb8] sm:$0xf] %v785_v21  ;;  %962 = vst [vmem:[#allocation2 + $0xbc] sm:$0x1] %v961_v28  ;;  %v3756_v19 = vsel %vm7892_vm13, %v3754_v56, %v3755_v59 }
  0xe1   : > { %v6199_v17 = vcombine.low %v3753_v20, %v3756_v19  ;;  %v3760_v54 = vsel %vm7892_vm13, %v6184_v36, %v3759_v24  ;;  %v3761_v50 = vrot.slane %v3759_v24, 4  ;;  %v6185_v48 = vrot.slane %v3646_v38, 9  ;;  %v2915_v44 = vld [vmem:[#allocation2 + $0x88] sm:$0xf]  ;;  %v3647_v35 = vld [vmem:[#allocation2 + $0x84] sm:$0xe] }
  0xe2   : > { %v8275_v30 = vld [vmem:[#allocation2 + $0xac] sm:$0xf]  ;;  %v1032_v45 = vld [vmem:[#allocation2 + $0xb0] sm:$0x1]  ;;  %v1376_v33 = vrot.slane %v1374_v15, 4  ;;  %v1379_v53 = vrot.slane %v1377_v62, 5 }
  0xe3   : > { %v1383_v5 = vshll.u32 %v8275_v30, 16  ;;  %v1387_v60 = vshrl.u32 %v8275_v30, 16  ;;  %v1393_v9 = vshll.u32 %v1032_v45, 16  ;;  %6825 = vmatmul.mubr.bf16.gmra.mrb[12].mxu0 %v6199_v17  ;;  %v3763_v57 = vsel %vm7892_vm13, %v3761_v50, %v3762_v26  ;;  %v3648_v20 = vld [vmem:[#allocation2 + $0x90] sm:$0xe] }
  0xe4   : > { %v1380_v43 = vor.u32 %v1379_v53, %v1376_v33  ;;  %v6200_v13 = vcombine.low %v3760_v54, %v3763_v57  ;;  %v3766_v59 = vrot.slane %v8283_v16, 5  ;;  %v3769_v21 = vrot.slane %v8286_v51, 5  ;;  %v2918_v19 = vld [vmem:[#allocation2 + $0x94] sm:$0xf]  ;;  %v2919_v33 = vld [vmem:[#allocation2 + $0x98] sm:$0x1] }
  0xe5   : > { %v8281_v6 = vld [vmem:[#allocation2 + $0xb4] sm:$0xf]  ;;  %v1385_v58 = vrot.slane %v1383_v5, 5  ;;  %v1389_v29 = vrot.slane %v1387_v60, 4  ;;  %v1395_v18 = vrot.slane %v1393_v9, 5  ;;  %v6186_v45 = vrot.slane %v3647_v35, 9 }
  0xe6   : > { %v1398_v11 = vshrl.u32 %v8281_v6, 16  ;;  %v1381_v25 = vrot.slane %v1380_v43, 4  ;;  %v1401_v0 = vshll.u32 %v8281_v6, 16  ;;  %6828 = vmatprep.mubr.bf16.mxu0 %v6200_v13  ;;  %v3767_v15 = vsel %vm7892_vm13, %v6185_v48, %v3766_v59  ;;  %v3649_v57 = vld [vmem:[#allocation2 + $0x9c] sm:$0xe] }
  0xe7   : > { %v1390_v41 = vor.u32 %v1389_v29, %v1385_v58  ;;  %v8289_v7 = vld [vmem:[#allocation2 + $0xb8] sm:$0xf]  ;;  %v1033_v23 = vld [vmem:[#allocation2 + $0xbc] sm:$0x1]  ;;  %v3768_v62 = vrot.slane %v3766_v59, 4  ;;  %v3773_v5 = vrot.slane %v2915_v44, 5 }
  0xe8   : > { %v1400_v27 = vrot.slane %v1398_v11, 4  ;;  %v1403_v61 = vrot.slane %v1401_v0, 5  ;;  %v1407_v40 = vshll.u32 %v8289_v7, 16  ;;  %v1411_v42 = vshrl.u32 %v8289_v7, 16  ;;  %v2921_v29 = vld [vmem:[#allocation2 + $0xa0] sm:$0xf] }
  0xe9   : > { %v1386_v22 = vsel %vm7587_vm2, %v1381_v25, %v1385_v58  ;;  %v1391_v10 = vrot.slane %v1390_v41, 4  ;;  %v1417_v46 = vshll.u32 %v1033_v23, 16  ;;  %v3770_v53 = vsel %vm7892_vm13, %v3768_v62, %v3769_v21  ;;  %v2922_v11 = vld [vmem:[#allocation2 + $0xa4] sm:$0x1]  ;;  %v7394_v25 = vld [vmem:[#allocation2] sm:$0xf] }
  0xea   : > { %v1404_v56 = vor.u32 %v1403_v61, %v1400_v27  ;;  %v1409_v36 = vrot.slane %v1407_v40, 5  ;;  %v1413_v24 = vrot.slane %v1411_v42, 4  ;;  %v3776_v60 = vrot.slane %v2916_v2, 5  ;;  %v2924_v48 = vld [vmem:[#allocation2 + $0xac] sm:$0xf]  ;;  %v267_v62 = vld [vmem:[%s7563_s24 + $0xf0] sm:$0xff] }
  0xeb   : > { %v1396_v28 = vsel %vm7587_vm2, %v1391_v10, %v1395_v18  ;;  %v1419_v26 = vrot.slane %v1417_v46, 5  ;;  %v6187_v9 = vrot.slane %v3648_v20, 9  ;;  %v6201_v38 = vcombine.low %v3767_v15, %v3770_v53  ;;  %v8305_v18 = vld [vmem:[#allocation2 + $0x4] sm:$0xf]  ;;  %v2925_v2 = vld [vmem:[#allocation2 + $0xb0] sm:$0x1] }
  0xec   : > { %v6054_v17 = vcombine.low %v1386_v22, %v1396_v28  ;;  %v1405_v54 = vrot.slane %v1404_v56, 4  ;;  %v1414_v50 = vor.u32 %v1413_v24, %v1409_v36  ;;  %v3780_v58 = vrot.slane %v2918_v19, 5  ;;  %v3650_v35 = vld [vmem:[#allocation2 + $0xa8] sm:$0xe]  ;;  %v2927_v20 = vld [vmem:[#allocation2 + $0xb8] sm:$0xf] }
  0xed   : > { %v6064_v0 = vcombine.low %v7394_v25, %v8305_v18  ;;  %v3774_v41 = vsel %vm7892_vm13, %v6186_v45, %v3773_v5  ;;  %v3775_v23 = vrot.slane %v3773_v5, 4  ;;  %v3783_v27 = vrot.slane %v2919_v33, 5  ;;  %6829 = vmatmul.mubr.bf16.gmra.mrb[16].mxu0 %v6201_v38  ;;  %v3651_v56 = vld [vmem:[#allocation2 + $0xb4] sm:$0xe]  ;;  %v2928_v28 = vld [vmem:[#allocation2 + $0xbc] sm:$0x1] }
  0xee   : > { %6600 = vmatprep.mubr.bf16.mxu1 %v6054_v17  ;;  %v1410_v43 = vsel %vm7587_vm2, %v1405_v54, %v1409_v36  ;;  %v1415_v13 = vrot.slane %v1414_v50, 4  ;;  %v3781_v40 = vsel %vm7892_vm13, %v6187_v9, %v3780_v58  ;;  %v3782_v42 = vrot.slane %v3780_v58, 4  ;;  %v268_v19 = vld [vmem:[%s7563_s24 + $0xf8] sm:$0xff]  ;;  %v8326_v38 = vld [vmem:[#allocation2 + $0x10] sm:$0xf] }
  0xef   : > { %v6188_v44 = vrot.slane %v3649_v57, 9  ;;  %v3777_v10 = vsel %vm7892_vm13, %v3775_v23, %v3776_v60  ;;  %v3787_v46 = vrot.slane %v2921_v29, 5  ;;  %v3790_v59 = vrot.slane %v2922_v11, 5  ;;  %v7398_v11 = vld [vmem:[#allocation2 + $0x18] sm:$0xf] }
  0xf0   : > { %v1420_v61 = vsel %vm7587_vm2, %v1415_v13, %v1419_v26  ;;  %v6202_v36 = vcombine.low %v3774_v41, %v3777_v10  ;;  %v3784_v24 = vsel %vm7892_vm13, %v3782_v42, %v3783_v27  ;;  %v3794_v21 = vrot.slane %v2924_v48, 5  ;;  %v7396_v13 = vld [vmem:[#allocation2 + $0xc] sm:$0xf]  ;;  %v8329_v25 = vld [vmem:[#allocation2 + $0x1c] sm:$0xf] }
  0xf1   : > { %v6055_v22 = vcombine.low %v1410_v43, %v1420_v61  ;;  %v3788_v26 = vsel %vm7892_vm13, %v6188_v44, %v3787_v46  ;;  %v3789_v15 = vrot.slane %v3787_v46, 4  ;;  %v6203_v17 = vcombine.low %v3781_v40, %v3784_v24  ;;  %v7400_v41 = vld [vmem:[%s9392_s2] ss:$0 sm:$0xff] }
  0xf2   : > { %6832 = vmatprep.mubr.bf16.mxu0 %v6202_v36  ;;  %v6189_v54 = vrot.slane %v3650_v35, 9  ;;  %v3796_v50 = vrot.slane %v3794_v21, 4  ;;  %v3797_v45 = vrot.slane %v2925_v2, 5  ;;  %v6190_v53 = vrot.slane %v3651_v56, 9  ;;  %v7401_v35 = vld [vmem:[%s9393_s3 + $0x80] sm:$0xff]  }
  0xf3   : > { %6601 = vmatmul.mubr.bf16.gmra.mrb[28].mxu1 %v6055_v22  ;;  %v3791_v33 = vsel %vm7892_vm13, %v3789_v15, %v3790_v59  ;;  %v3801_v5 = vrot.slane %v2927_v20, 5  ;;  %v3804_v60 = vrot.slane %v2928_v28, 5  ;;  %v306_v57 = vmul.f32 %v8202_v49, %v267_v62  ;;  %v7315_v59 = vld [vmem:[%s9393_s3 + $0x90] sm:$0xff]   ;;  %v7402_v28 = vld [vmem:[#allocation2 + $0x24] sm:$0xf] }
  0xf4   : > { %6620 = vmatprep.mubr.bf16.mxu1 %v6064_v0  ;;  %v6204_v9 = vcombine.low %v3788_v26, %v3791_v33  ;;  %v307_v43 = vmul.f32 %v8202_v49, %v268_v19  ;;  %v6065_v58 = vcombine.low %v7396_v13, %v8326_v38  ;;  %v6066_v0 = vcombine.low %v7398_v11, %v8329_v25  ;;  %v7311_v49 = vld [vmem:[%s9393_s3 + $0x88] sm:$0xff]   ;;  %v7404_v62 = vld [vmem:[#allocation2 + $0x30] sm:$0xf]  ;;  %v8355_v19 = vld [vmem:[#allocation2 + $0x34] sm:$0xf] }
  0xf5   : > { %v3803_v29 = vrot.slane %v3801_v5, 4  ;;  %6833 = vmatmul.mubr.bf16.gmra.mrb[20].mxu0 %v6203_v17  ;;  %v345_v23 = vadd.f32 %v7400_v41, %v306_v57  ;;  %v3795_v48 = vsel %vm7892_vm13, %v6189_v54, %v3794_v21  ;;  %v3798_v61 = vsel %vm7892_vm13, %v3796_v50, %v3797_v45  ;;  %v8352_v26 = vld [vmem:[#allocation2 + $0x28] sm:$0xf]  ;;  %v963_v45 = vld [vmem:[#allocation2 + $0xc0] sm:$0xf]  ;;  %v7319_v33 = vld [vmem:[%s9393_s3 + $0x98] sm:$0xff]  }
  0xf6   : > { %v346_v27 = vadd.f32 %v7400_v41, %v307_v43  ;;  %6836 = vmatprep.mubr.bf16.mxu0 %v6204_v9  ;;  %v3802_v40 = vsel %vm7892_vm13, %v6190_v53, %v3801_v5  ;;  %v6205_v22 = vcombine.low %v3795_v48, %v3798_v61  ;;  %v6067_v15 = vcombine.low %v7402_v28, %v8352_v26  ;;  %v967_v53 = vld [vmem:[#allocation2 + $0xc8] sm:$0x1]  ;;  %v7406_v11 = vld [vmem:[#allocation2 + $0x3c] sm:$0xf] }
  0xf7   : > { %v3805_v42 = vsel %vm7892_vm13, %v3803_v29, %v3804_v60  ;;  %v377_v44 = vmax.f32 %v345_v23, 0.0  ;;  %v6068_v17 = vcombine.low %v7404_v62, %v8355_v19  ;;  %v7323_v29 = vld [vmem:[%s9393_s3 + $0xa0] sm:$0xff]   ;;  %v7408_v41 = vld [vmem:[#allocation2 + $0x48] sm:$0xf]  ;;  %v8373_v23 = vld [vmem:[#allocation2 + $0x4c] sm:$0xf] }
  0xf8   : > { %v378_v2 = vmax.f32 %v346_v27, 0.0  ;;  %v6206_v20 = vcombine.low %v3802_v40, %v3805_v42  ;;  %v6070_v8 = vcombine.low %v7408_v41, %v8373_v23  ;;  %v3162_v28 = vshrl.u32 %v8283_v16, 16  ;;  %v2015_v62 = vld [vmem:[#allocation2] sm:$0xe]  ;;  %v7416_v41 = vld [vmem:[#allocation2 + $0x20] sm:$0x1] }
  0xf9   : > { %v6338_v10 = vpack.c.bf16 %v377_v44, %v377_v44  ;;  %v7335_v44 = vld [vmem:[%s9393_s3 + $0xb0] sm:$0xff]  }
  0xfa   : > { %v6339_v46 = vpack.c.bf16 %v378_v2, %v378_v2  ;;  %v7410_v2 = vld [vmem:[#allocation2 + $0x54] sm:$0xf] }
  0xfb   : > { %6621 = vmatmul.mubr.bf16.vlgmr.msra.gmra.mrb[0].mxu1 %v6065_v58  ;;  %v788_v56 = vshrl.u32 %v6338_v10, 16  ;;  %v791_v36 = vshll.u32 %v6338_v10, 16 }
  0xfc   : > { %6653 = vmatpush3.bf16.msra.mxu1 %v7401_v35  ;;  %6624 = vmatprep.mubr.bf16.mxu1 %v6066_v0  ;;  %v796_v24 = vshrl.u32 %v6339_v46, 16  ;;  %v799_v21 = vshll.u32 %v6339_v46, 16  ;;  %v8370_v0 = vld [vmem:[#allocation2 + $0x40] sm:$0xf]  ;;  %v8382_v35 = vld [vmem:[#allocation2 + $0x58] sm:$0xf] }
  0xfd   : > { %6654 = vmatprep.subr.bf16.mxu1 %v7311_v49  ;;  %6837 = vmatmul.mubr.bf16.gmra.mrb[24].mxu0 %v6205_v22  ;;  %v790_v54 = vrot.slane %v788_v56, 7  ;;  %v6069_v3 = vcombine.low %v7406_v11, %v8370_v0  ;;  %v6071_v22 = vcombine.low %v7410_v2, %v8382_v35  ;;  %v8388_v56 = vld [vmem:[#allocation2 + $0x64] sm:$0xf]  ;;  %v6074_v2 = vcombine.low %v8122_v4, %v8130_v1  ;;  %v7331_v4 = vld [vmem:[%s9393_s3 + $0x1c8] sm:$0xff]  }
  0xfe   : > { %v798_v50 = vrot.slane %v796_v24, 7  ;;  %6840 = vmatprep.mubr.bf16.mxu0 %v6206_v20  ;;  %v7412_v20 = vld [vmem:[#allocation2 + $0x60] sm:$0xf]  ;;  %v7324_v24 = vld [vmem:[#allocation2 + $0x18] sm:$0xff]  }
  0xff   : > { %v793_v5 = vor.u32 %v791_v36, %v790_v54  ;;  %v794_v60 = vrot.slane %v790_v54, 4  ;;  %v6072_v36 = vcombine.low %v7412_v20, %v8388_v56 }
 0x100   : > { %6655 = vmatpush3.bf16.msra.mxu1 %v7311_v49  ;;  %v801_v9 = vor.u32 %v799_v21, %v798_v50  ;;  %v803_v57 = vrot.slane %v798_v50, 4  ;;  %v7341_v21 = vld [vmem:[%s9393_s3 + $0xb8] sm:$0xff]   ;;  %v2016_v50 = vld [vmem:[#allocation2 + $0xc] sm:$0xe] }
 0x101   : > { %6656 = vmatprep.subr.bf16.mxu1 %v7315_v59  ;;  %v964_v13 = vsel %vm7632_vm9, %v793_v5, %v963_v45  ;;  %v2075_v45 = vrot.slane %v8326_v38, 5  ;;  %v2089_v5 = vrot.slane %v8352_v26, 5  ;;  %v6088_v38 = vrot.slane %v2015_v62, 9  ;;  %v8408_v26 = vld [vmem:[%s9393_s3 + $0xc0] sm:$0xff]  }
 0x102   : > { %v802_v43 = vsel %vm7625_vm8, %v794_v60, %v801_v9  ;;  %v968_v58 = vsel %vm7639_vm10, %v803_v57, %v967_v53  ;;  %965 = vst [vmem:[#allocation2 + $0xc0] sm:$0xf] %v964_v13  ;;  %v2082_v53 = vrot.slane %v8329_v25, 5  ;;  %v7414_v60 = vld [vmem:[#allocation2 + $0x8] sm:$0x1] }
 0x103   : > { %6625 = vmatmul.mubr.bf16.gmra.mrb[4].mxu1 %v6067_v15  ;;  %966 = vst [vmem:[#allocation2 + $0xc4] sm:$0xf] %v802_v43  ;;  %969 = vst [vmem:[#allocation2 + $0xc8] sm:$0x1] %v968_v58  ;;  %v2071_v9 = vrot.slane %v7414_v60, 5  ;;  %v2077_v25 = vrot.slane %v2075_v45, 4 }
 0x104   : > { %6628 = vmatprep.mubr.bf16.mxu1 %v6068_v17  ;;  %6657 = vmatpush3.bf16.msra.mxu1 %v7315_v59  ;;  %v3158_v59 = vshll.u32 %v8283_v16, 16  ;;  %v2068_v17 = vrot.slane %v8305_v18, 5  ;;  %v7415_v16 = vld [vmem:[#allocation2 + $0x14] sm:$0x1]  ;;  %v2018_v13 = vld [vmem:[#allocation2 + $0x24] sm:$0xe] }
 0x105   : > { %6658 = vmatprep.subr.bf16.mxu1 %v7319_v33  ;;  %v2078_v57 = vrot.slane %v7415_v16, 5  ;;  %v8403_v18 = vrot.slane %v3162_v28, 4  ;;  %v2103_v16 = vrot.slane %v8370_v0, 5  ;;  %v4524_v0 = vld [vmem:[#allocation2 + $0x28] sm:$0xf] }
 0x106   : > { %v8401_v43 = vrot.slane %v3158_v59, 5  ;;  %v2070_v58 = vrot.slane %v2068_v17, 4  ;;  %v7330_v59 = vld [vmem:[#allocation2 + $0x30] sm:$0xff]   ;;  %v8421_v20 = vsel %vm7892_vm13, %v6088_v38, %v2068_v17  ;;  %v2096_v17 = vrot.slane %v8355_v19, 5  ;;  %v7420_v38 = vld [vmem:[#allocation2 + $0x38] sm:$0x1] }
 0x107   : > { %9418 = vst [vmem:[#allocation4_spill] sm:$0xff] %v8403_v18  ;;  %v6079_v19 = vcombine.low %v8281_v6, %v8289_v7  ;;  %v4532_v7 = vld [vmem:[#allocation2 + $0x48] sm:$0xf]  ;;  %v9426_v18 = vshll.u32 %v8286_v51, 16  ;;  %v7361_v51 = vld [vmem:[%s9393_s3 + $0xe0] sm:$0xff]  }
 0x108   : > { %6659 = vmatpush3.bf16.msra.mxu1 %v7319_v33  ;;  %v2017_v33 = vld [vmem:[#allocation2 + $0x18] sm:$0xe]  ;;  %9417 = vst [vmem:[#allocation3_spill] sm:$0xff] %v8401_v43 }
 0x109   : > { %6660 = vmatprep.subr.bf16.mxu1 %v7323_v29  ;;  %v3652_v48 = vld [vmem:[#allocation2 + $0xc0] sm:$0xe]  ;;  %v6090_v11 = vrot.slane %v2017_v33, 9  ;;  %v6077_v33 = vcombine.low %v8230_v37, %v8234_v32  ;;  %v7355_v37 = vld [vmem:[%s9393_s3 + $0x1f0] sm:$0xff]  }
 0x10a   : > { %v2930_v27 = vld [vmem:[#allocation2 + $0xc4] sm:$0xf]  ;;  %v2931_v49 = vld [vmem:[#allocation2 + $0xc8] sm:$0x1]  ;;  %v6191_v61 = vrot.slane %v3652_v48, 9  ;;  %v6091_v48 = vrot.slane %v2018_v13, 9 }
 0x10b   : > { %6629 = vmatmul.mubr.bf16.gmra.mrb[8].mxu1 %v6069_v3  ;;  %v3808_v40 = vrot.slane %v2930_v27, 5  ;;  %v3811_v42 = vrot.slane %v2931_v49, 5  ;;  %v2084_v3 = vrot.slane %v2082_v53, 4  ;;  %v8410_v27 = vld [vmem:[#allocation2 + $0x70] sm:$0xf] }
 0x10c   : > { %6632 = vmatprep.mubr.bf16.mxu1 %v6070_v8  ;;  %6661 = vmatpush3.bf16.msra.mxu1 %v7323_v29  ;;  %v6089_v29 = vrot.slane %v2016_v50, 9  ;;  %v2085_v8 = vrot.slane %v7416_v41, 5  ;;  %v8449_v28 = vsel %vm7892_vm13, %v6091_v48, %v2089_v5  ;;  %v4520_v50 = vld [vmem:[#allocation2 + $0x18] sm:$0xf]  ;;  %v2098_v41 = vrot.slane %v2096_v17, 4 }
 0x10d   : > { %6662 = vmatprep.subr.bf16.mxu1 %v7329_v14  ;;  %v3809_v10 = vsel %vm7892_vm13, %v6191_v61, %v3808_v40  ;;  %v3810_v46 = vrot.slane %v3808_v40, 4  ;;  %v2091_v61 = vrot.slane %v2089_v5, 4  ;;  %v7419_v40 = vld [vmem:[#allocation2 + $0x2c] sm:$0x1]  ;;  %v4521_v5 = vld [vmem:[#allocation2 + $0x1c] sm:$0xf] }
 0x10e   : > { %v8432_v1 = vsel %vm7892_vm13, %v6089_v29, %v2075_v45  ;;  %v6076_v45 = vcombine.low %v8207_v31, %v8215_v47  ;;  %v7332_v31 = vld [vmem:[#allocation2 + $0x3c] sm:$0xff]   ;;  %v7337_v47 = vld [vmem:[%s9393_s3 + $0x1d0] sm:$0xff]  }
 0x10f   : > { %v3812_v15 = vsel %vm7892_vm13, %v3810_v46, %v3811_v42  ;;  %v2092_v42 = vrot.slane %v7419_v40, 5  ;;  %v6075_v46 = vcombine.low %v8142_v55, %v8148_v12  ;;  %v8436_v55 = vsel %vm7892_vm13, %v2077_v25, %v2078_v57  ;;  %v2022_v29 = vld [vmem:[#allocation2 + $0x54] sm:$0xe]  ;;  %v4523_v25 = vld [vmem:[#allocation2 + $0x24] sm:$0xf] }
 0x110   : > { %6663 = vmatpush3.bf16.msra.mxu1 %v7329_v14  ;;  %v6207_v54 = vcombine.low %v3809_v10, %v3812_v15  ;;  %v7417_v14 = vld [vmem:[#allocation2 + $0x6c] sm:$0xf]  ;;  %v8441_v12 = vsel %vm7892_vm13, %v6090_v11, %v2082_v53  ;;  %v6078_v53 = vcombine.low %v8263_v52, %v8275_v30  ;;  %v6105_v57 = vcombine.low %v8432_v1, %v8436_v55  ;;  %v7353_v55 = vld [vmem:[%s9393_s3 + $0xd0] sm:$0xff]  }
 0x111   : > { %6664 = vmatprep.subr.bf16.mxu1 %v7335_v44  ;;  %v6073_v49 = vcombine.low %v7417_v14, %v8410_v27  ;;  %v8453_v15 = vsel %vm7892_vm13, %v2091_v61, %v2092_v42  ;;  %v7336_v11 = vld [vmem:[#allocation2 + $0x48] sm:$0xff]   ;;  %v2117_v61 = vrot.slane %v8382_v35, 5  ;;  %v4569_v40 = vshrl.u32 %v4520_v50, 16 }
 0x112   : > { %6841 = vmatmul.mubr.bf16.gmra.mrb[28].mxu0 %v6207_v54  ;;  %v8456_v54 = vld [vmem:[#allocation2 + $0x48] sm:$0xe]  ;;  %v4572_v42 = vshll.u32 %v4520_v50, 16  ;;  %v7422_v50 = vld [vmem:[#allocation2 + $0x50] sm:$0x1] }
 0x113   : > { %6633 = vmatmul.mubr.bf16.gmra.mrb[12].mxu1 %v6071_v22  ;;  %6860 = vmatprep.mubr.bf16.mxu0 %v7324_v24  ;;  %v2019_v22 = vld [vmem:[#allocation2 + $0x30] sm:$0xe]  ;;  %v8445_v24 = vsel %vm7892_vm13, %v2084_v3, %v2085_v8  ;;  %v7421_v8 = vld [vmem:[#allocation2 + $0x44] sm:$0x1]  ;;  %v6094_v48 = vrot.slane %v8456_v54, 9  ;;  %v4606_v54 = vshrl.u32 %v4524_v0, 16 }
 0x114   : > { %6636 = vmatprep.mubr.bf16.mxu1 %v6072_v36  ;;  %6665 = vmatpush3.bf16.msra.mxu1 %v7335_v44  ;;  %v7326_v44 = vld [vmem:[#allocation2 + $0x24] sm:$0xff]   ;;  %v8425_v36 = vsel %vm7892_vm13, %v2070_v58, %v2071_v9  ;;  %v6092_v62 = vrot.slane %v2019_v22, 9  ;;  %v2099_v58 = vrot.slane %v7420_v38, 5  ;;  %v2106_v14 = vrot.slane %v7421_v8, 5 }
 0x115   : > { %6666 = vmatprep.subr.bf16.mxu1 %v7341_v21  ;;  %v6104_v60 = vcombine.low %v8421_v20, %v8425_v36  ;;  %v2105_v22 = vrot.slane %v2103_v16, 4  ;;  %v2113_v38 = vrot.slane %v7422_v50, 5  ;;  %v6095_v8 = vrot.slane %v2022_v29, 9  ;;  %v7344_v50 = vld [vmem:[#allocation2 + $0x6c] sm:$0xff]   ;;  %v8610_v36 = vld [vmem:[%s9393_s3 + $0x200] sm:$0xff]  }
 0x116   : > { %v8481_v3 = vsel %vm7892_vm13, %v6092_v62, %v2096_v17  ;;  %v4596_v62 = vshll.u32 %v4523_v25, 16  ;;  %v4602_v17 = vshll.u32 %v4524_v0, 16  ;;  %v8495_v35 = vsel %vm7892_vm13, %v2098_v41, %v2099_v58  ;;  %v8605_v20 = vld [vmem:[#allocation2 + $0x4c] sm:$0xf] }
 0x117   : > { %v4571_v13 = vrot.slane %v4569_v40, 4  ;;  %v8504_v58 = vsel %vm7892_vm13, %v2105_v22, %v2106_v14  ;;  %v4608_v40 = vrot.slane %v4606_v54, 4  ;;  %v4525_v22 = vld [vmem:[#allocation2 + $0x2c] sm:$0x1]  ;;  %v7342_v54 = vld [vmem:[#allocation2 + $0x60] sm:$0xff]   ;;  %9419 = vst [vmem:[#allocation5_spill] sm:$0xff] %v8605_v20  ;;  %v9422_v1 = vcombine.low %v8441_v12, %v8445_v24 }
 0x118   : > { %6667 = vmatpush3.bf16.msra.mxu1 %v7341_v21  ;;  %v2020_v21 = vld [vmem:[#allocation2 + $0x3c] sm:$0xe] }
 0x119   : > { %6700 = vmatprep.subr.bf16.mxu1 %v8408_v26  ;;  %v6093_v9 = vrot.slane %v2020_v21, 9  ;;  %v4582_v21 = vshrl.u32 %v4521_v5, 16 }
 0x11a   : > { %6861 = vmatmul.mubr.bf16.vlgmr.msra.gmra.mrb[0].mxu0 %v7326_v44  ;;  %v7343_v44 = vld [vmem:[%s9393_s3 + $0x1d8] sm:$0xff]  }
 0x11b   : > { %6637 = vmatmul.mubr.bf16.gmra.mrb[16].mxu1 %v6073_v49  ;;  %6893 = vmatpush3.bf16.msra.mxu0 %v8197_v63  ;;  %v2110_v49 = vrot.slane %v8373_v23, 5  ;;  %v4593_v23 = vshrl.u32 %v4523_v25, 16  ;;  %v4574_v25 = vrot.slane %v4572_v42, 5  ;;  %v4584_v0 = vrot.slane %v4582_v21, 4  ;;  %v7338_v42 = vld [vmem:[#allocation2 + $0x54] sm:$0xff]  }
 0x11c   : > { %6640 = vmatprep.mubr.bf16.mxu1 %v6074_v2  ;;  %6864 = vmatprep.mubr.bf16.mxu0 %v7330_v59  ;;  %v8491_v2 = vsel %vm7892_vm13, %v6093_v9, %v2103_v16  ;;  %v4578_v59 = vshll.u32 %v4521_v5, 16  ;;  %v2119_v9 = vrot.slane %v2117_v61, 4  ;;  %v7423_v16 = vld [vmem:[#allocation2 + $0x5c] sm:$0x1]  ;;  %v8497_v5 = vld [vmem:[#allocation2 + $0x60] sm:$0xe] }
 0x11d   : > { %6894 = vmatprep.subr.bf16.mxu0 %v7331_v4  ;;  %v2120_v10 = vrot.slane %v7423_v16, 5  ;;  %v4595_v41 = vrot.slane %v4593_v23, 4  ;;  %v2124_v21 = vrot.slane %v8388_v56, 5  ;;  %v2024_v23 = vld [vmem:[#allocation2 + $0x6c] sm:$0xe] }
 0x11e   : > { %v8510_v29 = vrot.slane %v4578_v59, 5  ;;  %v7424_v16 = vld [vmem:[#allocation2 + $0x7c] sm:$0xf]  ;;  %v7351_v56 = vld [vmem:[%s9393_s3 + $0x1e8] sm:$0xff]  }
 0x11f   : > { %6895 = vmatpush3.bf16.msra.mxu0 %v7331_v4  ;;  %v2112_v4 = vrot.slane %v2110_v49, 4  ;;  %v8527_v59 = vsel %vm7892_vm13, %v2119_v9, %v2120_v10  ;;  %v7428_v9 = vld [vmem:[#allocation2 + $0x88] sm:$0xf] }
 0x120   : > { %6896 = vmatprep.subr.bf16.mxu0 %v7337_v47 }
 0x121   : > { %v8518_v14 = vsel %vm7892_vm13, %v2112_v4, %v2113_v38 }
 0x122   : > { %6865 = vmatmul.mubr.bf16.gmra.mrb[4].mxu0 %v7332_v31  ;;  %v4522_v31 = vld [vmem:[#allocation2 + $0x20] sm:$0x1] }
 0x123   : > { %6641 = vmatmul.mubr.bf16.gmra.mrb[20].mxu1 %v6075_v46  ;;  %6868 = vmatprep.mubr.bf16.mxu0 %v7336_v11  ;;  %v7347_v46 = vld [vmem:[%s9393_s3 + $0x1e0] sm:$0xff]   ;;  %v4598_v11 = vrot.slane %v4596_v62, 5  ;;  %v2131_v62 = vrot.slane %v8410_v27, 5  ;;  %v4588_v38 = vshll.u32 %v4522_v31, 16  ;;  %v4526_v27 = vld [vmem:[#allocation2 + $0x30] sm:$0xf] }
 0x124   : > { %6644 = vmatprep.mubr.bf16.mxu1 %v6076_v45  ;;  %6897 = vmatpush3.bf16.msra.mxu0 %v7337_v47  ;;  %v8508_v45 = vsel %vm7892_vm13, %v6094_v48, %v2110_v49  ;;  %v8512_v47 = vrot.slane %v4602_v17, 5  ;;  %v8522_v49 = vsel %vm7892_vm13, %v6095_v8, %v2117_v61  ;;  %v6096_v48 = vrot.slane %v8497_v5, 9  ;;  %v2025_v8 = vld [vmem:[#allocation2 + $0x78] sm:$0xe] }
 0x125   : > { %6898 = vmatprep.subr.bf16.mxu0 %v7343_v44  ;;  %v4575_v17 = vor.u32 %v4574_v25, %v4571_v13  ;;  %v4585_v61 = vor.u32 %v4584_v0, %v8510_v29  ;;  %v2138_v5 = vrot.slane %v7424_v16, 5  ;;  %v4599_v10 = vor.u32 %v4598_v11, %v4595_v41  ;;  %v7425_v25 = vld [vmem:[#allocation2 + $0x68] sm:$0x1]  ;;  %v7426_v16 = vld [vmem:[#allocation2 + $0x74] sm:$0x1] }
 0x126   : > { %v4609_v13 = vor.u32 %v4608_v40, %v8512_v47  ;;  %v2127_v31 = vrot.slane %v7425_v25, 5  ;;  %v6097_v0 = vrot.slane %v2024_v23, 9  ;;  %v2134_v4 = vrot.slane %v7426_v16, 5  ;;  %v7427_v25 = vld [vmem:[#allocation2 + $0x80] sm:$0x1] }
 0x127   : > { %v2126_v41 = vrot.slane %v2124_v21, 4  ;;  %v2133_v11 = vrot.slane %v2131_v62, 4  ;;  %v4576_v40 = vrot.slane %v4575_v17, 4  ;;  %v4586_v32 = vrot.slane %v4585_v61, 4  ;;  %v4527_v61 = vld [vmem:[#allocation2 + $0x34] sm:$0xf] }
 0x128   : > { %6899 = vmatpush3.bf16.msra.mxu0 %v7343_v44  ;;  %v4612_v44 = vshll.u32 %v4525_v22, 16  ;;  %v6098_v22 = vrot.slane %v2025_v8, 9  ;;  %v2140_v23 = vrot.slane %v2138_v5, 4  ;;  %v4600_v16 = vrot.slane %v4599_v10, 4 }
 0x129   : > { %6900 = vmatprep.subr.bf16.mxu0 %v7347_v46  ;;  %v4610_v52 = vrot.slane %v4609_v13, 4  ;;  %v2145_v17 = vrot.slane %v7428_v9, 5  ;;  %v4620_v8 = vshll.u32 %v4526_v27, 16  ;;  %v8561_v10 = vsel %vm7892_vm13, %v2126_v41, %v2127_v31  ;;  %v7429_v31 = vld [vmem:[#allocation2 + $0x8c] sm:$0x1] }
 0x12a   : > { %6869 = vmatmul.mubr.bf16.gmra.mrb[8].mxu0 %v7338_v42  ;;  %v2141_v42 = vrot.slane %v7427_v25, 5  ;;  %v4614_v30 = vrot.slane %v4612_v44, 5  ;;  %v8565_v13 = vsel %vm7892_vm13, %v2133_v11, %v2134_v4  ;;  %v7346_v44 = vld [vmem:[#allocation2 + $0x78] sm:$0xff]   ;;  %v4626_v11 = vshll.u32 %v4527_v61, 16 }
 0x12b   : > { %6645 = vmatmul.mubr.bf16.gmra.mrb[24].mxu1 %v6077_v33  ;;  %6872 = vmatprep.mubr.bf16.mxu0 %v7342_v54  ;;  %v4590_v33 = vrot.slane %v4588_v38, 5  ;;  %v8553_v54 = vsel %vm7892_vm13, %v6096_v48, %v2124_v21  ;;  %v4617_v38 = vshrl.u32 %v4526_v27, 16  ;;  %v4581_v48 = vsel %vm7587_vm2, %v4576_v40, %v8510_v29  ;;  %v7359_v29 = vld [vmem:[%s9393_s3 + $0x1f8] sm:$0xff]   ;;  %v4530_v40 = vld [vmem:[#allocation2 + $0x40] sm:$0xf] }
 0x12c   : > { %6648 = vmatprep.mubr.bf16.mxu1 %v6078_v53  ;;  %6901 = vmatpush3.bf16.msra.mxu0 %v7347_v46  ;;  %v2026_v53 = vld [vmem:[#allocation2 + $0x84] sm:$0xe]  ;;  %v8557_v46 = vsel %vm7892_vm13, %v6097_v0, %v2131_v62  ;;  %v8572_v21 = vsel %vm7892_vm13, %v6098_v22, %v2138_v5  ;;  %v4529_v62 = vld [vmem:[#allocation2 + $0x3c] sm:$0xf]  ;;  %v8578_v9 = vsel %vm7892_vm13, %v2140_v23, %v2141_v42  ;;  %v2148_v0 = vrot.slane %v7429_v31, 5 }
 0x12d   : > { %6902 = vmatprep.subr.bf16.mxu0 %v7351_v56  ;;  %v4591_v27 = vsel %vm7587_vm2, %v4586_v32, %v4590_v33  ;;  %v6099_v4 = vrot.slane %v2026_v53, 9  ;;  %v4605_v5 = vsel %vm7587_vm2, %v4600_v16, %v8512_v47  ;;  %v2147_v41 = vrot.slane %v2145_v17, 4  ;;  %v4528_v22 = vld [vmem:[#allocation2 + $0x38] sm:$0x1]  ;;  %v8626_v31 = vld [vmem:[#allocation2 + $0x90] sm:$0xe] }
 0x12e   : > { %v4619_v32 = vrot.slane %v4617_v38, 4  ;;  %v4622_v33 = vrot.slane %v4620_v8, 5  ;;  %v4630_v23 = vshrl.u32 %v4527_v61, 16  ;;  %v4641_v25 = vshrl.u32 %v4529_v62, 16  ;;  %v4531_v61 = vld [vmem:[#allocation2 + $0x44] sm:$0x1] }
 0x12f   : > { %v8599_v6 = vcombine.low %v4581_v48, %v4591_v27  ;;  %v8618_v53 = vsel %vm7892_vm13, %v2147_v41, %v2148_v0  ;;  %v4535_v38 = vld [vmem:[#allocation2 + $0x54] sm:$0xf]  ;;  %v7348_v8 = vld [vmem:[#allocation2 + $0x84] sm:$0xff]   ;;  %v4678_v0 = vshrl.u32 %v8605_v20, 16 }
 0x130   : > { %6903 = vmatpush3.bf16.msra.mxu0 %v7351_v56  ;;  %v4615_v56 = vsel %vm7587_vm2, %v4610_v52, %v4614_v30  ;;  %v4650_v52 = vshll.u32 %v4530_v40, 16  ;;  %v4654_v30 = vshrl.u32 %v4530_v40, 16  ;;  %v4623_v48 = vor.u32 %v4622_v33, %v4619_v32  ;;  %v7349_v41 = vld [vmem:[%s9393_s3 + $0xc8] sm:$0xff]  }
 0x131   : > { %6904 = vmatprep.subr.bf16.mxu0 %v7355_v37  ;;  %v8622_v27 = vrot.slane %v4641_v25, 4  ;;  %v4674_v40 = vshll.u32 %v8605_v20, 16  ;;  %v4660_v33 = vshll.u32 %v4531_v61, 16  ;;  %v4689_v25 = vshrl.u32 %v4535_v38, 16 }
 0x132   : > { %6873 = vmatmul.mubr.bf16.gmra.mrb[12].mxu0 %v7344_v50  ;;  %v4644_v50 = vshll.u32 %v4529_v62, 16  ;;  %v8620_v62 = vrot.slane %v4626_v11, 5  ;;  %v4656_v32 = vrot.slane %v4654_v30, 4  ;;  %v8641_v47 = vrot.slane %v4623_v48, 4  ;;  %v8648_v30 = vld [vmem:[#allocation2 + $0x50] sm:$0x1] }
 0x133   : > { %6649 = vmatmul.mubr.bf16.gmra.mrb[28].mxu1 %v6079_v19  ;;  %6876 = vmatprep.mubr.bf16.mxu0 %v7346_v44  ;;  %v8603_v19 = vsel %vm7892_vm13, %v6099_v4, %v2145_v17  ;;  %v4636_v17 = vshll.u32 %v4528_v22, 16  ;;  %v4632_v44 = vrot.slane %v4630_v23, 4  ;;  %v8624_v4 = vld [vmem:[#allocation2 + $0x58] sm:$0xf]  ;;  %v8633_v22 = vrot.slane %v4650_v52, 5  ;;  %v7350_v23 = vld [vmem:[#allocation2 + $0x90] sm:$0xff]  }
 0x134   : > { %6668 = vmatprep.mubr.bf16.mxu1 %v6104_v60  ;;  %6905 = vmatpush3.bf16.msra.mxu0 %v7355_v37  ;;  %v8612_v60 = vcombine.low %v4605_v5, %v4615_v56  ;;  %9420 = vst [vmem:[#allocation6_spill] sm:$0xff] %v8624_v4  ;;  %v4665_v5 = vshrl.u32 %v4532_v7, 16  ;;  %v4668_v56 = vshll.u32 %v4532_v7, 16  ;;  %v4646_v11 = vrot.slane %v4644_v50, 5  ;;  %9421 = vst [vmem:[#allocation7_spill] sm:$0xff] %v8648_v30 }
 0x135   : > { %6906 = vmatprep.subr.bf16.mxu0 %v7359_v29  ;;  %v4692_v37 = vshll.u32 %v4535_v38, 16  ;;  %v4698_v7 = vshll.u32 %v8624_v4, 16  ;;  %v4702_v16 = vshrl.u32 %v8624_v4, 16  ;;  %v8644_v50 = vrot.slane %v4636_v17, 5 }
 0x136   : > { %v6100_v52 = vrot.slane %v8626_v31, 9  ;;  %v4667_v61 = vrot.slane %v4665_v5, 4  ;;  %v4670_v38 = vrot.slane %v4668_v56, 5  ;;  %v8650_v42 = vrot.slane %v4674_v40, 5  ;;  %v7431_v40 = vld [vmem:[#allocation2 + $0x98] sm:$0x1] }
 0x137   : > { %v4680_v63 = vrot.slane %v4678_v0, 4  ;;  %v8660_v17 = vrot.slane %v4660_v33, 5  ;;  %v4691_v31 = vrot.slane %v4689_v25, 4  ;;  %v4694_v5 = vrot.slane %v4692_v37, 5  ;;  %v2029_v37 = vld [vmem:[#allocation2 + $0xa8] sm:$0xe] }
 0x138   : > { %6907 = vmatpush3.bf16.msra.mxu0 %v7359_v29  ;;  %v4633_v29 = vor.u32 %v4632_v44, %v8620_v62  ;;  %v2028_v44 = vld [vmem:[#allocation2 + $0x9c] sm:$0xe]  ;;  %v8662_v56 = vrot.slane %v4698_v7, 5  ;;  %v4704_v12 = vrot.slane %v4702_v16, 4  ;;  %v2155_v0 = vrot.slane %v7431_v40, 5  ;;  %v7354_v16 = vld [vmem:[#allocation2 + $0xa8] sm:$0xff]  }
 0x139   : > { %6940 = vmatprep.subr.bf16.mxu0 %v8610_v36  ;;  %v6101_v33 = vrot.slane %v2028_v44, 9  ;;  %v7433_v25 = vld [vmem:[#allocation2 + $0xac] sm:$0xf]  ;;  %v6102_v20 = vrot.slane %v2029_v37, 9 }
 0x13a   : > { %6877 = vmatmul.mubr.bf16.gmra.mrb[16].mxu0 %v7348_v8  ;;  %v7430_v8 = vld [vmem:[#allocation2 + $0x94] sm:$0xf]  ;;  %v8664_v24 = vrot.slane %v4633_v29, 4  ;;  %v2166_v7 = vrot.slane %v7433_v25, 5  ;;  %v4629_v29 = vsel %vm7587_vm2, %v8641_v47, %v8620_v62  ;;  %v4705_v44 = vor.u32 %v4704_v12, %v8662_v56  ;;  %v7434_v62 = vld [vmem:[#allocation2 + $0xa4] sm:$0x1] }
 0x13b   : > { %6669 = vmatmul.mubr.bf16.vlgmr.msra.gmra.mrb[0].mxu1 %v6105_v57  ;;  %v4647_v57 = vor.u32 %v4646_v11, %v8622_v27  ;;  %v2152_v48 = vrot.slane %v7430_v8, 5  ;;  %6880 = vmatprep.mubr.bf16.mxu0 %v7350_v23  ;;  %v4684_v27 = vshll.u32 %v8648_v30, 16  ;;  %v8667_v11 = vld [vmem:[#allocation2 + $0x5c] sm:$0x1]  ;;  %v4671_v8 = vor.u32 %v4670_v38, %v4667_v61  ;;  %v7435_v12 = vld [vmem:[#allocation2 + $0xb0] sm:$0x1] }
 0x13c   : > { %6701 = vmatpush3.bf16.msra.mxu1 %v8408_v26  ;;  %6672 = vmatprep.mubr.bf16.mxu1 %v9422_v1  ;;  %v4657_v26 = vor.u32 %v4656_v32, %v8633_v22  ;;  %v7432_v1 = vld [vmem:[#allocation2 + $0xa0] sm:$0xf]  ;;  %9423 = vst [vmem:[#allocation8_spill] sm:$0xff] %v8667_v11  ;;  %v4681_v23 = vor.u32 %v4680_v63, %v8650_v42  ;;  %v7357_v63 = vld [vmem:[%s9393_s3 + $0xd8] sm:$0xff]   ;;  %v4708_v25 = vshll.u32 %v8667_v11, 16  ;;  %v2169_v43 = vrot.slane %v7435_v12, 5 }
 0x13d   : > { %6702 = vmatprep.subr.bf16.mxu1 %v7349_v41  ;;  %v2159_v4 = vrot.slane %v7432_v1, 5  ;;  %v7352_v32 = vld [vmem:[#allocation2 + $0x9c] sm:$0xff]   ;;  %v4648_v40 = vrot.slane %v4647_v57, 4  ;;  %v8676_v1 = vsel %vm7892_vm13, %v6100_v52, %v2152_v48  ;;  %v4695_v38 = vor.u32 %v4694_v5, %v4691_v31  ;;  %v2030_v11 = vld [vmem:[#allocation2 + $0xb4] sm:$0xe] }
 0x13e   : > { %v4658_v61 = vrot.slane %v4657_v26, 4  ;;  %v9424_v30 = vcombine.low %v8449_v28, %v8453_v15  ;;  %v2162_v57 = vrot.slane %v7434_v62, 5  ;;  %v4686_v52 = vrot.slane %v4684_v27, 5  ;;  %v7436_v27 = vld [vmem:[#allocation2 + $0xb8] sm:$0xf] }
 0x13f   : > { %v2161_v47 = vrot.slane %v2159_v4, 4  ;;  %v4672_v26 = vrot.slane %v4671_v8, 4  ;;  %v4682_v31 = vrot.slane %v4681_v23, 4  ;;  %v2168_v5 = vrot.slane %v2166_v7, 4  ;;  %v7356_v8 = vld [vmem:[#allocation2 + $0xb4] sm:$0xff]  }
 0x140   : > { %6703 = vmatpush3.bf16.msra.mxu1 %v7349_v41  ;;  %v2154_v41 = vrot.slane %v2152_v48, 4  ;;  %v9425_v48 = vcombine.low %v8481_v3, %v8495_v35  ;;  %v8691_v28 = vrot.slane %v9426_v18, 5  ;;  %v4639_v15 = vsel %vm7587_vm2, %v8664_v24, %v8644_v50 }
 0x141   : > { %6704 = vmatprep.subr.bf16.mxu1 %v7353_v55  ;;  %v4653_v3 = vsel %vm7587_vm2, %v4648_v40, %v8633_v22  ;;  %v4663_v18 = vsel %vm7587_vm2, %v4658_v61, %v8660_v17  ;;  %v4710_v50 = vrot.slane %v4708_v25, 5  ;;  %v8712_v24 = vsel %vm7892_vm13, %v6101_v33, %v2159_v4  ;;  %v4538_v33 = vld [vmem:[#allocation2 + $0x60] sm:$0xf]  ;;  %v8739_v61 = vld [vmem:[#allocation2 + $0x64] sm:$0xf] }
 0x142   : > { %6881 = vmatmul.mubr.bf16.gmra.mrb[20].mxu0 %v7352_v32  ;;  %9427 = vst [vmem:[#allocation9_spill] sm:$0xff] %v8691_v28  ;;  %v8702_v35 = vsel %vm7892_vm13, %v2154_v41, %v2155_v0  ;;  %v8716_v22 = vsel %vm7892_vm13, %v2161_v47, %v2162_v57  ;;  %v6103_v0 = vrot.slane %v2030_v11, 9  ;;  %v2173_v32 = vrot.slane %v7436_v27, 5  ;;  %v7358_v11 = vld [vmem:[#allocation2 + $0xc0] sm:$0xff]   ;;  %v4541_v25 = vld [vmem:[#allocation2 + $0x6c] sm:$0xf] }
 0x143   : > { %6673 = vmatmul.mubr.bf16.gmra.mrb[4].mxu1 %v9424_v30  ;;  %6884 = vmatprep.mubr.bf16.mxu0 %v7354_v16  ;;  %v4696_v30 = vrot.slane %v4695_v38, 4  ;;  %v4677_v23 = vsel %vm7587_vm2, %v4672_v26, %v8650_v42  ;;  %v4687_v17 = vsel %vm7587_vm2, %v4682_v31, %v4686_v52  ;;  %v8725_v37 = vsel %vm7892_vm13, %v6102_v20, %v2166_v7  ;;  %v8741_v20 = vld [vmem:[#allocation2 + $0x68] sm:$0x1]  ;;  %v8753_v38 = vld [vmem:[#allocation2 + $0xbc] sm:$0x1] }
 0x144   : > { %6676 = vmatprep.mubr.bf16.mxu1 %v9425_v48  ;;  %6705 = vmatpush3.bf16.msra.mxu1 %v7353_v55  ;;  %v4706_v55 = vrot.slane %v4705_v44, 4  ;;  %v8729_v4 = vsel %vm7892_vm13, %v2168_v5, %v2169_v43  ;;  %v8733_v40 = vcombine.low %v4629_v29, %v4639_v15  ;;  %v8735_v42 = vcombine.low %v4653_v3, %v4663_v18  ;;  %v7363_v43 = vld [vmem:[%s9393_s3 + $0xe8] sm:$0xff]   ;;  %v8756_v47 = vld [vmem:[#allocation2 + $0x70] sm:$0xf]  ;;  %v4544_v26 = vld [vmem:[#allocation2 + $0x78] sm:$0xf] }
 0x145   : > { %6706 = vmatprep.subr.bf16.mxu1 %v7357_v63  ;;  %9428 = vst [vmem:[#allocation10_spill] sm:$0xff] %v8729_v4  ;;  %v4701_v29 = vsel %vm7587_vm2, %v4696_v30, %v8662_v56  ;;  %v9429_v62 = vcombine.low %v8491_v2, %v8504_v58  ;;  %v8761_v57 = vcombine.low %v4677_v23, %v4687_v17  ;;  %v8769_v48 = vrot.slane %v2173_v32, 4  ;;  %v8771_v31 = vld [vmem:[#allocation2 + $0x7c] sm:$0xf]  ;;  %v4547_v3 = vld [vmem:[#allocation2 + $0x84] sm:$0xf] }
 0x146   : > { %v8767_v56 = vsel %vm7892_vm13, %v6103_v0, %v2173_v32  ;;  %9430 = vst [vmem:[#allocation11_spill] sm:$0xff] %v8771_v31  ;;  %v9431_v5 = vcombine.low %v8508_v45, %v8518_v14  ;;  %v4713_v2 = vshrl.u32 %v4538_v33, 16  ;;  %v4716_v58 = vshll.u32 %v4538_v33, 16  ;;  %v8781_v0 = vld [vmem:[#allocation2 + $0x88] sm:$0xf]  ;;  %v7365_v45 = vld [vmem:[%s9393_s3 + $0xf0] sm:$0xff]  }
 0x147   : > { %v4722_v12 = vshll.u32 %v8739_v61, 16  ;;  %v4726_v15 = vshrl.u32 %v8739_v61, 16  ;;  %v4732_v30 = vshll.u32 %v8741_v20, 16  ;;  %9432 = vst [vmem:[#allocation12_spill] sm:$0xff] %v8781_v0  ;;  %v4746_v14 = vshll.u32 %v8756_v47, 16 }
 0x148   : > { %6707 = vmatpush3.bf16.msra.mxu1 %v7357_v63  ;;  %v4711_v63 = vsel %vm7587_vm2, %v4706_v55, %v4710_v50  ;;  %v4737_v55 = vshrl.u32 %v4541_v25, 16  ;;  %v4740_v50 = vshll.u32 %v4541_v25, 16  ;;  %v4750_v27 = vshrl.u32 %v8756_v47, 16  ;;  %v4550_v44 = vld [vmem:[#allocation2 + $0x90] sm:$0xf] }
 0x149   : > { %6708 = vmatprep.subr.bf16.mxu1 %v7361_v51  ;;  %v8778_v18 = vcombine.low %v4701_v29, %v4711_v63  ;;  %v4761_v32 = vshrl.u32 %v4544_v26, 16  ;;  %v4770_v23 = vshll.u32 %v8771_v31, 16  ;;  %v4774_v17 = vshrl.u32 %v8771_v31, 16  ;;  %v7367_v29 = vld [vmem:[%s9393_s3 + $0xf8] sm:$0xff]   ;;  %v8801_v28 = vld [vmem:[#allocation2 + $0x80] sm:$0x1] }
 0x14a   : > { %6885 = vmatmul.mubr.bf16.gmra.mrb[24].mxu0 %v7356_v8  ;;  %v4764_v8 = vshll.u32 %v4544_v26, 16  ;;  %v4785_v33 = vshrl.u32 %v4547_v3, 16  ;;  %v4715_v63 = vrot.slane %v4713_v2, 4  ;;  %v4718_v25 = vrot.slane %v4716_v58, 5 }
 0x14b   : > { %6677 = vmatmul.mubr.bf16.gmra.mrb[8].mxu1 %v9429_v62  ;;  %6888 = vmatprep.mubr.bf16.mxu0 %v7358_v11  ;;  %v4788_v11 = vshll.u32 %v4547_v3, 16  ;;  %v8793_v62 = vld [vmem:[#allocation2 + $0x74] sm:$0x1]  ;;  %v4798_v52 = vshrl.u32 %v8781_v0, 16  ;;  %v8797_v26 = vrot.slane %v4722_v12, 5  ;;  %v4728_v7 = vrot.slane %v4726_v15, 4 }
 0x14c   : > { %6680 = vmatprep.mubr.bf16.mxu1 %v9431_v5  ;;  %6709 = vmatpush3.bf16.msra.mxu1 %v7361_v51  ;;  %v7360_v51 = vld [vmem:[#allocation2 + $0xcc] sm:$0xff]   ;;  %v4794_v5 = vshll.u32 %v8781_v0, 16  ;;  %v4739_v41 = vrot.slane %v4737_v55, 4  ;;  %v4742_v16 = vrot.slane %v4740_v50, 5  ;;  %v8799_v3 = vrot.slane %v4746_v14, 5 }
 0x14d   : > { %6710 = vmatprep.subr.bf16.mxu1 %v7363_v43  ;;  %v4752_v31 = vrot.slane %v4750_v27, 4  ;;  %v4763_v2 = vrot.slane %v4761_v32, 4  ;;  %v4766_v58 = vrot.slane %v4764_v8, 5  ;;  %v9433_v4 = vcombine.low %v8522_v49, %v8527_v59  ;;  %v8808_v55 = vld [vmem:[#allocation2 + $0x94] sm:$0xf] }
 0x14e   : > { %v8806_v0 = vrot.slane %v4770_v23, 5  ;;  %v4787_v12 = vrot.slane %v4785_v33, 4  ;;  %v4790_v15 = vrot.slane %v4788_v11, 5  ;;  %9434 = vst [vmem:[#allocation13_spill] sm:$0xff] %v8808_v55  ;;  %v9435_v50 = vcombine.low %v8553_v54, %v8561_v10  ;;  %v8813_v14 = vld [vmem:[#allocation2 + $0x8c] sm:$0x1] }
 0x14f   : > { %v8815_v27 = vrot.slane %v4794_v5, 5  ;;  %v4800_v32 = vrot.slane %v4798_v52, 4  ;;  %v4809_v8 = vshrl.u32 %v4550_v44, 16  ;;  %v4812_v49 = vshll.u32 %v4550_v44, 16  ;;  %v4553_v33 = vld [vmem:[#allocation2 + $0x9c] sm:$0xf] }
 0x150   : > { %6711 = vmatpush3.bf16.msra.mxu1 %v7363_v43  ;;  %v4776_v43 = vrot.slane %v4774_v17, 4  ;;  %v4719_v59 = vor.u32 %v4718_v25, %v4715_v63  ;;  %v8819_v23 = vrot.slane %v4732_v30, 5  ;;  %v4743_v54 = vor.u32 %v4742_v16, %v4739_v41 }
 0x151   : > { %6712 = vmatprep.subr.bf16.mxu1 %v7365_v45  ;;  %v4753_v10 = vor.u32 %v4752_v31, %v8799_v3  ;;  %v4818_v17 = vshll.u32 %v8808_v55, 16  ;;  %v4822_v52 = vshrl.u32 %v8808_v55, 16  ;;  %v4767_v44 = vor.u32 %v4766_v58, %v4763_v2  ;;  %v7364_v2 = vld [vmem:[%s9393_s3 + $0x208] sm:$0xff]   ;;  %v8849_v55 = vld [vmem:[#allocation2 + $0xa0] sm:$0xf] }
 0x152   : > { %6889 = vmatmul.mubr.bf16.gmra.mrb[28].mxu0 %v7360_v51  ;;  %v4756_v51 = vshll.u32 %v8793_v62, 16  ;;  %v4791_v30 = vor.u32 %v4790_v15, %v4787_v12  ;;  %v4801_v11 = vor.u32 %v4800_v32, %v8815_v27  ;;  %v4811_v63 = vrot.slane %v4809_v8, 4 }
 0x153   : > { %6681 = vmatmul.mubr.bf16.gmra.mrb[12].mxu1 %v9433_v4  ;;  %6908 = vmatprep.mubr.bf16.mxu0 %v8599_v6  ;;  %v4729_v4 = vor.u32 %v4728_v7, %v8797_v26  ;;  %v4777_v6 = vor.u32 %v4776_v43, %v8806_v0  ;;  %v4804_v7 = vshll.u32 %v8813_v14, 16  ;;  %v4814_v25 = vrot.slane %v4812_v49, 5 }
 0x154   : > { %6684 = vmatprep.mubr.bf16.mxu1 %v9435_v50  ;;  %6713 = vmatpush3.bf16.msra.mxu1 %v7365_v45  ;;  %v4780_v45 = vshll.u32 %v8801_v28, 16  ;;  %v4720_v16 = vrot.slane %v4719_v59, 4  ;;  %v4833_v31 = vshrl.u32 %v4553_v33, 16  ;;  %v4836_v5 = vshll.u32 %v4553_v33, 16  ;;  %v8835_v50 = vld [vmem:[%s9393_s3 + $0x100] sm:$0xff]  }
 0x155   : > { %6714 = vmatprep.subr.bf16.mxu1 %v7367_v29  ;;  %v4730_v41 = vrot.slane %v4729_v4, 4  ;;  %v4744_v58 = vrot.slane %v4743_v54, 4  ;;  %v4758_v43 = vrot.slane %v4756_v51, 5  ;;  %v8838_v12 = vrot.slane %v4818_v17, 5  ;;  %v8843_v4 = vld [vmem:[#allocation2 + $0x98] sm:$0x1] }
 0x156   : > { %v4824_v15 = vrot.slane %v4822_v52, 4  ;;  %v4754_v32 = vrot.slane %v4753_v10, 4  ;;  %v4768_v8 = vrot.slane %v4767_v44, 4  ;;  %v4778_v49 = vrot.slane %v4777_v6, 4  ;;  %v4556_v44 = vld [vmem:[#allocation2 + $0xa8] sm:$0xf] }
 0x157   : > { %v4782_v59 = vrot.slane %v4780_v45, 5  ;;  %v9437_v51 = vcombine.low %v8572_v21, %v8578_v9  ;;  %v4792_v54 = vrot.slane %v4791_v30, 4  ;;  %v4802_v17 = vrot.slane %v4801_v11, 4  ;;  %v8883_v30 = vld [vmem:[#allocation2 + $0xac] sm:$0xf] }
 0x158   : > { %6715 = vmatpush3.bf16.msra.mxu1 %v7367_v29  ;;  %v9436_v29 = vcombine.low %v8557_v46, %v8565_v13  ;;  %v4806_v33 = vrot.slane %v4804_v7, 5  ;;  %v4815_v52 = vor.u32 %v4814_v25, %v4811_v63  ;;  %v9438_v46 = vrot.slane %v8753_v38, 5 }
 0x159   : > { %6988 = vmatprep.subr.bf16.mxu1 %v8835_v50  ;;  %v4725_v21 = vsel %vm7587_vm2, %v4720_v16, %v8797_v26  ;;  %v4835_v9 = vrot.slane %v4833_v31, 4  ;;  %v4749_v38 = vsel %vm7587_vm2, %v4744_v58, %v8799_v3  ;;  %v4828_v10 = vshll.u32 %v8843_v4, 16  ;;  %v8874_v26 = vld [vmem:[#allocation2 + $0xa4] sm:$0x1]  ;;  %v7368_v58 = vld [vmem:[%s9393_s3 + $0x218] sm:$0xff]  }
 0x15a   : > { %6909 = vmatmul.mubr.bf16.vlgmr.msra.gmra.mrb[0].mxu0 %v8612_v60  ;;  %v8858_v13 = vsel %vm7892_vm13, %v8769_v48, %v9438_v46  ;;  %v4838_v60 = vrot.slane %v4836_v5, 5  ;;  %v4825_v48 = vor.u32 %v4824_v15, %v8838_v12  ;;  %v4759_v6 = vsel %vm7587_vm2, %v4754_v32, %v4758_v43 }
 0x15b   : > { %6685 = vmatmul.mubr.bf16.gmra.mrb[16].mxu1 %v9436_v29  ;;  %6941 = vmatpush3.bf16.msra.mxu0 %v8610_v36  ;;  %v7366_v36 = vld [vmem:[%s9393_s3 + $0x210] sm:$0xff]   ;;  %v4773_v45 = vsel %vm7587_vm2, %v4768_v8, %v8806_v0  ;;  %v4846_v7 = vshrl.u32 %v8849_v55, 16  ;;  %v4783_v3 = vsel %vm7587_vm2, %v4778_v49, %v4782_v59  ;;  %v4797_v11 = vsel %vm7587_vm2, %v4792_v54, %v8815_v27  ;;  %v5277_v59 = vld [vmem:[#allocation2 + $0x48] sm:$0xe]  ;;  %v9441_v54 = vld [vmem:[#allocation3_spill] sm:$0xff] }
 0x15c   : > { %6688 = vmatprep.mubr.bf16.mxu1 %v9437_v51  ;;  %6912 = vmatprep.mubr.bf16.mxu0 %v8733_v40  ;;  %v4735_v40 = vsel %vm7587_vm2, %v4730_v41, %v8819_v23  ;;  %v4842_v23 = vshll.u32 %v8849_v55, 16  ;;  %v4807_v63 = vsel %vm7587_vm2, %v4802_v17, %v4806_v33  ;;  %v8892_v25 = vrot.slane %v4815_v52, 4  ;;  %v9440_v51 = vld [vmem:[#allocation4_spill] sm:$0xff] }
 0x15d   : > { %6942 = vmatprep.subr.bf16.mxu0 %v7364_v2  ;;  %v4839_v0 = vor.u32 %v4838_v60, %v4835_v9  ;;  %v4852_v16 = vshll.u32 %v8874_v26, 16  ;;  %v4857_v41 = vshrl.u32 %v4556_v44, 16  ;;  %v4860_v31 = vshll.u32 %v4556_v44, 16  ;;  %v8933_v9 = vld [vmem:[#allocation2 + $0xb4] sm:$0xf] }
 0x15e   : > { %v6119_v5 = vcombine.low %v8767_v56, %v8858_v13  ;;  %v8900_v27 = vrot.slane %v4825_v48, 4  ;;  %v8902_v43 = vrot.slane %v4828_v10, 5  ;;  %v4866_v15 = vshll.u32 %v8883_v30, 16  ;;  %v5279_v10 = vld [vmem:[#allocation2 + $0x60] sm:$0xe] }
 0x15f   : > { %6943 = vmatpush3.bf16.msra.mxu0 %v7364_v2  ;;  %v9439_v2 = vcombine.low %v8603_v19, %v8618_v53  ;;  %v6246_v29 = vcombine.low %v4725_v21, %v4735_v40  ;;  %v8908_v32 = vcombine.low %v4749_v38, %v4759_v6  ;;  %v8910_v8 = vrot.slane %v4842_v23, 5  ;;  %v8931_v21 = vld [vmem:[#allocation2 + $0xb0] sm:$0x1]  ;;  %v5278_v40 = vld [vmem:[#allocation2 + $0x54] sm:$0xe]  ;;  %v7371_v38 = vld [vmem:[%s9393_s3 + $0x220] sm:$0xff]  }
 0x160   : > { %6944 = vmatprep.subr.bf16.mxu0 %v7366_v36  ;;  %v8912_v49 = vrot.slane %v4846_v7, 4  ;;  %v9442_v17 = vor.u32 %v9440_v51, %v9441_v54  ;;  %v9443_v52 = vcombine.low %v8676_v1, %v8702_v35  ;;  %v8923_v19 = vcombine.low %v4773_v45, %v4783_v3  ;;  %v9444_v23 = vld [vmem:[#allocation5_spill] sm:$0xff]  ;;  %v9445_v3 = vld [vmem:[#allocation7_spill] sm:$0xff] }
 0x161   : > { %v8925_v53 = vcombine.low %v4797_v11, %v4807_v63  ;;  %v4821_v46 = vsel %vm7587_vm2, %v8892_v25, %v8838_v12  ;;  %v8938_v1 = vrot.slane %v4852_v16, 5  ;;  %v4859_v35 = vrot.slane %v4857_v41, 4  ;;  %v9446_v25 = vld [vmem:[#allocation6_spill] sm:$0xff]  ;;  %v9447_v16 = vld [vmem:[#allocation8_spill] sm:$0xff]  ;;  %v9064_v13 = vld [vmem:[#allocation2 + $0xbc] sm:$0x1] }
 0x162   : > { %v8917_v33 = vrot.slane %v9442_v17, 4  ;;  %6913 = vmatmul.mubr.bf16.gmra.mrb[4].mxu0 %v8735_v42  ;;  %v8936_v42 = vrot.slane %v4839_v0, 4  ;;  %v4862_v60 = vrot.slane %v4860_v31, 5  ;;  %v4831_v12 = vsel %vm7587_vm2, %v8900_v27, %v8902_v43  ;;  %v5280_v31 = vld [vmem:[#allocation2 + $0x6c] sm:$0xe] }
 0x163   : > { %6689 = vmatmul.mubr.bf16.gmra.mrb[20].mxu1 %v9439_v2  ;;  %6916 = vmatprep.mubr.bf16.mxu0 %v8761_v57  ;;  %v8947_v48 = vrot.slane %v4866_v15, 5  ;;  %v4870_v57 = vshrl.u32 %v8883_v30, 16  ;;  %v4849_v44 = vor.u32 %v8912_v49, %v8910_v8  ;;  %v4876_v6 = vshll.u32 %v8931_v21, 16  ;;  %v7374_v49 = vld [vmem:[%s9393_s3 + $0x228] sm:$0xff]  }
 0x164   : > { %6692 = vmatprep.mubr.bf16.mxu1 %v9443_v52  ;;  %6945 = vmatpush3.bf16.msra.mxu0 %v7366_v36  ;;  %v6268_v36 = vrot.slane %v5277_v59, 9  ;;  %v4881_v45 = vshrl.u32 %v8933_v9, 16  ;;  %v5367_v7 = vrot.slane %v9444_v23, 5  ;;  %v5370_v11 = vrot.slane %v9445_v3, 5 }
 0x165   : > { %6946 = vmatprep.subr.bf16.mxu0 %v7368_v58  ;;  %v6269_v63 = vrot.slane %v5278_v40, 9  ;;  %v5374_v0 = vrot.slane %v9446_v25, 5  ;;  %v5377_v41 = vrot.slane %v9447_v16, 5  ;;  %v4863_v27 = vor.u32 %v4862_v60, %v4859_v35  ;;  %v7369_v16 = vld [vmem:[#allocation2 + $0xc] sm:$0xff]  }
 0x166   : > { %v8960_v43 = vsel %vm7892_vm13, %v6268_v36, %v5367_v7  ;;  %v5369_v15 = vrot.slane %v5367_v7, 4  ;;  %v6270_v2 = vrot.slane %v5279_v10, 9  ;;  %v8965_v59 = vrot.slane %v4870_v57, 4  ;;  %v9449_v36 = vld [vmem:[#allocation10_spill] sm:$0xff] }
 0x167   : > { %v8969_v51 = vsel %vm7892_vm13, %v6269_v63, %v5374_v0  ;;  %v5376_v17 = vrot.slane %v5374_v0, 4  ;;  %v9448_v52 = vcombine.low %v8712_v24, %v8716_v22  ;;  %v5384_v60 = vrot.slane %v8741_v20, 5  ;;  %v5281_v0 = vld [vmem:[#allocation2 + $0x78] sm:$0xe] }
 0x168   : > { %6947 = vmatpush3.bf16.msra.mxu0 %v7368_v58  ;;  %v5381_v58 = vrot.slane %v8739_v61, 5  ;;  %v8977_v35 = vsel %vm7892_vm13, %v5369_v15, %v5370_v11  ;;  %v6271_v40 = vrot.slane %v5280_v31, 9  ;;  %v5388_v57 = vrot.slane %v8756_v47, 5  ;;  %v9013_v11 = vld [vmem:[#allocation2 + $0xb8] sm:$0xf] }
 0x169   : > { %6948 = vmatprep.subr.bf16.mxu0 %v7371_v38  ;;  %v9450_v10 = vcombine.low %v8725_v37, %v9449_v36  ;;  %v6284_v61 = vcombine.low %v8960_v43, %v8977_v35  ;;  %v8989_v24 = vsel %vm7892_vm13, %v5376_v17, %v5377_v41  ;;  %v5391_v23 = vrot.slane %v8793_v62, 5  ;;  %v2911_v62 = vld [vmem:[#allocation2 + $0x78] sm:$0xf]  ;;  %v7457_v35 = vld [vmem:[#allocation2 + $0x8c] sm:$0x1] }
 0x16a   : > { %6917 = vmatmul.mubr.bf16.gmra.mrb[8].mxu0 %v8778_v18  ;;  %v8993_v22 = vsel %vm7892_vm13, %v6270_v2, %v5381_v58  ;;  %v5383_v20 = vrot.slane %v5381_v58, 4  ;;  %v6285_v47 = vcombine.low %v8969_v51, %v8989_v24  ;;  %v8999_v37 = vsel %vm7892_vm13, %v6271_v40, %v5388_v57 }
 0x16b   : > { %6693 = vmatmul.mubr.bf16.gmra.mrb[24].mxu1 %v9448_v52  ;;  %6920 = vmatprep.mubr.bf16.mxu0 %v6246_v29  ;;  %v5390_v18 = vrot.slane %v5388_v57, 4  ;;  %v9002_v7 = vcombine.low %v4821_v46, %v4831_v12  ;;  %v4845_v3 = vsel %vm7587_vm2, %v8936_v42, %v8910_v8  ;;  %v9008_v29 = vrot.slane %v4849_v44, 4  ;;  %v9452_v57 = vld [vmem:[#allocation11_spill] sm:$0xff] }
 0x16c   : > { %6696 = vmatprep.mubr.bf16.mxu1 %v9450_v10  ;;  %6949 = vmatpush3.bf16.msra.mxu0 %v7371_v38  ;;  %v7377_v38 = vld [vmem:[%s9393_s3 + $0x230] sm:$0xff]   ;;  %v9017_v63 = vsel %vm7892_vm13, %v5383_v20, %v5384_v60  ;;  %v9019_v46 = vrot.slane %v4876_v6, 5  ;;  %v4884_v12 = vshll.u32 %v8933_v9, 16  ;;  %v9028_v41 = vrot.slane %v4863_v27, 4  ;;  %v4562_v6 = vld [vmem:[#allocation2 + $0xc0] sm:$0xf] }
 0x16d   : > { %6950 = vmatprep.subr.bf16.mxu0 %v7374_v49  ;;  %v6286_v25 = vcombine.low %v8993_v22, %v9017_v63  ;;  %v9026_v44 = vsel %vm7892_vm13, %v5390_v18, %v5391_v23  ;;  %v4873_v31 = vor.u32 %v8965_v59, %v8947_v48  ;;  %v9032_v15 = vrot.slane %v4881_v45, 4  ;;  %v5282_v60 = vld [vmem:[#allocation2 + $0x84] sm:$0xe]  ;;  %v7380_v45 = vld [vmem:[%s9393_s3 + $0x238] sm:$0xff]   ;;  %v9451_v59 = vld [vmem:[#allocation9_spill] sm:$0xff] }
 0x16e   : > { %v6287_v9 = vcombine.low %v8999_v37, %v9026_v44  ;;  %v4890_v2 = vshll.u32 %v9013_v11, 16  ;;  %v4894_v17 = vshrl.u32 %v9013_v11, 16  ;;  %v3149_v58 = vshrl.u32 %v2911_v62, 16  ;;  %v7461_v63 = vld [vmem:[#allocation2 + $0xa4] sm:$0x1] }
 0x16f   : > { %v3152_v52 = vshll.u32 %v2911_v62, 16  ;;  %v4855_v27 = vsel %vm7587_vm2, %v9008_v29, %v8938_v1  ;;  %v6272_v40 = vrot.slane %v5281_v0, 9  ;;  %v5395_v36 = vrot.slane %v9452_v57, 5  ;;  %v9055_v1 = vld [vmem:[#allocation2 + $0xc4] sm:$0xf] }
 0x170   : > { %6951 = vmatpush3.bf16.msra.mxu0 %v7374_v49  ;;  %v3171_v49 = vsel %vm7587_vm2, %v8917_v33, %v9451_v59  ;;  %v9053_v10 = vrot.slane %v4884_v12, 5  ;;  %v3151_v20 = vrot.slane %v3149_v58, 4  ;;  %v5398_v23 = vrot.slane %v8801_v28, 5  ;;  %v9453_v58 = vld [vmem:[#allocation12_spill] sm:$0xff] }
 0x171   : > { %6952 = vmatprep.subr.bf16.mxu0 %v7377_v38  ;;  %v3154_v18 = vrot.slane %v3152_v52, 5  ;;  %v4905_v29 = vshrl.u32 %v4562_v6, 16  ;;  %v9061_v33 = vsel %vm7892_vm13, %v6272_v40, %v5395_v36  ;;  %v5397_v62 = vrot.slane %v5395_v36, 4  ;;  %v4565_v36 = vld [vmem:[#allocation2 + $0xcc] sm:$0xf] }
 0x172   : > { %6921 = vmatmul.mubr.bf16.gmra.mrb[12].mxu0 %v8908_v32  ;;  %v6273_v0 = vrot.slane %v5282_v60, 9  ;;  %v4874_v56 = vrot.slane %v4873_v31, 4  ;;  %v5402_v28 = vrot.slane %v9453_v58, 5  ;;  %v4914_v32 = vshll.u32 %v9055_v1, 16 }
 0x173   : > { %6697 = vmatmul.mubr.bf16.gmra.mrb[28].mxu1 %v6119_v5  ;;  %6924 = vmatprep.mubr.bf16.mxu0 %v8923_v19  ;;  %v4908_v5 = vshll.u32 %v4562_v6, 16  ;;  %v3155_v12 = vor.u32 %v3154_v18, %v3151_v20  ;;  %v9071_v52 = vsel %vm7892_vm13, %v5397_v62, %v5398_v23  ;;  %v5405_v60 = vrot.slane %v8813_v14, 5  ;;  %v7370_v19 = vld [vmem:[#allocation2 + $0x18] sm:$0xff]  }
 0x174   : > { %6716 = vmatprep.mubr.bf16.mxu1 %v7369_v16  ;;  %6953 = vmatpush3.bf16.msra.mxu0 %v7377_v38  ;;  %v4918_v16 = vshrl.u32 %v9055_v1, 16  ;;  %v9074_v31 = vrot.slane %v4890_v2, 5  ;;  %v4896_v59 = vrot.slane %v4894_v17, 4  ;;  %v6288_v6 = vcombine.low %v9061_v33, %v9071_v52  ;;  %v7372_v2 = vld [vmem:[#allocation2 + $0x24] sm:$0xff]   ;;  %v2929_v33 = vld [vmem:[#allocation2 + $0xc0] sm:$0xf] }
 0x175   : > { %6954 = vmatprep.subr.bf16.mxu0 %v7380_v45  ;;  %v3156_v38 = vrot.slane %v3155_v12, 4  ;;  %v4869_v40 = vsel %vm7587_vm2, %v9028_v41, %v8947_v48  ;;  %v4900_v57 = vshll.u32 %v9064_v13, 16  ;;  %v9085_v20 = vsel %vm7892_vm13, %v6273_v0, %v5402_v28  ;;  %v9095_v12 = vld [vmem:[#allocation2 + $0xd0] sm:$0xf] }
 0x176   : > { %v5404_v14 = vrot.slane %v5402_v28, 4  ;;  %v4879_v17 = vsel %vm7587_vm2, %v4874_v56, %v9019_v46  ;;  %v4907_v18 = vrot.slane %v4905_v29, 4  ;;  %v4910_v23 = vrot.slane %v4908_v5, 5  ;;  %v5283_v28 = vld [vmem:[#allocation2 + $0x90] sm:$0xe] }
 0x177   : > { %v3161_v48 = vsel %vm7587_vm2, %v3156_v38, %v9441_v54  ;;  %v9093_v41 = vrot.slane %v4914_v32, 5  ;;  %v4920_v62 = vrot.slane %v4918_v16, 4  ;;  %v4887_v46 = vor.u32 %v9053_v10, %v9032_v15  ;;  %v9106_v29 = vld [vmem:[#allocation2 + $0xc8] sm:$0x1] }
 0x178   : > { %6955 = vmatpush3.bf16.msra.mxu0 %v7380_v45  ;;  %v9097_v0 = vcombine.low %v3161_v48, %v3171_v49  ;;  %v9101_v58 = vsel %vm7892_vm13, %v5404_v14, %v5405_v60  ;;  %v4897_v45 = vor.u32 %v4896_v59, %v9074_v31  ;;  %v4929_v54 = vshrl.u32 %v4565_v36, 16  ;;  %v7439_v10 = vld [vmem:[%s9393_s3 + $0x108] sm:$0xff]   ;;  %v5284_v60 = vld [vmem:[#allocation2 + $0x9c] sm:$0xe]  ;;  %v7373_v59 = vld [vmem:[#allocation2 + $0x30] sm:$0xff]  }
 0x179   : > { %v6289_v56 = vcombine.low %v9085_v20, %v9101_v58  ;;  %v6251_v49 = vcombine.low %v4845_v3, %v4855_v27  ;;  %v4902_v5 = vrot.slane %v4900_v57, 5  ;;  %v4932_v15 = vshll.u32 %v4565_v36, 16  ;;  %v9454_v3 = vld [vmem:[#allocation13_spill] sm:$0xff]  ;;  %v7375_v14 = vld [vmem:[#allocation2 + $0x3c] sm:$0xff]  }
 0x17a   : > { %6925 = vmatmul.mubr.bf16.gmra.mrb[16].mxu0 %v8925_v53  ;;  %v6252_v32 = vcombine.low %v4869_v40, %v4879_v17  ;;  %v4938_v16 = vshll.u32 %v9095_v12, 16  ;;  %v6274_v53 = vrot.slane %v5283_v28, 9  ;;  %v4921_v8 = vor.u32 %v4920_v62, %v9093_v41 }
 0x17b   : > { %6717 = vmatmul.mubr.bf16.vlgmr.msra.gmra.mrb[0].mxu1 %v7370_v19  ;;  %6928 = vmatprep.mubr.bf16.mxu0 %v9002_v7  ;;  %v4911_v19 = vor.u32 %v4910_v23, %v4907_v18  ;;  %v4924_v42 = vshll.u32 %v9106_v29, 16  ;;  %v5409_v27 = vrot.slane %v9454_v3, 5  ;;  %v4888_v38 = vrot.slane %v4887_v46, 4  ;;  %v7440_v23 = vld [vmem:[%s9393_s3 + $0x110] sm:$0xff]  }
 0x17c   : > { %6996 = vmatpush3.bf16.msra.mxu1 %v8835_v50  ;;  %6720 = vmatprep.mubr.bf16.mxu1 %v7372_v2  ;;  %v4942_v50 = vshrl.u32 %v9095_v12, 16  ;;  %v4898_v57 = vrot.slane %v4897_v45, 4  ;;  %v4931_v36 = vrot.slane %v4929_v54, 4  ;;  %v5412_v40 = vrot.slane %v8843_v4, 5 }
 0x17d   : > { %6989 = vmatprep.subr.bf16.mxu1 %v7439_v10  ;;  %v4934_v2 = vrot.slane %v4932_v15, 5  ;;  %v9129_v17 = vsel %vm7892_vm13, %v6274_v53, %v5409_v27  ;;  %v5411_v7 = vrot.slane %v5409_v27, 4  ;;  %v6275_v18 = vrot.slane %v5284_v60, 9  ;;  %v9138_v15 = vld [vmem:[#allocation2 + $0xd4] sm:$0x1] }
 0x17e   : > { %v9134_v48 = vrot.slane %v4938_v16, 5  ;;  %v4944_v62 = vrot.slane %v4942_v50, 4  ;;  %v5416_v28 = vrot.slane %v8849_v55, 5  ;;  %v5419_v4 = vrot.slane %v8874_v26, 5 }
 0x17f   : > { %v4912_v46 = vrot.slane %v4911_v19, 4  ;;  %v4922_v45 = vrot.slane %v4921_v8, 4  ;;  %v4926_v54 = vrot.slane %v4924_v42, 5  ;;  %v4893_v26 = vsel %vm7587_vm2, %v4888_v38, %v9074_v31  ;;  %v7376_v38 = vld [vmem:[#allocation2 + $0x48] sm:$0xff]  }
 0x180   : > { %6997 = vmatpush3.bf16.msra.mxu1 %v7439_v10  ;;  %v9142_v10 = vsel %vm7892_vm13, %v5411_v7, %v5412_v40  ;;  %v9148_v16 = vsel %vm7892_vm13, %v6275_v18, %v5416_v28  ;;  %v5418_v55 = vrot.slane %v5416_v28, 4  ;;  %v4935_v50 = vor.u32 %v4934_v2, %v4931_v36  ;;  %v7378_v40 = vld [vmem:[#allocation2 + $0x54] sm:$0xff]  }
 0x181   : > { %6990 = vmatprep.subr.bf16.mxu1 %v7440_v23  ;;  %v6290_v53 = vcombine.low %v9129_v17, %v9142_v10  ;;  %v4903_v60 = vsel %vm7587_vm2, %v4898_v57, %v4902_v5  ;;  %v4945_v19 = vor.u32 %v4944_v62, %v9134_v48  ;;  %v4948_v8 = vshll.u32 %v9138_v15, 16  ;;  %v5273_v57 = vld [vmem:[#allocation2 + $0x18] sm:$0xe]  ;;  %v7443_v62 = vld [vmem:[%s9393_s3 + $0x120] sm:$0xff]  }
 0x182   : > { %6929 = vmatmul.mubr.bf16.gmra.mrb[20].mxu0 %v6251_v49  ;;  %v9159_v42 = vsel %vm7892_vm13, %v5418_v55, %v5419_v4  ;;  %v7441_v49 = vld [vmem:[%s9393_s3 + $0x118] sm:$0xff]   ;;  %v4917_v31 = vsel %vm7587_vm2, %v4912_v46, %v9093_v41  ;;  %v4927_v5 = vsel %vm7587_vm2, %v4922_v45, %v4926_v54  ;;  %v6253_v36 = vcombine.low %v4893_v26, %v4903_v60  ;;  %v5286_v41 = vld [vmem:[#allocation2 + $0xb4] sm:$0xe]  ;;  %v7444_v46 = vld [vmem:[#allocation2 + $0x20] sm:$0x1] }
 0x183   : > { %6721 = vmatmul.mubr.bf16.gmra.mrb[4].mxu1 %v7373_v59  ;;  %6932 = vmatprep.mubr.bf16.mxu0 %v6252_v32  ;;  %v7442_v32 = vld [vmem:[#allocation2 + $0x1c] sm:$0xf]  ;;  %v6291_v27 = vcombine.low %v9148_v16, %v9159_v42  ;;  %v5285_v59 = vld [vmem:[#allocation2 + $0xa8] sm:$0xe]  ;;  %v6254_v2 = vcombine.low %v4917_v31, %v4927_v5  ;;  %v4946_v7 = vrot.slane %v4945_v19, 4  ;;  %v4950_v18 = vrot.slane %v4948_v8, 5 }
 0x184   : > { %6724 = vmatprep.mubr.bf16.mxu1 %v7375_v14  ;;  %6998 = vmatpush3.bf16.msra.mxu1 %v7440_v23  ;;  %v5339_v3 = vrot.slane %v7442_v32, 5  ;;  %v4936_v14 = vrot.slane %v4935_v50, 4  ;;  %v6276_v23 = vrot.slane %v5285_v59, 9  ;;  %v6264_v28 = vrot.slane %v5273_v57, 9  ;;  %v5274_v54 = vld [vmem:[#allocation2 + $0x24] sm:$0xe] }
 0x185   : > { %6991 = vmatprep.subr.bf16.mxu1 %v7441_v49  ;;  %v5342_v45 = vrot.slane %v7444_v46, 5  ;;  %v5423_v55 = vrot.slane %v8883_v30, 5  ;;  %v5426_v26 = vrot.slane %v8931_v21, 5  ;;  %v7445_v60 = vld [vmem:[#allocation2 + $0x28] sm:$0xf]  ;;  %v6277_v8 = vrot.slane %v5286_v41, 9 }
 0x186   : > { %v5341_v4 = vrot.slane %v5339_v3, 4  ;;  %v4941_v50 = vsel %vm7587_vm2, %v4936_v14, %v9134_v48  ;;  %v5346_v19 = vrot.slane %v7445_v60, 5  ;;  %v4951_v31 = vsel %vm7587_vm2, %v4946_v7, %v4950_v18  ;;  %v5275_v5 = vld [vmem:[#allocation2 + $0x30] sm:$0xe]  ;;  %v7446_v30 = vld [vmem:[#allocation2 + $0x34] sm:$0xf] }
 0x187   : > { %v5353_v32 = vrot.slane %v7446_v30, 5  ;;  %v9184_v21 = vsel %vm7892_vm13, %v6276_v23, %v5423_v55  ;;  %v5425_v59 = vrot.slane %v5423_v55, 4  ;;  %v5340_v48 = vsel %vm7892_vm13, %v6264_v28, %v5339_v3  ;;  %v7447_v57 = vld [vmem:[%s9393_s3 + $0x128] sm:$0xff]   ;;  %v5276_v60 = vld [vmem:[#allocation2 + $0x3c] sm:$0xe] }
 0x188   : > { %6999 = vmatpush3.bf16.msra.mxu1 %v7441_v49  ;;  %v5430_v49 = vrot.slane %v9013_v11, 5  ;;  %v6265_v11 = vrot.slane %v5274_v54, 9  ;;  %v7448_v14 = vld [vmem:[#allocation2 + $0x2c] sm:$0x1]  ;;  %v5433_v18 = vrot.slane %v9064_v13, 5  ;;  %v6255_v23 = vcombine.low %v4941_v50, %v4951_v31  ;;  %v7450_v13 = vld [vmem:[%s9393_s3 + $0x130] sm:$0xff]  }
 0x189   : > { %6992 = vmatprep.subr.bf16.mxu1 %v7443_v62  ;;  %v9195_v7 = vsel %vm7892_vm13, %v5425_v59, %v5426_v26  ;;  %v7381_v41 = vld [vmem:[#allocation2 + $0x6c] sm:$0xff]   ;;  %v6266_v28 = vrot.slane %v5275_v5, 9  ;;  %v7449_v54 = vld [vmem:[#allocation2 + $0x38] sm:$0x1]  ;;  %v7451_v5 = vld [vmem:[#allocation2 + $0x40] sm:$0xf] }
 0x18a   : > { %6933 = vmatmul.mubr.bf16.gmra.mrb[24].mxu0 %v6253_v36  ;;  %v5432_v36 = vrot.slane %v5430_v49, 4  ;;  %v9199_v3 = vsel %vm7892_vm13, %v6277_v8, %v5430_v49  ;;  %v5356_v55 = vrot.slane %v7449_v54, 5  ;;  %v5287_v8 = vld [vmem:[#allocation2 + $0xc0] sm:$0xe]  ;;  %v5347_v49 = vsel %vm7892_vm13, %v6265_v11, %v5346_v19 }
 0x18b   : > { %6725 = vmatmul.mubr.bf16.gmra.mrb[8].mxu1 %v7376_v38  ;;  %6936 = vmatprep.mubr.bf16.mxu0 %v6254_v2  ;;  %v5343_v38 = vsel %vm7892_vm13, %v5341_v4, %v5342_v45  ;;  %v5349_v2 = vrot.slane %v7448_v14, 5  ;;  %v6292_v4 = vcombine.low %v9184_v21, %v9195_v7  ;;  %v5355_v45 = vrot.slane %v5353_v32, 4 }
 0x18c   : > { %6728 = vmatprep.mubr.bf16.mxu1 %v7378_v40  ;;  %7000 = vmatpush3.bf16.msra.mxu1 %v7443_v62  ;;  %v7379_v40 = vld [vmem:[#allocation2 + $0x60] sm:$0xff]   ;;  %v5348_v62 = vrot.slane %v5346_v19, 4  ;;  %v6280_v46 = vcombine.low %v5340_v48, %v5343_v38  ;;  %v9206_v26 = vsel %vm7892_vm13, %v5432_v36, %v5433_v18  ;;  %v5360_v30 = vrot.slane %v7451_v5, 5  ;;  %v5288_v38 = vld [vmem:[#allocation2 + $0xcc] sm:$0xe]  ;;  %v7452_v36 = vld [vmem:[%s9393_s3 + $0x138] sm:$0xff]  }
 0x18d   : > { %6993 = vmatprep.subr.bf16.mxu1 %v7447_v57  ;;  %v6293_v50 = vcombine.low %v9199_v3, %v9206_v26  ;;  %v5354_v59 = vsel %vm7892_vm13, %v6266_v28, %v5353_v32  ;;  %v5357_v48 = vsel %vm7892_vm13, %v5355_v45, %v5356_v55  ;;  %v2908_v19 = vld [vmem:[#allocation2 + $0x6c] sm:$0xf]  ;;  %v6278_v11 = vrot.slane %v5287_v8, 9  ;;  %v7454_v8 = vld [vmem:[#allocation2 + $0x70] sm:$0xf] }
 0x18e   : > { %v5350_v31 = vsel %vm7892_vm13, %v5348_v62, %v5349_v2  ;;  %v7453_v2 = vld [vmem:[#allocation2 + $0x44] sm:$0x1]  ;;  %v5440_v32 = vrot.slane %v9106_v29, 5  ;;  %v6282_v62 = vcombine.low %v5354_v59, %v5357_v48  ;;  %v5362_v28 = vrot.slane %v5360_v30, 4 }
 0x18f   : > { %v6281_v14 = vcombine.low %v5347_v49, %v5350_v31  ;;  %v5363_v18 = vrot.slane %v7453_v2, 5  ;;  %v5444_v45 = vrot.slane %v9095_v12, 5  ;;  %v3125_v54 = vshrl.u32 %v2908_v19, 16  ;;  %v7384_v2 = vld [vmem:[#allocation2 + $0x90] sm:$0xff]  }
 0x190   : > { %7001 = vmatpush3.bf16.msra.mxu1 %v7447_v57  ;;  %v6267_v57 = vrot.slane %v5276_v60, 9  ;;  %v3128_v55 = vshll.u32 %v2908_v19, 16  ;;  %v3134_v49 = vshll.u32 %v7454_v8, 16  ;;  %v3138_v31 = vshrl.u32 %v7454_v8, 16 }
 0x191   : > { %6994 = vmatprep.subr.bf16.mxu1 %v7450_v13  ;;  %v5447_v5 = vrot.slane %v9138_v15, 5 }
 0x192   : > { %6937 = vmatmul.mubr.bf16.gmra.mrb[28].mxu0 %v6255_v23  ;;  %v5437_v23 = vrot.slane %v9055_v1, 5  ;;  %v5446_v1 = vrot.slane %v5444_v45, 4  ;;  %v5361_v59 = vsel %vm7892_vm13, %v6267_v57, %v5360_v30  ;;  %v3130_v19 = vrot.slane %v3128_v55, 5  ;;  %v7385_v57 = vld [vmem:[#allocation2 + $0x9c] sm:$0xff]  }
 0x193   : > { %6729 = vmatmul.mubr.bf16.gmra.mrb[12].mxu1 %v7379_v40  ;;  %6956 = vmatprep.mubr.bf16.mxu0 %v6280_v46  ;;  %v7382_v40 = vld [vmem:[#allocation2 + $0x78] sm:$0xff]   ;;  %v6279_v46 = vrot.slane %v5288_v38, 9  ;;  %v5364_v38 = vsel %vm7892_vm13, %v5362_v28, %v5363_v18  ;;  %v3140_v15 = vrot.slane %v3138_v31, 4  ;;  %v7386_v31 = vld [vmem:[#allocation2 + $0xa8] sm:$0xff]  }
 0x194   : > { %6732 = vmatprep.mubr.bf16.mxu1 %v7381_v41  ;;  %7002 = vmatpush3.bf16.msra.mxu1 %v7450_v13  ;;  %v7383_v41 = vld [vmem:[#allocation2 + $0x84] sm:$0xff]   ;;  %v9229_v13 = vsel %vm7892_vm13, %v6278_v11, %v5437_v23  ;;  %v5439_v60 = vrot.slane %v5437_v23, 4  ;;  %v9248_v11 = vsel %vm7892_vm13, %v5446_v1, %v5447_v5  ;;  %v6283_v30 = vcombine.low %v5361_v59, %v5364_v38  ;;  %v7387_v1 = vld [vmem:[#allocation2 + $0xb4] sm:$0xff]  }
 0x195   : > { %6995 = vmatprep.subr.bf16.mxu1 %v7452_v36  ;;  %v9237_v12 = vsel %vm7892_vm13, %v6279_v46, %v5444_v45  ;;  %v2914_v23 = vld [vmem:[#allocation2 + $0x84] sm:$0xf]  ;;  %v3182_v45 = vshll.u32 %v7456_v39, 16 }
 0x196   : > { %v9233_v29 = vsel %vm7892_vm13, %v5439_v60, %v5440_v32  ;;  %v3173_v18 = vshrl.u32 %v2914_v23, 16  ;;  %v3176_v28 = vshll.u32 %v2914_v23, 16  ;;  %v2917_v60 = vld [vmem:[#allocation2 + $0x90] sm:$0xf] }
 0x197   : > { %v6294_v48 = vcombine.low %v9229_v13, %v9233_v29  ;;  %v9255_v38 = vrot.slane %v3182_v45, 5 }
 0x198   : > { %7003 = vmatpush3.bf16.msra.mxu1 %v7452_v36  ;;  %v3127_v36 = vrot.slane %v3125_v54, 4  ;;  %v3186_v54 = vshrl.u32 %v7456_v39, 16  ;;  %v3175_v5 = vrot.slane %v3173_v18, 4  ;;  %v3178_v59 = vrot.slane %v3176_v28, 5 }
 0x19a   : > { %6957 = vmatmul.mubr.bf16.vlgmr.msra.gmra.mrb[0].mxu0 %v6281_v14  ;;  %v6295_v14 = vcombine.low %v9237_v12, %v9248_v11  ;;  %v3131_v32 = vor.u32 %v3130_v19, %v3127_v36  ;;  %v3188_v36 = vrot.slane %v3186_v54, 4  ;;  %v3197_v19 = vshrl.u32 %v2917_v60, 16 }
 0x19b   : > { %6733 = vmatmul.mubr.bf16.gmra.mrb[16].mxu1 %v7382_v40  ;;  %6960 = vmatprep.mubr.bf16.mxu0 %v6282_v62  ;;  %v3136_v40 = vrot.slane %v3134_v49, 5  ;;  %v7455_v62 = vld [vmem:[#allocation2 + $0x74] sm:$0x1] }
 0x19c   : > { %6736 = vmatprep.mubr.bf16.mxu1 %v7383_v41  ;;  %v3144_v46 = vshll.u32 %v7455_v62, 16  ;;  %v3132_v55 = vrot.slane %v3131_v32, 4  ;;  %v3189_v39 = vor.u32 %v3188_v36, %v9255_v38  ;;  %v3199_v45 = vrot.slane %v3197_v19, 4  ;;  %v7460_v36 = vld [vmem:[#allocation2 + $0x98] sm:$0x1] }
 0x19d   : > { %v3141_v41 = vor.u32 %v3140_v15, %v3136_v40  ;;  %v3200_v15 = vshll.u32 %v2917_v60, 16  ;;  %v3216_v19 = vshll.u32 %v7460_v36, 16 }
 0x19e   : > { %v3146_v49 = vrot.slane %v3144_v46, 5  ;;  %v7459_v46 = vld [vmem:[#allocation2 + $0xa0] sm:$0xf] }
 0x19f   : > { %v3142_v8 = vrot.slane %v3141_v41, 4  ;;  %v3230_v18 = vshll.u32 %v7459_v46, 16  ;;  %v3234_v28 = vshrl.u32 %v7459_v46, 16  ;;  %v3202_v54 = vrot.slane %v3200_v15, 5 }
 0x1a1   : > { %v3147_v43 = vsel %vm7587_vm2, %v3142_v8, %v3146_v49  ;;  %v9270_v51 = vrot.slane %v3230_v18, 5  ;;  %v3236_v24 = vrot.slane %v3234_v28, 4  ;;  %v3218_v28 = vrot.slane %v3216_v19, 5 }
 0x1a2   : > { %6961 = vmatmul.mubr.bf16.gmra.mrb[4].mxu0 %v6283_v30  ;;  %v3137_v30 = vsel %vm7587_vm2, %v3132_v55, %v3136_v40  ;;  %v3179_v40 = vor.u32 %v3178_v59, %v3175_v5  ;;  %v7388_v55 = vld [vmem:[#allocation2 + $0xc0] sm:$0xff]   ;;  %v3190_v5 = vrot.slane %v3189_v39, 4  ;;  %v3203_v59 = vor.u32 %v3202_v54, %v3199_v45  ;;  %v7463_v45 = vld [vmem:[#allocation2 + $0xb8] sm:$0xf] }
 0x1a3   : > { %6737 = vmatmul.mubr.bf16.gmra.mrb[20].mxu1 %v7384_v2  ;;  %6964 = vmatprep.mubr.bf16.mxu0 %v6284_v61  ;;  %v2920_v2 = vld [vmem:[#allocation2 + $0x9c] sm:$0xf]  ;;  %v3192_v61 = vshll.u32 %v7457_v35, 16  ;;  %v6160_v60 = vcombine.low %v3137_v30, %v3147_v43  ;;  %v2926_v43 = vld [vmem:[#allocation2 + $0xb4] sm:$0xf]  ;;  %v3278_v54 = vshll.u32 %v7463_v45, 16 }
 0x1a4   : > { %6740 = vmatprep.mubr.bf16.mxu1 %v7385_v57  ;;  %v7458_v57 = vld [vmem:[#allocation2 + $0x94] sm:$0xf]  ;;  %v3221_v41 = vshrl.u32 %v2920_v2, 16  ;;  %v3224_v62 = vshll.u32 %v2920_v2, 16  ;;  %v3204_v18 = vrot.slane %v3203_v59, 4  ;;  %v3272_v39 = vshll.u32 %v2926_v43, 16 }
 0x1a5   : > { %v3206_v23 = vshll.u32 %v7458_v57, 16  ;;  %v3210_v32 = vshrl.u32 %v7458_v57, 16  ;;  %v3194_v8 = vrot.slane %v3192_v61, 5  ;;  %v3237_v57 = vor.u32 %v3236_v24, %v9270_v51  ;;  %v7464_v59 = vld [vmem:[#allocation2 + $0xb0] sm:$0x1] }
 0x1a6   : > { %v3223_v2 = vrot.slane %v3221_v41, 4  ;;  %v3226_v35 = vrot.slane %v3224_v62, 5  ;;  %v3282_v37 = vshrl.u32 %v7463_v45, 16  ;;  %v3264_v36 = vshll.u32 %v7464_v59, 16 }
 0x1a7   : > { %v9268_v49 = vrot.slane %v3206_v23, 5  ;;  %v7462_v23 = vld [vmem:[#allocation2 + $0xac] sm:$0xf]  ;;  %v3195_v46 = vsel %vm7587_vm2, %v3190_v5, %v3194_v8 }
 0x1a8   : > { %v3227_v61 = vor.u32 %v3226_v35, %v3223_v2  ;;  %v3258_v41 = vshrl.u32 %v7462_v23, 16  ;;  %v3284_v5 = vrot.slane %v3282_v37, 4  ;;  %v3266_v20 = vrot.slane %v3264_v36, 5  ;;  %v7467_v37 = vld [vmem:[#allocation2 + $0xc8] sm:$0x1] }
 0x1a9   : > { %v3209_v52 = vsel %vm7587_vm2, %v3204_v18, %v9268_v49 }
 0x1aa   : > { %6965 = vmatmul.mubr.bf16.gmra.mrb[8].mxu0 %v6285_v47  ;;  %v2923_v47 = vld [vmem:[#allocation2 + $0xa8] sm:$0xf]  ;;  %v3260_v35 = vrot.slane %v3258_v41, 4 }
 0x1ab   : > { %6741 = vmatmul.mubr.bf16.gmra.mrb[24].mxu1 %v7386_v31  ;;  %6968 = vmatprep.mubr.bf16.mxu0 %v6286_v25  ;;  %v3212_v31 = vrot.slane %v3210_v32, 4  ;;  %v3240_v25 = vshll.u32 %v7461_v63, 16  ;;  %v3245_v15 = vshrl.u32 %v2923_v47, 16  ;;  %v3248_v30 = vshll.u32 %v2923_v47, 16 }
 0x1ac   : > { %6744 = vmatprep.mubr.bf16.mxu1 %v7387_v1  ;;  %v3180_v1 = vrot.slane %v3179_v40, 4  ;;  %v3254_v32 = vshll.u32 %v7462_v23, 16  ;;  %v3269_v40 = vshrl.u32 %v2926_v43, 16  ;;  %v3274_v47 = vrot.slane %v3272_v39, 5 }
 0x1ad   : > { %v3213_v22 = vor.u32 %v3212_v31, %v9268_v49  ;;  %v3228_v31 = vrot.slane %v3227_v61, 4  ;;  %v3293_v49 = vshrl.u32 %v2929_v33, 16 }
 0x1ae   : > { %v3185_v62 = vsel %vm7587_vm2, %v3180_v1, %v9255_v38  ;;  %v3238_v38 = vrot.slane %v3237_v57, 4  ;;  %v3256_v2 = vrot.slane %v3254_v32, 5  ;;  %v3271_v24 = vrot.slane %v3269_v40, 4  ;;  %v7466_v57 = vld [vmem:[#allocation2 + $0xbc] sm:$0x1] }
 0x1af   : > { %v3214_v44 = vrot.slane %v3213_v22, 4  ;;  %v6162_v8 = vcombine.low %v3185_v62, %v3195_v46  ;;  %v3280_v1 = vrot.slane %v3278_v54, 5  ;;  %v3233_v19 = vsel %vm7587_vm2, %v3228_v31, %v9270_v51 }
 0x1b0   : > { %v3288_v23 = vshll.u32 %v7466_v57, 16  ;;  %v3295_v58 = vrot.slane %v3293_v49, 4 }
 0x1b1   : > { %v3285_v51 = vor.u32 %v3284_v5, %v3280_v1 }
 0x1b2   : > { %6969 = vmatmul.mubr.bf16.gmra.mrb[12].mxu0 %v6287_v9  ;;  %v3242_v9 = vrot.slane %v3240_v25, 5  ;;  %v3261_v25 = vor.u32 %v3260_v35, %v3256_v2  ;;  %v3290_v45 = vrot.slane %v3288_v23, 5 }
 0x1b3   : > { %6745 = vmatmul.mubr.bf16.gmra.mrb[28].mxu1 %v7388_v55  ;;  %6972 = vmatprep.mubr.bf16.mxu0 %v6288_v6  ;;  %v3247_v55 = vrot.slane %v3245_v15, 4  ;;  %v3219_v6 = vsel %vm7587_vm2, %v3214_v44, %v3218_v28  ;;  %v3296_v15 = vshll.u32 %v2929_v33, 16  ;;  %v3286_v39 = vrot.slane %v3285_v51, 4 }
 0x1b4   : > { %6780 = vmatprep.mubr.bf16.mxu1 %v6160_v60  ;;  %v3250_v60 = vrot.slane %v3248_v30, 5  ;;  %v3243_v22 = vsel %vm7587_vm2, %v3238_v38, %v3242_v9  ;;  %v7465_v30 = vld [vmem:[#allocation2 + $0xc4] sm:$0xf]  ;;  %v6163_v32 = vcombine.low %v3209_v52, %v3219_v6  ;;  %v3262_v46 = vrot.slane %v3261_v25, 4 }
 0x1b5   : > { %v3302_v43 = vshll.u32 %v7465_v30, 16  ;;  %v3306_v61 = vshrl.u32 %v7465_v30, 16  ;;  %v6164_v41 = vcombine.low %v3233_v19, %v3243_v22  ;;  %v3312_v44 = vshll.u32 %v7467_v37, 16 }
 0x1b6   : > { %v3251_v63 = vor.u32 %v3250_v60, %v3247_v55  ;;  %v3267_v10 = vsel %vm7587_vm2, %v3262_v46, %v3266_v20  ;;  %v3291_v55 = vsel %vm7587_vm2, %v3286_v39, %v3290_v45 }
 0x1b7   : > { %v3304_v18 = vrot.slane %v3302_v43, 5  ;;  %v3308_v28 = vrot.slane %v3306_v61, 4  ;;  %v3314_v31 = vrot.slane %v3312_v44, 5 }
 0x1b8   : > { %v3252_v62 = vrot.slane %v3251_v63, 4 }
 0x1b9   : > { %v3309_v54 = vor.u32 %v3308_v28, %v3304_v18 }
 0x1ba   : > { %6973 = vmatmul.mubr.bf16.gmra.mrb[16].mxu0 %v6289_v56  ;;  %v3298_v56 = vrot.slane %v3296_v15, 5  ;;  %v3257_v17 = vsel %vm7587_vm2, %v3252_v62, %v3256_v2 }
 0x1bb   : > { %6781 = vmatmul.mubr.bf16.vlgmr.msra.gmra.mrb[16].mxu1 %v9097_v0  ;;  %6976 = vmatprep.mubr.bf16.mxu0 %v6290_v53  ;;  %v3275_v0 = vor.u32 %v3274_v47, %v3271_v24  ;;  %v6165_v16 = vcombine.low %v3257_v17, %v3267_v10  ;;  %v3310_v60 = vrot.slane %v3309_v54, 4 }
 0x1bc   : > { %6784 = vmatprep.mubr.bf16.mxu1 %v6162_v8  ;;  %v3299_v53 = vor.u32 %v3298_v56, %v3295_v58 }
 0x1bd   : > { %v3276_v40 = vrot.slane %v3275_v0, 4  ;;  %v3315_v7 = vsel %vm7587_vm2, %v3310_v60, %v3314_v31 }
 0x1bf   : > { %v3281_v9 = vsel %vm7587_vm2, %v3276_v40, %v3280_v1 }
 0x1c0   : > { %v6166_v42 = vcombine.low %v3281_v9, %v3291_v55 }
 0x1c2   : > { %6977 = vmatmul.mubr.bf16.gmra.mrb[20].mxu0 %v6291_v27  ;;  %v3300_v27 = vrot.slane %v3299_v53, 4 }
 0x1c3   : > { %6785 = vmatmul.mubr.bf16.gmra.mrb[20].mxu1 %v6163_v32  ;;  %6980 = vmatprep.mubr.bf16.mxu0 %v6292_v4 }
 0x1c4   : > { %6788 = vmatprep.mubr.bf16.mxu1 %v6164_v41  ;;  %v3305_v21 = vsel %vm7587_vm2, %v3300_v27, %v3304_v18 }
 0x1c5   : > { %v6167_v4 = vcombine.low %v3305_v21, %v3315_v7 }
 0x1ca   : > { %6981 = vmatmul.mubr.bf16.gmra.mrb[24].mxu0 %v6293_v50 }
 0x1cb   : > { %6789 = vmatmul.mubr.bf16.gmra.mrb[24].mxu1 %v6165_v16  ;;  %6984 = vmatprep.mubr.bf16.mxu0 %v6294_v48 }
 0x1cc   : > { %6792 = vmatprep.mubr.bf16.mxu1 %v6166_v42 }
 0x1d2   : > { %6985 = vmatmul.mubr.bf16.gmra.mrb[28].mxu0 %v6295_v14 }
 0x1d3   : > { %6793 = vmatmul.mubr.bf16.gmra.mrb[28].mxu1 %v6167_v4 }
 0x24e   : > { %v6718_v38 = vpop.f32.mrb[0].mxu1 }
 0x24f   : > { %v2725_v3 = vpop.f32.mrb[1].mxu1 }
 0x250   : > { %v6719_v26 = vpop.f32.mrb[2].mxu1 }
 0x251   : > { %v2728_v50 = vpop.f32.mrb[3].mxu1 }
 0x256   : > { %v6722_v2 = vpop.f32.mrb[4].mxu1 }
 0x257   : > { %v2741_v35 = vpop.f32.mrb[5].mxu1 }
 0x258   : > { %v6723_v8 = vpop.f32.mrb[6].mxu1 }
 0x259   : > { %v2744_v34 = vpop.f32.mrb[7].mxu1 }
 0x25e   : > { %v6726_v24 = vpop.f32.mrb[8].mxu1 }
 0x25f   : > { %v2757_v47 = vpop.f32.mrb[9].mxu1 }
 0x260   : > { %v6727_v1 = vpop.f32.mrb[10].mxu1 }
 0x261   : > { %v9329_v13 = vpop.f32.mrb[11].mxu1 }
 0x266   : > { %v9331_v29 = vpop.f32.mrb[12].mxu1 }
 0x267   : > { %v9333_v48 = vpop.f32.mrb[13].mxu1 }
 0x268   : > { %v9335_v12 = vpop.f32.mrb[14].mxu1 }
 0x269   : > { %v9337_v11 = vpop.f32.mrb[15].mxu1 }
 0x26d   : > { %v6958_v14 = vpop.f32.mrb[0].mxu0 }
 0x26e   : > { %v7004_v5 = vadd.f32 %v6958_v14, %v6718_v38  ;;  %v5611_v33 = vpop.f32.mrb[1].mxu0 }
 0x26f   : > { %v7005_v52 = vadd.f32 %v5611_v33, %v2725_v3  ;;  %v6959_v6 = vpop.f32.mrb[2].mxu0 }
 0x270   : > { %5772 = vst [vmem:[%s9344_s26 + $0x10] sm:$0xff] %v7004_v5  ;;  %v7006_v59 = vadd.f32 %v6959_v6, %v6719_v26  ;;  %v5614_v36 = vpop.f32.mrb[3].mxu0  ;;  %v5842_v49 = vmul.f32 %v7004_v5, %v7004_v5 }
 0x271   : > { %5770 = vst [vmem:[%s9344_s26] sm:$0xff] %v7005_v52  ;;  %v7007_v19 = vadd.f32 %v5614_v36, %v2728_v50  ;;  %v5840_v22 = vmul.f32 %v7005_v52, %v7005_v52 }
 0x272   : > { %5773 = vst [vmem:[%s9344_s26 + $0x18] sm:$0xff] %v7006_v59  ;;  %v5843_v51 = vmul.f32 %v7006_v59, %v7006_v59 }
 0x273   : > { %5771 = vst [vmem:[%s9344_s26 + $0x8] sm:$0xff] %v7007_v19  ;;  %v5802_v63 = vadd.f32 %v7007_v19, %v7005_v52  ;;  %v5841_v25 = vmul.f32 %v7007_v19, %v7007_v19 }
 0x275   : > { %v5803_v15 = vadd.f32 %v7004_v5, %v5802_v63  ;;  %v5872_v30 = vadd.f32 %v5841_v25, %v5840_v22  ;;  %v6962_v43 = vpop.f32.mrb[4].mxu0 }
 0x276   : > { %v7008_v61 = vadd.f32 %v6962_v43, %v6722_v2  ;;  %v5627_v0 = vpop.f32.mrb[5].mxu0 }
 0x277   : > { %v5873_v57 = vadd.f32 %v5872_v30, %v5842_v49  ;;  %v7009_v23 = vadd.f32 %v5627_v0, %v2741_v35  ;;  %v5804_v32 = vadd.f32 %v7006_v59, %v5803_v15  ;;  %v6963_v41 = vpop.f32.mrb[6].mxu0 }
 0x278   : > { %5776 = vst [vmem:[%s9344_s26 + $0x30] sm:$0xff] %v7008_v61  ;;  %v7010_v62 = vadd.f32 %v6963_v41, %v6723_v8  ;;  %v5630_v46 = vpop.f32.mrb[7].mxu0  ;;  %v5846_v45 = vmul.f32 %v7008_v61, %v7008_v61 }
 0x279   : > { %5774 = vst [vmem:[%s9344_s26 + $0x20] sm:$0xff] %v7009_v23  ;;  %v5805_v20 = vadd.f32 %v7009_v23, %v5804_v32  ;;  %v5844_v58 = vmul.f32 %v7009_v23, %v7009_v23  ;;  %v5874_v56 = vadd.f32 %v5873_v57, %v5843_v51  ;;  %v7011_v18 = vadd.f32 %v5630_v46, %v2744_v34 }
 0x27a   : > { %5777 = vst [vmem:[%s9344_s26 + $0x38] sm:$0xff] %v7010_v62  ;;  %v5847_v44 = vmul.f32 %v7010_v62, %v7010_v62 }
 0x27b   : > { %v5875_v28 = vadd.f32 %v5874_v56, %v5844_v58  ;;  %5775 = vst [vmem:[%s9344_s26 + $0x28] sm:$0xff] %v7011_v18  ;;  %v5806_v40 = vadd.f32 %v7011_v18, %v5805_v20  ;;  %v5845_v39 = vmul.f32 %v7011_v18, %v7011_v18 }
 0x27d   : > { %v5807_v17 = vadd.f32 %v7008_v61, %v5806_v40  ;;  %v5876_v10 = vadd.f32 %v5875_v28, %v5845_v39  ;;  %v6966_v53 = vpop.f32.mrb[8].mxu0 }
 0x27e   : > { %v7012_v54 = vadd.f32 %v6966_v53, %v6726_v24  ;;  %v5643_v37 = vpop.f32.mrb[9].mxu0 }
 0x27f   : > { %v5877_v9 = vadd.f32 %v5876_v10, %v5846_v45  ;;  %v7013_v55 = vadd.f32 %v5643_v37, %v2757_v47  ;;  %v5808_v16 = vadd.f32 %v7010_v62, %v5807_v17  ;;  %v6967_v42 = vpop.f32.mrb[10].mxu0 }
 0x280   : > { %5780 = vst [vmem:[%s9344_s26 + $0x50] sm:$0xff] %v7012_v54  ;;  %v7014_v27 = vadd.f32 %v6967_v42, %v6727_v1  ;;  %v5646_v60 = vpop.f32.mrb[11].mxu0  ;;  %v5850_v50 = vmul.f32 %v7012_v54, %v7012_v54 }
 0x281   : > { %5778 = vst [vmem:[%s9344_s26 + $0x40] sm:$0xff] %v7013_v55  ;;  %v5809_v31 = vadd.f32 %v7013_v55, %v5808_v16  ;;  %v5848_v21 = vmul.f32 %v7013_v55, %v7013_v55  ;;  %v5878_v7 = vadd.f32 %v5877_v9, %v5847_v44  ;;  %v7015_v4 = vadd.f32 %v5646_v60, %v9329_v13 }
 0x282   : > { %5781 = vst [vmem:[%s9344_s26 + $0x58] sm:$0xff] %v7014_v27  ;;  %v5851_v47 = vmul.f32 %v7014_v27, %v7014_v27 }
 0x283   : > { %v5879_v38 = vadd.f32 %v5878_v7, %v5848_v21  ;;  %5779 = vst [vmem:[%s9344_s26 + $0x48] sm:$0xff] %v7015_v4  ;;  %v5810_v3 = vadd.f32 %v7015_v4, %v5809_v31  ;;  %v5849_v26 = vmul.f32 %v7015_v4, %v7015_v4 }
 0x285   : > { %v5811_v2 = vadd.f32 %v7012_v54, %v5810_v3  ;;  %v5880_v35 = vadd.f32 %v5879_v38, %v5849_v26  ;;  %v6970_v8 = vpop.f32.mrb[12].mxu0 }
 0x286   : > { %v7016_v34 = vadd.f32 %v6970_v8, %v9331_v29  ;;  %v5659_v24 = vpop.f32.mrb[13].mxu0 }
 0x287   : > { %v5881_v1 = vadd.f32 %v5880_v35, %v5850_v50  ;;  %v7017_v13 = vadd.f32 %v5659_v24, %v9333_v48  ;;  %v5812_v14 = vadd.f32 %v7014_v27, %v5811_v2  ;;  %v6971_v5 = vpop.f32.mrb[14].mxu0 }
 0x288   : > { %5784 = vst [vmem:[%s9344_s26 + $0x70] sm:$0xff] %v7016_v34  ;;  %v7018_v33 = vadd.f32 %v6971_v5, %v9335_v12  ;;  %v5662_v52 = vpop.f32.mrb[15].mxu0  ;;  %v5854_v48 = vmul.f32 %v7016_v34, %v7016_v34 }
 0x289   : > { %5782 = vst [vmem:[%s9344_s26 + $0x60] sm:$0xff] %v7017_v13  ;;  %v5813_v6 = vadd.f32 %v7017_v13, %v5812_v14  ;;  %v5852_v59 = vmul.f32 %v7017_v13, %v7017_v13  ;;  %v5882_v36 = vadd.f32 %v5881_v1, %v5851_v47  ;;  %v7019_v19 = vadd.f32 %v5662_v52, %v9337_v11 }
 0x28a   : > { %5785 = vst [vmem:[%s9344_s26 + $0x78] sm:$0xff] %v7018_v33  ;;  %v5855_v51 = vmul.f32 %v7018_v33, %v7018_v33 }
 0x28b   : > { %v5883_v29 = vadd.f32 %v5882_v36, %v5852_v59  ;;  %5783 = vst [vmem:[%s9344_s26 + $0x68] sm:$0xff] %v7019_v19  ;;  %v5814_v22 = vadd.f32 %v7019_v19, %v5813_v6  ;;  %v5853_v63 = vmul.f32 %v7019_v19, %v7019_v19 }
 0x28d   : > { %v5815_v49 = vadd.f32 %v7016_v34, %v5814_v22  ;;  %v5884_v15 = vadd.f32 %v5883_v29, %v5853_v63  ;;  %v6974_v12 = vpop.f32.mrb[16].mxu0 }
 0x28e   : > { %v6782_v25 = vpop.f32.mrb[16].mxu1  ;;  %v5675_v0 = vpop.f32.mrb[17].mxu0 }
 0x28f   : > { %v3542_v30 = vpop.f32.mrb[17].mxu1  ;;  %v7020_v43 = vadd.f32 %v6974_v12, %v6782_v25  ;;  %v5885_v11 = vadd.f32 %v5884_v15, %v5854_v48  ;;  %v5816_v23 = vadd.f32 %v7018_v33, %v5815_v49  ;;  %v6975_v41 = vpop.f32.mrb[18].mxu0 }
 0x290   : > { %v6783_v61 = vpop.f32.mrb[18].mxu1  ;;  %v7021_v57 = vadd.f32 %v5675_v0, %v3542_v30  ;;  %v5678_v46 = vpop.f32.mrb[19].mxu0 }
 0x291   : > { %v3545_v32 = vpop.f32.mrb[19].mxu1  ;;  %5788 = vst [vmem:[%s9344_s26 + $0x90] sm:$0xff] %v7020_v43  ;;  %v7022_v62 = vadd.f32 %v6975_v41, %v6783_v61  ;;  %v5886_v56 = vadd.f32 %v5885_v11, %v5855_v51  ;;  %v5858_v17 = vmul.f32 %v7020_v43, %v7020_v43 }
 0x292   : > { %5786 = vst [vmem:[%s9344_s26 + $0x80] sm:$0xff] %v7021_v57  ;;  %v5817_v20 = vadd.f32 %v7021_v57, %v5816_v23  ;;  %v5856_v58 = vmul.f32 %v7021_v57, %v7021_v57  ;;  %v7023_v18 = vadd.f32 %v5678_v46, %v3545_v32 }
 0x293   : > { %5789 = vst [vmem:[%s9344_s26 + $0x98] sm:$0xff] %v7022_v62  ;;  %v5859_v16 = vmul.f32 %v7022_v62, %v7022_v62 }
 0x294   : > { %v5887_v28 = vadd.f32 %v5886_v56, %v5856_v58  ;;  %5787 = vst [vmem:[%s9344_s26 + $0x88] sm:$0xff] %v7023_v18  ;;  %v5818_v40 = vadd.f32 %v7023_v18, %v5817_v20  ;;  %v5857_v39 = vmul.f32 %v7023_v18, %v7023_v18 }
 0x295   : > { %v6978_v37 = vpop.f32.mrb[20].mxu0 }
 0x296   : > { %v6786_v45 = vpop.f32.mrb[20].mxu1  ;;  %v5819_v10 = vadd.f32 %v7020_v43, %v5818_v40  ;;  %v5888_v53 = vadd.f32 %v5887_v28, %v5857_v39  ;;  %v5691_v55 = vpop.f32.mrb[21].mxu0 }
 0x297   : > { %v3558_v54 = vpop.f32.mrb[21].mxu1  ;;  %v7024_v44 = vadd.f32 %v6978_v37, %v6786_v45  ;;  %v6979_v21 = vpop.f32.mrb[22].mxu0 }
 0x298   : > { %v6787_v9 = vpop.f32.mrb[22].mxu1  ;;  %v5889_v42 = vadd.f32 %v5888_v53, %v5858_v17  ;;  %v7025_v27 = vadd.f32 %v5691_v55, %v3558_v54  ;;  %v5820_v60 = vadd.f32 %v7022_v62, %v5819_v10  ;;  %v5694_v4 = vpop.f32.mrb[23].mxu0 }
 0x299   : > { %v3561_v31 = vpop.f32.mrb[23].mxu1  ;;  %5792 = vst [vmem:[%s9344_s26 + $0xb0] sm:$0xff] %v7024_v44  ;;  %v7026_v7 = vadd.f32 %v6979_v21, %v6787_v9  ;;  %v5862_v24 = vmul.f32 %v7024_v44, %v7024_v44 }
 0x29a   : > { %5790 = vst [vmem:[%s9344_s26 + $0xa0] sm:$0xff] %v7025_v27  ;;  %v5821_v38 = vadd.f32 %v7025_v27, %v5820_v60  ;;  %v5860_v3 = vmul.f32 %v7025_v27, %v7025_v27  ;;  %v5890_v26 = vadd.f32 %v5889_v42, %v5859_v16  ;;  %v7027_v50 = vadd.f32 %v5694_v4, %v3561_v31 }
 0x29b   : > { %5793 = vst [vmem:[%s9344_s26 + $0xb8] sm:$0xff] %v7026_v7  ;;  %v5863_v6 = vmul.f32 %v7026_v7, %v7026_v7 }
 0x29c   : > { %v5891_v2 = vadd.f32 %v5890_v26, %v5860_v3  ;;  %5791 = vst [vmem:[%s9344_s26 + $0xa8] sm:$0xff] %v7027_v50  ;;  %v5822_v35 = vadd.f32 %v7027_v50, %v5821_v38  ;;  %v5861_v8 = vmul.f32 %v7027_v50, %v7027_v50 }
 0x29d   : > { %v6982_v14 = vpop.f32.mrb[24].mxu0 }
 0x29e   : > { %v6790_v34 = vpop.f32.mrb[24].mxu1  ;;  %v5823_v47 = vadd.f32 %v7024_v44, %v5822_v35  ;;  %v5892_v1 = vadd.f32 %v5891_v2, %v5861_v8  ;;  %v5707_v52 = vpop.f32.mrb[25].mxu0 }
 0x29f   : > { %v3574_v13 = vpop.f32.mrb[25].mxu1  ;;  %v7028_v5 = vadd.f32 %v6982_v14, %v6790_v34  ;;  %v6983_v22 = vpop.f32.mrb[26].mxu0 }
 0x2a0   : > { %v6791_v33 = vpop.f32.mrb[26].mxu1  ;;  %v5893_v59 = vadd.f32 %v5892_v1, %v5862_v24  ;;  %v7029_v36 = vadd.f32 %v5707_v52, %v3574_v13  ;;  %v5824_v19 = vadd.f32 %v7026_v7, %v5823_v47  ;;  %v5710_v25 = vpop.f32.mrb[27].mxu0 }
 0x2a1   : > { %v3577_v29 = vpop.f32.mrb[27].mxu1  ;;  %5796 = vst [vmem:[%s9344_s26 + $0xd0] sm:$0xff] %v7028_v5  ;;  %v7030_v63 = vadd.f32 %v6983_v22, %v6791_v33  ;;  %v5866_v51 = vmul.f32 %v7028_v5, %v7028_v5 }
 0x2a2   : > { %5794 = vst [vmem:[%s9344_s26 + $0xc0] sm:$0xff] %v7029_v36  ;;  %v5825_v48 = vadd.f32 %v7029_v36, %v5824_v19  ;;  %v5864_v49 = vmul.f32 %v7029_v36, %v7029_v36  ;;  %v5894_v15 = vadd.f32 %v5893_v59, %v5863_v6  ;;  %v7031_v30 = vadd.f32 %v5710_v25, %v3577_v29 }
 0x2a3   : > { %5797 = vst [vmem:[%s9344_s26 + $0xd8] sm:$0xff] %v7030_v63  ;;  %v5867_v20 = vmul.f32 %v7030_v63, %v7030_v63 }
 0x2a4   : > { %v5895_v12 = vadd.f32 %v5894_v15, %v5864_v49  ;;  %5795 = vst [vmem:[%s9344_s26 + $0xc8] sm:$0xff] %v7031_v30  ;;  %v5826_v43 = vadd.f32 %v7031_v30, %v5825_v48  ;;  %v5865_v61 = vmul.f32 %v7031_v30, %v7031_v30 }
 0x2a5   : > { %v6986_v32 = vpop.f32.mrb[28].mxu0 }
 0x2a6   : > { %v6794_v0 = vpop.f32.mrb[28].mxu1  ;;  %v5827_v11 = vadd.f32 %v7028_v5, %v5826_v43  ;;  %v5896_v57 = vadd.f32 %v5895_v12, %v5865_v61  ;;  %v5723_v46 = vpop.f32.mrb[29].mxu0 }
 0x2a7   : > { %v3590_v23 = vpop.f32.mrb[29].mxu1  ;;  %v7032_v41 = vadd.f32 %v6986_v32, %v6794_v0  ;;  %v6987_v40 = vpop.f32.mrb[30].mxu0 }
 0x2a8   : > { %v6795_v62 = vpop.f32.mrb[30].mxu1  ;;  %v5897_v58 = vadd.f32 %v5896_v57, %v5866_v51  ;;  %v7033_v56 = vadd.f32 %v5723_v46, %v3590_v23  ;;  %v5828_v18 = vadd.f32 %v7030_v63, %v5827_v11  ;;  %v5726_v45 = vpop.f32.mrb[31].mxu0 }
 0x2a9   : > { %v3593_v28 = vpop.f32.mrb[31].mxu1  ;;  %5800 = vst [vmem:[%s9344_s26 + $0xf0] sm:$0xff] %v7032_v41  ;;  %v7034_v39 = vadd.f32 %v6987_v40, %v6795_v62  ;;  %v5870_v55 = vmul.f32 %v7032_v41, %v7032_v41 }
 0x2aa   : > { %5798 = vst [vmem:[%s9344_s26 + $0xe0] sm:$0xff] %v7033_v56  ;;  %v5829_v17 = vadd.f32 %v7033_v56, %v5828_v18  ;;  %v5868_v10 = vmul.f32 %v7033_v56, %v7033_v56  ;;  %v5898_v53 = vadd.f32 %v5897_v58, %v5867_v20  ;;  %v7035_v54 = vadd.f32 %v5726_v45, %v3593_v28 }
 0x2ab   : > { %5801 = vst [vmem:[%s9344_s26 + $0xf8] sm:$0xff] %v7034_v39  ;;  %v5871_v27 = vmul.f32 %v7034_v39, %v7034_v39 }
 0x2ac   : > { %v5899_v37 = vadd.f32 %v5898_v53, %v5868_v10  ;;  %5799 = vst [vmem:[%s9344_s26 + $0xe8] sm:$0xff] %v7035_v54  ;;  %v5830_v44 = vadd.f32 %v7035_v54, %v5829_v17  ;;  %v5869_v9 = vmul.f32 %v7035_v54, %v7035_v54 }
 0x2ae   : > { %v5831_v16 = vadd.f32 %v7032_v41, %v5830_v44  ;;  %v5900_v42 = vadd.f32 %v5899_v37, %v5869_v9 }
 0x2b0   : > { %v5832_v60 = vadd.f32 %v7034_v39, %v5831_v16  ;;  %v5901_v31 = vadd.f32 %v5900_v42, %v5870_v55 }
 0x2b2   : > { %v5833_v21 = vrot.slane %v5832_v60, 4  ;;  %v5902_v7 = vadd.f32 %v5901_v31, %v5871_v27 }
 0x2b4   : > { %v5834_v4 = vadd.f32 %v5833_v21, %v5832_v60  ;;  %v5903_v38 = vrot.slane %v5902_v7, 4 }
 0x2b6   : > { %v5835_v3 = vrot.slane %v5834_v4, 2  ;;  %v5904_v26 = vadd.f32 %v5903_v38, %v5902_v7 }
 0x2b8   : > { %v5836_v50 = vadd.f32 %v5835_v3, %v5834_v4  ;;  %v5905_v2 = vrot.slane %v5904_v26, 2 }
 0x2ba   : > { %v5837_v35 = vrot.slane %v5836_v50, 1  ;;  %v5906_v8 = vadd.f32 %v5905_v2, %v5904_v26 }
 0x2bc   : > { %v5838_v34 = vadd.f32 %v5837_v35, %v5836_v50  ;;  %v5907_v24 = vrot.slane %v5906_v8, 1 }
 0x2be   : > { %5839 = vst [vmem:[%s235_s29] sm:$0x1] %v5838_v34  ;;  %v5908_v47 = vadd.f32 %v5907_v24, %v5906_v8 }
 0x2c0   : > { %5909 = vst [vmem:[%s235_s29 + $0x1] sm:$0x1] %v5908_v47 }
 0x2c1 PF: > { %s16_s18 = sadd.s32 1, %s7474_s18  }
 0x2c2   : > { %p13_p4 = scmp.ge.s32.totalorder %s16_s18, 4  }
 0x2c4   :  { %15 = sbr.rel (!%p13_p4) target bundleno = 1 (0x1), region = 80 }

</bundles_post_ra>
